<compile_context>
chip_gen: v7x
topology: tpu7x:2x2x1
jax: 0.10.0
libtpu: 0.0.40
codegen_flags: <defaults>
</compile_context>

<pallas_src>
import functools

import jax
import jax.numpy as jnp
from jax import lax
from jax.experimental import pallas as pl
from jax.experimental.pallas import tpu as pltpu


def _round_up(x, m):
    return ((x + m - 1) // m) * m


# -----------------------------------------------------------------------------
# Pallas kernels
# -----------------------------------------------------------------------------
def _gemm_kernel(a_ref, b_ref, bias_ref, o_ref, *rest,
                 add_bias, apply_act, compute_stats, negative_slope):
    """Tiled matmul, K-reduction over grid axis 2.

    Epilogue fuses: optional bias add, optional LeakyReLU, optional per-channel
    column sum / sum-of-squares accumulation (for BatchNorm statistics).
    """
    if compute_stats:
        s1_ref, s2_ref, acc_ref = rest
    else:
        (acc_ref,) = rest

    i = pl.program_id(0)
    k = pl.program_id(2)

    @pl.when(k == 0)
    def _():
        acc_ref[...] = jnp.zeros_like(acc_ref)

    acc_ref[...] += jnp.dot(a_ref[...], b_ref[...],
                            preferred_element_type=jnp.float32)

    @pl.when(k == pl.num_programs(2) - 1)
    def _():
        acc = acc_ref[...]

        if compute_stats:
            blk_s1 = jnp.sum(acc, axis=0, keepdims=True)
            blk_s2 = jnp.sum(acc * acc, axis=0, keepdims=True)

            @pl.when(i == 0)
            def _():
                s1_ref[...] = blk_s1
                s2_ref[...] = blk_s2

            @pl.when(i > 0)
            def _():
                s1_ref[...] += blk_s1
                s2_ref[...] += blk_s2

        out = acc
        if add_bias:
            out = out + bias_ref[...]          # (tm, tn) + (1, tn)
        if apply_act:
            out = jnp.where(out >= 0, out, negative_slope * out)
        o_ref[...] = out.astype(o_ref.dtype)


def _scale_shift_act_kernel(x_ref, scale_ref, shift_ref, o_ref, *,
                            negative_slope):
    """y = LeakyReLU(x * scale + shift) with per-channel scale/shift."""
    y = x_ref[...] * scale_ref[...] + shift_ref[...]
    o_ref[...] = jnp.where(y >= 0, y, negative_slope * y).astype(o_ref.dtype)


# -----------------------------------------------------------------------------
# Pallas wrappers
# -----------------------------------------------------------------------------
def conv_gemm(a, b, bias, *, add_bias, apply_act, compute_stats, out_dtype,
              negative_slope=0.2):
    """a: (M, K) patches, b: (K, Cout) weights, bias: (Cout,) f32.

    Returns (out[M, Cout], col_sum[Cout] | None, col_sumsq[Cout] | None).
    Matmul runs in bf16 with f32 accumulation.
    """
    a = a.astype(jnp.bfloat16)
    b = b.astype(jnp.bfloat16)
    M, K = a.shape
    _, cout = b.shape

    # Single N block (Cout <= 512 in this model) -> A streamed exactly once
    # and BN stats can accumulate in one resident (1, tn) output buffer.
    np_ = _round_up(cout, 128)
    tn = np_
    kp = _round_up(K, 128)
    if kp % 512 == 0:
        tk = 512
    elif kp % 256 == 0:
        tk = 256
    else:
        tk = 128
    tm = min(256, _round_up(M, 8))
    mp = _round_up(M, tm)

    a_p = a if (mp, kp) == (M, K) else jnp.pad(a, ((0, mp - M), (0, kp - K)))
    b_p = b if (kp, np_) == (K, cout) else jnp.pad(b, ((0, kp - K), (0, np_ - cout)))
    bias_p = jnp.pad(bias.astype(jnp.float32), (0, np_ - cout)).reshape(1, np_)

    grid = (mp // tm, np_ // tn, kp // tk)

    out_shapes = [jax.ShapeDtypeStruct((mp, np_), out_dtype)]
    out_specs = [pl.BlockSpec((tm, tn), lambda i, j, k: (i, j))]
    if compute_stats:
        out_shapes += [jax.ShapeDtypeStruct((1, np_), jnp.float32),
                       jax.ShapeDtypeStruct((1, np_), jnp.float32)]
        out_specs += [pl.BlockSpec((1, tn), lambda i, j, k: (0, j)),
                      pl.BlockSpec((1, tn), lambda i, j, k: (0, j))]

    kernel = functools.partial(
        _gemm_kernel, add_bias=add_bias, apply_act=apply_act,
        compute_stats=compute_stats, negative_slope=negative_slope)

    results = pl.pallas_call(
        kernel,
        out_shape=tuple(out_shapes),
        grid_spec=pltpu.PrefetchScalarGridSpec(
            num_scalar_prefetch=0,
            grid=grid,
            in_specs=[
                pl.BlockSpec((tm, tk), lambda i, j, k: (i, k)),
                pl.BlockSpec((tk, tn), lambda i, j, k: (k, j)),
                pl.BlockSpec((1, tn), lambda i, j, k: (0, j)),
            ],
            out_specs=tuple(out_specs),
            scratch_shapes=[pltpu.VMEM((tm, tn), jnp.float32)],
        ),
        compiler_params=pltpu.CompilerParams(
            dimension_semantics=(
                # stats accumulate across i -> that axis must run sequentially
                "arbitrary" if compute_stats else "parallel",
                "parallel",
                "arbitrary"),
            vmem_limit_bytes=32 * 1024 * 1024),
    )(a_p, b_p, bias_p)

    out = results[0][:M, :cout]
    if compute_stats:
        return out, results[1][0, :cout], results[2][0, :cout]
    return out, None, None


def scale_shift_act(x, scale, shift, *, out_dtype, negative_slope=0.2):
    """x: (M, C) f32, scale/shift: (C,) f32 -> LeakyReLU(x*scale + shift)."""
    M, C = x.shape
    cp = _round_up(C, 128)
    tm = min(1024, _round_up(M, 8))
    mp = _round_up(M, tm)

    x_p = x if (mp, cp) == (M, C) else jnp.pad(x, ((0, mp - M), (0, cp - C)))
    sc = jnp.pad(scale.astype(jnp.float32), (0, cp - C)).reshape(1, cp)
    sh = jnp.pad(shift.astype(jnp.float32), (0, cp - C)).reshape(1, cp)

    out = pl.pallas_call(
        functools.partial(_scale_shift_act_kernel,
                          negative_slope=negative_slope),
        out_shape=jax.ShapeDtypeStruct((mp, cp), out_dtype),
        grid_spec=pltpu.PrefetchScalarGridSpec(
            num_scalar_prefetch=0,
            grid=(mp // tm,),
            in_specs=[
                pl.BlockSpec((tm, cp), lambda i: (i, 0)),
                pl.BlockSpec((1, cp), lambda i: (0, 0)),
                pl.BlockSpec((1, cp), lambda i: (0, 0)),
            ],
            out_specs=pl.BlockSpec((tm, cp), lambda i: (i, 0)),
        ),
        compiler_params=pltpu.CompilerParams(
            dimension_semantics=("parallel",),
            vmem_limit_bytes=32 * 1024 * 1024),
    )(x_p, sc, sh)
    return out[:M, :C]


# -----------------------------------------------------------------------------
# JAX glue: channels-last im2col and AvgPool3d(count_include_pad=False)
# -----------------------------------------------------------------------------
def im2col_3d_nhwc(x, kw, stride, pad):
    """x: (N, D, H, W, C) -> (N*Do*Ho*Wo, kw^3*C).

    Column order (kd, kh, kw, cin) with cin fastest: matches the PyTorch weight
    transposed to (kd, kh, kw, cin, cout) and keeps channels on the lane dim.
    """
    N, D, H, W, C = x.shape
    xp = jnp.pad(x, ((0, 0), (pad, pad), (pad, pad), (pad, pad), (0, 0)))
    do = (D + 2 * pad - kw) // stride + 1
    ho = (H + 2 * pad - kw) // stride + 1
    wo = (W + 2 * pad - kw) // stride + 1

    cols = []
    for kd in range(kw):
        for kh in range(kw):
            for kwi in range(kw):
                sl = xp[:,
                        kd: kd + (do - 1) * stride + 1: stride,
                        kh: kh + (ho - 1) * stride + 1: stride,
                        kwi: kwi + (wo - 1) * stride + 1: stride,
                        :]
                cols.append(sl)                     # (N, do, ho, wo, C)
    patches = jnp.stack(cols, axis=-2)              # (N, do, ho, wo, kw^3, C)
    patches = patches.reshape(N * do * ho * wo, kw * kw * kw * C)
    return patches, (do, ho, wo)


def avg_pool3d_nhwc(x):
    """AvgPool3d(kernel=3, stride=2, padding=1, count_include_pad=False)."""
    sums = lax.reduce_window(
        x, 0.0, lax.add,
        window_dimensions=(1, 3, 3, 3, 1),
        window_strides=(1, 2, 2, 2, 1),
        padding=((0, 0), (1, 1), (1, 1), (1, 1), (0, 0)))
    ones = jnp.ones(x.shape[1:4], x.dtype)
    counts = lax.reduce_window(
        ones, 0.0, lax.add,
        window_dimensions=(3, 3, 3),
        window_strides=(2, 2, 2),
        padding=((1, 1), (1, 1), (1, 1)))
    return sums / counts[None, :, :, :, None]


# -----------------------------------------------------------------------------
# Model construction / forward
# -----------------------------------------------------------------------------
def make_layer_specs(input_nc, ndf, n_layers):
    """(cin, cout, stride, has_bn, has_act) per layer; mirrors
    NLayerDiscriminator.__init__ (getIntermFeat=False, use_sigmoid=False)."""
    specs = [(input_nc, ndf, 2, False, True)]
    nf = ndf
    for _ in range(1, n_layers):
        nf_prev, nf = nf, min(nf * 2, 512)
        specs.append((nf_prev, nf, 2, True, True))
    nf_prev, nf = nf, min(nf * 2, 512)
    specs.append((nf_prev, nf, 1, True, True))
    specs.append((nf, 1, 1, False, False))          # final conv, no act
    return tuple(specs)


def make_nlayer_params(key, layer_specs):
    """Deterministic synthetic init; weights kept in PyTorch Conv3d layout."""
    kw = 4
    params = []
    for (cin, cout, stride, has_bn, has_act) in layer_specs:
        key, wk, bk = jax.random.split(key, 3)
        p = dict(
            w=jax.random.normal(wk, (cout, cin, kw, kw, kw), jnp.float32) * 0.02,
            b=jax.random.normal(bk, (cout,), jnp.float32) * 0.02)
        if has_bn:
            p['gamma'] = jnp.ones((cout,), jnp.float32)
            p['beta'] = jnp.zeros((cout,), jnp.float32)
        params.append(p)
    return params


def nlayer_forward(params, layer_specs, x):
    """One NLayerDiscriminator forward. x: (N, D, H, W, C) channels-last."""
    kw, pad = 4, 2
    n_total = len(layer_specs)
    for li, (spec, p) in enumerate(zip(layer_specs, params)):
        cin, cout, stride, has_bn, has_act = spec
        N = x.shape[0]
        x = x.astype(jnp.bfloat16)
        patches, (do, ho, wo) = im2col_3d_nhwc(x, kw, stride, pad)
        w_mat = jnp.transpose(p['w'], (2, 3, 4, 1, 0)).reshape(-1, cout)
        is_last = (li == n_total - 1)

        if has_bn:
            # Train-mode BatchNorm: the conv bias cancels in (y - mean), so the
            # GEMM skips it and its epilogue accumulates sum / sum-of-squares.
            y, s1, s2 = conv_gemm(patches, w_mat, p['b'],
                                  add_bias=False, apply_act=False,
                                  compute_stats=True, out_dtype=jnp.float32)
            m_rows = y.shape[0]
            mean = s1 / m_rows
            var = jnp.maximum(s2 / m_rows - mean * mean, 0.0)   # biased var
            scale = p['gamma'] / jnp.sqrt(var + 1e-5)
            shift = p['beta'] - mean * scale
            y = scale_shift_act(y, scale, shift, out_dtype=jnp.bfloat16)
        else:
            out_dtype = jnp.float32 if is_last else jnp.bfloat16
            y, _, _ = conv_gemm(patches, w_mat, p['b'],
                                add_bias=True, apply_act=has_act,
                                compute_stats=False, out_dtype=out_dtype)

        x = y.reshape(N, do, ho, wo, cout)          # channels-last, no transpose
    return x


@functools.partial(jax.jit, static_argnames=("layer_specs", "num_D"))
def multiscale_forward(all_params, x, *, layer_specs, num_D):
    """MultiscaleDiscriminator.forward (getIntermFeat=False).

    x: (N, C, D, H, W) NCDHW.  Returns [[out_{num_D-1}(x)],
    [out_{num_D-2}(down(x))], ...] with each output in NCDHW.
    """
    xd = jnp.transpose(x, (0, 2, 3, 4, 1)).astype(jnp.float32)  # -> NDHWC once
    result = []
    for i in range(num_D):
        params = all_params[num_D - 1 - i]
        out = nlayer_forward(params, layer_specs, xd)
        result.append([jnp.transpose(out, (0, 4, 1, 2, 3))])    # back to NCDHW
        if i != num_D - 1:
            xd = avg_pool3d_nhwc(xd)
    return result


# -----------------------------------------------------------------------------
if __name__ == "__main__":
    key = jax.random.PRNGKey(0)
    input_nc, ndf, n_layers, num_D = 4, 8, 3, 3      # small synthetic config

    layer_specs = make_layer_specs(input_nc, ndf, n_layers)
    keys = jax.random.split(key, num_D + 1)
    all_params = [make_nlayer_params(keys[i], layer_specs) for i in range(num_D)]

    # (N, C, D, H, W) — PyTorch Conv3d NCDHW layout
    x = jax.random.normal(keys[num_D], (2, input_nc, 8, 16, 16), jnp.float32)

    result = multiscale_forward(all_params, x,
                                layer_specs=layer_specs, num_D=num_D)
    jax.block_until_ready(result)
    print("KERNEL_OK")
</pallas_src>

<mosaic_0001>
module attributes {stable_mosaic.version = 11 : i64} {
  func.func @_gemm_kernel(%arg0: i32, %arg1: i32, %arg2: i32, %arg3: memref<256x256xbf16, #tpu.memory_space<vmem>>, %arg4: memref<256x128xbf16, #tpu.memory_space<vmem>>, %arg5: memref<1x128xf32, #tpu.memory_space<vmem>>, %arg6: memref<256x128xbf16, #tpu.memory_space<vmem>>, %arg7: memref<256x128xf32, #tpu.memory_space<vmem>>) attributes {dimension_semantics = [#tpu.dimension_semantics<parallel>, #tpu.dimension_semantics<parallel>, #tpu.dimension_semantics<arbitrary>], iteration_bounds = array<i64: 4, 1, 1>, scalar_prefetch = 0 : i64, scratch_operands = 1 : i64, tpu.core_type = #tpu.core_type<tc>, window_params = [{transform_indices = @transform_0, window_bounds = array<i64: 256, 256>}, {transform_indices = @transform_1, window_bounds = array<i64: 256, 128>}, {transform_indices = @transform_2, window_bounds = array<i64: 1, 128>}, {transform_indices = @transform_3, window_bounds = array<i64: 256, 128>}]} {
    %c0_i32 = arith.constant 0 : i32
    %0 = arith.cmpi eq, %arg2, %c0_i32 : i32
    %1 = arith.extui %0 : i1 to i32
    %c0_i32_0 = arith.constant 0 : i32
    %2 = arith.cmpi ne, %1, %c0_i32_0 : i32
    scf.if %2 {
      %cst_10 = arith.constant 0.000000e+00 : f32
      %12 = vector.broadcast %cst_10 : f32 to vector<256x128xf32>
      %c0_11 = arith.constant 0 : index
      %c0_12 = arith.constant 0 : index
      %13 = vector.load %arg7[%c0_11, %c0_12] : memref<256x128xf32, #tpu.memory_space<vmem>>, vector<256x128xf32>
      tpu.vector_store %arg7[%c0_11, %c0_12], %12 {strides = array<i32>} : memref<256x128xf32, #tpu.memory_space<vmem>>, vector<256x128xf32>,
    } else {
    }
    %c0 = arith.constant 0 : index
    %c0_1 = arith.constant 0 : index
    %3 = vector.load %arg7[%c0, %c0_1] : memref<256x128xf32, #tpu.memory_space<vmem>>, vector<256x128xf32>
    %c0_2 = arith.constant 0 : index
    %c0_3 = arith.constant 0 : index
    %4 = vector.load %arg3[%c0_2, %c0_3] : memref<256x256xbf16, #tpu.memory_space<vmem>>, vector<256x256xbf16>
    %c0_4 = arith.constant 0 : index
    %c0_5 = arith.constant 0 : index
    %5 = vector.load %arg4[%c0_4, %c0_5] : memref<256x128xbf16, #tpu.memory_space<vmem>>, vector<256x128xbf16>
    %cst = arith.constant dense<0.000000e+00> : vector<256x128xf32>
    %6 = tpu.matmul %4, %5, %cst {dimension_numbers = #tpu.dot_dimension_numbers<[1], [0], [0], [1], [0, 0, 1, 1], [], []>} : vector<256x256xbf16>, vector<256x128xbf16>, vector<256x128xf32> -> vector<256x128xf32>
    %7 = arith.addf %3, %6 : vector<256x128xf32>
    %c0_6 = arith.constant 0 : index
    %c0_7 = arith.constant 0 : index
    %8 = vector.load %arg7[%c0_6, %c0_7] : memref<256x128xf32, #tpu.memory_space<vmem>>, vector<256x128xf32>
    tpu.vector_store %arg7[%c0_6, %c0_7], %7 {strides = array<i32>} : memref<256x128xf32, #tpu.memory_space<vmem>>, vector<256x128xf32>,
    %c0_i32_8 = arith.constant 0 : i32
    %9 = arith.cmpi eq, %arg2, %c0_i32_8 : i32
    %10 = arith.extui %9 : i1 to i32
    %c0_i32_9 = arith.constant 0 : i32
    %11 = arith.cmpi ne, %10, %c0_i32_9 : i32
    scf.if %11 {
      %c0_10 = arith.constant 0 : index
      %c0_11 = arith.constant 0 : index
      %12 = vector.load %arg7[%c0_10, %c0_11] : memref<256x128xf32, #tpu.memory_space<vmem>>, vector<256x128xf32>
      %c0_12 = arith.constant 0 : index
      %c0_13 = arith.constant 0 : index
      %13 = vector.load %arg5[%c0_12, %c0_13] : memref<1x128xf32, #tpu.memory_space<vmem>>, vector<1x128xf32>
      %14 = vector.broadcast %13 : vector<1x128xf32> to vector<256x128xf32>
      %15 = arith.addf %12, %14 : vector<256x128xf32>
      %cst_14 = arith.constant 0.000000e+00 : f32
      %16 = vector.broadcast %cst_14 : f32 to vector<256x128xf32>
      %17 = arith.cmpf oge, %15, %16 : vector<256x128xf32>
      %cst_15 = arith.constant 2.000000e-01 : f32
      %18 = vector.broadcast %cst_15 : f32 to vector<256x128xf32>
      %19 = arith.mulf %18, %15 : vector<256x128xf32>
      %20 = arith.select %17, %15, %19 : vector<256x128xi1>, vector<256x128xf32>
      %21 = arith.truncf %20 : vector<256x128xf32> to vector<256x128xbf16>
      %c0_16 = arith.constant 0 : index
      %c0_17 = arith.constant 0 : index
      %22 = vector.load %arg6[%c0_16, %c0_17] : memref<256x128xbf16, #tpu.memory_space<vmem>>, vector<256x128xbf16>
      tpu.vector_store %arg6[%c0_16, %c0_17], %21 {strides = array<i32>} : memref<256x128xbf16, #tpu.memory_space<vmem>>, vector<256x128xbf16>,
    } else {
    }
    return
  }
  func.func @transform_0(%arg0: i32, %arg1: i32, %arg2: i32) -> (i32, i32) {
    %c0_i32 = arith.constant 0 : i32
    return %arg0, %arg2 : i32, i32
  }
  func.func @transform_1(%arg0: i32, %arg1: i32, %arg2: i32) -> (i32, i32) {
    %c0_i32 = arith.constant 0 : i32
    return %arg2, %arg1 : i32, i32
  }
  func.func @transform_2(%arg0: i32, %arg1: i32, %arg2: i32) -> (i32, i32) {
    %c0_i32 = arith.constant 0 : i32
    %c0_i32_0 = arith.constant 0 : i32
    return %c0_i32, %arg1 : i32, i32
  }
  func.func @transform_3(%arg0: i32, %arg1: i32, %arg2: i32) -> (i32, i32) {
    %c0_i32 = arith.constant 0 : i32
    return %arg0, %arg1 : i32, i32
  }
}

module attributes {stable_mosaic.version = 11 : i64} {
  func.func @_gemm_kernel(%arg0: i32, %arg1: i32, %arg2: i32, %arg3: memref<152x512xbf16, #tpu.memory_space<vmem>>, %arg4: memref<512x128xbf16, #tpu.memory_space<vmem>>, %arg5: memref<1x128xf32, #tpu.memory_space<vmem>>, %arg6: memref<152x128xf32, #tpu.memory_space<vmem>>, %arg7: memref<1x128xf32, #tpu.memory_space<vmem>>, %arg8: memref<1x128xf32, #tpu.memory_space<vmem>>, %arg9: memref<152x128xf32, #tpu.memory_space<vmem>>) attributes {dimension_semantics = [#tpu.dimension_semantics<arbitrary>, #tpu.dimension_semantics<parallel>, #tpu.dimension_semantics<arbitrary>], iteration_bounds = array<i64: 1, 1, 1>, scalar_prefetch = 0 : i64, scratch_operands = 1 : i64, tpu.core_type = #tpu.core_type<tc>, window_params = [{transform_indices = @transform_0, window_bounds = array<i64: 152, 512>}, {transform_indices = @transform_1, window_bounds = array<i64: 512, 128>}, {transform_indices = @transform_2, window_bounds = array<i64: 1, 128>}, {transform_indices = @transform_3, window_bounds = array<i64: 152, 128>}, {transform_indices = @transform_4, window_bounds = array<i64: 1, 128>}, {transform_indices = @transform_5, window_bounds = array<i64: 1, 128>}]} {
    %c0_i32 = arith.constant 0 : i32
    %0 = arith.cmpi eq, %arg2, %c0_i32 : i32
    %1 = arith.extui %0 : i1 to i32
    %c0_i32_0 = arith.constant 0 : i32
    %2 = arith.cmpi ne, %1, %c0_i32_0 : i32
    scf.if %2 {
      %cst_10 = arith.constant 0.000000e+00 : f32
      %12 = vector.broadcast %cst_10 : f32 to vector<152x128xf32>
      %c0_11 = arith.constant 0 : index
      %c0_12 = arith.constant 0 : index
      %13 = vector.load %arg9[%c0_11, %c0_12] : memref<152x128xf32, #tpu.memory_space<vmem>>, vector<152x128xf32>
      tpu.vector_store %arg9[%c0_11, %c0_12], %12 {strides = array<i32>} : memref<152x128xf32, #tpu.memory_space<vmem>>, vector<152x128xf32>,
    } else {
    }
    %c0 = arith.constant 0 : index
    %c0_1 = arith.constant 0 : index
    %3 = vector.load %arg9[%c0, %c0_1] : memref<152x128xf32, #tpu.memory_space<vmem>>, vector<152x128xf32>
    %c0_2 = arith.constant 0 : index
    %c0_3 = arith.constant 0 : index
    %4 = vector.load %arg3[%c0_2, %c0_3] : memref<152x512xbf16, #tpu.memory_space<vmem>>, vector<152x512xbf16>
    %c0_4 = arith.constant 0 : index
    %c0_5 = arith.constant 0 : index
    %5 = vector.load %arg4[%c0_4, %c0_5] : memref<512x128xbf16, #tpu.memory_space<vmem>>, vector<512x128xbf16>
    %cst = arith.constant dense<0.000000e+00> : vector<152x128xf32>
    %6 = tpu.matmul %4, %5, %cst {dimension_numbers = #tpu.dot_dimension_numbers<[1], [0], [0], [1], [0, 0, 1, 1], [], []>} : vector<152x512xbf16>, vector<512x128xbf16>, vector<152x128xf32> -> vector<152x128xf32>
    %7 = arith.addf %3, %6 : vector<152x128xf32>
    %c0_6 = arith.constant 0 : index
    %c0_7 = arith.constant 0 : index
    %8 = vector.load %arg9[%c0_6, %c0_7] : memref<152x128xf32, #tpu.memory_space<vmem>>, vector<152x128xf32>
    tpu.vector_store %arg9[%c0_6, %c0_7], %7 {strides = array<i32>} : memref<152x128xf32, #tpu.memory_space<vmem>>, vector<152x128xf32>,
    %c0_i32_8 = arith.constant 0 : i32
    %9 = arith.cmpi eq, %arg2, %c0_i32_8 : i32
    %10 = arith.extui %9 : i1 to i32
    %c0_i32_9 = arith.constant 0 : i32
    %11 = arith.cmpi ne, %10, %c0_i32_9 : i32
    scf.if %11 {
      %c0_10 = arith.constant 0 : index
      %c0_11 = arith.constant 0 : index
      %12 = vector.load %arg9[%c0_10, %c0_11] : memref<152x128xf32, #tpu.memory_space<vmem>>, vector<152x128xf32>
      %cst_12 = arith.constant dense<0.000000e+00> : vector<128xf32>
      %13 = vector.multi_reduction <add>, %12, %cst_12 [0] : vector<152x128xf32> to vector<128xf32>
      %14 = vector.shape_cast %13 : vector<128xf32> to vector<1x128xf32>
      %15 = arith.mulf %12, %12 : vector<152x128xf32>
      %cst_13 = arith.constant dense<0.000000e+00> : vector<128xf32>
      %16 = vector.multi_reduction <add>, %15, %cst_13 [0] : vector<152x128xf32> to vector<128xf32>
      %17 = vector.shape_cast %16 : vector<128xf32> to vector<1x128xf32>
      %c0_i32_14 = arith.constant 0 : i32
      %18 = arith.cmpi eq, %arg0, %c0_i32_14 : i32
      %19 = arith.extui %18 : i1 to i32
      %c0_i32_15 = arith.constant 0 : i32
      %20 = arith.cmpi ne, %19, %c0_i32_15 : i32
      scf.if %20 {
        %c0_20 = arith.constant 0 : index
        %c0_21 = arith.constant 0 : index
        %25 = vector.load %arg7[%c0_20, %c0_21] : memref<1x128xf32, #tpu.memory_space<vmem>>, vector<1x128xf32>
        tpu.vector_store %arg7[%c0_20, %c0_21], %14 {strides = array<i32>} : memref<1x128xf32, #tpu.memory_space<vmem>>, vector<1x128xf32>,
        %c0_22 = arith.constant 0 : index
        %c0_23 = arith.constant 0 : index
        %26 = vector.load %arg8[%c0_22, %c0_23] : memref<1x128xf32, #tpu.memory_space<vmem>>, vector<1x128xf32>
        tpu.vector_store %arg8[%c0_22, %c0_23], %17 {strides = array<i32>} : memref<1x128xf32, #tpu.memory_space<vmem>>, vector<1x128xf32>,
      } else {
      }
      %c0_i32_16 = arith.constant 0 : i32
      %21 = arith.cmpi sgt, %arg0, %c0_i32_16 : i32
      %22 = arith.extui %21 : i1 to i32
      %c0_i32_17 = arith.constant 0 : i32
      %23 = arith.cmpi ne, %22, %c0_i32_17 : i32
      scf.if %23 {
        %c0_20 = arith.constant 0 : index
        %c0_21 = arith.constant 0 : index
        %25 = vector.load %arg7[%c0_20, %c0_21] : memref<1x128xf32, #tpu.memory_space<vmem>>, vector<1x128xf32>
        %26 = arith.addf %25, %14 : vector<1x128xf32>
        %c0_22 = arith.constant 0 : index
        %c0_23 = arith.constant 0 : index
        %27 = vector.load %arg7[%c0_22, %c0_23] : memref<1x128xf32, #tpu.memory_space<vmem>>, vector<1x128xf32>
        tpu.vector_store %arg7[%c0_22, %c0_23], %26 {strides = array<i32>} : memref<1x128xf32, #tpu.memory_space<vmem>>, vector<1x128xf32>,
        %c0_24 = arith.constant 0 : index
        %c0_25 = arith.constant 0 : index
        %28 = vector.load %arg8[%c0_24, %c0_25] : memref<1x128xf32, #tpu.memory_space<vmem>>, vector<1x128xf32>
        %29 = arith.addf %28, %17 : vector<1x128xf32>
        %c0_26 = arith.constant 0 : index
        %c0_27 = arith.constant 0 : index
        %30 = vector.load %arg8[%c0_26, %c0_27] : memref<1x128xf32, #tpu.memory_space<vmem>>, vector<1x128xf32>
        tpu.vector_store %arg8[%c0_26, %c0_27], %29 {strides = array<i32>} : memref<1x128xf32, #tpu.memory_space<vmem>>, vector<1x128xf32>,
      } else {
      }
      %c0_18 = arith.constant 0 : index
      %c0_19 = arith.constant 0 : index
      %24 = vector.load %arg6[%c0_18, %c0_19] : memref<152x128xf32, #tpu.memory_space<vmem>>, vector<152x128xf32>
      tpu.vector_store %arg6[%c0_18, %c0_19], %12 {strides = array<i32>} : memref<152x128xf32, #tpu.memory_space<vmem>>, vector<152x128xf32>,
    } else {
    }
    return
  }
  func.func @transform_0(%arg0: i32, %arg1: i32, %arg2: i32) -> (i32, i32) {
    %c0_i32 = arith.constant 0 : i32
    return %arg0, %arg2 : i32, i32
  }
  func.func @transform_1(%arg0: i32, %arg1: i32, %arg2: i32) -> (i32, i32) {
    %c0_i32 = arith.constant 0 : i32
    return %arg2, %arg1 : i32, i32
  }
  func.func @transform_2(%arg0: i32, %arg1: i32, %arg2: i32) -> (i32, i32) {
    %c0_i32 = arith.constant 0 : i32
    %c0_i32_0 = arith.constant 0 : i32
    return %c0_i32, %arg1 : i32, i32
  }
  func.func @transform_3(%arg0: i32, %arg1: i32, %arg2: i32) -> (i32, i32) {
    %c0_i32 = arith.constant 0 : i32
    return %arg0, %arg1 : i32, i32
  }
  func.func @transform_4(%arg0: i32, %arg1: i32, %arg2: i32) -> (i32, i32) {
    %c0_i32 = arith.constant 0 : i32
    %c0_i32_0 = arith.constant 0 : i32
    return %c0_i32, %arg1 : i32, i32
  }
  func.func @transform_5(%arg0: i32, %arg1: i32, %arg2: i32) -> (i32, i32) {
    %c0_i32 = arith.constant 0 : i32
    %c0_i32_0 = arith.constant 0 : i32
    return %c0_i32, %arg1 : i32, i32
  }
}

module attributes {stable_mosaic.version = 11 : i64} {
  func.func @_scale_shift_act_kernel(%arg0: i32, %arg1: memref<152x128xf32, #tpu.memory_space<vmem>>, %arg2: memref<1x128xf32, #tpu.memory_space<vmem>>, %arg3: memref<1x128xf32, #tpu.memory_space<vmem>>, %arg4: memref<152x128xbf16, #tpu.memory_space<vmem>>) attributes {dimension_semantics = [#tpu.dimension_semantics<parallel>], iteration_bounds = array<i64: 1>, scalar_prefetch = 0 : i64, scratch_operands = 0 : i64, tpu.core_type = #tpu.core_type<tc>, window_params = [{transform_indices = @transform_0, window_bounds = array<i64: 152, 128>}, {pipeline_mode = #tpu.pipeline_mode<synchronous>, transform_indices = @transform_1, window_bounds = array<i64: 1, 128>}, {pipeline_mode = #tpu.pipeline_mode<synchronous>, transform_indices = @transform_2, window_bounds = array<i64: 1, 128>}, {transform_indices = @transform_3, window_bounds = array<i64: 152, 128>}]} {
    %c0 = arith.constant 0 : index
    %c0_0 = arith.constant 0 : index
    %0 = vector.load %arg1[%c0, %c0_0] : memref<152x128xf32, #tpu.memory_space<vmem>>, vector<152x128xf32>
    %c0_1 = arith.constant 0 : index
    %c0_2 = arith.constant 0 : index
    %1 = vector.load %arg2[%c0_1, %c0_2] : memref<1x128xf32, #tpu.memory_space<vmem>>, vector<1x128xf32>
    %2 = vector.broadcast %1 : vector<1x128xf32> to vector<152x128xf32>
    %3 = arith.mulf %0, %2 : vector<152x128xf32>
    %c0_3 = arith.constant 0 : index
    %c0_4 = arith.constant 0 : index
    %4 = vector.load %arg3[%c0_3, %c0_4] : memref<1x128xf32, #tpu.memory_space<vmem>>, vector<1x128xf32>
    %5 = vector.broadcast %4 : vector<1x128xf32> to vector<152x128xf32>
    %6 = arith.addf %3, %5 : vector<152x128xf32>
    %cst = arith.constant 0.000000e+00 : f32
    %7 = vector.broadcast %cst : f32 to vector<152x128xf32>
    %8 = arith.cmpf oge, %6, %7 : vector<152x128xf32>
    %cst_5 = arith.constant 2.000000e-01 : f32
    %9 = vector.broadcast %cst_5 : f32 to vector<152x128xf32>
    %10 = arith.mulf %9, %6 : vector<152x128xf32>
    %11 = arith.select %8, %6, %10 : vector<152x128xi1>, vector<152x128xf32>
    %12 = arith.truncf %11 : vector<152x128xf32> to vector<152x128xbf16>
    %c0_6 = arith.constant 0 : index
    %c0_7 = arith.constant 0 : index
    %13 = vector.load %arg4[%c0_6, %c0_7] : memref<152x128xbf16, #tpu.memory_space<vmem>>, vector<152x128xbf16>
    tpu.vector_store %arg4[%c0_6, %c0_7], %12 {strides = array<i32>} : memref<152x128xbf16, #tpu.memory_space<vmem>>, vector<152x128xbf16>,
    return
  }
  func.func @transform_0(%arg0: i32) -> (i32, i32) {
    %c0_i32 = arith.constant 0 : i32
    %c0_i32_0 = arith.constant 0 : i32
    return %arg0, %c0_i32 : i32, i32
  }
  func.func @transform_1(%arg0: i32) -> (i32, i32) {
    %c0_i32 = arith.constant 0 : i32
    %c0_i32_0 = arith.constant 0 : i32
    %c0_i32_1 = arith.constant 0 : i32
    return %c0_i32, %c0_i32_0 : i32, i32
  }
  func.func @transform_2(%arg0: i32) -> (i32, i32) {
    %c0_i32 = arith.constant 0 : i32
    %c0_i32_0 = arith.constant 0 : i32
    %c0_i32_1 = arith.constant 0 : i32
    return %c0_i32, %c0_i32_0 : i32, i32
  }
  func.func @transform_3(%arg0: i32) -> (i32, i32) {
    %c0_i32 = arith.constant 0 : i32
    %c0_i32_0 = arith.constant 0 : i32
    return %arg0, %c0_i32 : i32, i32
  }
}

module attributes {stable_mosaic.version = 11 : i64} {
  func.func @_gemm_kernel(%arg0: i32, %arg1: i32, %arg2: i32, %arg3: memref<40x512xbf16, #tpu.memory_space<vmem>>, %arg4: memref<512x128xbf16, #tpu.memory_space<vmem>>, %arg5: memref<1x128xf32, #tpu.memory_space<vmem>>, %arg6: memref<40x128xf32, #tpu.memory_space<vmem>>, %arg7: memref<1x128xf32, #tpu.memory_space<vmem>>, %arg8: memref<1x128xf32, #tpu.memory_space<vmem>>, %arg9: memref<40x128xf32, #tpu.memory_space<vmem>>) attributes {dimension_semantics = [#tpu.dimension_semantics<arbitrary>, #tpu.dimension_semantics<parallel>, #tpu.dimension_semantics<arbitrary>], iteration_bounds = array<i64: 1, 1, 2>, scalar_prefetch = 0 : i64, scratch_operands = 1 : i64, tpu.core_type = #tpu.core_type<tc>, window_params = [{transform_indices = @transform_0, window_bounds = array<i64: 40, 512>}, {transform_indices = @transform_1, window_bounds = array<i64: 512, 128>}, {transform_indices = @transform_2, window_bounds = array<i64: 1, 128>}, {transform_indices = @transform_3, window_bounds = array<i64: 40, 128>}, {transform_indices = @transform_4, window_bounds = array<i64: 1, 128>}, {transform_indices = @transform_5, window_bounds = array<i64: 1, 128>}]} {
    %c0_i32 = arith.constant 0 : i32
    %0 = arith.cmpi eq, %arg2, %c0_i32 : i32
    %1 = arith.extui %0 : i1 to i32
    %c0_i32_0 = arith.constant 0 : i32
    %2 = arith.cmpi ne, %1, %c0_i32_0 : i32
    scf.if %2 {
      %cst_9 = arith.constant 0.000000e+00 : f32
      %12 = vector.broadcast %cst_9 : f32 to vector<40x128xf32>
      %c0_10 = arith.constant 0 : index
      %c0_11 = arith.constant 0 : index
      %13 = vector.load %arg9[%c0_10, %c0_11] : memref<40x128xf32, #tpu.memory_space<vmem>>, vector<40x128xf32>
      tpu.vector_store %arg9[%c0_10, %c0_11], %12 {strides = array<i32>} : memref<40x128xf32, #tpu.memory_space<vmem>>, vector<40x128xf32>,
    } else {
    }
    %c0 = arith.constant 0 : index
    %c0_1 = arith.constant 0 : index
    %3 = vector.load %arg9[%c0, %c0_1] : memref<40x128xf32, #tpu.memory_space<vmem>>, vector<40x128xf32>
    %c0_2 = arith.constant 0 : index
    %c0_3 = arith.constant 0 : index
    %4 = vector.load %arg3[%c0_2, %c0_3] : memref<40x512xbf16, #tpu.memory_space<vmem>>, vector<40x512xbf16>
    %c0_4 = arith.constant 0 : index
    %c0_5 = arith.constant 0 : index
    %5 = vector.load %arg4[%c0_4, %c0_5] : memref<512x128xbf16, #tpu.memory_space<vmem>>, vector<512x128xbf16>
    %cst = arith.constant dense<0.000000e+00> : vector<40x128xf32>
    %6 = tpu.matmul %4, %5, %cst {dimension_numbers = #tpu.dot_dimension_numbers<[1], [0], [0], [1], [0, 0, 1, 1], [], []>} : vector<40x512xbf16>, vector<512x128xbf16>, vector<40x128xf32> -> vector<40x128xf32>
    %7 = arith.addf %3, %6 : vector<40x128xf32>
    %c0_6 = arith.constant 0 : index
    %c0_7 = arith.constant 0 : index
    %8 = vector.load %arg9[%c0_6, %c0_7] : memref<40x128xf32, #tpu.memory_space<vmem>>, vector<40x128xf32>
    tpu.vector_store %arg9[%c0_6, %c0_7], %7 {strides = array<i32>} : memref<40x128xf32, #tpu.memory_space<vmem>>, vector<40x128xf32>,
    %c1_i32 = arith.constant 1 : i32
    %9 = arith.cmpi eq, %arg2, %c1_i32 : i32
    %10 = arith.extui %9 : i1 to i32
    %c0_i32_8 = arith.constant 0 : i32
    %11 = arith.cmpi ne, %10, %c0_i32_8 : i32
    scf.if %11 {
      %c0_9 = arith.constant 0 : index
      %c0_10 = arith.constant 0 : index
      %12 = vector.load %arg9[%c0_9, %c0_10] : memref<40x128xf32, #tpu.memory_space<vmem>>, vector<40x128xf32>
      %cst_11 = arith.constant dense<0.000000e+00> : vector<128xf32>
      %13 = vector.multi_reduction <add>, %12, %cst_11 [0] : vector<40x128xf32> to vector<128xf32>
      %14 = vector.shape_cast %13 : vector<128xf32> to vector<1x128xf32>
      %15 = arith.mulf %12, %12 : vector<40x128xf32>
      %cst_12 = arith.constant dense<0.000000e+00> : vector<128xf32>
      %16 = vector.multi_reduction <add>, %15, %cst_12 [0] : vector<40x128xf32> to vector<128xf32>
      %17 = vector.shape_cast %16 : vector<128xf32> to vector<1x128xf32>
      %c0_i32_13 = arith.constant 0 : i32
      %18 = arith.cmpi eq, %arg0, %c0_i32_13 : i32
      %19 = arith.extui %18 : i1 to i32
      %c0_i32_14 = arith.constant 0 : i32
      %20 = arith.cmpi ne, %19, %c0_i32_14 : i32
      scf.if %20 {
        %c0_19 = arith.constant 0 : index
        %c0_20 = arith.constant 0 : index
        %25 = vector.load %arg7[%c0_19, %c0_20] : memref<1x128xf32, #tpu.memory_space<vmem>>, vector<1x128xf32>
        tpu.vector_store %arg7[%c0_19, %c0_20], %14 {strides = array<i32>} : memref<1x128xf32, #tpu.memory_space<vmem>>, vector<1x128xf32>,
        %c0_21 = arith.constant 0 : index
        %c0_22 = arith.constant 0 : index
        %26 = vector.load %arg8[%c0_21, %c0_22] : memref<1x128xf32, #tpu.memory_space<vmem>>, vector<1x128xf32>
        tpu.vector_store %arg8[%c0_21, %c0_22], %17 {strides = array<i32>} : memref<1x128xf32, #tpu.memory_space<vmem>>, vector<1x128xf32>,
      } else {
      }
      %c0_i32_15 = arith.constant 0 : i32
      %21 = arith.cmpi sgt, %arg0, %c0_i32_15 : i32
      %22 = arith.extui %21 : i1 to i32
      %c0_i32_16 = arith.constant 0 : i32
      %23 = arith.cmpi ne, %22, %c0_i32_16 : i32
      scf.if %23 {
        %c0_19 = arith.constant 0 : index
        %c0_20 = arith.constant 0 : index
        %25 = vector.load %arg7[%c0_19, %c0_20] : memref<1x128xf32, #tpu.memory_space<vmem>>, vector<1x128xf32>
        %26 = arith.addf %25, %14 : vector<1x128xf32>
        %c0_21 = arith.constant 0 : index
        %c0_22 = arith.constant 0 : index
        %27 = vector.load %arg7[%c0_21, %c0_22] : memref<1x128xf32, #tpu.memory_space<vmem>>, vector<1x128xf32>
        tpu.vector_store %arg7[%c0_21, %c0_22], %26 {strides = array<i32>} : memref<1x128xf32, #tpu.memory_space<vmem>>, vector<1x128xf32>,
        %c0_23 = arith.constant 0 : index
        %c0_24 = arith.constant 0 : index
        %28 = vector.load %arg8[%c0_23, %c0_24] : memref<1x128xf32, #tpu.memory_space<vmem>>, vector<1x128xf32>
        %29 = arith.addf %28, %17 : vector<1x128xf32>
        %c0_25 = arith.constant 0 : index
        %c0_26 = arith.constant 0 : index
        %30 = vector.load %arg8[%c0_25, %c0_26] : memref<1x128xf32, #tpu.memory_space<vmem>>, vector<1x128xf32>
        tpu.vector_store %arg8[%c0_25, %c0_26], %29 {strides = array<i32>} : memref<1x128xf32, #tpu.memory_space<vmem>>, vector<1x128xf32>,
      } else {
      }
      %c0_17 = arith.constant 0 : index
      %c0_18 = arith.constant 0 : index
      %24 = vector.load %arg6[%c0_17, %c0_18] : memref<40x128xf32, #tpu.memory_space<vmem>>, vector<40x128xf32>
      tpu.vector_store %arg6[%c0_17, %c0_18], %12 {strides = array<i32>} : memref<40x128xf32, #tpu.memory_space<vmem>>, vector<40x128xf32>,
    } else {
    }
    return
  }
  func.func @transform_0(%arg0: i32, %arg1: i32, %arg2: i32) -> (i32, i32) {
    %c0_i32 = arith.constant 0 : i32
    return %arg0, %arg2 : i32, i32
  }
  func.func @transform_1(%arg0: i32, %arg1: i32, %arg2: i32) -> (i32, i32) {
    %c0_i32 = arith.constant 0 : i32
    return %arg2, %arg1 : i32, i32
  }
  func.func @transform_2(%arg0: i32, %arg1: i32, %arg2: i32) -> (i32, i32) {
    %c0_i32 = arith.constant 0 : i32
    %c0_i32_0 = arith.constant 0 : i32
    return %c0_i32, %arg1 : i32, i32
  }
  func.func @transform_3(%arg0: i32, %arg1: i32, %arg2: i32) -> (i32, i32) {
    %c0_i32 = arith.constant 0 : i32
    return %arg0, %arg1 : i32, i32
  }
  func.func @transform_4(%arg0: i32, %arg1: i32, %arg2: i32) -> (i32, i32) {
    %c0_i32 = arith.constant 0 : i32
    %c0_i32_0 = arith.constant 0 : i32
    return %c0_i32, %arg1 : i32, i32
  }
  func.func @transform_5(%arg0: i32, %arg1: i32, %arg2: i32) -> (i32, i32) {
    %c0_i32 = arith.constant 0 : i32
    %c0_i32_0 = arith.constant 0 : i32
    return %c0_i32, %arg1 : i32, i32
  }
}

module attributes {stable_mosaic.version = 11 : i64} {
  func.func @_scale_shift_act_kernel(%arg0: i32, %arg1: memref<40x128xf32, #tpu.memory_space<vmem>>, %arg2: memref<1x128xf32, #tpu.memory_space<vmem>>, %arg3: memref<1x128xf32, #tpu.memory_space<vmem>>, %arg4: memref<40x128xbf16, #tpu.memory_space<vmem>>) attributes {dimension_semantics = [#tpu.dimension_semantics<parallel>], iteration_bounds = array<i64: 1>, scalar_prefetch = 0 : i64, scratch_operands = 0 : i64, tpu.core_type = #tpu.core_type<tc>, window_params = [{transform_indices = @transform_0, window_bounds = array<i64: 40, 128>}, {pipeline_mode = #tpu.pipeline_mode<synchronous>, transform_indices = @transform_1, window_bounds = array<i64: 1, 128>}, {pipeline_mode = #tpu.pipeline_mode<synchronous>, transform_indices = @transform_2, window_bounds = array<i64: 1, 128>}, {transform_indices = @transform_3, window_bounds = array<i64: 40, 128>}]} {
    %c0 = arith.constant 0 : index
    %c0_0 = arith.constant 0 : index
    %0 = vector.load %arg1[%c0, %c0_0] : memref<40x128xf32, #tpu.memory_space<vmem>>, vector<40x128xf32>
    %c0_1 = arith.constant 0 : index
    %c0_2 = arith.constant 0 : index
    %1 = vector.load %arg2[%c0_1, %c0_2] : memref<1x128xf32, #tpu.memory_space<vmem>>, vector<1x128xf32>
    %2 = vector.broadcast %1 : vector<1x128xf32> to vector<40x128xf32>
    %3 = arith.mulf %0, %2 : vector<40x128xf32>
    %c0_3 = arith.constant 0 : index
    %c0_4 = arith.constant 0 : index
    %4 = vector.load %arg3[%c0_3, %c0_4] : memref<1x128xf32, #tpu.memory_space<vmem>>, vector<1x128xf32>
    %5 = vector.broadcast %4 : vector<1x128xf32> to vector<40x128xf32>
    %6 = arith.addf %3, %5 : vector<40x128xf32>
    %cst = arith.constant 0.000000e+00 : f32
    %7 = vector.broadcast %cst : f32 to vector<40x128xf32>
    %8 = arith.cmpf oge, %6, %7 : vector<40x128xf32>
    %cst_5 = arith.constant 2.000000e-01 : f32
    %9 = vector.broadcast %cst_5 : f32 to vector<40x128xf32>
    %10 = arith.mulf %9, %6 : vector<40x128xf32>
    %11 = arith.select %8, %6, %10 : vector<40x128xi1>, vector<40x128xf32>
    %12 = arith.truncf %11 : vector<40x128xf32> to vector<40x128xbf16>
    %c0_6 = arith.constant 0 : index
    %c0_7 = arith.constant 0 : index
    %13 = vector.load %arg4[%c0_6, %c0_7] : memref<40x128xbf16, #tpu.memory_space<vmem>>, vector<40x128xbf16>
    tpu.vector_store %arg4[%c0_6, %c0_7], %12 {strides = array<i32>} : memref<40x128xbf16, #tpu.memory_space<vmem>>, vector<40x128xbf16>,
    return
  }
  func.func @transform_0(%arg0: i32) -> (i32, i32) {
    %c0_i32 = arith.constant 0 : i32
    %c0_i32_0 = arith.constant 0 : i32
    return %arg0, %c0_i32 : i32, i32
  }
  func.func @transform_1(%arg0: i32) -> (i32, i32) {
    %c0_i32 = arith.constant 0 : i32
    %c0_i32_0 = arith.constant 0 : i32
    %c0_i32_1 = arith.constant 0 : i32
    return %c0_i32, %c0_i32_0 : i32, i32
  }
  func.func @transform_2(%arg0: i32) -> (i32, i32) {
    %c0_i32 = arith.constant 0 : i32
    %c0_i32_0 = arith.constant 0 : i32
    %c0_i32_1 = arith.constant 0 : i32
    return %c0_i32, %c0_i32_0 : i32, i32
  }
  func.func @transform_3(%arg0: i32) -> (i32, i32) {
    %c0_i32 = arith.constant 0 : i32
    %c0_i32_0 = arith.constant 0 : i32
    return %arg0, %c0_i32 : i32, i32
  }
}

module attributes {stable_mosaic.version = 11 : i64} {
  func.func @_gemm_kernel(%arg0: i32, %arg1: i32, %arg2: i32, %arg3: memref<96x512xbf16, #tpu.memory_space<vmem>>, %arg4: memref<512x128xbf16, #tpu.memory_space<vmem>>, %arg5: memref<1x128xf32, #tpu.memory_space<vmem>>, %arg6: memref<96x128xf32, #tpu.memory_space<vmem>>, %arg7: memref<1x128xf32, #tpu.memory_space<vmem>>, %arg8: memref<1x128xf32, #tpu.memory_space<vmem>>, %arg9: memref<96x128xf32, #tpu.memory_space<vmem>>) attributes {dimension_semantics = [#tpu.dimension_semantics<arbitrary>, #tpu.dimension_semantics<parallel>, #tpu.dimension_semantics<arbitrary>], iteration_bounds = array<i64: 1, 1, 4>, scalar_prefetch = 0 : i64, scratch_operands = 1 : i64, tpu.core_type = #tpu.core_type<tc>, window_params = [{transform_indices = @transform_0, window_bounds = array<i64: 96, 512>}, {transform_indices = @transform_1, window_bounds = array<i64: 512, 128>}, {transform_indices = @transform_2, window_bounds = array<i64: 1, 128>}, {transform_indices = @transform_3, window_bounds = array<i64: 96, 128>}, {transform_indices = @transform_4, window_bounds = array<i64: 1, 128>}, {transform_indices = @transform_5, window_bounds = array<i64: 1, 128>}]} {
    %c0_i32 = arith.constant 0 : i32
    %0 = arith.cmpi eq, %arg2, %c0_i32 : i32
    %1 = arith.extui %0 : i1 to i32
    %c0_i32_0 = arith.constant 0 : i32
    %2 = arith.cmpi ne, %1, %c0_i32_0 : i32
    scf.if %2 {
      %cst_9 = arith.constant 0.000000e+00 : f32
      %12 = vector.broadcast %cst_9 : f32 to vector<96x128xf32>
      %c0_10 = arith.constant 0 : index
      %c0_11 = arith.constant 0 : index
      %13 = vector.load %arg9[%c0_10, %c0_11] : memref<96x128xf32, #tpu.memory_space<vmem>>, vector<96x128xf32>
      tpu.vector_store %arg9[%c0_10, %c0_11], %12 {strides = array<i32>} : memref<96x128xf32, #tpu.memory_space<vmem>>, vector<96x128xf32>,
    } else {
    }
    %c0 = arith.constant 0 : index
    %c0_1 = arith.constant 0 : index
    %3 = vector.load %arg9[%c0, %c0_1] : memref<96x128xf32, #tpu.memory_space<vmem>>, vector<96x128xf32>
    %c0_2 = arith.constant 0 : index
    %c0_3 = arith.constant 0 : index
    %4 = vector.load %arg3[%c0_2, %c0_3] : memref<96x512xbf16, #tpu.memory_space<vmem>>, vector<96x512xbf16>
    %c0_4 = arith.constant 0 : index
    %c0_5 = arith.constant 0 : index
    %5 = vector.load %arg4[%c0_4, %c0_5] : memref<512x128xbf16, #tpu.memory_space<vmem>>, vector<512x128xbf16>
    %cst = arith.constant dense<0.000000e+00> : vector<96x128xf32>
    %6 = tpu.matmul %4, %5, %cst {dimension_numbers = #tpu.dot_dimension_numbers<[1], [0], [0], [1], [0, 0, 1, 1], [], []>} : vector<96x512xbf16>, vector<512x128xbf16>, vector<96x128xf32> -> vector<96x128xf32>
    %7 = arith.addf %3, %6 : vector<96x128xf32>
    %c0_6 = arith.constant 0 : index
    %c0_7 = arith.constant 0 : index
    %8 = vector.load %arg9[%c0_6, %c0_7] : memref<96x128xf32, #tpu.memory_space<vmem>>, vector<96x128xf32>
    tpu.vector_store %arg9[%c0_6, %c0_7], %7 {strides = array<i32>} : memref<96x128xf32, #tpu.memory_space<vmem>>, vector<96x128xf32>,
    %c3_i32 = arith.constant 3 : i32
    %9 = arith.cmpi eq, %arg2, %c3_i32 : i32
    %10 = arith.extui %9 : i1 to i32
    %c0_i32_8 = arith.constant 0 : i32
    %11 = arith.cmpi ne, %10, %c0_i32_8 : i32
    scf.if %11 {
      %c0_9 = arith.constant 0 : index
      %c0_10 = arith.constant 0 : index
      %12 = vector.load %arg9[%c0_9, %c0_10] : memref<96x128xf32, #tpu.memory_space<vmem>>, vector<96x128xf32>
      %cst_11 = arith.constant dense<0.000000e+00> : vector<128xf32>
      %13 = vector.multi_reduction <add>, %12, %cst_11 [0] : vector<96x128xf32> to vector<128xf32>
      %14 = vector.shape_cast %13 : vector<128xf32> to vector<1x128xf32>
      %15 = arith.mulf %12, %12 : vector<96x128xf32>
      %cst_12 = arith.constant dense<0.000000e+00> : vector<128xf32>
      %16 = vector.multi_reduction <add>, %15, %cst_12 [0] : vector<96x128xf32> to vector<128xf32>
      %17 = vector.shape_cast %16 : vector<128xf32> to vector<1x128xf32>
      %c0_i32_13 = arith.constant 0 : i32
      %18 = arith.cmpi eq, %arg0, %c0_i32_13 : i32
      %19 = arith.extui %18 : i1 to i32
      %c0_i32_14 = arith.constant 0 : i32
      %20 = arith.cmpi ne, %19, %c0_i32_14 : i32
      scf.if %20 {
        %c0_19 = arith.constant 0 : index
        %c0_20 = arith.constant 0 : index
        %25 = vector.load %arg7[%c0_19, %c0_20] : memref<1x128xf32, #tpu.memory_space<vmem>>, vector<1x128xf32>
        tpu.vector_store %arg7[%c0_19, %c0_20], %14 {strides = array<i32>} : memref<1x128xf32, #tpu.memory_space<vmem>>, vector<1x128xf32>,
        %c0_21 = arith.constant 0 : index
        %c0_22 = arith.constant 0 : index
        %26 = vector.load %arg8[%c0_21, %c0_22] : memref<1x128xf32, #tpu.memory_space<vmem>>, vector<1x128xf32>
        tpu.vector_store %arg8[%c0_21, %c0_22], %17 {strides = array<i32>} : memref<1x128xf32, #tpu.memory_space<vmem>>, vector<1x128xf32>,
      } else {
      }
      %c0_i32_15 = arith.constant 0 : i32
      %21 = arith.cmpi sgt, %arg0, %c0_i32_15 : i32
      %22 = arith.extui %21 : i1 to i32
      %c0_i32_16 = arith.constant 0 : i32
      %23 = arith.cmpi ne, %22, %c0_i32_16 : i32
      scf.if %23 {
        %c0_19 = arith.constant 0 : index
        %c0_20 = arith.constant 0 : index
        %25 = vector.load %arg7[%c0_19, %c0_20] : memref<1x128xf32, #tpu.memory_space<vmem>>, vector<1x128xf32>
        %26 = arith.addf %25, %14 : vector<1x128xf32>
        %c0_21 = arith.constant 0 : index
        %c0_22 = arith.constant 0 : index
        %27 = vector.load %arg7[%c0_21, %c0_22] : memref<1x128xf32, #tpu.memory_space<vmem>>, vector<1x128xf32>
        tpu.vector_store %arg7[%c0_21, %c0_22], %26 {strides = array<i32>} : memref<1x128xf32, #tpu.memory_space<vmem>>, vector<1x128xf32>,
        %c0_23 = arith.constant 0 : index
        %c0_24 = arith.constant 0 : index
        %28 = vector.load %arg8[%c0_23, %c0_24] : memref<1x128xf32, #tpu.memory_space<vmem>>, vector<1x128xf32>
        %29 = arith.addf %28, %17 : vector<1x128xf32>
        %c0_25 = arith.constant 0 : index
        %c0_26 = arith.constant 0 : index
        %30 = vector.load %arg8[%c0_25, %c0_26] : memref<1x128xf32, #tpu.memory_space<vmem>>, vector<1x128xf32>
        tpu.vector_store %arg8[%c0_25, %c0_26], %29 {strides = array<i32>} : memref<1x128xf32, #tpu.memory_space<vmem>>, vector<1x128xf32>,
      } else {
      }
      %c0_17 = arith.constant 0 : index
      %c0_18 = arith.constant 0 : index
      %24 = vector.load %arg6[%c0_17, %c0_18] : memref<96x128xf32, #tpu.memory_space<vmem>>, vector<96x128xf32>
      tpu.vector_store %arg6[%c0_17, %c0_18], %12 {strides = array<i32>} : memref<96x128xf32, #tpu.memory_space<vmem>>, vector<96x128xf32>,
    } else {
    }
    return
  }
  func.func @transform_0(%arg0: i32, %arg1: i32, %arg2: i32) -> (i32, i32) {
    %c0_i32 = arith.constant 0 : i32
    return %arg0, %arg2 : i32, i32
  }
  func.func @transform_1(%arg0: i32, %arg1: i32, %arg2: i32) -> (i32, i32) {
    %c0_i32 = arith.constant 0 : i32
    return %arg2, %arg1 : i32, i32
  }
  func.func @transform_2(%arg0: i32, %arg1: i32, %arg2: i32) -> (i32, i32) {
    %c0_i32 = arith.constant 0 : i32
    %c0_i32_0 = arith.constant 0 : i32
    return %c0_i32, %arg1 : i32, i32
  }
  func.func @transform_3(%arg0: i32, %arg1: i32, %arg2: i32) -> (i32, i32) {
    %c0_i32 = arith.constant 0 : i32
    return %arg0, %arg1 : i32, i32
  }
  func.func @transform_4(%arg0: i32, %arg1: i32, %arg2: i32) -> (i32, i32) {
    %c0_i32 = arith.constant 0 : i32
    %c0_i32_0 = arith.constant 0 : i32
    return %c0_i32, %arg1 : i32, i32
  }
  func.func @transform_5(%arg0: i32, %arg1: i32, %arg2: i32) -> (i32, i32) {
    %c0_i32 = arith.constant 0 : i32
    %c0_i32_0 = arith.constant 0 : i32
    return %c0_i32, %arg1 : i32, i32
  }
}

module attributes {stable_mosaic.version = 11 : i64} {
  func.func @_scale_shift_act_kernel(%arg0: i32, %arg1: memref<96x128xf32, #tpu.memory_space<vmem>>, %arg2: memref<1x128xf32, #tpu.memory_space<vmem>>, %arg3: memref<1x128xf32, #tpu.memory_space<vmem>>, %arg4: memref<96x128xbf16, #tpu.memory_space<vmem>>) attributes {dimension_semantics = [#tpu.dimension_semantics<parallel>], iteration_bounds = array<i64: 1>, scalar_prefetch = 0 : i64, scratch_operands = 0 : i64, tpu.core_type = #tpu.core_type<tc>, window_params = [{transform_indices = @transform_0, window_bounds = array<i64: 96, 128>}, {pipeline_mode = #tpu.pipeline_mode<synchronous>, transform_indices = @transform_1, window_bounds = array<i64: 1, 128>}, {pipeline_mode = #tpu.pipeline_mode<synchronous>, transform_indices = @transform_2, window_bounds = array<i64: 1, 128>}, {transform_indices = @transform_3, window_bounds = array<i64: 96, 128>}]} {
    %c0 = arith.constant 0 : index
    %c0_0 = arith.constant 0 : index
    %0 = vector.load %arg1[%c0, %c0_0] : memref<96x128xf32, #tpu.memory_space<vmem>>, vector<96x128xf32>
    %c0_1 = arith.constant 0 : index
    %c0_2 = arith.constant 0 : index
    %1 = vector.load %arg2[%c0_1, %c0_2] : memref<1x128xf32, #tpu.memory_space<vmem>>, vector<1x128xf32>
    %2 = vector.broadcast %1 : vector<1x128xf32> to vector<96x128xf32>
    %3 = arith.mulf %0, %2 : vector<96x128xf32>
    %c0_3 = arith.constant 0 : index
    %c0_4 = arith.constant 0 : index
    %4 = vector.load %arg3[%c0_3, %c0_4] : memref<1x128xf32, #tpu.memory_space<vmem>>, vector<1x128xf32>
    %5 = vector.broadcast %4 : vector<1x128xf32> to vector<96x128xf32>
    %6 = arith.addf %3, %5 : vector<96x128xf32>
    %cst = arith.constant 0.000000e+00 : f32
    %7 = vector.broadcast %cst : f32 to vector<96x128xf32>
    %8 = arith.cmpf oge, %6, %7 : vector<96x128xf32>
    %cst_5 = arith.constant 2.000000e-01 : f32
    %9 = vector.broadcast %cst_5 : f32 to vector<96x128xf32>
    %10 = arith.mulf %9, %6 : vector<96x128xf32>
    %11 = arith.select %8, %6, %10 : vector<96x128xi1>, vector<96x128xf32>
    %12 = arith.truncf %11 : vector<96x128xf32> to vector<96x128xbf16>
    %c0_6 = arith.constant 0 : index
    %c0_7 = arith.constant 0 : index
    %13 = vector.load %arg4[%c0_6, %c0_7] : memref<96x128xbf16, #tpu.memory_space<vmem>>, vector<96x128xbf16>
    tpu.vector_store %arg4[%c0_6, %c0_7], %12 {strides = array<i32>} : memref<96x128xbf16, #tpu.memory_space<vmem>>, vector<96x128xbf16>,
    return
  }
  func.func @transform_0(%arg0: i32) -> (i32, i32) {
    %c0_i32 = arith.constant 0 : i32
    %c0_i32_0 = arith.constant 0 : i32
    return %arg0, %c0_i32 : i32, i32
  }
  func.func @transform_1(%arg0: i32) -> (i32, i32) {
    %c0_i32 = arith.constant 0 : i32
    %c0_i32_0 = arith.constant 0 : i32
    %c0_i32_1 = arith.constant 0 : i32
    return %c0_i32, %c0_i32_0 : i32, i32
  }
  func.func @transform_2(%arg0: i32) -> (i32, i32) {
    %c0_i32 = arith.constant 0 : i32
    %c0_i32_0 = arith.constant 0 : i32
    %c0_i32_1 = arith.constant 0 : i32
    return %c0_i32, %c0_i32_0 : i32, i32
  }
  func.func @transform_3(%arg0: i32) -> (i32, i32) {
    %c0_i32 = arith.constant 0 : i32
    %c0_i32_0 = arith.constant 0 : i32
    return %arg0, %c0_i32 : i32, i32
  }
}

module attributes {stable_mosaic.version = 11 : i64} {
  func.func @_gemm_kernel(%arg0: i32, %arg1: i32, %arg2: i32, %arg3: memref<200x512xbf16, #tpu.memory_space<vmem>>, %arg4: memref<512x128xbf16, #tpu.memory_space<vmem>>, %arg5: memref<1x128xf32, #tpu.memory_space<vmem>>, %arg6: memref<200x128xf32, #tpu.memory_space<vmem>>, %arg7: memref<200x128xf32, #tpu.memory_space<vmem>>) attributes {dimension_semantics = [#tpu.dimension_semantics<parallel>, #tpu.dimension_semantics<parallel>, #tpu.dimension_semantics<arbitrary>], iteration_bounds = array<i64: 1, 1, 8>, scalar_prefetch = 0 : i64, scratch_operands = 1 : i64, tpu.core_type = #tpu.core_type<tc>, window_params = [{transform_indices = @transform_0, window_bounds = array<i64: 200, 512>}, {transform_indices = @transform_1, window_bounds = array<i64: 512, 128>}, {transform_indices = @transform_2, window_bounds = array<i64: 1, 128>}, {transform_indices = @transform_3, window_bounds = array<i64: 200, 128>}]} {
    %c0_i32 = arith.constant 0 : i32
    %0 = arith.cmpi eq, %arg2, %c0_i32 : i32
    %1 = arith.extui %0 : i1 to i32
    %c0_i32_0 = arith.constant 0 : i32
    %2 = arith.cmpi ne, %1, %c0_i32_0 : i32
    scf.if %2 {
      %cst_9 = arith.constant 0.000000e+00 : f32
      %12 = vector.broadcast %cst_9 : f32 to vector<200x128xf32>
      %c0_10 = arith.constant 0 : index
      %c0_11 = arith.constant 0 : index
      %13 = vector.load %arg7[%c0_10, %c0_11] : memref<200x128xf32, #tpu.memory_space<vmem>>, vector<200x128xf32>
      tpu.vector_store %arg7[%c0_10, %c0_11], %12 {strides = array<i32>} : memref<200x128xf32, #tpu.memory_space<vmem>>, vector<200x128xf32>,
    } else {
    }
    %c0 = arith.constant 0 : index
    %c0_1 = arith.constant 0 : index
    %3 = vector.load %arg7[%c0, %c0_1] : memref<200x128xf32, #tpu.memory_space<vmem>>, vector<200x128xf32>
    %c0_2 = arith.constant 0 : index
    %c0_3 = arith.constant 0 : index
    %4 = vector.load %arg3[%c0_2, %c0_3] : memref<200x512xbf16, #tpu.memory_space<vmem>>, vector<200x512xbf16>
    %c0_4 = arith.constant 0 : index
    %c0_5 = arith.constant 0 : index
    %5 = vector.load %arg4[%c0_4, %c0_5] : memref<512x128xbf16, #tpu.memory_space<vmem>>, vector<512x128xbf16>
    %cst = arith.constant dense<0.000000e+00> : vector<200x128xf32>
    %6 = tpu.matmul %4, %5, %cst {dimension_numbers = #tpu.dot_dimension_numbers<[1], [0], [0], [1], [0, 0, 1, 1], [], []>} : vector<200x512xbf16>, vector<512x128xbf16>, vector<200x128xf32> -> vector<200x128xf32>
    %7 = arith.addf %3, %6 : vector<200x128xf32>
    %c0_6 = arith.constant 0 : index
    %c0_7 = arith.constant 0 : index
    %8 = vector.load %arg7[%c0_6, %c0_7] : memref<200x128xf32, #tpu.memory_space<vmem>>, vector<200x128xf32>
    tpu.vector_store %arg7[%c0_6, %c0_7], %7 {strides = array<i32>} : memref<200x128xf32, #tpu.memory_space<vmem>>, vector<200x128xf32>,
    %c7_i32 = arith.constant 7 : i32
    %9 = arith.cmpi eq, %arg2, %c7_i32 : i32
    %10 = arith.extui %9 : i1 to i32
    %c0_i32_8 = arith.constant 0 : i32
    %11 = arith.cmpi ne, %10, %c0_i32_8 : i32
    scf.if %11 {
      %c0_9 = arith.constant 0 : index
      %c0_10 = arith.constant 0 : index
      %12 = vector.load %arg7[%c0_9, %c0_10] : memref<200x128xf32, #tpu.memory_space<vmem>>, vector<200x128xf32>
      %c0_11 = arith.constant 0 : index
      %c0_12 = arith.constant 0 : index
      %13 = vector.load %arg5[%c0_11, %c0_12] : memref<1x128xf32, #tpu.memory_space<vmem>>, vector<1x128xf32>
      %14 = vector.broadcast %13 : vector<1x128xf32> to vector<200x128xf32>
      %15 = arith.addf %12, %14 : vector<200x128xf32>
      %c0_13 = arith.constant 0 : index
      %c0_14 = arith.constant 0 : index
      %16 = vector.load %arg6[%c0_13, %c0_14] : memref<200x128xf32, #tpu.memory_space<vmem>>, vector<200x128xf32>
      tpu.vector_store %arg6[%c0_13, %c0_14], %15 {strides = array<i32>} : memref<200x128xf32, #tpu.memory_space<vmem>>, vector<200x128xf32>,
    } else {
    }
    return
  }
  func.func @transform_0(%arg0: i32, %arg1: i32, %arg2: i32) -> (i32, i32) {
    %c0_i32 = arith.constant 0 : i32
    return %arg0, %arg2 : i32, i32
  }
  func.func @transform_1(%arg0: i32, %arg1: i32, %arg2: i32) -> (i32, i32) {
    %c0_i32 = arith.constant 0 : i32
    return %arg2, %arg1 : i32, i32
  }
  func.func @transform_2(%arg0: i32, %arg1: i32, %arg2: i32) -> (i32, i32) {
    %c0_i32 = arith.constant 0 : i32
    %c0_i32_0 = arith.constant 0 : i32
    return %c0_i32, %arg1 : i32, i32
  }
  func.func @transform_3(%arg0: i32, %arg1: i32, %arg2: i32) -> (i32, i32) {
    %c0_i32 = arith.constant 0 : i32
    return %arg0, %arg1 : i32, i32
  }
}

module attributes {stable_mosaic.version = 11 : i64} {
  func.func @_gemm_kernel(%arg0: i32, %arg1: i32, %arg2: i32, %arg3: memref<40x256xbf16, #tpu.memory_space<vmem>>, %arg4: memref<256x128xbf16, #tpu.memory_space<vmem>>, %arg5: memref<1x128xf32, #tpu.memory_space<vmem>>, %arg6: memref<40x128xbf16, #tpu.memory_space<vmem>>, %arg7: memref<40x128xf32, #tpu.memory_space<vmem>>) attributes {dimension_semantics = [#tpu.dimension_semantics<parallel>, #tpu.dimension_semantics<parallel>, #tpu.dimension_semantics<arbitrary>], iteration_bounds = array<i64: 1, 1, 1>, scalar_prefetch = 0 : i64, scratch_operands = 1 : i64, tpu.core_type = #tpu.core_type<tc>, window_params = [{transform_indices = @transform_0, window_bounds = array<i64: 40, 256>}, {transform_indices = @transform_1, window_bounds = array<i64: 256, 128>}, {transform_indices = @transform_2, window_bounds = array<i64: 1, 128>}, {transform_indices = @transform_3, window_bounds = array<i64: 40, 128>}]} {
    %c0_i32 = arith.constant 0 : i32
    %0 = arith.cmpi eq, %arg2, %c0_i32 : i32
    %1 = arith.extui %0 : i1 to i32
    %c0_i32_0 = arith.constant 0 : i32
    %2 = arith.cmpi ne, %1, %c0_i32_0 : i32
    scf.if %2 {
      %cst_10 = arith.constant 0.000000e+00 : f32
      %12 = vector.broadcast %cst_10 : f32 to vector<40x128xf32>
      %c0_11 = arith.constant 0 : index
      %c0_12 = arith.constant 0 : index
      %13 = vector.load %arg7[%c0_11, %c0_12] : memref<40x128xf32, #tpu.memory_space<vmem>>, vector<40x128xf32>
      tpu.vector_store %arg7[%c0_11, %c0_12], %12 {strides = array<i32>} : memref<40x128xf32, #tpu.memory_space<vmem>>, vector<40x128xf32>,
    } else {
    }
    %c0 = arith.constant 0 : index
    %c0_1 = arith.constant 0 : index
    %3 = vector.load %arg7[%c0, %c0_1] : memref<40x128xf32, #tpu.memory_space<vmem>>, vector<40x128xf32>
    %c0_2 = arith.constant 0 : index
    %c0_3 = arith.constant 0 : index
    %4 = vector.load %arg3[%c0_2, %c0_3] : memref<40x256xbf16, #tpu.memory_space<vmem>>, vector<40x256xbf16>
    %c0_4 = arith.constant 0 : index
    %c0_5 = arith.constant 0 : index
    %5 = vector.load %arg4[%c0_4, %c0_5] : memref<256x128xbf16, #tpu.memory_space<vmem>>, vector<256x128xbf16>
    %cst = arith.constant dense<0.000000e+00> : vector<40x128xf32>
    %6 = tpu.matmul %4, %5, %cst {dimension_numbers = #tpu.dot_dimension_numbers<[1], [0], [0], [1], [0, 0, 1, 1], [], []>} : vector<40x256xbf16>, vector<256x128xbf16>, vector<40x128xf32> -> vector<40x128xf32>
    %7 = arith.addf %3, %6 : vector<40x128xf32>
    %c0_6 = arith.constant 0 : index
    %c0_7 = arith.constant 0 : index
    %8 = vector.load %arg7[%c0_6, %c0_7] : memref<40x128xf32, #tpu.memory_space<vmem>>, vector<40x128xf32>
    tpu.vector_store %arg7[%c0_6, %c0_7], %7 {strides = array<i32>} : memref<40x128xf32, #tpu.memory_space<vmem>>, vector<40x128xf32>,
    %c0_i32_8 = arith.constant 0 : i32
    %9 = arith.cmpi eq, %arg2, %c0_i32_8 : i32
    %10 = arith.extui %9 : i1 to i32
    %c0_i32_9 = arith.constant 0 : i32
    %11 = arith.cmpi ne, %10, %c0_i32_9 : i32
    scf.if %11 {
      %c0_10 = arith.constant 0 : index
      %c0_11 = arith.constant 0 : index
      %12 = vector.load %arg7[%c0_10, %c0_11] : memref<40x128xf32, #tpu.memory_space<vmem>>, vector<40x128xf32>
      %c0_12 = arith.constant 0 : index
      %c0_13 = arith.constant 0 : index
      %13 = vector.load %arg5[%c0_12, %c0_13] : memref<1x128xf32, #tpu.memory_space<vmem>>, vector<1x128xf32>
      %14 = vector.broadcast %13 : vector<1x128xf32> to vector<40x128xf32>
      %15 = arith.addf %12, %14 : vector<40x128xf32>
      %cst_14 = arith.constant 0.000000e+00 : f32
      %16 = vector.broadcast %cst_14 : f32 to vector<40x128xf32>
      %17 = arith.cmpf oge, %15, %16 : vector<40x128xf32>
      %cst_15 = arith.constant 2.000000e-01 : f32
      %18 = vector.broadcast %cst_15 : f32 to vector<40x128xf32>
      %19 = arith.mulf %18, %15 : vector<40x128xf32>
      %20 = arith.select %17, %15, %19 : vector<40x128xi1>, vector<40x128xf32>
      %21 = arith.truncf %20 : vector<40x128xf32> to vector<40x128xbf16>
      %c0_16 = arith.constant 0 : index
      %c0_17 = arith.constant 0 : index
      %22 = vector.load %arg6[%c0_16, %c0_17] : memref<40x128xbf16, #tpu.memory_space<vmem>>, vector<40x128xbf16>
      tpu.vector_store %arg6[%c0_16, %c0_17], %21 {strides = array<i32>} : memref<40x128xbf16, #tpu.memory_space<vmem>>, vector<40x128xbf16>,
    } else {
    }
    return
  }
  func.func @transform_0(%arg0: i32, %arg1: i32, %arg2: i32) -> (i32, i32) {
    %c0_i32 = arith.constant 0 : i32
    return %arg0, %arg2 : i32, i32
  }
  func.func @transform_1(%arg0: i32, %arg1: i32, %arg2: i32) -> (i32, i32) {
    %c0_i32 = arith.constant 0 : i32
    return %arg2, %arg1 : i32, i32
  }
  func.func @transform_2(%arg0: i32, %arg1: i32, %arg2: i32) -> (i32, i32) {
    %c0_i32 = arith.constant 0 : i32
    %c0_i32_0 = arith.constant 0 : i32
    return %c0_i32, %arg1 : i32, i32
  }
  func.func @transform_3(%arg0: i32, %arg1: i32, %arg2: i32) -> (i32, i32) {
    %c0_i32 = arith.constant 0 : i32
    return %arg0, %arg1 : i32, i32
  }
}

module attributes {stable_mosaic.version = 11 : i64} {
  func.func @_gemm_kernel(%arg0: i32, %arg1: i32, %arg2: i32, %arg3: memref<16x512xbf16, #tpu.memory_space<vmem>>, %arg4: memref<512x128xbf16, #tpu.memory_space<vmem>>, %arg5: memref<1x128xf32, #tpu.memory_space<vmem>>, %arg6: memref<16x128xf32, #tpu.memory_space<vmem>>, %arg7: memref<1x128xf32, #tpu.memory_space<vmem>>, %arg8: memref<1x128xf32, #tpu.memory_space<vmem>>, %arg9: memref<16x128xf32, #tpu.memory_space<vmem>>) attributes {dimension_semantics = [#tpu.dimension_semantics<arbitrary>, #tpu.dimension_semantics<parallel>, #tpu.dimension_semantics<arbitrary>], iteration_bounds = array<i64: 1, 1, 1>, scalar_prefetch = 0 : i64, scratch_operands = 1 : i64, tpu.core_type = #tpu.core_type<tc>, window_params = [{transform_indices = @transform_0, window_bounds = array<i64: 16, 512>}, {transform_indices = @transform_1, window_bounds = array<i64: 512, 128>}, {transform_indices = @transform_2, window_bounds = array<i64: 1, 128>}, {transform_indices = @transform_3, window_bounds = array<i64: 16, 128>}, {transform_indices = @transform_4, window_bounds = array<i64: 1, 128>}, {transform_indices = @transform_5, window_bounds = array<i64: 1, 128>}]} {
    %c0_i32 = arith.constant 0 : i32
    %0 = arith.cmpi eq, %arg2, %c0_i32 : i32
    %1 = arith.extui %0 : i1 to i32
    %c0_i32_0 = arith.constant 0 : i32
    %2 = arith.cmpi ne, %1, %c0_i32_0 : i32
    scf.if %2 {
      %cst_10 = arith.constant 0.000000e+00 : f32
      %12 = vector.broadcast %cst_10 : f32 to vector<16x128xf32>
      %c0_11 = arith.constant 0 : index
      %c0_12 = arith.constant 0 : index
      %13 = vector.load %arg9[%c0_11, %c0_12] : memref<16x128xf32, #tpu.memory_space<vmem>>, vector<16x128xf32>
      tpu.vector_store %arg9[%c0_11, %c0_12], %12 {strides = array<i32>} : memref<16x128xf32, #tpu.memory_space<vmem>>, vector<16x128xf32>,
    } else {
    }
    %c0 = arith.constant 0 : index
    %c0_1 = arith.constant 0 : index
    %3 = vector.load %arg9[%c0, %c0_1] : memref<16x128xf32, #tpu.memory_space<vmem>>, vector<16x128xf32>
    %c0_2 = arith.constant 0 : index
    %c0_3 = arith.constant 0 : index
    %4 = vector.load %arg3[%c0_2, %c0_3] : memref<16x512xbf16, #tpu.memory_space<vmem>>, vector<16x512xbf16>
    %c0_4 = arith.constant 0 : index
    %c0_5 = arith.constant 0 : index
    %5 = vector.load %arg4[%c0_4, %c0_5] : memref<512x128xbf16, #tpu.memory_space<vmem>>, vector<512x128xbf16>
    %cst = arith.constant dense<0.000000e+00> : vector<16x128xf32>
    %6 = tpu.matmul %4, %5, %cst {dimension_numbers = #tpu.dot_dimension_numbers<[1], [0], [0], [1], [0, 0, 1, 1], [], []>} : vector<16x512xbf16>, vector<512x128xbf16>, vector<16x128xf32> -> vector<16x128xf32>
    %7 = arith.addf %3, %6 : vector<16x128xf32>
    %c0_6 = arith.constant 0 : index
    %c0_7 = arith.constant 0 : index
    %8 = vector.load %arg9[%c0_6, %c0_7] : memref<16x128xf32, #tpu.memory_space<vmem>>, vector<16x128xf32>
    tpu.vector_store %arg9[%c0_6, %c0_7], %7 {strides = array<i32>} : memref<16x128xf32, #tpu.memory_space<vmem>>, vector<16x128xf32>,
    %c0_i32_8 = arith.constant 0 : i32
    %9 = arith.cmpi eq, %arg2, %c0_i32_8 : i32
    %10 = arith.extui %9 : i1 to i32
    %c0_i32_9 = arith.constant 0 : i32
    %11 = arith.cmpi ne, %10, %c0_i32_9 : i32
    scf.if %11 {
      %c0_10 = arith.constant 0 : index
      %c0_11 = arith.constant 0 : index
      %12 = vector.load %arg9[%c0_10, %c0_11] : memref<16x128xf32, #tpu.memory_space<vmem>>, vector<16x128xf32>
      %cst_12 = arith.constant dense<0.000000e+00> : vector<128xf32>
      %13 = vector.multi_reduction <add>, %12, %cst_12 [0] : vector<16x128xf32> to vector<128xf32>
      %14 = vector.shape_cast %13 : vector<128xf32> to vector<1x128xf32>
      %15 = arith.mulf %12, %12 : vector<16x128xf32>
      %cst_13 = arith.constant dense<0.000000e+00> : vector<128xf32>
      %16 = vector.multi_reduction <add>, %15, %cst_13 [0] : vector<16x128xf32> to vector<128xf32>
      %17 = vector.shape_cast %16 : vector<128xf32> to vector<1x128xf32>
      %c0_i32_14 = arith.constant 0 : i32
      %18 = arith.cmpi eq, %arg0, %c0_i32_14 : i32
      %19 = arith.extui %18 : i1 to i32
      %c0_i32_15 = arith.constant 0 : i32
      %20 = arith.cmpi ne, %19, %c0_i32_15 : i32
      scf.if %20 {
        %c0_20 = arith.constant 0 : index
        %c0_21 = arith.constant 0 : index
        %25 = vector.load %arg7[%c0_20, %c0_21] : memref<1x128xf32, #tpu.memory_space<vmem>>, vector<1x128xf32>
        tpu.vector_store %arg7[%c0_20, %c0_21], %14 {strides = array<i32>} : memref<1x128xf32, #tpu.memory_space<vmem>>, vector<1x128xf32>,
        %c0_22 = arith.constant 0 : index
        %c0_23 = arith.constant 0 : index
        %26 = vector.load %arg8[%c0_22, %c0_23] : memref<1x128xf32, #tpu.memory_space<vmem>>, vector<1x128xf32>
        tpu.vector_store %arg8[%c0_22, %c0_23], %17 {strides = array<i32>} : memref<1x128xf32, #tpu.memory_space<vmem>>, vector<1x128xf32>,
      } else {
      }
      %c0_i32_16 = arith.constant 0 : i32
      %21 = arith.cmpi sgt, %arg0, %c0_i32_16 : i32
      %22 = arith.extui %21 : i1 to i32
      %c0_i32_17 = arith.constant 0 : i32
      %23 = arith.cmpi ne, %22, %c0_i32_17 : i32
      scf.if %23 {
        %c0_20 = arith.constant 0 : index
        %c0_21 = arith.constant 0 : index
        %25 = vector.load %arg7[%c0_20, %c0_21] : memref<1x128xf32, #tpu.memory_space<vmem>>, vector<1x128xf32>
        %26 = arith.addf %25, %14 : vector<1x128xf32>
        %c0_22 = arith.constant 0 : index
        %c0_23 = arith.constant 0 : index
        %27 = vector.load %arg7[%c0_22, %c0_23] : memref<1x128xf32, #tpu.memory_space<vmem>>, vector<1x128xf32>
        tpu.vector_store %arg7[%c0_22, %c0_23], %26 {strides = array<i32>} : memref<1x128xf32, #tpu.memory_space<vmem>>, vector<1x128xf32>,
        %c0_24 = arith.constant 0 : index
        %c0_25 = arith.constant 0 : index
        %28 = vector.load %arg8[%c0_24, %c0_25] : memref<1x128xf32, #tpu.memory_space<vmem>>, vector<1x128xf32>
        %29 = arith.addf %28, %17 : vector<1x128xf32>
        %c0_26 = arith.constant 0 : index
        %c0_27 = arith.constant 0 : index
        %30 = vector.load %arg8[%c0_26, %c0_27] : memref<1x128xf32, #tpu.memory_space<vmem>>, vector<1x128xf32>
        tpu.vector_store %arg8[%c0_26, %c0_27], %29 {strides = array<i32>} : memref<1x128xf32, #tpu.memory_space<vmem>>, vector<1x128xf32>,
      } else {
      }
      %c0_18 = arith.constant 0 : index
      %c0_19 = arith.constant 0 : index
      %24 = vector.load %arg6[%c0_18, %c0_19] : memref<16x128xf32, #tpu.memory_space<vmem>>, vector<16x128xf32>
      tpu.vector_store %arg6[%c0_18, %c0_19], %12 {strides = array<i32>} : memref<16x128xf32, #tpu.memory_space<vmem>>, vector<16x128xf32>,
    } else {
    }
    return
  }
  func.func @transform_0(%arg0: i32, %arg1: i32, %arg2: i32) -> (i32, i32) {
    %c0_i32 = arith.constant 0 : i32
    return %arg0, %arg2 : i32, i32
  }
  func.func @transform_1(%arg0: i32, %arg1: i32, %arg2: i32) -> (i32, i32) {
    %c0_i32 = arith.constant 0 : i32
    return %arg2, %arg1 : i32, i32
  }
  func.func @transform_2(%arg0: i32, %arg1: i32, %arg2: i32) -> (i32, i32) {
    %c0_i32 = arith.constant 0 : i32
    %c0_i32_0 = arith.constant 0 : i32
    return %c0_i32, %arg1 : i32, i32
  }
  func.func @transform_3(%arg0: i32, %arg1: i32, %arg2: i32) -> (i32, i32) {
    %c0_i32 = arith.constant 0 : i32
    return %arg0, %arg1 : i32, i32
  }
  func.func @transform_4(%arg0: i32, %arg1: i32, %arg2: i32) -> (i32, i32) {
    %c0_i32 = arith.constant 0 : i32
    %c0_i32_0 = arith.constant 0 : i32
    return %c0_i32, %arg1 : i32, i32
  }
  func.func @transform_5(%arg0: i32, %arg1: i32, %arg2: i32) -> (i32, i32) {
    %c0_i32 = arith.constant 0 : i32
    %c0_i32_0 = arith.constant 0 : i32
    return %c0_i32, %arg1 : i32, i32
  }
}

module attributes {stable_mosaic.version = 11 : i64} {
  func.func @_scale_shift_act_kernel(%arg0: i32, %arg1: memref<16x128xf32, #tpu.memory_space<vmem>>, %arg2: memref<1x128xf32, #tpu.memory_space<vmem>>, %arg3: memref<1x128xf32, #tpu.memory_space<vmem>>, %arg4: memref<16x128xbf16, #tpu.memory_space<vmem>>) attributes {dimension_semantics = [#tpu.dimension_semantics<parallel>], iteration_bounds = array<i64: 1>, scalar_prefetch = 0 : i64, scratch_operands = 0 : i64, tpu.core_type = #tpu.core_type<tc>, window_params = [{transform_indices = @transform_0, window_bounds = array<i64: 16, 128>}, {pipeline_mode = #tpu.pipeline_mode<synchronous>, transform_indices = @transform_1, window_bounds = array<i64: 1, 128>}, {pipeline_mode = #tpu.pipeline_mode<synchronous>, transform_indices = @transform_2, window_bounds = array<i64: 1, 128>}, {transform_indices = @transform_3, window_bounds = array<i64: 16, 128>}]} {
    %c0 = arith.constant 0 : index
    %c0_0 = arith.constant 0 : index
    %0 = vector.load %arg1[%c0, %c0_0] : memref<16x128xf32, #tpu.memory_space<vmem>>, vector<16x128xf32>
    %c0_1 = arith.constant 0 : index
    %c0_2 = arith.constant 0 : index
    %1 = vector.load %arg2[%c0_1, %c0_2] : memref<1x128xf32, #tpu.memory_space<vmem>>, vector<1x128xf32>
    %2 = vector.broadcast %1 : vector<1x128xf32> to vector<16x128xf32>
    %3 = arith.mulf %0, %2 : vector<16x128xf32>
    %c0_3 = arith.constant 0 : index
    %c0_4 = arith.constant 0 : index
    %4 = vector.load %arg3[%c0_3, %c0_4] : memref<1x128xf32, #tpu.memory_space<vmem>>, vector<1x128xf32>
    %5 = vector.broadcast %4 : vector<1x128xf32> to vector<16x128xf32>
    %6 = arith.addf %3, %5 : vector<16x128xf32>
    %cst = arith.constant 0.000000e+00 : f32
    %7 = vector.broadcast %cst : f32 to vector<16x128xf32>
    %8 = arith.cmpf oge, %6, %7 : vector<16x128xf32>
    %cst_5 = arith.constant 2.000000e-01 : f32
    %9 = vector.broadcast %cst_5 : f32 to vector<16x128xf32>
    %10 = arith.mulf %9, %6 : vector<16x128xf32>
    %11 = arith.select %8, %6, %10 : vector<16x128xi1>, vector<16x128xf32>
    %12 = arith.truncf %11 : vector<16x128xf32> to vector<16x128xbf16>
    %c0_6 = arith.constant 0 : index
    %c0_7 = arith.constant 0 : index
    %13 = vector.load %arg4[%c0_6, %c0_7] : memref<16x128xbf16, #tpu.memory_space<vmem>>, vector<16x128xbf16>
    tpu.vector_store %arg4[%c0_6, %c0_7], %12 {strides = array<i32>} : memref<16x128xbf16, #tpu.memory_space<vmem>>, vector<16x128xbf16>,
    return
  }
  func.func @transform_0(%arg0: i32) -> (i32, i32) {
    %c0_i32 = arith.constant 0 : i32
    %c0_i32_0 = arith.constant 0 : i32
    return %arg0, %c0_i32 : i32, i32
  }
  func.func @transform_1(%arg0: i32) -> (i32, i32) {
    %c0_i32 = arith.constant 0 : i32
    %c0_i32_0 = arith.constant 0 : i32
    %c0_i32_1 = arith.constant 0 : i32
    return %c0_i32, %c0_i32_0 : i32, i32
  }
  func.func @transform_2(%arg0: i32) -> (i32, i32) {
    %c0_i32 = arith.constant 0 : i32
    %c0_i32_0 = arith.constant 0 : i32
    %c0_i32_1 = arith.constant 0 : i32
    return %c0_i32, %c0_i32_0 : i32, i32
  }
  func.func @transform_3(%arg0: i32) -> (i32, i32) {
    %c0_i32 = arith.constant 0 : i32
    %c0_i32_0 = arith.constant 0 : i32
    return %arg0, %c0_i32 : i32, i32
  }
}

module attributes {stable_mosaic.version = 11 : i64} {
  func.func @_gemm_kernel(%arg0: i32, %arg1: i32, %arg2: i32, %arg3: memref<16x512xbf16, #tpu.memory_space<vmem>>, %arg4: memref<512x128xbf16, #tpu.memory_space<vmem>>, %arg5: memref<1x128xf32, #tpu.memory_space<vmem>>, %arg6: memref<16x128xf32, #tpu.memory_space<vmem>>, %arg7: memref<1x128xf32, #tpu.memory_space<vmem>>, %arg8: memref<1x128xf32, #tpu.memory_space<vmem>>, %arg9: memref<16x128xf32, #tpu.memory_space<vmem>>) attributes {dimension_semantics = [#tpu.dimension_semantics<arbitrary>, #tpu.dimension_semantics<parallel>, #tpu.dimension_semantics<arbitrary>], iteration_bounds = array<i64: 1, 1, 2>, scalar_prefetch = 0 : i64, scratch_operands = 1 : i64, tpu.core_type = #tpu.core_type<tc>, window_params = [{transform_indices = @transform_0, window_bounds = array<i64: 16, 512>}, {transform_indices = @transform_1, window_bounds = array<i64: 512, 128>}, {transform_indices = @transform_2, window_bounds = array<i64: 1, 128>}, {transform_indices = @transform_3, window_bounds = array<i64: 16, 128>}, {transform_indices = @transform_4, window_bounds = array<i64: 1, 128>}, {transform_indices = @transform_5, window_bounds = array<i64: 1, 128>}]} {
    %c0_i32 = arith.constant 0 : i32
    %0 = arith.cmpi eq, %arg2, %c0_i32 : i32
    %1 = arith.extui %0 : i1 to i32
    %c0_i32_0 = arith.constant 0 : i32
    %2 = arith.cmpi ne, %1, %c0_i32_0 : i32
    scf.if %2 {
      %cst_9 = arith.constant 0.000000e+00 : f32
      %12 = vector.broadcast %cst_9 : f32 to vector<16x128xf32>
      %c0_10 = arith.constant 0 : index
      %c0_11 = arith.constant 0 : index
      %13 = vector.load %arg9[%c0_10, %c0_11] : memref<16x128xf32, #tpu.memory_space<vmem>>, vector<16x128xf32>
      tpu.vector_store %arg9[%c0_10, %c0_11], %12 {strides = array<i32>} : memref<16x128xf32, #tpu.memory_space<vmem>>, vector<16x128xf32>,
    } else {
    }
    %c0 = arith.constant 0 : index
    %c0_1 = arith.constant 0 : index
    %3 = vector.load %arg9[%c0, %c0_1] : memref<16x128xf32, #tpu.memory_space<vmem>>, vector<16x128xf32>
    %c0_2 = arith.constant 0 : index
    %c0_3 = arith.constant 0 : index
    %4 = vector.load %arg3[%c0_2, %c0_3] : memref<16x512xbf16, #tpu.memory_space<vmem>>, vector<16x512xbf16>
    %c0_4 = arith.constant 0 : index
    %c0_5 = arith.constant 0 : index
    %5 = vector.load %arg4[%c0_4, %c0_5] : memref<512x128xbf16, #tpu.memory_space<vmem>>, vector<512x128xbf16>
    %cst = arith.constant dense<0.000000e+00> : vector<16x128xf32>
    %6 = tpu.matmul %4, %5, %cst {dimension_numbers = #tpu.dot_dimension_numbers<[1], [0], [0], [1], [0, 0, 1, 1], [], []>} : vector<16x512xbf16>, vector<512x128xbf16>, vector<16x128xf32> -> vector<16x128xf32>
    %7 = arith.addf %3, %6 : vector<16x128xf32>
    %c0_6 = arith.constant 0 : index
    %c0_7 = arith.constant 0 : index
    %8 = vector.load %arg9[%c0_6, %c0_7] : memref<16x128xf32, #tpu.memory_space<vmem>>, vector<16x128xf32>
    tpu.vector_store %arg9[%c0_6, %c0_7], %7 {strides = array<i32>} : memref<16x128xf32, #tpu.memory_space<vmem>>, vector<16x128xf32>,
    %c1_i32 = arith.constant 1 : i32
    %9 = arith.cmpi eq, %arg2, %c1_i32 : i32
    %10 = arith.extui %9 : i1 to i32
    %c0_i32_8 = arith.constant 0 : i32
    %11 = arith.cmpi ne, %10, %c0_i32_8 : i32
    scf.if %11 {
      %c0_9 = arith.constant 0 : index
      %c0_10 = arith.constant 0 : index
      %12 = vector.load %arg9[%c0_9, %c0_10] : memref<16x128xf32, #tpu.memory_space<vmem>>, vector<16x128xf32>
      %cst_11 = arith.constant dense<0.000000e+00> : vector<128xf32>
      %13 = vector.multi_reduction <add>, %12, %cst_11 [0] : vector<16x128xf32> to vector<128xf32>
      %14 = vector.shape_cast %13 : vector<128xf32> to vector<1x128xf32>
      %15 = arith.mulf %12, %12 : vector<16x128xf32>
      %cst_12 = arith.constant dense<0.000000e+00> : vector<128xf32>
      %16 = vector.multi_reduction <add>, %15, %cst_12 [0] : vector<16x128xf32> to vector<128xf32>
      %17 = vector.shape_cast %16 : vector<128xf32> to vector<1x128xf32>
      %c0_i32_13 = arith.constant 0 : i32
      %18 = arith.cmpi eq, %arg0, %c0_i32_13 : i32
      %19 = arith.extui %18 : i1 to i32
      %c0_i32_14 = arith.constant 0 : i32
      %20 = arith.cmpi ne, %19, %c0_i32_14 : i32
      scf.if %20 {
        %c0_19 = arith.constant 0 : index
        %c0_20 = arith.constant 0 : index
        %25 = vector.load %arg7[%c0_19, %c0_20] : memref<1x128xf32, #tpu.memory_space<vmem>>, vector<1x128xf32>
        tpu.vector_store %arg7[%c0_19, %c0_20], %14 {strides = array<i32>} : memref<1x128xf32, #tpu.memory_space<vmem>>, vector<1x128xf32>,
        %c0_21 = arith.constant 0 : index
        %c0_22 = arith.constant 0 : index
        %26 = vector.load %arg8[%c0_21, %c0_22] : memref<1x128xf32, #tpu.memory_space<vmem>>, vector<1x128xf32>
        tpu.vector_store %arg8[%c0_21, %c0_22], %17 {strides = array<i32>} : memref<1x128xf32, #tpu.memory_space<vmem>>, vector<1x128xf32>,
      } else {
      }
      %c0_i32_15 = arith.constant 0 : i32
      %21 = arith.cmpi sgt, %arg0, %c0_i32_15 : i32
      %22 = arith.extui %21 : i1 to i32
      %c0_i32_16 = arith.constant 0 : i32
      %23 = arith.cmpi ne, %22, %c0_i32_16 : i32
      scf.if %23 {
        %c0_19 = arith.constant 0 : index
        %c0_20 = arith.constant 0 : index
        %25 = vector.load %arg7[%c0_19, %c0_20] : memref<1x128xf32, #tpu.memory_space<vmem>>, vector<1x128xf32>
        %26 = arith.addf %25, %14 : vector<1x128xf32>
        %c0_21 = arith.constant 0 : index
        %c0_22 = arith.constant 0 : index
        %27 = vector.load %arg7[%c0_21, %c0_22] : memref<1x128xf32, #tpu.memory_space<vmem>>, vector<1x128xf32>
        tpu.vector_store %arg7[%c0_21, %c0_22], %26 {strides = array<i32>} : memref<1x128xf32, #tpu.memory_space<vmem>>, vector<1x128xf32>,
        %c0_23 = arith.constant 0 : index
        %c0_24 = arith.constant 0 : index
        %28 = vector.load %arg8[%c0_23, %c0_24] : memref<1x128xf32, #tpu.memory_space<vmem>>, vector<1x128xf32>
        %29 = arith.addf %28, %17 : vector<1x128xf32>
        %c0_25 = arith.constant 0 : index
        %c0_26 = arith.constant 0 : index
        %30 = vector.load %arg8[%c0_25, %c0_26] : memref<1x128xf32, #tpu.memory_space<vmem>>, vector<1x128xf32>
        tpu.vector_store %arg8[%c0_25, %c0_26], %29 {strides = array<i32>} : memref<1x128xf32, #tpu.memory_space<vmem>>, vector<1x128xf32>,
      } else {
      }
      %c0_17 = arith.constant 0 : index
      %c0_18 = arith.constant 0 : index
      %24 = vector.load %arg6[%c0_17, %c0_18] : memref<16x128xf32, #tpu.memory_space<vmem>>, vector<16x128xf32>
      tpu.vector_store %arg6[%c0_17, %c0_18], %12 {strides = array<i32>} : memref<16x128xf32, #tpu.memory_space<vmem>>, vector<16x128xf32>,
    } else {
    }
    return
  }
  func.func @transform_0(%arg0: i32, %arg1: i32, %arg2: i32) -> (i32, i32) {
    %c0_i32 = arith.constant 0 : i32
    return %arg0, %arg2 : i32, i32
  }
  func.func @transform_1(%arg0: i32, %arg1: i32, %arg2: i32) -> (i32, i32) {
    %c0_i32 = arith.constant 0 : i32
    return %arg2, %arg1 : i32, i32
  }
  func.func @transform_2(%arg0: i32, %arg1: i32, %arg2: i32) -> (i32, i32) {
    %c0_i32 = arith.constant 0 : i32
    %c0_i32_0 = arith.constant 0 : i32
    return %c0_i32, %arg1 : i32, i32
  }
  func.func @transform_3(%arg0: i32, %arg1: i32, %arg2: i32) -> (i32, i32) {
    %c0_i32 = arith.constant 0 : i32
    return %arg0, %arg1 : i32, i32
  }
  func.func @transform_4(%arg0: i32, %arg1: i32, %arg2: i32) -> (i32, i32) {
    %c0_i32 = arith.constant 0 : i32
    %c0_i32_0 = arith.constant 0 : i32
    return %c0_i32, %arg1 : i32, i32
  }
  func.func @transform_5(%arg0: i32, %arg1: i32, %arg2: i32) -> (i32, i32) {
    %c0_i32 = arith.constant 0 : i32
    %c0_i32_0 = arith.constant 0 : i32
    return %c0_i32, %arg1 : i32, i32
  }
}

module attributes {stable_mosaic.version = 11 : i64} {
  func.func @_gemm_kernel(%arg0: i32, %arg1: i32, %arg2: i32, %arg3: memref<152x256xbf16, #tpu.memory_space<vmem>>, %arg4: memref<256x128xbf16, #tpu.memory_space<vmem>>, %arg5: memref<1x128xf32, #tpu.memory_space<vmem>>, %arg6: memref<152x128xbf16, #tpu.memory_space<vmem>>, %arg7: memref<152x128xf32, #tpu.memory_space<vmem>>) attributes {dimension_semantics = [#tpu.dimension_semantics<parallel>, #tpu.dimension_semantics<parallel>, #tpu.dimension_semantics<arbitrary>], iteration_bounds = array<i64: 1, 1, 1>, scalar_prefetch = 0 : i64, scratch_operands = 1 : i64, tpu.core_type = #tpu.core_type<tc>, window_params = [{transform_indices = @transform_0, window_bounds = array<i64: 152, 256>}, {transform_indices = @transform_1, window_bounds = array<i64: 256, 128>}, {transform_indices = @transform_2, window_bounds = array<i64: 1, 128>}, {transform_indices = @transform_3, window_bounds = array<i64: 152, 128>}]} {
    %c0_i32 = arith.constant 0 : i32
    %0 = arith.cmpi eq, %arg2, %c0_i32 : i32
    %1 = arith.extui %0 : i1 to i32
    %c0_i32_0 = arith.constant 0 : i32
    %2 = arith.cmpi ne, %1, %c0_i32_0 : i32
    scf.if %2 {
      %cst_10 = arith.constant 0.000000e+00 : f32
      %12 = vector.broadcast %cst_10 : f32 to vector<152x128xf32>
      %c0_11 = arith.constant 0 : index
      %c0_12 = arith.constant 0 : index
      %13 = vector.load %arg7[%c0_11, %c0_12] : memref<152x128xf32, #tpu.memory_space<vmem>>, vector<152x128xf32>
      tpu.vector_store %arg7[%c0_11, %c0_12], %12 {strides = array<i32>} : memref<152x128xf32, #tpu.memory_space<vmem>>, vector<152x128xf32>,
    } else {
    }
    %c0 = arith.constant 0 : index
    %c0_1 = arith.constant 0 : index
    %3 = vector.load %arg7[%c0, %c0_1] : memref<152x128xf32, #tpu.memory_space<vmem>>, vector<152x128xf32>
    %c0_2 = arith.constant 0 : index
    %c0_3 = arith.constant 0 : index
    %4 = vector.load %arg3[%c0_2, %c0_3] : memref<152x256xbf16, #tpu.memory_space<vmem>>, vector<152x256xbf16>
    %c0_4 = arith.constant 0 : index
    %c0_5 = arith.constant 0 : index
    %5 = vector.load %arg4[%c0_4, %c0_5] : memref<256x128xbf16, #tpu.memory_space<vmem>>, vector<256x128xbf16>
    %cst = arith.constant dense<0.000000e+00> : vector<152x128xf32>
    %6 = tpu.matmul %4, %5, %cst {dimension_numbers = #tpu.dot_dimension_numbers<[1], [0], [0], [1], [0, 0, 1, 1], [], []>} : vector<152x256xbf16>, vector<256x128xbf16>, vector<152x128xf32> -> vector<152x128xf32>
    %7 = arith.addf %3, %6 : vector<152x128xf32>
    %c0_6 = arith.constant 0 : index
    %c0_7 = arith.constant 0 : index
    %8 = vector.load %arg7[%c0_6, %c0_7] : memref<152x128xf32, #tpu.memory_space<vmem>>, vector<152x128xf32>
    tpu.vector_store %arg7[%c0_6, %c0_7], %7 {strides = array<i32>} : memref<152x128xf32, #tpu.memory_space<vmem>>, vector<152x128xf32>,
    %c0_i32_8 = arith.constant 0 : i32
    %9 = arith.cmpi eq, %arg2, %c0_i32_8 : i32
    %10 = arith.extui %9 : i1 to i32
    %c0_i32_9 = arith.constant 0 : i32
    %11 = arith.cmpi ne, %10, %c0_i32_9 : i32
    scf.if %11 {
      %c0_10 = arith.constant 0 : index
      %c0_11 = arith.constant 0 : index
      %12 = vector.load %arg7[%c0_10, %c0_11] : memref<152x128xf32, #tpu.memory_space<vmem>>, vector<152x128xf32>
      %c0_12 = arith.constant 0 : index
      %c0_13 = arith.constant 0 : index
      %13 = vector.load %arg5[%c0_12, %c0_13] : memref<1x128xf32, #tpu.memory_space<vmem>>, vector<1x128xf32>
      %14 = vector.broadcast %13 : vector<1x128xf32> to vector<152x128xf32>
      %15 = arith.addf %12, %14 : vector<152x128xf32>
      %cst_14 = arith.constant 0.000000e+00 : f32
      %16 = vector.broadcast %cst_14 : f32 to vector<152x128xf32>
      %17 = arith.cmpf oge, %15, %16 : vector<152x128xf32>
      %cst_15 = arith.constant 2.000000e-01 : f32
      %18 = vector.broadcast %cst_15 : f32 to vector<152x128xf32>
      %19 = arith.mulf %18, %15 : vector<152x128xf32>
      %20 = arith.select %17, %15, %19 : vector<152x128xi1>, vector<152x128xf32>
      %21 = arith.truncf %20 : vector<152x128xf32> to vector<152x128xbf16>
      %c0_16 = arith.constant 0 : index
      %c0_17 = arith.constant 0 : index
      %22 = vector.load %arg6[%c0_16, %c0_17] : memref<152x128xbf16, #tpu.memory_space<vmem>>, vector<152x128xbf16>
      tpu.vector_store %arg6[%c0_16, %c0_17], %21 {strides = array<i32>} : memref<152x128xbf16, #tpu.memory_space<vmem>>, vector<152x128xbf16>,
    } else {
    }
    return
  }
  func.func @transform_0(%arg0: i32, %arg1: i32, %arg2: i32) -> (i32, i32) {
    %c0_i32 = arith.constant 0 : i32
    return %arg0, %arg2 : i32, i32
  }
  func.func @transform_1(%arg0: i32, %arg1: i32, %arg2: i32) -> (i32, i32) {
    %c0_i32 = arith.constant 0 : i32
    return %arg2, %arg1 : i32, i32
  }
  func.func @transform_2(%arg0: i32, %arg1: i32, %arg2: i32) -> (i32, i32) {
    %c0_i32 = arith.constant 0 : i32
    %c0_i32_0 = arith.constant 0 : i32
    return %c0_i32, %arg1 : i32, i32
  }
  func.func @transform_3(%arg0: i32, %arg1: i32, %arg2: i32) -> (i32, i32) {
    %c0_i32 = arith.constant 0 : i32
    return %arg0, %arg1 : i32, i32
  }
}

module attributes {stable_mosaic.version = 11 : i64} {
  func.func @_gemm_kernel(%arg0: i32, %arg1: i32, %arg2: i32, %arg3: memref<40x512xbf16, #tpu.memory_space<vmem>>, %arg4: memref<512x128xbf16, #tpu.memory_space<vmem>>, %arg5: memref<1x128xf32, #tpu.memory_space<vmem>>, %arg6: memref<40x128xf32, #tpu.memory_space<vmem>>, %arg7: memref<1x128xf32, #tpu.memory_space<vmem>>, %arg8: memref<1x128xf32, #tpu.memory_space<vmem>>, %arg9: memref<40x128xf32, #tpu.memory_space<vmem>>) attributes {dimension_semantics = [#tpu.dimension_semantics<arbitrary>, #tpu.dimension_semantics<parallel>, #tpu.dimension_semantics<arbitrary>], iteration_bounds = array<i64: 1, 1, 1>, scalar_prefetch = 0 : i64, scratch_operands = 1 : i64, tpu.core_type = #tpu.core_type<tc>, window_params = [{transform_indices = @transform_0, window_bounds = array<i64: 40, 512>}, {transform_indices = @transform_1, window_bounds = array<i64: 512, 128>}, {transform_indices = @transform_2, window_bounds = array<i64: 1, 128>}, {transform_indices = @transform_3, window_bounds = array<i64: 40, 128>}, {transform_indices = @transform_4, window_bounds = array<i64: 1, 128>}, {transform_indices = @transform_5, window_bounds = array<i64: 1, 128>}]} {
    %c0_i32 = arith.constant 0 : i32
    %0 = arith.cmpi eq, %arg2, %c0_i32 : i32
    %1 = arith.extui %0 : i1 to i32
    %c0_i32_0 = arith.constant 0 : i32
    %2 = arith.cmpi ne, %1, %c0_i32_0 : i32
    scf.if %2 {
      %cst_10 = arith.constant 0.000000e+00 : f32
      %12 = vector.broadcast %cst_10 : f32 to vector<40x128xf32>
      %c0_11 = arith.constant 0 : index
      %c0_12 = arith.constant 0 : index
      %13 = vector.load %arg9[%c0_11, %c0_12] : memref<40x128xf32, #tpu.memory_space<vmem>>, vector<40x128xf32>
      tpu.vector_store %arg9[%c0_11, %c0_12], %12 {strides = array<i32>} : memref<40x128xf32, #tpu.memory_space<vmem>>, vector<40x128xf32>,
    } else {
    }
    %c0 = arith.constant 0 : index
    %c0_1 = arith.constant 0 : index
    %3 = vector.load %arg9[%c0, %c0_1] : memref<40x128xf32, #tpu.memory_space<vmem>>, vector<40x128xf32>
    %c0_2 = arith.constant 0 : index
    %c0_3 = arith.constant 0 : index
    %4 = vector.load %arg3[%c0_2, %c0_3] : memref<40x512xbf16, #tpu.memory_space<vmem>>, vector<40x512xbf16>
    %c0_4 = arith.constant 0 : index
    %c0_5 = arith.constant 0 : index
    %5 = vector.load %arg4[%c0_4, %c0_5] : memref<512x128xbf16, #tpu.memory_space<vmem>>, vector<512x128xbf16>
    %cst = arith.constant dense<0.000000e+00> : vector<40x128xf32>
    %6 = tpu.matmul %4, %5, %cst {dimension_numbers = #tpu.dot_dimension_numbers<[1], [0], [0], [1], [0, 0, 1, 1], [], []>} : vector<40x512xbf16>, vector<512x128xbf16>, vector<40x128xf32> -> vector<40x128xf32>
    %7 = arith.addf %3, %6 : vector<40x128xf32>
    %c0_6 = arith.constant 0 : index
    %c0_7 = arith.constant 0 : index
    %8 = vector.load %arg9[%c0_6, %c0_7] : memref<40x128xf32, #tpu.memory_space<vmem>>, vector<40x128xf32>
    tpu.vector_store %arg9[%c0_6, %c0_7], %7 {strides = array<i32>} : memref<40x128xf32, #tpu.memory_space<vmem>>, vector<40x128xf32>,
    %c0_i32_8 = arith.constant 0 : i32
    %9 = arith.cmpi eq, %arg2, %c0_i32_8 : i32
    %10 = arith.extui %9 : i1 to i32
    %c0_i32_9 = arith.constant 0 : i32
    %11 = arith.cmpi ne, %10, %c0_i32_9 : i32
    scf.if %11 {
      %c0_10 = arith.constant 0 : index
      %c0_11 = arith.constant 0 : index
      %12 = vector.load %arg9[%c0_10, %c0_11] : memref<40x128xf32, #tpu.memory_space<vmem>>, vector<40x128xf32>
      %cst_12 = arith.constant dense<0.000000e+00> : vector<128xf32>
      %13 = vector.multi_reduction <add>, %12, %cst_12 [0] : vector<40x128xf32> to vector<128xf32>
      %14 = vector.shape_cast %13 : vector<128xf32> to vector<1x128xf32>
      %15 = arith.mulf %12, %12 : vector<40x128xf32>
      %cst_13 = arith.constant dense<0.000000e+00> : vector<128xf32>
      %16 = vector.multi_reduction <add>, %15, %cst_13 [0] : vector<40x128xf32> to vector<128xf32>
      %17 = vector.shape_cast %16 : vector<128xf32> to vector<1x128xf32>
      %c0_i32_14 = arith.constant 0 : i32
      %18 = arith.cmpi eq, %arg0, %c0_i32_14 : i32
      %19 = arith.extui %18 : i1 to i32
      %c0_i32_15 = arith.constant 0 : i32
      %20 = arith.cmpi ne, %19, %c0_i32_15 : i32
      scf.if %20 {
        %c0_20 = arith.constant 0 : index
        %c0_21 = arith.constant 0 : index
        %25 = vector.load %arg7[%c0_20, %c0_21] : memref<1x128xf32, #tpu.memory_space<vmem>>, vector<1x128xf32>
        tpu.vector_store %arg7[%c0_20, %c0_21], %14 {strides = array<i32>} : memref<1x128xf32, #tpu.memory_space<vmem>>, vector<1x128xf32>,
        %c0_22 = arith.constant 0 : index
        %c0_23 = arith.constant 0 : index
        %26 = vector.load %arg8[%c0_22, %c0_23] : memref<1x128xf32, #tpu.memory_space<vmem>>, vector<1x128xf32>
        tpu.vector_store %arg8[%c0_22, %c0_23], %17 {strides = array<i32>} : memref<1x128xf32, #tpu.memory_space<vmem>>, vector<1x128xf32>,
      } else {
      }
      %c0_i32_16 = arith.constant 0 : i32
      %21 = arith.cmpi sgt, %arg0, %c0_i32_16 : i32
      %22 = arith.extui %21 : i1 to i32
      %c0_i32_17 = arith.constant 0 : i32
      %23 = arith.cmpi ne, %22, %c0_i32_17 : i32
      scf.if %23 {
        %c0_20 = arith.constant 0 : index
        %c0_21 = arith.constant 0 : index
        %25 = vector.load %arg7[%c0_20, %c0_21] : memref<1x128xf32, #tpu.memory_space<vmem>>, vector<1x128xf32>
        %26 = arith.addf %25, %14 : vector<1x128xf32>
        %c0_22 = arith.constant 0 : index
        %c0_23 = arith.constant 0 : index
        %27 = vector.load %arg7[%c0_22, %c0_23] : memref<1x128xf32, #tpu.memory_space<vmem>>, vector<1x128xf32>
        tpu.vector_store %arg7[%c0_22, %c0_23], %26 {strides = array<i32>} : memref<1x128xf32, #tpu.memory_space<vmem>>, vector<1x128xf32>,
        %c0_24 = arith.constant 0 : index
        %c0_25 = arith.constant 0 : index
        %28 = vector.load %arg8[%c0_24, %c0_25] : memref<1x128xf32, #tpu.memory_space<vmem>>, vector<1x128xf32>
        %29 = arith.addf %28, %17 : vector<1x128xf32>
        %c0_26 = arith.constant 0 : index
        %c0_27 = arith.constant 0 : index
        %30 = vector.load %arg8[%c0_26, %c0_27] : memref<1x128xf32, #tpu.memory_space<vmem>>, vector<1x128xf32>
        tpu.vector_store %arg8[%c0_26, %c0_27], %29 {strides = array<i32>} : memref<1x128xf32, #tpu.memory_space<vmem>>, vector<1x128xf32>,
      } else {
      }
      %c0_18 = arith.constant 0 : index
      %c0_19 = arith.constant 0 : index
      %24 = vector.load %arg6[%c0_18, %c0_19] : memref<40x128xf32, #tpu.memory_space<vmem>>, vector<40x128xf32>
      tpu.vector_store %arg6[%c0_18, %c0_19], %12 {strides = array<i32>} : memref<40x128xf32, #tpu.memory_space<vmem>>, vector<40x128xf32>,
    } else {
    }
    return
  }
  func.func @transform_0(%arg0: i32, %arg1: i32, %arg2: i32) -> (i32, i32) {
    %c0_i32 = arith.constant 0 : i32
    return %arg0, %arg2 : i32, i32
  }
  func.func @transform_1(%arg0: i32, %arg1: i32, %arg2: i32) -> (i32, i32) {
    %c0_i32 = arith.constant 0 : i32
    return %arg2, %arg1 : i32, i32
  }
  func.func @transform_2(%arg0: i32, %arg1: i32, %arg2: i32) -> (i32, i32) {
    %c0_i32 = arith.constant 0 : i32
    %c0_i32_0 = arith.constant 0 : i32
    return %c0_i32, %arg1 : i32, i32
  }
  func.func @transform_3(%arg0: i32, %arg1: i32, %arg2: i32) -> (i32, i32) {
    %c0_i32 = arith.constant 0 : i32
    return %arg0, %arg1 : i32, i32
  }
  func.func @transform_4(%arg0: i32, %arg1: i32, %arg2: i32) -> (i32, i32) {
    %c0_i32 = arith.constant 0 : i32
    %c0_i32_0 = arith.constant 0 : i32
    return %c0_i32, %arg1 : i32, i32
  }
  func.func @transform_5(%arg0: i32, %arg1: i32, %arg2: i32) -> (i32, i32) {
    %c0_i32 = arith.constant 0 : i32
    %c0_i32_0 = arith.constant 0 : i32
    return %c0_i32, %arg1 : i32, i32
  }
}

module attributes {stable_mosaic.version = 11 : i64} {
  func.func @_gemm_kernel(%arg0: i32, %arg1: i32, %arg2: i32, %arg3: memref<56x512xbf16, #tpu.memory_space<vmem>>, %arg4: memref<512x128xbf16, #tpu.memory_space<vmem>>, %arg5: memref<1x128xf32, #tpu.memory_space<vmem>>, %arg6: memref<56x128xf32, #tpu.memory_space<vmem>>, %arg7: memref<1x128xf32, #tpu.memory_space<vmem>>, %arg8: memref<1x128xf32, #tpu.memory_space<vmem>>, %arg9: memref<56x128xf32, #tpu.memory_space<vmem>>) attributes {dimension_semantics = [#tpu.dimension_semantics<arbitrary>, #tpu.dimension_semantics<parallel>, #tpu.dimension_semantics<arbitrary>], iteration_bounds = array<i64: 1, 1, 4>, scalar_prefetch = 0 : i64, scratch_operands = 1 : i64, tpu.core_type = #tpu.core_type<tc>, window_params = [{transform_indices = @transform_0, window_bounds = array<i64: 56, 512>}, {transform_indices = @transform_1, window_bounds = array<i64: 512, 128>}, {transform_indices = @transform_2, window_bounds = array<i64: 1, 128>}, {transform_indices = @transform_3, window_bounds = array<i64: 56, 128>}, {transform_indices = @transform_4, window_bounds = array<i64: 1, 128>}, {transform_indices = @transform_5, window_bounds = array<i64: 1, 128>}]} {
    %c0_i32 = arith.constant 0 : i32
    %0 = arith.cmpi eq, %arg2, %c0_i32 : i32
    %1 = arith.extui %0 : i1 to i32
    %c0_i32_0 = arith.constant 0 : i32
    %2 = arith.cmpi ne, %1, %c0_i32_0 : i32
    scf.if %2 {
      %cst_9 = arith.constant 0.000000e+00 : f32
      %12 = vector.broadcast %cst_9 : f32 to vector<56x128xf32>
      %c0_10 = arith.constant 0 : index
      %c0_11 = arith.constant 0 : index
      %13 = vector.load %arg9[%c0_10, %c0_11] : memref<56x128xf32, #tpu.memory_space<vmem>>, vector<56x128xf32>
      tpu.vector_store %arg9[%c0_10, %c0_11], %12 {strides = array<i32>} : memref<56x128xf32, #tpu.memory_space<vmem>>, vector<56x128xf32>,
    } else {
    }
    %c0 = arith.constant 0 : index
    %c0_1 = arith.constant 0 : index
    %3 = vector.load %arg9[%c0, %c0_1] : memref<56x128xf32, #tpu.memory_space<vmem>>, vector<56x128xf32>
    %c0_2 = arith.constant 0 : index
    %c0_3 = arith.constant 0 : index
    %4 = vector.load %arg3[%c0_2, %c0_3] : memref<56x512xbf16, #tpu.memory_space<vmem>>, vector<56x512xbf16>
    %c0_4 = arith.constant 0 : index
    %c0_5 = arith.constant 0 : index
    %5 = vector.load %arg4[%c0_4, %c0_5] : memref<512x128xbf16, #tpu.memory_space<vmem>>, vector<512x128xbf16>
    %cst = arith.constant dense<0.000000e+00> : vector<56x128xf32>
    %6 = tpu.matmul %4, %5, %cst {dimension_numbers = #tpu.dot_dimension_numbers<[1], [0], [0], [1], [0, 0, 1, 1], [], []>} : vector<56x512xbf16>, vector<512x128xbf16>, vector<56x128xf32> -> vector<56x128xf32>
    %7 = arith.addf %3, %6 : vector<56x128xf32>
    %c0_6 = arith.constant 0 : index
    %c0_7 = arith.constant 0 : index
    %8 = vector.load %arg9[%c0_6, %c0_7] : memref<56x128xf32, #tpu.memory_space<vmem>>, vector<56x128xf32>
    tpu.vector_store %arg9[%c0_6, %c0_7], %7 {strides = array<i32>} : memref<56x128xf32, #tpu.memory_space<vmem>>, vector<56x128xf32>,
    %c3_i32 = arith.constant 3 : i32
    %9 = arith.cmpi eq, %arg2, %c3_i32 : i32
    %10 = arith.extui %9 : i1 to i32
    %c0_i32_8 = arith.constant 0 : i32
    %11 = arith.cmpi ne, %10, %c0_i32_8 : i32
    scf.if %11 {
      %c0_9 = arith.constant 0 : index
      %c0_10 = arith.constant 0 : index
      %12 = vector.load %arg9[%c0_9, %c0_10] : memref<56x128xf32, #tpu.memory_space<vmem>>, vector<56x128xf32>
      %cst_11 = arith.constant dense<0.000000e+00> : vector<128xf32>
      %13 = vector.multi_reduction <add>, %12, %cst_11 [0] : vector<56x128xf32> to vector<128xf32>
      %14 = vector.shape_cast %13 : vector<128xf32> to vector<1x128xf32>
      %15 = arith.mulf %12, %12 : vector<56x128xf32>
      %cst_12 = arith.constant dense<0.000000e+00> : vector<128xf32>
      %16 = vector.multi_reduction <add>, %15, %cst_12 [0] : vector<56x128xf32> to vector<128xf32>
      %17 = vector.shape_cast %16 : vector<128xf32> to vector<1x128xf32>
      %c0_i32_13 = arith.constant 0 : i32
      %18 = arith.cmpi eq, %arg0, %c0_i32_13 : i32
      %19 = arith.extui %18 : i1 to i32
      %c0_i32_14 = arith.constant 0 : i32
      %20 = arith.cmpi ne, %19, %c0_i32_14 : i32
      scf.if %20 {
        %c0_19 = arith.constant 0 : index
        %c0_20 = arith.constant 0 : index
        %25 = vector.load %arg7[%c0_19, %c0_20] : memref<1x128xf32, #tpu.memory_space<vmem>>, vector<1x128xf32>
        tpu.vector_store %arg7[%c0_19, %c0_20], %14 {strides = array<i32>} : memref<1x128xf32, #tpu.memory_space<vmem>>, vector<1x128xf32>,
        %c0_21 = arith.constant 0 : index
        %c0_22 = arith.constant 0 : index
        %26 = vector.load %arg8[%c0_21, %c0_22] : memref<1x128xf32, #tpu.memory_space<vmem>>, vector<1x128xf32>
        tpu.vector_store %arg8[%c0_21, %c0_22], %17 {strides = array<i32>} : memref<1x128xf32, #tpu.memory_space<vmem>>, vector<1x128xf32>,
      } else {
      }
      %c0_i32_15 = arith.constant 0 : i32
      %21 = arith.cmpi sgt, %arg0, %c0_i32_15 : i32
      %22 = arith.extui %21 : i1 to i32
      %c0_i32_16 = arith.constant 0 : i32
      %23 = arith.cmpi ne, %22, %c0_i32_16 : i32
      scf.if %23 {
        %c0_19 = arith.constant 0 : index
        %c0_20 = arith.constant 0 : index
        %25 = vector.load %arg7[%c0_19, %c0_20] : memref<1x128xf32, #tpu.memory_space<vmem>>, vector<1x128xf32>
        %26 = arith.addf %25, %14 : vector<1x128xf32>
        %c0_21 = arith.constant 0 : index
        %c0_22 = arith.constant 0 : index
        %27 = vector.load %arg7[%c0_21, %c0_22] : memref<1x128xf32, #tpu.memory_space<vmem>>, vector<1x128xf32>
        tpu.vector_store %arg7[%c0_21, %c0_22], %26 {strides = array<i32>} : memref<1x128xf32, #tpu.memory_space<vmem>>, vector<1x128xf32>,
        %c0_23 = arith.constant 0 : index
        %c0_24 = arith.constant 0 : index
        %28 = vector.load %arg8[%c0_23, %c0_24] : memref<1x128xf32, #tpu.memory_space<vmem>>, vector<1x128xf32>
        %29 = arith.addf %28, %17 : vector<1x128xf32>
        %c0_25 = arith.constant 0 : index
        %c0_26 = arith.constant 0 : index
        %30 = vector.load %arg8[%c0_25, %c0_26] : memref<1x128xf32, #tpu.memory_space<vmem>>, vector<1x128xf32>
        tpu.vector_store %arg8[%c0_25, %c0_26], %29 {strides = array<i32>} : memref<1x128xf32, #tpu.memory_space<vmem>>, vector<1x128xf32>,
      } else {
      }
      %c0_17 = arith.constant 0 : index
      %c0_18 = arith.constant 0 : index
      %24 = vector.load %arg6[%c0_17, %c0_18] : memref<56x128xf32, #tpu.memory_space<vmem>>, vector<56x128xf32>
      tpu.vector_store %arg6[%c0_17, %c0_18], %12 {strides = array<i32>} : memref<56x128xf32, #tpu.memory_space<vmem>>, vector<56x128xf32>,
    } else {
    }
    return
  }
  func.func @transform_0(%arg0: i32, %arg1: i32, %arg2: i32) -> (i32, i32) {
    %c0_i32 = arith.constant 0 : i32
    return %arg0, %arg2 : i32, i32
  }
  func.func @transform_1(%arg0: i32, %arg1: i32, %arg2: i32) -> (i32, i32) {
    %c0_i32 = arith.constant 0 : i32
    return %arg2, %arg1 : i32, i32
  }
  func.func @transform_2(%arg0: i32, %arg1: i32, %arg2: i32) -> (i32, i32) {
    %c0_i32 = arith.constant 0 : i32
    %c0_i32_0 = arith.constant 0 : i32
    return %c0_i32, %arg1 : i32, i32
  }
  func.func @transform_3(%arg0: i32, %arg1: i32, %arg2: i32) -> (i32, i32) {
    %c0_i32 = arith.constant 0 : i32
    return %arg0, %arg1 : i32, i32
  }
  func.func @transform_4(%arg0: i32, %arg1: i32, %arg2: i32) -> (i32, i32) {
    %c0_i32 = arith.constant 0 : i32
    %c0_i32_0 = arith.constant 0 : i32
    return %c0_i32, %arg1 : i32, i32
  }
  func.func @transform_5(%arg0: i32, %arg1: i32, %arg2: i32) -> (i32, i32) {
    %c0_i32 = arith.constant 0 : i32
    %c0_i32_0 = arith.constant 0 : i32
    return %c0_i32, %arg1 : i32, i32
  }
}

module attributes {stable_mosaic.version = 11 : i64} {
  func.func @_scale_shift_act_kernel(%arg0: i32, %arg1: memref<56x128xf32, #tpu.memory_space<vmem>>, %arg2: memref<1x128xf32, #tpu.memory_space<vmem>>, %arg3: memref<1x128xf32, #tpu.memory_space<vmem>>, %arg4: memref<56x128xbf16, #tpu.memory_space<vmem>>) attributes {dimension_semantics = [#tpu.dimension_semantics<parallel>], iteration_bounds = array<i64: 1>, scalar_prefetch = 0 : i64, scratch_operands = 0 : i64, tpu.core_type = #tpu.core_type<tc>, window_params = [{transform_indices = @transform_0, window_bounds = array<i64: 56, 128>}, {pipeline_mode = #tpu.pipeline_mode<synchronous>, transform_indices = @transform_1, window_bounds = array<i64: 1, 128>}, {pipeline_mode = #tpu.pipeline_mode<synchronous>, transform_indices = @transform_2, window_bounds = array<i64: 1, 128>}, {transform_indices = @transform_3, window_bounds = array<i64: 56, 128>}]} {
    %c0 = arith.constant 0 : index
    %c0_0 = arith.constant 0 : index
    %0 = vector.load %arg1[%c0, %c0_0] : memref<56x128xf32, #tpu.memory_space<vmem>>, vector<56x128xf32>
    %c0_1 = arith.constant 0 : index
    %c0_2 = arith.constant 0 : index
    %1 = vector.load %arg2[%c0_1, %c0_2] : memref<1x128xf32, #tpu.memory_space<vmem>>, vector<1x128xf32>
    %2 = vector.broadcast %1 : vector<1x128xf32> to vector<56x128xf32>
    %3 = arith.mulf %0, %2 : vector<56x128xf32>
    %c0_3 = arith.constant 0 : index
    %c0_4 = arith.constant 0 : index
    %4 = vector.load %arg3[%c0_3, %c0_4] : memref<1x128xf32, #tpu.memory_space<vmem>>, vector<1x128xf32>
    %5 = vector.broadcast %4 : vector<1x128xf32> to vector<56x128xf32>
    %6 = arith.addf %3, %5 : vector<56x128xf32>
    %cst = arith.constant 0.000000e+00 : f32
    %7 = vector.broadcast %cst : f32 to vector<56x128xf32>
    %8 = arith.cmpf oge, %6, %7 : vector<56x128xf32>
    %cst_5 = arith.constant 2.000000e-01 : f32
    %9 = vector.broadcast %cst_5 : f32 to vector<56x128xf32>
    %10 = arith.mulf %9, %6 : vector<56x128xf32>
    %11 = arith.select %8, %6, %10 : vector<56x128xi1>, vector<56x128xf32>
    %12 = arith.truncf %11 : vector<56x128xf32> to vector<56x128xbf16>
    %c0_6 = arith.constant 0 : index
    %c0_7 = arith.constant 0 : index
    %13 = vector.load %arg4[%c0_6, %c0_7] : memref<56x128xbf16, #tpu.memory_space<vmem>>, vector<56x128xbf16>
    tpu.vector_store %arg4[%c0_6, %c0_7], %12 {strides = array<i32>} : memref<56x128xbf16, #tpu.memory_space<vmem>>, vector<56x128xbf16>,
    return
  }
  func.func @transform_0(%arg0: i32) -> (i32, i32) {
    %c0_i32 = arith.constant 0 : i32
    %c0_i32_0 = arith.constant 0 : i32
    return %arg0, %c0_i32 : i32, i32
  }
  func.func @transform_1(%arg0: i32) -> (i32, i32) {
    %c0_i32 = arith.constant 0 : i32
    %c0_i32_0 = arith.constant 0 : i32
    %c0_i32_1 = arith.constant 0 : i32
    return %c0_i32, %c0_i32_0 : i32, i32
  }
  func.func @transform_2(%arg0: i32) -> (i32, i32) {
    %c0_i32 = arith.constant 0 : i32
    %c0_i32_0 = arith.constant 0 : i32
    %c0_i32_1 = arith.constant 0 : i32
    return %c0_i32, %c0_i32_0 : i32, i32
  }
  func.func @transform_3(%arg0: i32) -> (i32, i32) {
    %c0_i32 = arith.constant 0 : i32
    %c0_i32_0 = arith.constant 0 : i32
    return %arg0, %c0_i32 : i32, i32
  }
}

module attributes {stable_mosaic.version = 11 : i64} {
  func.func @_gemm_kernel(%arg0: i32, %arg1: i32, %arg2: i32, %arg3: memref<128x512xbf16, #tpu.memory_space<vmem>>, %arg4: memref<512x128xbf16, #tpu.memory_space<vmem>>, %arg5: memref<1x128xf32, #tpu.memory_space<vmem>>, %arg6: memref<128x128xf32, #tpu.memory_space<vmem>>, %arg7: memref<128x128xf32, #tpu.memory_space<vmem>>) attributes {dimension_semantics = [#tpu.dimension_semantics<parallel>, #tpu.dimension_semantics<parallel>, #tpu.dimension_semantics<arbitrary>], iteration_bounds = array<i64: 1, 1, 8>, scalar_prefetch = 0 : i64, scratch_operands = 1 : i64, tpu.core_type = #tpu.core_type<tc>, window_params = [{transform_indices = @transform_0, window_bounds = array<i64: 128, 512>}, {transform_indices = @transform_1, window_bounds = array<i64: 512, 128>}, {transform_indices = @transform_2, window_bounds = array<i64: 1, 128>}, {transform_indices = @transform_3, window_bounds = array<i64: 128, 128>}]} {
    %c0_i32 = arith.constant 0 : i32
    %0 = arith.cmpi eq, %arg2, %c0_i32 : i32
    %1 = arith.extui %0 : i1 to i32
    %c0_i32_0 = arith.constant 0 : i32
    %2 = arith.cmpi ne, %1, %c0_i32_0 : i32
    scf.if %2 {
      %cst_9 = arith.constant 0.000000e+00 : f32
      %12 = vector.broadcast %cst_9 : f32 to vector<128x128xf32>
      %c0_10 = arith.constant 0 : index
      %c0_11 = arith.constant 0 : index
      %13 = vector.load %arg7[%c0_10, %c0_11] : memref<128x128xf32, #tpu.memory_space<vmem>>, vector<128x128xf32>
      tpu.vector_store %arg7[%c0_10, %c0_11], %12 {strides = array<i32>} : memref<128x128xf32, #tpu.memory_space<vmem>>, vector<128x128xf32>,
    } else {
    }
    %c0 = arith.constant 0 : index
    %c0_1 = arith.constant 0 : index
    %3 = vector.load %arg7[%c0, %c0_1] : memref<128x128xf32, #tpu.memory_space<vmem>>, vector<128x128xf32>
    %c0_2 = arith.constant 0 : index
    %c0_3 = arith.constant 0 : index
    %4 = vector.load %arg3[%c0_2, %c0_3] : memref<128x512xbf16, #tpu.memory_space<vmem>>, vector<128x512xbf16>
    %c0_4 = arith.constant 0 : index
    %c0_5 = arith.constant 0 : index
    %5 = vector.load %arg4[%c0_4, %c0_5] : memref<512x128xbf16, #tpu.memory_space<vmem>>, vector<512x128xbf16>
    %cst = arith.constant dense<0.000000e+00> : vector<128x128xf32>
    %6 = tpu.matmul %4, %5, %cst {dimension_numbers = #tpu.dot_dimension_numbers<[1], [0], [0], [1], [0, 0, 1, 1], [], []>} : vector<128x512xbf16>, vector<512x128xbf16>, vector<128x128xf32> -> vector<128x128xf32>
    %7 = arith.addf %3, %6 : vector<128x128xf32>
    %c0_6 = arith.constant 0 : index
    %c0_7 = arith.constant 0 : index
    %8 = vector.load %arg7[%c0_6, %c0_7] : memref<128x128xf32, #tpu.memory_space<vmem>>, vector<128x128xf32>
    tpu.vector_store %arg7[%c0_6, %c0_7], %7 {strides = array<i32>} : memref<128x128xf32, #tpu.memory_space<vmem>>, vector<128x128xf32>,
    %c7_i32 = arith.constant 7 : i32
    %9 = arith.cmpi eq, %arg2, %c7_i32 : i32
    %10 = arith.extui %9 : i1 to i32
    %c0_i32_8 = arith.constant 0 : i32
    %11 = arith.cmpi ne, %10, %c0_i32_8 : i32
    scf.if %11 {
      %c0_9 = arith.constant 0 : index
      %c0_10 = arith.constant 0 : index
      %12 = vector.load %arg7[%c0_9, %c0_10] : memref<128x128xf32, #tpu.memory_space<vmem>>, vector<128x128xf32>
      %c0_11 = arith.constant 0 : index
      %c0_12 = arith.constant 0 : index
      %13 = vector.load %arg5[%c0_11, %c0_12] : memref<1x128xf32, #tpu.memory_space<vmem>>, vector<1x128xf32>
      %14 = vector.broadcast %13 : vector<1x128xf32> to vector<128x128xf32>
      %15 = arith.addf %12, %14 : vector<128x128xf32>
      %c0_13 = arith.constant 0 : index
      %c0_14 = arith.constant 0 : index
      %16 = vector.load %arg6[%c0_13, %c0_14] : memref<128x128xf32, #tpu.memory_space<vmem>>, vector<128x128xf32>
      tpu.vector_store %arg6[%c0_13, %c0_14], %15 {strides = array<i32>} : memref<128x128xf32, #tpu.memory_space<vmem>>, vector<128x128xf32>,
    } else {
    }
    return
  }
  func.func @transform_0(%arg0: i32, %arg1: i32, %arg2: i32) -> (i32, i32) {
    %c0_i32 = arith.constant 0 : i32
    return %arg0, %arg2 : i32, i32
  }
  func.func @transform_1(%arg0: i32, %arg1: i32, %arg2: i32) -> (i32, i32) {
    %c0_i32 = arith.constant 0 : i32
    return %arg2, %arg1 : i32, i32
  }
  func.func @transform_2(%arg0: i32, %arg1: i32, %arg2: i32) -> (i32, i32) {
    %c0_i32 = arith.constant 0 : i32
    %c0_i32_0 = arith.constant 0 : i32
    return %c0_i32, %arg1 : i32, i32
  }
  func.func @transform_3(%arg0: i32, %arg1: i32, %arg2: i32) -> (i32, i32) {
    %c0_i32 = arith.constant 0 : i32
    return %arg0, %arg1 : i32, i32
  }
}

</mosaic_0001>

<bundles_post_ra>
// kernel: multiscale_forward.24
= control target key start
LH: loop header
LB: loop body
LE: loop exit
PB: predicated region body
PF: predicated region fallthrough
CT: control target
= control target key end

     0   :  { %s1808_s12 = smov 0   ;;  %s1810_s13 = smov 0   ;;  %s1982_s0 = inlined_call_operand.vmem [shape: bf16[1024,256], index: 0, kind: input, shape index: {}]   ;;  %s1983_s1 = inlined_call_operand.vmem [shape: bf16[256,128], index: 1, kind: input, shape index: {}]   ;;  %s1984_s2 = inlined_call_operand.vmem [shape: f32[1,128], index: 2, kind: input, shape index: {}]   ;;  %s1985_s3 = inlined_call_operand.vmem [shape: bf16[1024,128], index: 3, kind: output, shape index: {}]  }
   0x1   :  { %s1812_s14 = smov 0  }
   0x2 LB: > { %s32_s15 = sadd.s32 1, %s1782_s13  ;;  %p1331_p0 = scmp.ge.s32.totalorder %s1786_s14, 1  ;;  %s1786_s14 = sphi %s1812_s14, %s13_s14   ;;  %s1782_s13 = sphi %s1810_s13, %s1987_s13   ;;  %s1778_s12 = sphi %s1808_s12, %s1986_s12  }
   0x3   : > { %p34_p1 = scmp.ge.s32.totalorder %s32_s15, 4  ;;  %p191_p2 = scmp.lt.s32.totalorder %s1786_s14, 5 }
   0x5   : > { %s1989_s15 = smov (%p34_p1, %s32_s15), 0  ;;  %p192_p3 = pnand %p1331_p0, %p191_p2 }
   0x6   : > { %v1700_v0 = vld [vmem:[%s1983_s1 + $0x40] sm:$0xff] (!%p192_p3)   ;;  %s1332_s18 = sshll.u32 (!%p192_p3), %s1778_s12, 5  ;;  %v1702_v2 = vld [vmem:[%s1983_s1 + $0x48] sm:$0xff] (!%p192_p3)   ;;  %v1704_v4 = vld [vmem:[%s1983_s1 + $0x50] sm:$0xff] (!%p192_p3)  }
   0x7   : > { %195 = sbr.rel (%p192_p3) target bundleno = 321 (0x141), region = 32  ;;  %v1701_v1 = vld [vmem:[%s1983_s1] sm:$0xff] (!%p192_p3)   ;;  %1548 = vmatprep.subr.bf16.mxu0 (!%p192_p3), %v1700_v0  ;;  %1660 = vmatprep.subr.bf16.mxu1 (!%p192_p3), %v1700_v0  ;;  %v1703_v3 = vld [vmem:[%s1983_s1 + $0x8] sm:$0xff] (!%p192_p3)   ;;  %p236_p4 = scmp.lt.s32.totalorder (!%p192_p3), %s1332_s18, 127  ;;  %v1705_v5 = vld [vmem:[%s1983_s1 + $0x10] sm:$0xff] (!%p192_p3)  }
   0x8   : > { %1549 = vmatpush3.bf16.msra.mxu0 (!%p192_p3), %v1701_v1  ;;  %1668 = vmatpush3.bf16.msra.mxu1 (!%p192_p3), %v1701_v1  ;;  %v1706_v6 = vld [vmem:[%s1983_s1 + $0x58] sm:$0xff] (!%p192_p3)   ;;  %v1708_v8 = vld [vmem:[%s1983_s1 + $0x60] sm:$0xff] (!%p192_p3)   ;;  %v1710_v10 = vld [vmem:[%s1983_s1 + $0x68] sm:$0xff] (!%p192_p3)  }
   0x9   : > { %1550 = vmatprep.subr.bf16.mxu0 (!%p192_p3), %v1702_v2  ;;  %1661 = vmatprep.subr.bf16.mxu1 (!%p192_p3), %v1702_v2  ;;  %v1707_v7 = vld [vmem:[%s1983_s1 + $0x18] sm:$0xff] (!%p192_p3)   ;;  %v1709_v9 = vld [vmem:[%s1983_s1 + $0x20] sm:$0xff] (!%p192_p3)   ;;  %v1711_v13 = vld [vmem:[%s1983_s1 + $0x28] sm:$0xff] (!%p192_p3)  }
   0xa   : > { %v1712_v14 = vld [vmem:[%s1983_s1 + $0x70] sm:$0xff] (!%p192_p3)   ;;  %v1714_v16 = vld [vmem:[%s1983_s1 + $0x78] sm:$0xff] (!%p192_p3)   ;;  %v1917_v51 = vld [vmem:[%s1984_s2] ss:$0 sm:$0xff] (!%p192_p3) }
   0xb   : > { %v1713_v15 = vld [vmem:[%s1983_s1 + $0x30] sm:$0xff] (!%p192_p3)   ;;  %v1715_v17 = vld [vmem:[%s1983_s1 + $0x38] sm:$0xff] (!%p192_p3)  }
   0xc   : > { %1551 = vmatpush3.bf16.msra.mxu0 (!%p192_p3), %v1703_v3  ;;  %1669 = vmatpush3.bf16.msra.mxu1 (!%p192_p3), %v1703_v3 }
   0xd   : > { %1552 = vmatprep.subr.bf16.mxu0 (!%p192_p3), %v1704_v4  ;;  %1662 = vmatprep.subr.bf16.mxu1 (!%p192_p3), %v1704_v4 }
   0xe   : > { %s1991_s18 = smov (!%p236_p4, %s1332_s18), 127 }
   0xf   : > { %s1420_s6 = sshll.u32 %s1991_s18, 3  ;;  %s1336_s5 = sshll.u32 %s1991_s18, 2 }
  0x10   : > { %1553 = vmatpush3.bf16.msra.mxu0 %v1705_v5  ;;  %1670 = vmatpush3.bf16.msra.mxu1 %v1705_v5  ;;  %s1859_s11 = scalar_lea.vmem %s1982_s0, %s1420_s6  ;;  %s1927_s8 = scalar_lea.vmem %s1985_s3, %s1336_s5 }
  0x11   : > { %1554 = vmatprep.subr.bf16.mxu0 %v1706_v6  ;;  %1663 = vmatprep.subr.bf16.mxu1 %v1706_v6  ;;  %v1718_v11 = vld [vmem:[%s1859_s11 + $0x4] ss:$8 sps:$4 sm:$0xff]   ;;  %v1716_v18 = vld [vmem:[%s1859_s11] ss:$8 sps:$4 sm:$0xff]   ;;  %v1722_v20 = vld [vmem:[%s1859_s11 + $0x14] ss:$8 sps:$4 sm:$0xff]  }
  0x12   : > { %v1721_v12 = vld [vmem:[%s1859_s11 + $0x84] ss:$8 sps:$4 sm:$0xff]   ;;  %688 = vmatprep.mubr.bf16.mxu0 %v1718_v11  ;;  %v1719_v19 = vld [vmem:[%s1859_s11 + $0x80] ss:$8 sps:$4 sm:$0xff]   ;;  %v1724_v21 = vld [vmem:[%s1859_s11 + $0x94] ss:$8 sps:$4 sm:$0xff]  }
  0x13   : > { %752 = vmatprep.mubr.bf16.mxu1 %v1721_v12  ;;  %v1726_v22 = vld [vmem:[%s1859_s11 + $0x10] ss:$8 sps:$4 sm:$0xff]   ;;  %v1728_v24 = vld [vmem:[%s1859_s11 + $0x24] ss:$8 sps:$4 sm:$0xff]   ;;  %v1732_v26 = vld [vmem:[%s1859_s11 + $0x20] ss:$8 sps:$4 sm:$0xff]  }
  0x14   : > { %1555 = vmatpush3.bf16.msra.mxu0 %v1707_v7  ;;  %1671 = vmatpush3.bf16.msra.mxu1 %v1707_v7  ;;  %v1727_v23 = vld [vmem:[%s1859_s11 + $0x90] ss:$8 sps:$4 sm:$0xff]   ;;  %v1730_v25 = vld [vmem:[%s1859_s11 + $0xa4] ss:$8 sps:$4 sm:$0xff]   ;;  %v1733_v27 = vld [vmem:[%s1859_s11 + $0xa0] ss:$8 sps:$4 sm:$0xff]  }
  0x15   : > { %1556 = vmatprep.subr.bf16.mxu0 %v1708_v8  ;;  %1664 = vmatprep.subr.bf16.mxu1 %v1708_v8  ;;  %v1734_v28 = vld [vmem:[%s1859_s11 + $0x34] ss:$8 sps:$4 sm:$0xff]   ;;  %v1738_v30 = vld [vmem:[%s1859_s11 + $0x30] ss:$8 sps:$4 sm:$0xff]   ;;  %v1740_v32 = vld [vmem:[%s1859_s11 + $0x44] ss:$8 sps:$4 sm:$0xff]  }
  0x16   : > { %v1736_v29 = vld [vmem:[%s1859_s11 + $0xb4] ss:$8 sps:$4 sm:$0xff]   ;;  %v1739_v31 = vld [vmem:[%s1859_s11 + $0xb0] ss:$8 sps:$4 sm:$0xff]   ;;  %v1742_v33 = vld [vmem:[%s1859_s11 + $0xc4] ss:$8 sps:$4 sm:$0xff]  }
  0x17   : > { %v1744_v34 = vld [vmem:[%s1859_s11 + $0x40] ss:$8 sps:$4 sm:$0xff]   ;;  %v1746_v36 = vld [vmem:[%s1859_s11 + $0x54] ss:$8 sps:$4 sm:$0xff]   ;;  %v1750_v38 = vld [vmem:[%s1859_s11 + $0x50] ss:$8 sps:$4 sm:$0xff]  }
  0x18   : > { %1557 = vmatpush3.bf16.msra.mxu0 %v1709_v9  ;;  %1672 = vmatpush3.bf16.msra.mxu1 %v1709_v9  ;;  %v1745_v35 = vld [vmem:[%s1859_s11 + $0xc0] ss:$8 sps:$4 sm:$0xff]   ;;  %v1748_v37 = vld [vmem:[%s1859_s11 + $0xd4] ss:$8 sps:$4 sm:$0xff]   ;;  %v1751_v39 = vld [vmem:[%s1859_s11 + $0xd0] ss:$8 sps:$4 sm:$0xff]  }
  0x19   : > { %1558 = vmatprep.subr.bf16.mxu0 %v1710_v10  ;;  %1665 = vmatprep.subr.bf16.mxu1 %v1710_v10  ;;  %v1752_v40 = vld [vmem:[%s1859_s11 + $0x64] ss:$8 sps:$4 sm:$0xff]   ;;  %v1756_v42 = vld [vmem:[%s1859_s11 + $0x60] ss:$8 sps:$4 sm:$0xff]   ;;  %v1758_v44 = vld [vmem:[%s1859_s11 + $0x74] ss:$8 sps:$4 sm:$0xff]  }
  0x1a   : > { %v1754_v41 = vld [vmem:[%s1859_s11 + $0xe4] ss:$8 sps:$4 sm:$0xff]   ;;  %v1757_v43 = vld [vmem:[%s1859_s11 + $0xe0] ss:$8 sps:$4 sm:$0xff]   ;;  %v1760_v45 = vld [vmem:[%s1859_s11 + $0xf4] ss:$8 sps:$4 sm:$0xff]  }
  0x1b   : > { %v1762_v46 = vld [vmem:[%s1859_s11 + $0x70] ss:$8 sps:$4 sm:$0xff]  }
  0x1c   : > { %1559 = vmatpush3.bf16.msra.mxu0 %v1711_v13  ;;  %1673 = vmatpush3.bf16.msra.mxu1 %v1711_v13  ;;  %v1763_v47 = vld [vmem:[%s1859_s11 + $0xf0] ss:$8 sps:$4 sm:$0xff]  }
  0x1d   : > { %1560 = vmatprep.subr.bf16.mxu0 %v1712_v14  ;;  %1666 = vmatprep.subr.bf16.mxu1 %v1712_v14 }
  0x20   : > { %1561 = vmatpush3.bf16.msra.mxu0 %v1713_v15  ;;  %1674 = vmatpush3.bf16.msra.mxu1 %v1713_v15 }
  0x21   : > { %1562 = vmatprep.subr.bf16.mxu0 %v1714_v16  ;;  %1667 = vmatprep.subr.bf16.mxu1 %v1714_v16 }
  0x24   : > { %1563 = vmatpush3.bf16.msra.mxu0 %v1715_v17  ;;  %1675 = vmatpush3.bf16.msra.mxu1 %v1715_v17 }
  0x27   : > { %689 = vmatmul.mubr.bf16.vlgmr.msra.gmra.mrb[0].mxu0 %v1716_v18  ;;  %753 = vmatmul.mubr.bf16.vlgmr.msra.gmra.mrb[0].mxu1 %v1719_v19 }
  0x28   : > { %696 = vmatprep.mubr.bf16.mxu0 %v1722_v20  ;;  %760 = vmatprep.mubr.bf16.mxu1 %v1724_v21 }
  0x2f   : > { %697 = vmatmul.mubr.bf16.gmra.mrb[4].mxu0 %v1726_v22  ;;  %761 = vmatmul.mubr.bf16.gmra.mrb[4].mxu1 %v1727_v23 }
  0x30   : > { %704 = vmatprep.mubr.bf16.mxu0 %v1728_v24  ;;  %768 = vmatprep.mubr.bf16.mxu1 %v1730_v25 }
  0x37   : > { %705 = vmatmul.mubr.bf16.gmra.mrb[8].mxu0 %v1732_v26  ;;  %769 = vmatmul.mubr.bf16.gmra.mrb[8].mxu1 %v1733_v27 }
  0x38   : > { %712 = vmatprep.mubr.bf16.mxu0 %v1734_v28  ;;  %776 = vmatprep.mubr.bf16.mxu1 %v1736_v29 }
  0x3f   : > { %713 = vmatmul.mubr.bf16.gmra.mrb[12].mxu0 %v1738_v30  ;;  %777 = vmatmul.mubr.bf16.gmra.mrb[12].mxu1 %v1739_v31 }
  0x40   : > { %720 = vmatprep.mubr.bf16.mxu0 %v1740_v32  ;;  %784 = vmatprep.mubr.bf16.mxu1 %v1742_v33 }
  0x47   : > { %721 = vmatmul.mubr.bf16.gmra.mrb[16].mxu0 %v1744_v34  ;;  %785 = vmatmul.mubr.bf16.gmra.mrb[16].mxu1 %v1745_v35 }
  0x48   : > { %728 = vmatprep.mubr.bf16.mxu0 %v1746_v36  ;;  %792 = vmatprep.mubr.bf16.mxu1 %v1748_v37 }
  0x4f   : > { %729 = vmatmul.mubr.bf16.gmra.mrb[20].mxu0 %v1750_v38  ;;  %793 = vmatmul.mubr.bf16.gmra.mrb[20].mxu1 %v1751_v39 }
  0x50   : > { %736 = vmatprep.mubr.bf16.mxu0 %v1752_v40  ;;  %800 = vmatprep.mubr.bf16.mxu1 %v1754_v41 }
  0x57   : > { %737 = vmatmul.mubr.bf16.gmra.mrb[24].mxu0 %v1756_v42  ;;  %801 = vmatmul.mubr.bf16.gmra.mrb[24].mxu1 %v1757_v43 }
  0x58   : > { %744 = vmatprep.mubr.bf16.mxu0 %v1758_v44  ;;  %808 = vmatprep.mubr.bf16.mxu1 %v1760_v45 }
  0x5f   : > { %745 = vmatmul.mubr.bf16.gmra.mrb[28].mxu0 %v1762_v46  ;;  %809 = vmatmul.mubr.bf16.gmra.mrb[28].mxu1 %v1763_v47 }
  0xfa   : > { %v1564_v48 = vpop.f32.mrb[0].mxu0  ;;  %v1612_v49 = vpop.f32.mrb[0].mxu1 }
  0xfb   : > { %v1565_v50 = vpop.f32.mrb[1].mxu0  ;;  %v1613_v52 = vpop.f32.mrb[1].mxu1 }
  0xfc   : > { %v1566_v53 = vadd.f32 %v1565_v50, %v1564_v48  ;;  %v1614_v54 = vadd.f32 %v1613_v52, %v1612_v49  ;;  %v1567_v55 = vpop.f32.mrb[2].mxu0  ;;  %v1615_v56 = vpop.f32.mrb[2].mxu1 }
  0xfd   : > { %v1568_v57 = vpop.f32.mrb[3].mxu0  ;;  %v1616_v58 = vpop.f32.mrb[3].mxu1 }
  0xfe   : > { %v923_v59 = vadd.f32 %v1566_v53, %v1917_v51  ;;  %v939_v60 = vadd.f32 %v1614_v54, %v1917_v51  ;;  %v1569_v61 = vadd.f32 %v1568_v57, %v1567_v55  ;;  %v1617_v62 = vadd.f32 %v1616_v58, %v1615_v56 }
 0x100   : > { %v987_v63 = vmul.f32 0.2, %v923_v59  ;;  %v1003_v0 = vmul.f32 0.2, %v939_v60  ;;  %vm955_vm0 = vcmp.ge.f32.partialorder %v923_v59, 0.0  ;;  %vm971_vm1 = vcmp.ge.f32.partialorder %v939_v60, 0.0 }
 0x101   : > { %v924_v1 = vadd.f32 %v1569_v61, %v1917_v51  ;;  %v940_v2 = vadd.f32 %v1617_v62, %v1917_v51 }
 0x102   : > { %v1570_v3 = vpop.f32.mrb[4].mxu0  ;;  %v1618_v4 = vpop.f32.mrb[4].mxu1  ;;  %v1019_v7 = vsel %vm955_vm0, %v923_v59, %v987_v63  ;;  %v1035_v8 = vsel %vm971_vm1, %v939_v60, %v1003_v0 }
 0x103   : > { %vm956_vm2 = vcmp.ge.f32.partialorder %v924_v1, 0.0  ;;  %v988_v5 = vmul.f32 0.2, %v924_v1  ;;  %vm972_vm3 = vcmp.ge.f32.partialorder %v940_v2, 0.0  ;;  %v1004_v6 = vmul.f32 0.2, %v940_v2 }
 0x104   : > { %v1571_v9 = vpop.f32.mrb[5].mxu0  ;;  %v1619_v10 = vpop.f32.mrb[5].mxu1 }
 0x105   : > { %v1020_v11 = vsel %vm956_vm2, %v924_v1, %v988_v5  ;;  %v1036_v12 = vsel %vm972_vm3, %v940_v2, %v1004_v6  ;;  %v1572_v13 = vadd.f32 %v1571_v9, %v1570_v3  ;;  %v1620_v14 = vadd.f32 %v1619_v10, %v1618_v4  ;;  %v1573_v15 = vpop.f32.mrb[6].mxu0  ;;  %v1621_v16 = vpop.f32.mrb[6].mxu1 }
 0x106   : > { %v1456_v17 = vpack.c.bf16 %v1020_v11, %v1019_v7  ;;  %v1496_v18 = vpack.c.bf16 %v1036_v12, %v1035_v8  ;;  %v1574_v19 = vpop.f32.mrb[7].mxu0  ;;  %v1622_v20 = vpop.f32.mrb[7].mxu1 }
 0x107   : > { %v925_v21 = vadd.f32 %v1572_v13, %v1917_v51  ;;  %v941_v22 = vadd.f32 %v1620_v14, %v1917_v51  ;;  %v1575_v23 = vadd.f32 %v1574_v19, %v1573_v15  ;;  %v1623_v24 = vadd.f32 %v1622_v20, %v1621_v16 }
 0x108   : > { %1457 = vst [vmem:[%s1927_s8] sm:$0xff] %v1456_v17   ;;  %1540 = vst [vmem:[%s1927_s8 + $0x40] sm:$0xff] %v1496_v18  }
 0x109   : > { %v989_v25 = vmul.f32 0.2, %v925_v21  ;;  %v1005_v26 = vmul.f32 0.2, %v941_v22  ;;  %v926_v27 = vadd.f32 %v1575_v23, %v1917_v51  ;;  %v942_v28 = vadd.f32 %v1623_v24, %v1917_v51 }
 0x10a   : > { %v1576_v29 = vpop.f32.mrb[8].mxu0  ;;  %v1624_v30 = vpop.f32.mrb[8].mxu1  ;;  %vm957_vm4 = vcmp.ge.f32.partialorder %v925_v21, 0.0  ;;  %vm973_vm5 = vcmp.ge.f32.partialorder %v941_v22, 0.0 }
 0x10b   : > { %v1577_v31 = vpop.f32.mrb[9].mxu0  ;;  %v1625_v32 = vpop.f32.mrb[9].mxu1  ;;  %vm958_vm6 = vcmp.ge.f32.partialorder %v926_v27, 0.0  ;;  %v990_v33 = vmul.f32 0.2, %v926_v27  ;;  %vm974_vm7 = vcmp.ge.f32.partialorder %v942_v28, 0.0  ;;  %v1021_v39 = vsel %vm957_vm4, %v925_v21, %v989_v25 }
 0x10c   : > { %v1006_v34 = vmul.f32 0.2, %v942_v28  ;;  %v1578_v35 = vadd.f32 %v1577_v31, %v1576_v29  ;;  %v1626_v36 = vadd.f32 %v1625_v32, %v1624_v30  ;;  %v1579_v37 = vpop.f32.mrb[10].mxu0  ;;  %v1627_v38 = vpop.f32.mrb[10].mxu1  ;;  %v1037_v40 = vsel %vm973_vm5, %v941_v22, %v1005_v26 }
 0x10d   : > { %v1022_v41 = vsel %vm958_vm6, %v926_v27, %v990_v33  ;;  %v1580_v43 = vpop.f32.mrb[11].mxu0  ;;  %v1628_v44 = vpop.f32.mrb[11].mxu1 }
 0x10e   : > { %v1038_v42 = vsel %vm974_vm7, %v942_v28, %v1006_v34  ;;  %v1461_v45 = vpack.c.bf16 %v1022_v41, %v1021_v39  ;;  %v927_v47 = vadd.f32 %v1578_v35, %v1917_v51  ;;  %v943_v48 = vadd.f32 %v1626_v36, %v1917_v51 }
 0x10f   : > { %v1501_v46 = vpack.c.bf16 %v1038_v42, %v1037_v40  ;;  %v1581_v49 = vadd.f32 %v1580_v43, %v1579_v37  ;;  %v1629_v50 = vadd.f32 %v1628_v44, %v1627_v38 }
 0x110   : > { %1533 = vst [vmem:[%s1927_s8 + $0x8] sm:$0xff] %v1461_v45   ;;  %v991_v52 = vmul.f32 0.2, %v927_v47  ;;  %v1007_v53 = vmul.f32 0.2, %v943_v48  ;;  %vm959_vm8 = vcmp.ge.f32.partialorder %v927_v47, 0.0 }
 0x111   : > { %1541 = vst [vmem:[%s1927_s8 + $0x48] sm:$0xff] %v1501_v46   ;;  %v928_v54 = vadd.f32 %v1581_v49, %v1917_v51  ;;  %v944_v55 = vadd.f32 %v1629_v50, %v1917_v51  ;;  %vm975_vm9 = vcmp.ge.f32.partialorder %v943_v48, 0.0 }
 0x112   : > { %v1582_v56 = vpop.f32.mrb[12].mxu0  ;;  %v1630_v57 = vpop.f32.mrb[12].mxu1  ;;  %v1023_v2 = vsel %vm959_vm8, %v927_v47, %v991_v52  ;;  %v1039_v3 = vsel %vm975_vm9, %v943_v48, %v1007_v53 }
 0x113   : > { %v1583_v58 = vpop.f32.mrb[13].mxu0  ;;  %v1631_v59 = vpop.f32.mrb[13].mxu1  ;;  %vm960_vm10 = vcmp.ge.f32.partialorder %v928_v54, 0.0  ;;  %v992_v60 = vmul.f32 0.2, %v928_v54  ;;  %vm976_vm11 = vcmp.ge.f32.partialorder %v944_v55, 0.0 }
 0x114   : > { %v1008_v61 = vmul.f32 0.2, %v944_v55  ;;  %v1584_v62 = vadd.f32 %v1583_v58, %v1582_v56  ;;  %v1632_v63 = vadd.f32 %v1631_v59, %v1630_v57  ;;  %v1585_v0 = vpop.f32.mrb[14].mxu0  ;;  %v1633_v1 = vpop.f32.mrb[14].mxu1 }
 0x115   : > { %v1024_v4 = vsel %vm960_vm10, %v928_v54, %v992_v60  ;;  %v1586_v6 = vpop.f32.mrb[15].mxu0  ;;  %v1634_v7 = vpop.f32.mrb[15].mxu1 }
 0x116   : > { %v1040_v5 = vsel %vm976_vm11, %v944_v55, %v1008_v61  ;;  %v1466_v8 = vpack.c.bf16 %v1024_v4, %v1023_v2  ;;  %v929_v10 = vadd.f32 %v1584_v62, %v1917_v51  ;;  %v945_v11 = vadd.f32 %v1632_v63, %v1917_v51 }
 0x117   : > { %v1506_v9 = vpack.c.bf16 %v1040_v5, %v1039_v3  ;;  %v1587_v12 = vadd.f32 %v1586_v6, %v1585_v0  ;;  %v1635_v13 = vadd.f32 %v1634_v7, %v1633_v1 }
 0x118   : > { %1534 = vst [vmem:[%s1927_s8 + $0x10] sm:$0xff] %v1466_v8   ;;  %v993_v14 = vmul.f32 0.2, %v929_v10  ;;  %v1009_v15 = vmul.f32 0.2, %v945_v11  ;;  %vm961_vm12 = vcmp.ge.f32.partialorder %v929_v10, 0.0 }
 0x119   : > { %1542 = vst [vmem:[%s1927_s8 + $0x50] sm:$0xff] %v1506_v9   ;;  %v930_v16 = vadd.f32 %v1587_v12, %v1917_v51  ;;  %v946_v17 = vadd.f32 %v1635_v13, %v1917_v51  ;;  %vm977_vm13 = vcmp.ge.f32.partialorder %v945_v11, 0.0 }
 0x11a   : > { %v1588_v18 = vpop.f32.mrb[16].mxu0  ;;  %v1636_v19 = vpop.f32.mrb[16].mxu1  ;;  %v1025_v28 = vsel %vm961_vm12, %v929_v10, %v993_v14  ;;  %v1041_v29 = vsel %vm977_vm13, %v945_v11, %v1009_v15 }
 0x11b   : > { %v1589_v20 = vpop.f32.mrb[17].mxu0  ;;  %v1637_v21 = vpop.f32.mrb[17].mxu1  ;;  %vm962_vm14 = vcmp.ge.f32.partialorder %v930_v16, 0.0  ;;  %v994_v22 = vmul.f32 0.2, %v930_v16  ;;  %vm978_vm15 = vcmp.ge.f32.partialorder %v946_v17, 0.0 }
 0x11c   : > { %v1010_v23 = vmul.f32 0.2, %v946_v17  ;;  %v1590_v24 = vadd.f32 %v1589_v20, %v1588_v18  ;;  %v1638_v25 = vadd.f32 %v1637_v21, %v1636_v19  ;;  %v1591_v26 = vpop.f32.mrb[18].mxu0  ;;  %v1639_v27 = vpop.f32.mrb[18].mxu1 }
 0x11d   : > { %v1026_v30 = vsel %vm962_vm14, %v930_v16, %v994_v22  ;;  %v1592_v32 = vpop.f32.mrb[19].mxu0  ;;  %v1640_v33 = vpop.f32.mrb[19].mxu1 }
 0x11e   : > { %v1042_v31 = vsel %vm978_vm15, %v946_v17, %v1010_v23  ;;  %v1471_v34 = vpack.c.bf16 %v1026_v30, %v1025_v28  ;;  %v931_v36 = vadd.f32 %v1590_v24, %v1917_v51  ;;  %v947_v37 = vadd.f32 %v1638_v25, %v1917_v51 }
 0x11f   : > { %v1511_v35 = vpack.c.bf16 %v1042_v31, %v1041_v29  ;;  %v1593_v38 = vadd.f32 %v1592_v32, %v1591_v26  ;;  %v1641_v39 = vadd.f32 %v1640_v33, %v1639_v27 }
 0x120   : > { %1535 = vst [vmem:[%s1927_s8 + $0x18] sm:$0xff] %v1471_v34   ;;  %v995_v40 = vmul.f32 0.2, %v931_v36  ;;  %v1011_v41 = vmul.f32 0.2, %v947_v37  ;;  %vm963_vm0 = vcmp.ge.f32.partialorder %v931_v36, 0.0 }
 0x121   : > { %1543 = vst [vmem:[%s1927_s8 + $0x58] sm:$0xff] %v1511_v35   ;;  %v932_v42 = vadd.f32 %v1593_v38, %v1917_v51  ;;  %v948_v43 = vadd.f32 %v1641_v39, %v1917_v51  ;;  %vm979_vm1 = vcmp.ge.f32.partialorder %v947_v37, 0.0 }
 0x122   : > { %v1594_v44 = vpop.f32.mrb[20].mxu0  ;;  %v1642_v45 = vpop.f32.mrb[20].mxu1  ;;  %v1027_v55 = vsel %vm963_vm0, %v931_v36, %v995_v40  ;;  %v1043_v56 = vsel %vm979_vm1, %v947_v37, %v1011_v41 }
 0x123   : > { %v1595_v46 = vpop.f32.mrb[21].mxu0  ;;  %v1643_v47 = vpop.f32.mrb[21].mxu1  ;;  %vm964_vm2 = vcmp.ge.f32.partialorder %v932_v42, 0.0  ;;  %v996_v48 = vmul.f32 0.2, %v932_v42  ;;  %vm980_vm3 = vcmp.ge.f32.partialorder %v948_v43, 0.0 }
 0x124   : > { %v1012_v49 = vmul.f32 0.2, %v948_v43  ;;  %v1596_v50 = vadd.f32 %v1595_v46, %v1594_v44  ;;  %v1644_v52 = vadd.f32 %v1643_v47, %v1642_v45  ;;  %v1597_v53 = vpop.f32.mrb[22].mxu0  ;;  %v1645_v54 = vpop.f32.mrb[22].mxu1 }
 0x125   : > { %v1028_v57 = vsel %vm964_vm2, %v932_v42, %v996_v48  ;;  %v1598_v59 = vpop.f32.mrb[23].mxu0  ;;  %v1646_v60 = vpop.f32.mrb[23].mxu1 }
 0x126   : > { %v1044_v58 = vsel %vm980_vm3, %v948_v43, %v1012_v49  ;;  %v1476_v61 = vpack.c.bf16 %v1028_v57, %v1027_v55  ;;  %v933_v63 = vadd.f32 %v1596_v50, %v1917_v51  ;;  %v949_v0 = vadd.f32 %v1644_v52, %v1917_v51 }
 0x127   : > { %v1516_v62 = vpack.c.bf16 %v1044_v58, %v1043_v56  ;;  %v1599_v1 = vadd.f32 %v1598_v59, %v1597_v53  ;;  %v1647_v2 = vadd.f32 %v1646_v60, %v1645_v54 }
 0x128   : > { %1536 = vst [vmem:[%s1927_s8 + $0x20] sm:$0xff] %v1476_v61   ;;  %v997_v3 = vmul.f32 0.2, %v933_v63  ;;  %v1013_v4 = vmul.f32 0.2, %v949_v0  ;;  %vm965_vm4 = vcmp.ge.f32.partialorder %v933_v63, 0.0 }
 0x129   : > { %1544 = vst [vmem:[%s1927_s8 + $0x60] sm:$0xff] %v1516_v62   ;;  %v934_v5 = vadd.f32 %v1599_v1, %v1917_v51  ;;  %v950_v6 = vadd.f32 %v1647_v2, %v1917_v51  ;;  %vm981_vm5 = vcmp.ge.f32.partialorder %v949_v0, 0.0 }
 0x12a   : > { %v1600_v7 = vpop.f32.mrb[24].mxu0  ;;  %v1648_v8 = vpop.f32.mrb[24].mxu1  ;;  %v1029_v17 = vsel %vm965_vm4, %v933_v63, %v997_v3  ;;  %v1045_v18 = vsel %vm981_vm5, %v949_v0, %v1013_v4 }
 0x12b   : > { %v1601_v9 = vpop.f32.mrb[25].mxu0  ;;  %v1649_v10 = vpop.f32.mrb[25].mxu1  ;;  %vm966_vm6 = vcmp.ge.f32.partialorder %v934_v5, 0.0  ;;  %v998_v11 = vmul.f32 0.2, %v934_v5  ;;  %vm982_vm7 = vcmp.ge.f32.partialorder %v950_v6, 0.0 }
 0x12c   : > { %v1014_v12 = vmul.f32 0.2, %v950_v6  ;;  %v1602_v13 = vadd.f32 %v1601_v9, %v1600_v7  ;;  %v1650_v14 = vadd.f32 %v1649_v10, %v1648_v8  ;;  %v1603_v15 = vpop.f32.mrb[26].mxu0  ;;  %v1651_v16 = vpop.f32.mrb[26].mxu1 }
 0x12d   : > { %v1030_v19 = vsel %vm966_vm6, %v934_v5, %v998_v11  ;;  %v1604_v21 = vpop.f32.mrb[27].mxu0  ;;  %v1652_v22 = vpop.f32.mrb[27].mxu1 }
 0x12e   : > { %v1046_v20 = vsel %vm982_vm7, %v950_v6, %v1014_v12  ;;  %v1481_v23 = vpack.c.bf16 %v1030_v19, %v1029_v17  ;;  %v935_v25 = vadd.f32 %v1602_v13, %v1917_v51  ;;  %v951_v26 = vadd.f32 %v1650_v14, %v1917_v51 }
 0x12f   : > { %v1521_v24 = vpack.c.bf16 %v1046_v20, %v1045_v18  ;;  %v1605_v27 = vadd.f32 %v1604_v21, %v1603_v15  ;;  %v1653_v28 = vadd.f32 %v1652_v22, %v1651_v16 }
 0x130   : > { %1537 = vst [vmem:[%s1927_s8 + $0x28] sm:$0xff] %v1481_v23   ;;  %v999_v29 = vmul.f32 0.2, %v935_v25  ;;  %v1015_v30 = vmul.f32 0.2, %v951_v26  ;;  %vm967_vm8 = vcmp.ge.f32.partialorder %v935_v25, 0.0 }
 0x131   : > { %1545 = vst [vmem:[%s1927_s8 + $0x68] sm:$0xff] %v1521_v24   ;;  %v936_v31 = vadd.f32 %v1605_v27, %v1917_v51  ;;  %v952_v32 = vadd.f32 %v1653_v28, %v1917_v51  ;;  %vm983_vm9 = vcmp.ge.f32.partialorder %v951_v26, 0.0 }
 0x132   : > { %v1606_v33 = vpop.f32.mrb[28].mxu0  ;;  %v1654_v34 = vpop.f32.mrb[28].mxu1  ;;  %v1031_v43 = vsel %vm967_vm8, %v935_v25, %v999_v29  ;;  %v1047_v44 = vsel %vm983_vm9, %v951_v26, %v1015_v30 }
 0x133   : > { %v1607_v35 = vpop.f32.mrb[29].mxu0  ;;  %v1655_v36 = vpop.f32.mrb[29].mxu1  ;;  %vm968_vm10 = vcmp.ge.f32.partialorder %v936_v31, 0.0  ;;  %v1000_v37 = vmul.f32 0.2, %v936_v31  ;;  %vm984_vm11 = vcmp.ge.f32.partialorder %v952_v32, 0.0 }
 0x134   : > { %v1016_v38 = vmul.f32 0.2, %v952_v32  ;;  %v1608_v39 = vadd.f32 %v1607_v35, %v1606_v33  ;;  %v1656_v40 = vadd.f32 %v1655_v36, %v1654_v34  ;;  %v1609_v41 = vpop.f32.mrb[30].mxu0  ;;  %v1657_v42 = vpop.f32.mrb[30].mxu1 }
 0x135   : > { %v1032_v45 = vsel %vm968_vm10, %v936_v31, %v1000_v37  ;;  %v1610_v47 = vpop.f32.mrb[31].mxu0  ;;  %v1658_v48 = vpop.f32.mrb[31].mxu1 }
 0x136   : > { %v1048_v46 = vsel %vm984_vm11, %v952_v32, %v1016_v38  ;;  %v1486_v49 = vpack.c.bf16 %v1032_v45, %v1031_v43  ;;  %v937_v52 = vadd.f32 %v1608_v39, %v1917_v51  ;;  %v953_v53 = vadd.f32 %v1656_v40, %v1917_v51 }
 0x137   : > { %v1526_v50 = vpack.c.bf16 %v1048_v46, %v1047_v44  ;;  %v1611_v54 = vadd.f32 %v1610_v47, %v1609_v41  ;;  %v1659_v55 = vadd.f32 %v1658_v48, %v1657_v42 }
 0x138   : > { %1538 = vst [vmem:[%s1927_s8 + $0x30] sm:$0xff] %v1486_v49   ;;  %v1001_v56 = vmul.f32 0.2, %v937_v52  ;;  %v1017_v57 = vmul.f32 0.2, %v953_v53  ;;  %vm969_vm12 = vcmp.ge.f32.partialorder %v937_v52, 0.0 }
 0x139   : > { %1546 = vst [vmem:[%s1927_s8 + $0x70] sm:$0xff] %v1526_v50   ;;  %v938_v58 = vadd.f32 %v1611_v54, %v1917_v51  ;;  %v954_v59 = vadd.f32 %v1659_v55, %v1917_v51  ;;  %vm985_vm13 = vcmp.ge.f32.partialorder %v953_v53, 0.0 }
 0x13a   : > { %v1033_v62 = vsel %vm969_vm12, %v937_v52, %v1001_v56  ;;  %v1049_v63 = vsel %vm985_vm13, %v953_v53, %v1017_v57 }
 0x13b   : > { %vm970_vm14 = vcmp.ge.f32.partialorder %v938_v58, 0.0  ;;  %v1002_v60 = vmul.f32 0.2, %v938_v58  ;;  %vm986_vm15 = vcmp.ge.f32.partialorder %v954_v59, 0.0  ;;  %v1018_v61 = vmul.f32 0.2, %v954_v59 }
 0x13d   : > { %v1034_v0 = vsel %vm970_vm14, %v938_v58, %v1002_v60  ;;  %v1050_v1 = vsel %vm986_vm15, %v954_v59, %v1018_v61 }
 0x13e   : > { %v1491_v2 = vpack.c.bf16 %v1034_v0, %v1033_v62  ;;  %v1531_v3 = vpack.c.bf16 %v1050_v1, %v1049_v63 }
 0x140   : > { %1539 = vst [vmem:[%s1927_s8 + $0x38] sm:$0xff] %v1491_v2   ;;  %1547 = vst [vmem:[%s1927_s8 + $0x78] sm:$0xff] %v1531_v3  }
 0x141 PF: > { %s13_s14 = sadd.s32 1, %s1786_s14   ;;  %s1986_s12 = smov %s1782_s13 }
 0x142   : > { %p10_p5 = scmp.ge.s32.totalorder %s13_s14, 6   ;;  %s1987_s13 = smov %s1989_s15 }
 0x144   :  { %12 = sbr.rel (!%p10_p5) target bundleno = 2 (0x2), region = 76 }

// kernel: multiscale_forward.25
= control target key start
LH: loop header
LB: loop body
LE: loop exit
PB: predicated region body
PF: predicated region fallthrough
CT: control target
= control target key end

     0   :  { %s1563_s1 = inlined_call_operand.vmem [shape: bf16[512,128], index: 1, kind: input, shape index: {}]   ;;  %s1564_s2 = inlined_call_operand.vmem [shape: f32[1,128], index: 2, kind: input, shape index: {}]   ;;  %s1565_s0 = inlined_call_operand.vmem [shape: bf16[152,512], index: 0, kind: input, shape index: {}]   ;;  %s1566_s3 = inlined_call_operand.vmem [shape: f32[152,128], index: 3, kind: output, shape index: {0}]   ;;  %s1567_s4 = inlined_call_operand.vmem [shape: f32[1,128], index: 4, kind: output, shape index: {1}]   ;;  %s1568_s5 = inlined_call_operand.vmem [shape: f32[1,128], index: 5, kind: output, shape index: {2}]  }
   0x1   :  { %v1170_v0 = vld [vmem:[%s1563_s1 + $0x40] sm:$0xff]   ;;  %v1174_v4 = vld [vmem:[%s1563_s1 + $0x48] sm:$0xff]   ;;  %v1178_v8 = vld [vmem:[%s1563_s1 + $0x50] sm:$0xff]  }
   0x2   :  { %v1171_v1 = vld [vmem:[%s1563_s1 + $0xc0] sm:$0xff]   ;;  %1018 = vmatprep.subr.bf16.mxu0 %v1170_v0  ;;  %v1175_v5 = vld [vmem:[%s1563_s1 + $0xc8] sm:$0xff]   ;;  %v1179_v9 = vld [vmem:[%s1563_s1 + $0xd0] sm:$0xff]  }
   0x3   :  { %v1172_v2 = vld [vmem:[%s1563_s1] sm:$0xff]   ;;  %1094 = vmatprep.subr.bf16.mxu1 %v1171_v1  ;;  %v1176_v6 = vld [vmem:[%s1563_s1 + $0x8] sm:$0xff]   ;;  %v1180_v10 = vld [vmem:[%s1563_s1 + $0x10] sm:$0xff]  }
   0x4   :  { %v1173_v3 = vld [vmem:[%s1563_s1 + $0x80] sm:$0xff]   ;;  %1019 = vmatpush3.bf16.msra.mxu0 %v1172_v2  ;;  %v1177_v7 = vld [vmem:[%s1563_s1 + $0x88] sm:$0xff]   ;;  %v1181_v11 = vld [vmem:[%s1563_s1 + $0x90] sm:$0xff]  }
   0x5   :  { %1095 = vmatpush3.bf16.msra.mxu1 %v1173_v3  ;;  %1020 = vmatprep.subr.bf16.mxu0 %v1174_v4  ;;  %v1182_v12 = vld [vmem:[%s1563_s1 + $0x58] sm:$0xff]   ;;  %v1186_v16 = vld [vmem:[%s1563_s1 + $0x60] sm:$0xff]   ;;  %v1190_v20 = vld [vmem:[%s1563_s1 + $0x68] sm:$0xff]  }
   0x6   :  { %1096 = vmatprep.subr.bf16.mxu1 %v1175_v5  ;;  %v1183_v13 = vld [vmem:[%s1563_s1 + $0xd8] sm:$0xff]   ;;  %v1187_v17 = vld [vmem:[%s1563_s1 + $0xe0] sm:$0xff]   ;;  %v1191_v21 = vld [vmem:[%s1563_s1 + $0xe8] sm:$0xff]  }
   0x7   :  { %v1184_v14 = vld [vmem:[%s1563_s1 + $0x18] sm:$0xff]   ;;  %v1188_v18 = vld [vmem:[%s1563_s1 + $0x20] sm:$0xff]   ;;  %v1192_v22 = vld [vmem:[%s1563_s1 + $0x28] sm:$0xff]  }
   0x8   :  { %1021 = vmatpush3.bf16.msra.mxu0 %v1176_v6  ;;  %v1185_v15 = vld [vmem:[%s1563_s1 + $0x98] sm:$0xff]   ;;  %v1189_v19 = vld [vmem:[%s1563_s1 + $0xa0] sm:$0xff]   ;;  %v1193_v23 = vld [vmem:[%s1563_s1 + $0xa8] sm:$0xff]  }
   0x9   :  { %1097 = vmatpush3.bf16.msra.mxu1 %v1177_v7  ;;  %1022 = vmatprep.subr.bf16.mxu0 %v1178_v8  ;;  %v1194_v24 = vld [vmem:[%s1563_s1 + $0x70] sm:$0xff]   ;;  %v1198_v28 = vld [vmem:[%s1563_s1 + $0x78] sm:$0xff]   ;;  %v96_v2 = vld [vmem:[%s1565_s0 + $0x120] sm:$0xff] }
   0xa   :  { %1098 = vmatprep.subr.bf16.mxu1 %v1179_v9  ;;  %v1195_v25 = vld [vmem:[%s1563_s1 + $0xf0] sm:$0xff]   ;;  %v1199_v29 = vld [vmem:[%s1563_s1 + $0xf8] sm:$0xff]   ;;  %v97_v3 = vld [vmem:[%s1565_s0 + $0x128] sm:$0xff]  ;;  %v983_v6 = vcombine.high %v96_v2, %v96_v2  ;;  %v982_v8 = vcombine.low %v96_v2, %v96_v2 }
   0xb   :  { %v1196_v26 = vld [vmem:[%s1563_s1 + $0x30] sm:$0xff]   ;;  %v1200_v30 = vld [vmem:[%s1563_s1 + $0x38] sm:$0xff]   ;;  %v985_v7 = vcombine.high %v97_v3, %v97_v3  ;;  %v984_v9 = vcombine.low %v97_v3, %v97_v3 }
   0xc   :  { %1023 = vmatpush3.bf16.msra.mxu0 %v1180_v10  ;;  %v1197_v27 = vld [vmem:[%s1563_s1 + $0xb0] sm:$0xff]   ;;  %v1201_v31 = vld [vmem:[%s1563_s1 + $0xb8] sm:$0xff]  }
   0xd   :  { %1099 = vmatpush3.bf16.msra.mxu1 %v1181_v11  ;;  %1024 = vmatprep.subr.bf16.mxu0 %v1182_v12  ;;  %v1202_v32 = vld [vmem:[%s1565_s0] ss:$16 sps:$4 sm:$0xff]   ;;  %v1204_v33 = vld [vmem:[%s1565_s0 + $0x4] ss:$16 sps:$4 sm:$0xff]   ;;  %v1205_v34 = vld [vmem:[%s1565_s0 + $0x8] ss:$16 sps:$4 sm:$0xff]  }
   0xe   :  { %1100 = vmatprep.subr.bf16.mxu1 %v1183_v13  ;;  %v1207_v35 = vld [vmem:[%s1565_s0 + $0xc] ss:$16 sps:$4 sm:$0xff]   ;;  %580 = vmatprep.mubr.bf16.mxu0 %v1204_v33  ;;  %v1208_v36 = vld [vmem:[%s1565_s0 + $0x24] ss:$16 sps:$4 sm:$0xff]   ;;  %v1212_v38 = vld [vmem:[%s1565_s0 + $0x20] ss:$16 sps:$4 sm:$0xff]  }
   0xf   :  { %692 = vmatprep.mubr.bf16.mxu1 %v1207_v35  ;;  %v1210_v37 = vld [vmem:[%s1565_s0 + $0x2c] ss:$16 sps:$4 sm:$0xff]   ;;  %v1213_v39 = vld [vmem:[%s1565_s0 + $0x28] ss:$16 sps:$4 sm:$0xff]   ;;  %v1214_v40 = vld [vmem:[%s1565_s0 + $0x44] ss:$16 sps:$4 sm:$0xff]  }
  0x10   :  { %1025 = vmatpush3.bf16.msra.mxu0 %v1184_v14  ;;  %v1216_v41 = vld [vmem:[%s1565_s0 + $0x4c] ss:$16 sps:$4 sm:$0xff]   ;;  %v1218_v42 = vld [vmem:[%s1565_s0 + $0x40] ss:$16 sps:$4 sm:$0xff]   ;;  %v1219_v43 = vld [vmem:[%s1565_s0 + $0x48] ss:$16 sps:$4 sm:$0xff]  }
  0x11   :  { %1101 = vmatpush3.bf16.msra.mxu1 %v1185_v15  ;;  %1026 = vmatprep.subr.bf16.mxu0 %v1186_v16  ;;  %v1220_v44 = vld [vmem:[%s1565_s0 + $0x64] ss:$16 sps:$4 sm:$0xff]   ;;  %v1222_v45 = vld [vmem:[%s1565_s0 + $0x6c] ss:$16 sps:$4 sm:$0xff]   ;;  %v1224_v46 = vld [vmem:[%s1565_s0 + $0x60] ss:$16 sps:$4 sm:$0xff]  }
  0x12   :  { %1102 = vmatprep.subr.bf16.mxu1 %v1187_v17  ;;  %v1225_v47 = vld [vmem:[%s1565_s0 + $0x68] ss:$16 sps:$4 sm:$0xff]   ;;  %v1226_v48 = vld [vmem:[%s1565_s0 + $0x84] ss:$16 sps:$4 sm:$0xff]   ;;  %v1228_v49 = vld [vmem:[%s1565_s0 + $0x8c] ss:$16 sps:$4 sm:$0xff]  }
  0x13   :  { %v1230_v50 = vld [vmem:[%s1565_s0 + $0x80] ss:$16 sps:$4 sm:$0xff]   ;;  %v1231_v51 = vld [vmem:[%s1565_s0 + $0x88] ss:$16 sps:$4 sm:$0xff]   ;;  %v1232_v52 = vld [vmem:[%s1565_s0 + $0xa4] ss:$16 sps:$4 sm:$0xff]  }
  0x14   :  { %1027 = vmatpush3.bf16.msra.mxu0 %v1188_v18  ;;  %v1234_v53 = vld [vmem:[%s1565_s0 + $0xac] ss:$16 sps:$4 sm:$0xff]   ;;  %v1236_v54 = vld [vmem:[%s1565_s0 + $0xa0] ss:$16 sps:$4 sm:$0xff]   ;;  %v1237_v55 = vld [vmem:[%s1565_s0 + $0xa8] ss:$16 sps:$4 sm:$0xff]  }
  0x15   :  { %1103 = vmatpush3.bf16.msra.mxu1 %v1189_v19  ;;  %1028 = vmatprep.subr.bf16.mxu0 %v1190_v20  ;;  %v1238_v56 = vld [vmem:[%s1565_s0 + $0xc4] ss:$16 sps:$4 sm:$0xff]   ;;  %v1240_v57 = vld [vmem:[%s1565_s0 + $0xcc] ss:$16 sps:$4 sm:$0xff]   ;;  %v1242_v58 = vld [vmem:[%s1565_s0 + $0xc0] ss:$16 sps:$4 sm:$0xff]  }
  0x16   :  { %1104 = vmatprep.subr.bf16.mxu1 %v1191_v21  ;;  %v1243_v59 = vld [vmem:[%s1565_s0 + $0xc8] ss:$16 sps:$4 sm:$0xff]   ;;  %v1244_v60 = vld [vmem:[%s1565_s0 + $0xe4] ss:$16 sps:$4 sm:$0xff]   ;;  %v1246_v61 = vld [vmem:[%s1565_s0 + $0xec] ss:$16 sps:$4 sm:$0xff]  }
  0x17   :  { %v1248_v62 = vld [vmem:[%s1565_s0 + $0xe0] ss:$16 sps:$4 sm:$0xff]   ;;  %v1249_v63 = vld [vmem:[%s1565_s0 + $0xe8] ss:$16 sps:$4 sm:$0xff]   ;;  %v1250_v0 = vld [vmem:[%s1565_s0 + $0x104] ss:$16 sps:$4 sm:$0xff]  }
  0x18   :  { %1029 = vmatpush3.bf16.msra.mxu0 %v1192_v22  ;;  %v1252_v1 = vld [vmem:[%s1565_s0 + $0x10c] ss:$16 sps:$4 sm:$0xff]   ;;  %v1254_v4 = vld [vmem:[%s1565_s0 + $0x100] ss:$16 sps:$4 sm:$0xff]   ;;  %v1255_v5 = vld [vmem:[%s1565_s0 + $0x108] ss:$16 sps:$4 sm:$0xff]  }
  0x19   :  { %1105 = vmatpush3.bf16.msra.mxu1 %v1193_v23  ;;  %1030 = vmatprep.subr.bf16.mxu0 %v1194_v24 }
  0x1a   :  { %1106 = vmatprep.subr.bf16.mxu1 %v1195_v25 }
  0x1c   :  { %1031 = vmatpush3.bf16.msra.mxu0 %v1196_v26 }
  0x1d   :  { %1107 = vmatpush3.bf16.msra.mxu1 %v1197_v27  ;;  %1032 = vmatprep.subr.bf16.mxu0 %v1198_v28 }
  0x1e   :  { %1108 = vmatprep.subr.bf16.mxu1 %v1199_v29 }
  0x20   :  { %1033 = vmatpush3.bf16.msra.mxu0 %v1200_v30 }
  0x21   :  { %1109 = vmatpush3.bf16.msra.mxu1 %v1201_v31 }
  0x23   :  { %581 = vmatmul.mubr.bf16.vlgmr.msra.gmra.mrb[0].mxu0 %v1202_v32 }
  0x24   :  { %693 = vmatmul.mubr.bf16.vlgmr.msra.gmra.mrb[0].mxu1 %v1205_v34  ;;  %588 = vmatprep.mubr.bf16.mxu0 %v1208_v36 }
  0x25   :  { %700 = vmatprep.mubr.bf16.mxu1 %v1210_v37 }
  0x2b   :  { %589 = vmatmul.mubr.bf16.gmra.mrb[4].mxu0 %v1212_v38 }
  0x2c   :  { %701 = vmatmul.mubr.bf16.gmra.mrb[4].mxu1 %v1213_v39  ;;  %596 = vmatprep.mubr.bf16.mxu0 %v1214_v40 }
  0x2d   :  { %708 = vmatprep.mubr.bf16.mxu1 %v1216_v41 }
  0x33   :  { %597 = vmatmul.mubr.bf16.gmra.mrb[8].mxu0 %v1218_v42 }
  0x34   :  { %709 = vmatmul.mubr.bf16.gmra.mrb[8].mxu1 %v1219_v43  ;;  %604 = vmatprep.mubr.bf16.mxu0 %v1220_v44 }
  0x35   :  { %716 = vmatprep.mubr.bf16.mxu1 %v1222_v45 }
  0x3b   :  { %605 = vmatmul.mubr.bf16.gmra.mrb[12].mxu0 %v1224_v46 }
  0x3c   :  { %717 = vmatmul.mubr.bf16.gmra.mrb[12].mxu1 %v1225_v47  ;;  %612 = vmatprep.mubr.bf16.mxu0 %v1226_v48 }
  0x3d   :  { %724 = vmatprep.mubr.bf16.mxu1 %v1228_v49 }
  0x43   :  { %613 = vmatmul.mubr.bf16.gmra.mrb[16].mxu0 %v1230_v50 }
  0x44   :  { %725 = vmatmul.mubr.bf16.gmra.mrb[16].mxu1 %v1231_v51  ;;  %620 = vmatprep.mubr.bf16.mxu0 %v1232_v52 }
  0x45   :  { %732 = vmatprep.mubr.bf16.mxu1 %v1234_v53 }
  0x4b   :  { %621 = vmatmul.mubr.bf16.gmra.mrb[20].mxu0 %v1236_v54 }
  0x4c   :  { %733 = vmatmul.mubr.bf16.gmra.mrb[20].mxu1 %v1237_v55  ;;  %628 = vmatprep.mubr.bf16.mxu0 %v1238_v56 }
  0x4d   :  { %740 = vmatprep.mubr.bf16.mxu1 %v1240_v57 }
  0x53   :  { %629 = vmatmul.mubr.bf16.gmra.mrb[24].mxu0 %v1242_v58 }
  0x54   :  { %741 = vmatmul.mubr.bf16.gmra.mrb[24].mxu1 %v1243_v59  ;;  %636 = vmatprep.mubr.bf16.mxu0 %v1244_v60 }
  0x55   :  { %748 = vmatprep.mubr.bf16.mxu1 %v1246_v61 }
  0x5b   :  { %637 = vmatmul.mubr.bf16.gmra.mrb[28].mxu0 %v1248_v62 }
  0x5c   :  { %749 = vmatmul.mubr.bf16.gmra.mrb[28].mxu1 %v1249_v63  ;;  %644 = vmatprep.mubr.bf16.mxu0 %v1250_v0 }
  0x5d   :  { %756 = vmatprep.mubr.bf16.mxu1 %v1252_v1 }
  0x63   :  { %645 = vmatmul.mubr.bf16.gmra.mrb[32].mxu0 %v1254_v4 }
  0x64   :  { %757 = vmatmul.mubr.bf16.gmra.mrb[32].mxu1 %v1255_v5  ;;  %652 = vmatprep.mubr.bf16.mxu0 %v983_v6 }
  0x65   :  { %764 = vmatprep.mubr.bf16.mxu1 %v985_v7 }
  0x6b   :  { %653 = vmatmul.mubr.bf16.gmra.mrb[36].mxu0 %v982_v8 }
  0x6c   :  { %765 = vmatmul.mubr.bf16.gmra.mrb[36].mxu1 %v984_v9 }
  0xf6   :  { %v1034_v10 = vpop.f32.mrb[0].mxu0 }
  0xf7   :  { %v1110_v11 = vpop.f32.mrb[0].mxu1  ;;  %v1035_v12 = vpop.f32.mrb[1].mxu0 }
  0xf8   :  { %v1036_v13 = vadd.f32 %v1035_v12, %v1034_v10  ;;  %v1111_v14 = vpop.f32.mrb[1].mxu1  ;;  %v1037_v15 = vpop.f32.mrb[2].mxu0 }
  0xf9   :  { %v1112_v16 = vadd.f32 %v1111_v14, %v1110_v11  ;;  %v1113_v17 = vpop.f32.mrb[2].mxu1  ;;  %v1038_v18 = vpop.f32.mrb[3].mxu0 }
  0xfa   :  { %v1039_v19 = vadd.f32 %v1038_v18, %v1037_v15  ;;  %v1114_v20 = vpop.f32.mrb[3].mxu1 }
  0xfb   :  { %v695_v21 = vadd.f32 %v1112_v16, %v1036_v13  ;;  %v1115_v22 = vadd.f32 %v1114_v20, %v1113_v17 }
  0xfd   :  { %915 = vst [vmem:[%s1566_s3] sm:$0xff] %v695_v21  ;;  %v698_v23 = vadd.f32 %v1115_v22, %v1039_v19  ;;  %v856_v25 = vmul.f32 %v695_v21, %v695_v21 }
  0xfe   :  { %v1040_v24 = vpop.f32.mrb[4].mxu0 }
  0xff   :  { %v832_v26 = vadd.f32 %v698_v23, %v695_v21  ;;  %v857_v27 = vmul.f32 %v698_v23, %v698_v23  ;;  %916 = vst [vmem:[%s1566_s3 + $0x8] sm:$0xff] %v698_v23  ;;  %v1116_v28 = vpop.f32.mrb[4].mxu1  ;;  %v1041_v29 = vpop.f32.mrb[5].mxu0 }
 0x100   :  { %v1042_v30 = vadd.f32 %v1041_v29, %v1040_v24  ;;  %v1117_v31 = vpop.f32.mrb[5].mxu1  ;;  %v1043_v32 = vpop.f32.mrb[6].mxu0 }
 0x101   :  { %v875_v33 = vadd.f32 %v857_v27, %v856_v25  ;;  %v1118_v34 = vadd.f32 %v1117_v31, %v1116_v28  ;;  %v1119_v35 = vpop.f32.mrb[6].mxu1  ;;  %v1044_v36 = vpop.f32.mrb[7].mxu0 }
 0x102   :  { %v1045_v37 = vadd.f32 %v1044_v36, %v1043_v32  ;;  %v1120_v38 = vpop.f32.mrb[7].mxu1 }
 0x103   :  { %v703_v39 = vadd.f32 %v1118_v34, %v1042_v30  ;;  %v1121_v40 = vadd.f32 %v1120_v38, %v1119_v35 }
 0x105   :  { %v833_v41 = vadd.f32 %v832_v26, %v703_v39  ;;  %v858_v42 = vmul.f32 %v703_v39, %v703_v39  ;;  %917 = vst [vmem:[%s1566_s3 + $0x10] sm:$0xff] %v703_v39  ;;  %v706_v43 = vadd.f32 %v1121_v40, %v1045_v37 }
 0x106   :  { %v1046_v44 = vpop.f32.mrb[8].mxu0 }
 0x107   :  { %v876_v45 = vadd.f32 %v875_v33, %v858_v42  ;;  %v834_v46 = vadd.f32 %v833_v41, %v706_v43  ;;  %v859_v47 = vmul.f32 %v706_v43, %v706_v43  ;;  %918 = vst [vmem:[%s1566_s3 + $0x18] sm:$0xff] %v706_v43  ;;  %v1122_v48 = vpop.f32.mrb[8].mxu1  ;;  %v1047_v49 = vpop.f32.mrb[9].mxu0 }
 0x108   :  { %v1048_v50 = vadd.f32 %v1047_v49, %v1046_v44  ;;  %v1123_v51 = vpop.f32.mrb[9].mxu1  ;;  %v1049_v52 = vpop.f32.mrb[10].mxu0 }
 0x109   :  { %v877_v53 = vadd.f32 %v876_v45, %v859_v47  ;;  %v1124_v54 = vadd.f32 %v1123_v51, %v1122_v48  ;;  %v1125_v55 = vpop.f32.mrb[10].mxu1  ;;  %v1050_v56 = vpop.f32.mrb[11].mxu0 }
 0x10a   :  { %v1051_v57 = vadd.f32 %v1050_v56, %v1049_v52  ;;  %v1126_v58 = vpop.f32.mrb[11].mxu1 }
 0x10b   :  { %v711_v59 = vadd.f32 %v1124_v54, %v1048_v50  ;;  %v1127_v60 = vadd.f32 %v1126_v58, %v1125_v55 }
 0x10d   :  { %v835_v61 = vadd.f32 %v834_v46, %v711_v59  ;;  %v860_v62 = vmul.f32 %v711_v59, %v711_v59  ;;  %919 = vst [vmem:[%s1566_s3 + $0x20] sm:$0xff] %v711_v59  ;;  %v714_v63 = vadd.f32 %v1127_v60, %v1051_v57 }
 0x10e   :  { %v1052_v0 = vpop.f32.mrb[12].mxu0 }
 0x10f   :  { %v878_v1 = vadd.f32 %v877_v53, %v860_v62  ;;  %v836_v2 = vadd.f32 %v835_v61, %v714_v63  ;;  %v861_v3 = vmul.f32 %v714_v63, %v714_v63  ;;  %920 = vst [vmem:[%s1566_s3 + $0x28] sm:$0xff] %v714_v63  ;;  %v1128_v4 = vpop.f32.mrb[12].mxu1  ;;  %v1053_v5 = vpop.f32.mrb[13].mxu0 }
 0x110   :  { %v1054_v6 = vadd.f32 %v1053_v5, %v1052_v0  ;;  %v1129_v7 = vpop.f32.mrb[13].mxu1  ;;  %v1055_v8 = vpop.f32.mrb[14].mxu0 }
 0x111   :  { %v879_v9 = vadd.f32 %v878_v1, %v861_v3  ;;  %v1130_v10 = vadd.f32 %v1129_v7, %v1128_v4  ;;  %v1131_v11 = vpop.f32.mrb[14].mxu1  ;;  %v1056_v12 = vpop.f32.mrb[15].mxu0 }
 0x112   :  { %v1057_v13 = vadd.f32 %v1056_v12, %v1055_v8  ;;  %v1132_v14 = vpop.f32.mrb[15].mxu1 }
 0x113   :  { %v719_v15 = vadd.f32 %v1130_v10, %v1054_v6  ;;  %v1133_v16 = vadd.f32 %v1132_v14, %v1131_v11 }
 0x115   :  { %v837_v17 = vadd.f32 %v836_v2, %v719_v15  ;;  %v862_v18 = vmul.f32 %v719_v15, %v719_v15  ;;  %921 = vst [vmem:[%s1566_s3 + $0x30] sm:$0xff] %v719_v15  ;;  %v722_v19 = vadd.f32 %v1133_v16, %v1057_v13 }
 0x116   :  { %v1058_v20 = vpop.f32.mrb[16].mxu0 }
 0x117   :  { %v880_v21 = vadd.f32 %v879_v9, %v862_v18  ;;  %v838_v22 = vadd.f32 %v837_v17, %v722_v19  ;;  %v863_v23 = vmul.f32 %v722_v19, %v722_v19  ;;  %922 = vst [vmem:[%s1566_s3 + $0x38] sm:$0xff] %v722_v19  ;;  %v1134_v24 = vpop.f32.mrb[16].mxu1  ;;  %v1059_v25 = vpop.f32.mrb[17].mxu0 }
 0x118   :  { %v1060_v26 = vadd.f32 %v1059_v25, %v1058_v20  ;;  %v1135_v27 = vpop.f32.mrb[17].mxu1  ;;  %v1061_v28 = vpop.f32.mrb[18].mxu0 }
 0x119   :  { %v881_v29 = vadd.f32 %v880_v21, %v863_v23  ;;  %v1136_v30 = vadd.f32 %v1135_v27, %v1134_v24  ;;  %v1137_v31 = vpop.f32.mrb[18].mxu1  ;;  %v1062_v32 = vpop.f32.mrb[19].mxu0 }
 0x11a   :  { %v1063_v33 = vadd.f32 %v1062_v32, %v1061_v28  ;;  %v1138_v34 = vpop.f32.mrb[19].mxu1 }
 0x11b   :  { %v727_v35 = vadd.f32 %v1136_v30, %v1060_v26  ;;  %v1139_v36 = vadd.f32 %v1138_v34, %v1137_v31 }
 0x11d   :  { %v839_v37 = vadd.f32 %v838_v22, %v727_v35  ;;  %v864_v38 = vmul.f32 %v727_v35, %v727_v35  ;;  %923 = vst [vmem:[%s1566_s3 + $0x40] sm:$0xff] %v727_v35  ;;  %v730_v39 = vadd.f32 %v1139_v36, %v1063_v33 }
 0x11e   :  { %v1064_v40 = vpop.f32.mrb[20].mxu0 }
 0x11f   :  { %v882_v41 = vadd.f32 %v881_v29, %v864_v38  ;;  %v840_v42 = vadd.f32 %v839_v37, %v730_v39  ;;  %v865_v43 = vmul.f32 %v730_v39, %v730_v39  ;;  %924 = vst [vmem:[%s1566_s3 + $0x48] sm:$0xff] %v730_v39  ;;  %v1140_v44 = vpop.f32.mrb[20].mxu1  ;;  %v1065_v45 = vpop.f32.mrb[21].mxu0 }
 0x120   :  { %v1066_v46 = vadd.f32 %v1065_v45, %v1064_v40  ;;  %v1141_v47 = vpop.f32.mrb[21].mxu1  ;;  %v1067_v48 = vpop.f32.mrb[22].mxu0 }
 0x121   :  { %v883_v49 = vadd.f32 %v882_v41, %v865_v43  ;;  %v1142_v50 = vadd.f32 %v1141_v47, %v1140_v44  ;;  %v1143_v51 = vpop.f32.mrb[22].mxu1  ;;  %v1068_v52 = vpop.f32.mrb[23].mxu0 }
 0x122   :  { %v1069_v53 = vadd.f32 %v1068_v52, %v1067_v48  ;;  %v1144_v54 = vpop.f32.mrb[23].mxu1 }
 0x123   :  { %v735_v55 = vadd.f32 %v1142_v50, %v1066_v46  ;;  %v1145_v56 = vadd.f32 %v1144_v54, %v1143_v51 }
 0x125   :  { %v841_v57 = vadd.f32 %v840_v42, %v735_v55  ;;  %v866_v58 = vmul.f32 %v735_v55, %v735_v55  ;;  %925 = vst [vmem:[%s1566_s3 + $0x50] sm:$0xff] %v735_v55  ;;  %v738_v59 = vadd.f32 %v1145_v56, %v1069_v53 }
 0x126   :  { %v1070_v60 = vpop.f32.mrb[24].mxu0 }
 0x127   :  { %v884_v61 = vadd.f32 %v883_v49, %v866_v58  ;;  %v842_v62 = vadd.f32 %v841_v57, %v738_v59  ;;  %v867_v63 = vmul.f32 %v738_v59, %v738_v59  ;;  %926 = vst [vmem:[%s1566_s3 + $0x58] sm:$0xff] %v738_v59  ;;  %v1146_v0 = vpop.f32.mrb[24].mxu1  ;;  %v1071_v1 = vpop.f32.mrb[25].mxu0 }
 0x128   :  { %v1072_v2 = vadd.f32 %v1071_v1, %v1070_v60  ;;  %v1147_v3 = vpop.f32.mrb[25].mxu1  ;;  %v1073_v4 = vpop.f32.mrb[26].mxu0 }
 0x129   :  { %v885_v5 = vadd.f32 %v884_v61, %v867_v63  ;;  %v1148_v6 = vadd.f32 %v1147_v3, %v1146_v0  ;;  %v1149_v7 = vpop.f32.mrb[26].mxu1  ;;  %v1074_v8 = vpop.f32.mrb[27].mxu0 }
 0x12a   :  { %v1075_v9 = vadd.f32 %v1074_v8, %v1073_v4  ;;  %v1150_v10 = vpop.f32.mrb[27].mxu1 }
 0x12b   :  { %v743_v11 = vadd.f32 %v1148_v6, %v1072_v2  ;;  %v1151_v12 = vadd.f32 %v1150_v10, %v1149_v7 }
 0x12d   :  { %v843_v13 = vadd.f32 %v842_v62, %v743_v11  ;;  %v868_v14 = vmul.f32 %v743_v11, %v743_v11  ;;  %927 = vst [vmem:[%s1566_s3 + $0x60] sm:$0xff] %v743_v11  ;;  %v746_v15 = vadd.f32 %v1151_v12, %v1075_v9 }
 0x12e   :  { %v1076_v16 = vpop.f32.mrb[28].mxu0 }
 0x12f   :  { %v886_v17 = vadd.f32 %v885_v5, %v868_v14  ;;  %v844_v18 = vadd.f32 %v843_v13, %v746_v15  ;;  %v869_v19 = vmul.f32 %v746_v15, %v746_v15  ;;  %928 = vst [vmem:[%s1566_s3 + $0x68] sm:$0xff] %v746_v15  ;;  %v1152_v20 = vpop.f32.mrb[28].mxu1  ;;  %v1077_v21 = vpop.f32.mrb[29].mxu0 }
 0x130   :  { %v1078_v22 = vadd.f32 %v1077_v21, %v1076_v16  ;;  %v1153_v23 = vpop.f32.mrb[29].mxu1  ;;  %v1079_v24 = vpop.f32.mrb[30].mxu0 }
 0x131   :  { %v887_v25 = vadd.f32 %v886_v17, %v869_v19  ;;  %v1154_v26 = vadd.f32 %v1153_v23, %v1152_v20  ;;  %v1155_v27 = vpop.f32.mrb[30].mxu1  ;;  %v1080_v28 = vpop.f32.mrb[31].mxu0 }
 0x132   :  { %v1081_v29 = vadd.f32 %v1080_v28, %v1079_v24  ;;  %v1156_v30 = vpop.f32.mrb[31].mxu1 }
 0x133   :  { %v751_v31 = vadd.f32 %v1154_v26, %v1078_v22  ;;  %v1157_v32 = vadd.f32 %v1156_v30, %v1155_v27 }
 0x135   :  { %v845_v33 = vadd.f32 %v844_v18, %v751_v31  ;;  %v870_v34 = vmul.f32 %v751_v31, %v751_v31  ;;  %929 = vst [vmem:[%s1566_s3 + $0x70] sm:$0xff] %v751_v31  ;;  %v754_v35 = vadd.f32 %v1157_v32, %v1081_v29 }
 0x136   :  { %v1082_v36 = vpop.f32.mrb[32].mxu0 }
 0x137   :  { %v888_v37 = vadd.f32 %v887_v25, %v870_v34  ;;  %v846_v38 = vadd.f32 %v845_v33, %v754_v35  ;;  %v871_v39 = vmul.f32 %v754_v35, %v754_v35  ;;  %930 = vst [vmem:[%s1566_s3 + $0x78] sm:$0xff] %v754_v35  ;;  %v1158_v40 = vpop.f32.mrb[32].mxu1  ;;  %v1083_v41 = vpop.f32.mrb[33].mxu0 }
 0x138   :  { %v1084_v42 = vadd.f32 %v1083_v41, %v1082_v36  ;;  %v1159_v43 = vpop.f32.mrb[33].mxu1  ;;  %v1085_v44 = vpop.f32.mrb[34].mxu0 }
 0x139   :  { %v889_v45 = vadd.f32 %v888_v37, %v871_v39  ;;  %v1160_v46 = vadd.f32 %v1159_v43, %v1158_v40  ;;  %v1161_v47 = vpop.f32.mrb[34].mxu1  ;;  %v1086_v48 = vpop.f32.mrb[35].mxu0 }
 0x13a   :  { %v1087_v49 = vadd.f32 %v1086_v48, %v1085_v44  ;;  %v1162_v50 = vpop.f32.mrb[35].mxu1 }
 0x13b   :  { %v759_v51 = vadd.f32 %v1160_v46, %v1084_v42  ;;  %v1163_v52 = vadd.f32 %v1162_v50, %v1161_v47 }
 0x13d   :  { %v847_v53 = vadd.f32 %v846_v38, %v759_v51  ;;  %v872_v54 = vmul.f32 %v759_v51, %v759_v51  ;;  %931 = vst [vmem:[%s1566_s3 + $0x80] sm:$0xff] %v759_v51  ;;  %v762_v55 = vadd.f32 %v1163_v52, %v1087_v49 }
 0x13e   :  { %v1088_v56 = vpop.f32.mrb[36].mxu0 }
 0x13f   :  { %v890_v57 = vadd.f32 %v889_v45, %v872_v54  ;;  %v848_v58 = vadd.f32 %v847_v53, %v762_v55  ;;  %v873_v59 = vmul.f32 %v762_v55, %v762_v55  ;;  %932 = vst [vmem:[%s1566_s3 + $0x88] sm:$0xff] %v762_v55  ;;  %v1164_v60 = vpop.f32.mrb[36].mxu1  ;;  %v1089_v61 = vpop.f32.mrb[37].mxu0 }
 0x140   :  { %v1090_v62 = vadd.f32 %v1089_v61, %v1088_v56  ;;  %v1165_v63 = vpop.f32.mrb[37].mxu1  ;;  %v1091_v0 = vpop.f32.mrb[38].mxu0 }
 0x141   :  { %v891_v1 = vadd.f32 %v890_v57, %v873_v59  ;;  %v1166_v2 = vadd.f32 %v1165_v63, %v1164_v60  ;;  %v1167_v3 = vpop.f32.mrb[38].mxu1  ;;  %v1092_v4 = vpop.f32.mrb[39].mxu0 }
 0x142   :  { %v1168_v5 = vpop.f32.mrb[39].mxu1 }
 0x143   :  { %v767_v6 = vadd.f32 %v1166_v2, %v1090_v62 }
 0x145   :  { %v849_v7 = vadd.f32 %v848_v58, %v767_v6  ;;  %v874_v8 = vmul.f32 %v767_v6, %v767_v6  ;;  %933 = vst [vmem:[%s1566_s3 + $0x90] sm:$0xff] %v767_v6 }
 0x147   :  { %v850_v9 = vrot.slane %v849_v7, 4  ;;  %v892_v10 = vadd.f32 %v891_v1, %v874_v8 }
 0x149   :  { %v851_v11 = vadd.f32 %v850_v9, %v849_v7  ;;  %v893_v12 = vrot.slane %v892_v10, 4 }
 0x14b   :  { %v852_v13 = vrot.slane %v851_v11, 2  ;;  %v894_v14 = vadd.f32 %v893_v12, %v892_v10 }
 0x14d   :  { %v853_v15 = vadd.f32 %v852_v13, %v851_v11  ;;  %v895_v16 = vrot.slane %v894_v14, 2 }
 0x14f   :  { %v854_v17 = vrot.slane %v853_v15, 1  ;;  %v896_v18 = vadd.f32 %v895_v16, %v894_v14 }
 0x151   :  { %v855_v19 = vadd.f32 %v854_v17, %v853_v15  ;;  %v897_v20 = vrot.slane %v896_v18, 1 }
 0x153   :  { %v898_v21 = vadd.f32 %v897_v20, %v896_v18  ;;  %903 = vst [vmem:[%s1567_s4] sm:$0x1] %v855_v19 }
 0x155   :  { %904 = vst [vmem:[%s1568_s5] sm:$0x1] %v898_v21 }

// kernel: multiscale_forward.26
= control target key start
LH: loop header
LB: loop body
LE: loop exit
PB: predicated region body
PF: predicated region fallthrough
CT: control target
= control target key end

     0   :  { %s490_s0 = inlined_call_operand.vmem [shape: f32[152,128], index: 0, kind: input, shape index: {}]   ;;  %s491_s1 = inlined_call_operand.vmem [shape: f32[1,128], index: 1, kind: input, shape index: {}]   ;;  %s492_s2 = inlined_call_operand.vmem [shape: f32[1,128], index: 2, kind: input, shape index: {}]   ;;  %s493_s3 = inlined_call_operand.vmem [shape: bf16[152,128], index: 3, kind: output, shape index: {}]  }
   0x1   :  { %v14_v0 = vld [vmem:[%s490_s0] sm:$0xff]  ;;  %v15_v1 = vld [vmem:[%s490_s0 + $0x8] sm:$0xff]  ;;  %v16_v6 = vld [vmem:[%s490_s0 + $0x10] sm:$0xff] }
   0x2   :  { %v364_v2 = vld [vmem:[%s491_s1] ss:$0 sm:$0xff]  ;;  %v17_v7 = vld [vmem:[%s490_s0 + $0x18] sm:$0xff]  ;;  %v19_v11 = vld [vmem:[%s490_s0 + $0x28] sm:$0xff] }
   0x3   :  { %v40_v3 = vmul.f32 %v364_v2, %v14_v0  ;;  %v41_v4 = vmul.f32 %v364_v2, %v15_v1  ;;  %v371_v5 = vld [vmem:[%s492_s2] ss:$0 sm:$0xff]  ;;  %v42_v8 = vmul.f32 %v364_v2, %v16_v6  ;;  %v43_v9 = vmul.f32 %v364_v2, %v17_v7  ;;  %v20_v12 = vld [vmem:[%s490_s0 + $0x30] sm:$0xff]  ;;  %v21_v17 = vld [vmem:[%s490_s0 + $0x38] sm:$0xff] }
   0x4   :  { %v18_v10 = vld [vmem:[%s490_s0 + $0x20] sm:$0xff]  ;;  %v45_v16 = vmul.f32 %v364_v2, %v19_v11  ;;  %v46_v20 = vmul.f32 %v364_v2, %v20_v12  ;;  %v47_v21 = vmul.f32 %v364_v2, %v21_v17  ;;  %v23_v35 = vld [vmem:[%s490_s0 + $0x48] sm:$0xff]  ;;  %v24_v36 = vld [vmem:[%s490_s0 + $0x50] sm:$0xff] }
   0x5   :  { %v66_v13 = vadd.f32 %v371_v5, %v40_v3  ;;  %v67_v14 = vadd.f32 %v371_v5, %v41_v4  ;;  %v44_v15 = vmul.f32 %v364_v2, %v18_v10  ;;  %v68_v18 = vadd.f32 %v371_v5, %v42_v8  ;;  %v22_v34 = vld [vmem:[%s490_s0 + $0x40] sm:$0xff]  ;;  %v25_v42 = vld [vmem:[%s490_s0 + $0x58] sm:$0xff]  ;;  %v27_v48 = vld [vmem:[%s490_s0 + $0x68] sm:$0xff] }
   0x6   :  { %v69_v19 = vadd.f32 %v371_v5, %v43_v9  ;;  %v71_v29 = vadd.f32 %v371_v5, %v45_v16  ;;  %v72_v33 = vadd.f32 %v371_v5, %v46_v20  ;;  %v73_v40 = vadd.f32 %v371_v5, %v47_v21  ;;  %v26_v47 = vld [vmem:[%s490_s0 + $0x60] sm:$0xff]  ;;  %v28_v60 = vld [vmem:[%s490_s0 + $0x70] sm:$0xff]  ;;  %v29_v7 = vld [vmem:[%s490_s0 + $0x78] sm:$0xff] }
   0x7   :  { %vm85_vm0 = vcmp.ge.f32.partialorder %v66_v13, 0.0  ;;  %vm86_vm1 = vcmp.ge.f32.partialorder %v67_v14, 0.0  ;;  %v104_v22 = vmul.f32 0.2, %v66_v13  ;;  %v105_v23 = vmul.f32 0.2, %v67_v14 }
   0x8   :  { %vm87_vm2 = vcmp.ge.f32.partialorder %v68_v18, 0.0  ;;  %vm88_vm3 = vcmp.ge.f32.partialorder %v69_v19, 0.0  ;;  %v106_v24 = vmul.f32 0.2, %v68_v18  ;;  %v107_v25 = vmul.f32 0.2, %v69_v19 }
   0x9   :  { %v123_v26 = vsel %vm85_vm0, %v66_v13, %v104_v22  ;;  %v124_v27 = vsel %vm86_vm1, %v67_v14, %v105_v23  ;;  %v70_v28 = vadd.f32 %v371_v5, %v44_v15  ;;  %vm90_vm5 = vcmp.ge.f32.partialorder %v71_v29, 0.0  ;;  %v30_v12 = vld [vmem:[%s490_s0 + $0x80] sm:$0xff]  ;;  %v31_v13 = vld [vmem:[%s490_s0 + $0x88] sm:$0xff]  ;;  %v32_v20 = vld [vmem:[%s490_s0 + $0x90] sm:$0xff] }
   0xa   :  { %v285_v30 = vpack.c.bf16 %v124_v27, %v123_v26  ;;  %v125_v31 = vsel %vm87_vm2, %v68_v18, %v106_v24  ;;  %v126_v32 = vsel %vm88_vm3, %v69_v19, %v107_v25  ;;  %v109_v39 = vmul.f32 0.2, %v71_v29 }
   0xb   :  { %v290_v37 = vpack.c.bf16 %v126_v32, %v125_v31  ;;  %vm89_vm4 = vcmp.ge.f32.partialorder %v70_v28, 0.0  ;;  %v108_v38 = vmul.f32 0.2, %v70_v28  ;;  %vm91_vm6 = vcmp.ge.f32.partialorder %v72_v33, 0.0 }
   0xc   :  { %286 = vst [vmem:[%s493_s3] sm:$0xff] %v285_v30   ;;  %v110_v41 = vmul.f32 0.2, %v72_v33  ;;  %v48_v44 = vmul.f32 %v364_v2, %v22_v34  ;;  %v49_v45 = vmul.f32 %v364_v2, %v23_v35  ;;  %v50_v46 = vmul.f32 %v364_v2, %v24_v36 }
   0xd   :  { %327 = vst [vmem:[%s493_s3 + $0x8] sm:$0xff] %v290_v37   ;;  %v127_v43 = vsel %vm89_vm4, %v70_v28, %v108_v38  ;;  %v128_v49 = vsel %vm90_vm5, %v71_v29, %v109_v39  ;;  %vm92_vm7 = vcmp.ge.f32.partialorder %v73_v40, 0.0  ;;  %v111_v50 = vmul.f32 0.2, %v73_v40 }
   0xe   :  { %v129_v51 = vsel %vm91_vm6, %v72_v33, %v110_v41  ;;  %v295_v52 = vpack.c.bf16 %v128_v49, %v127_v43  ;;  %v74_v53 = vadd.f32 %v371_v5, %v48_v44  ;;  %v75_v54 = vadd.f32 %v371_v5, %v49_v45 }
   0xf   :  { %v51_v55 = vmul.f32 %v364_v2, %v25_v42  ;;  %v130_v56 = vsel %vm92_vm7, %v73_v40, %v111_v50  ;;  %v76_v57 = vadd.f32 %v371_v5, %v50_v46  ;;  %v52_v58 = vmul.f32 %v364_v2, %v26_v47 }
  0x10   :  { %v53_v59 = vmul.f32 %v364_v2, %v27_v48  ;;  %328 = vst [vmem:[%s493_s3 + $0x10] sm:$0xff] %v295_v52   ;;  %v300_v61 = vpack.c.bf16 %v130_v56, %v129_v51  ;;  %vm93_vm8 = vcmp.ge.f32.partialorder %v74_v53, 0.0  ;;  %vm94_vm9 = vcmp.ge.f32.partialorder %v75_v54, 0.0 }
  0x11   :  { %v112_v62 = vmul.f32 0.2, %v74_v53  ;;  %v113_v63 = vmul.f32 0.2, %v75_v54  ;;  %v77_v0 = vadd.f32 %v371_v5, %v51_v55  ;;  %vm95_vm10 = vcmp.ge.f32.partialorder %v76_v57, 0.0 }
  0x12   :  { %v114_v1 = vmul.f32 0.2, %v76_v57  ;;  %329 = vst [vmem:[%s493_s3 + $0x18] sm:$0xff] %v300_v61   ;;  %v78_v4 = vadd.f32 %v371_v5, %v52_v58  ;;  %v79_v6 = vadd.f32 %v371_v5, %v53_v59  ;;  %v54_v8 = vmul.f32 %v364_v2, %v28_v60 }
  0x13   :  { %v131_v3 = vsel %vm93_vm8, %v74_v53, %v112_v62  ;;  %v132_v9 = vsel %vm94_vm9, %v75_v54, %v113_v63  ;;  %vm96_vm11 = vcmp.ge.f32.partialorder %v77_v0, 0.0  ;;  %v115_v10 = vmul.f32 0.2, %v77_v0 }
  0x14   :  { %v133_v11 = vsel %vm95_vm10, %v76_v57, %v114_v1  ;;  %v305_v14 = vpack.c.bf16 %v132_v9, %v131_v3  ;;  %vm97_vm12 = vcmp.ge.f32.partialorder %v78_v4, 0.0  ;;  %vm98_vm13 = vcmp.ge.f32.partialorder %v79_v6, 0.0 }
  0x15   :  { %v116_v15 = vmul.f32 0.2, %v78_v4  ;;  %v134_v16 = vsel %vm96_vm11, %v77_v0, %v115_v10  ;;  %v117_v17 = vmul.f32 0.2, %v79_v6  ;;  %v55_v18 = vmul.f32 %v364_v2, %v29_v7 }
  0x16   :  { %v80_v19 = vadd.f32 %v371_v5, %v54_v8  ;;  %330 = vst [vmem:[%s493_s3 + $0x20] sm:$0xff] %v305_v14   ;;  %v310_v21 = vpack.c.bf16 %v134_v16, %v133_v11  ;;  %v56_v23 = vmul.f32 %v364_v2, %v30_v12  ;;  %v57_v24 = vmul.f32 %v364_v2, %v31_v13 }
  0x17   :  { %v135_v22 = vsel %vm97_vm12, %v78_v4, %v116_v15  ;;  %v136_v25 = vsel %vm98_vm13, %v79_v6, %v117_v17  ;;  %v81_v26 = vadd.f32 %v371_v5, %v55_v18  ;;  %v58_v31 = vmul.f32 %v364_v2, %v32_v20 }
  0x18   :  { %vm99_vm14 = vcmp.ge.f32.partialorder %v80_v19, 0.0  ;;  %v118_v27 = vmul.f32 0.2, %v80_v19  ;;  %331 = vst [vmem:[%s493_s3 + $0x28] sm:$0xff] %v310_v21   ;;  %v315_v28 = vpack.c.bf16 %v136_v25, %v135_v22  ;;  %v82_v29 = vadd.f32 %v371_v5, %v56_v23 }
  0x19   :  { %v83_v30 = vadd.f32 %v371_v5, %v57_v24  ;;  %vm100_vm15 = vcmp.ge.f32.partialorder %v81_v26, 0.0  ;;  %v119_v32 = vmul.f32 0.2, %v81_v26  ;;  %v84_v37 = vadd.f32 %v371_v5, %v58_v31 }
  0x1a   :  { %v137_v33 = vsel %vm99_vm14, %v80_v19, %v118_v27  ;;  %332 = vst [vmem:[%s493_s3 + $0x30] sm:$0xff] %v315_v28   ;;  %vm101_vm0 = vcmp.ge.f32.partialorder %v82_v29, 0.0  ;;  %v120_v34 = vmul.f32 0.2, %v82_v29 }
  0x1b   :  { %vm102_vm1 = vcmp.ge.f32.partialorder %v83_v30, 0.0  ;;  %v121_v35 = vmul.f32 0.2, %v83_v30  ;;  %v138_v36 = vsel %vm100_vm15, %v81_v26, %v119_v32  ;;  %vm103_vm2 = vcmp.ge.f32.partialorder %v84_v37, 0.0 }
  0x1c   :  { %v320_v38 = vpack.c.bf16 %v138_v36, %v137_v33  ;;  %v139_v39 = vsel %vm101_vm0, %v82_v29, %v120_v34  ;;  %v122_v2 = vmul.f32 0.2, %v84_v37 }
  0x1d   :  { %v140_v40 = vsel %vm102_vm1, %v83_v30, %v121_v35 }
  0x1e   :  { %v325_v41 = vpack.c.bf16 %v140_v40, %v139_v39  ;;  %333 = vst [vmem:[%s493_s3 + $0x38] sm:$0xff] %v320_v38   ;;  %v141_v42 = vsel %vm103_vm2, %v84_v37, %v122_v2 }
  0x1f   :  { %v281_v43 = vpack.c.bf16 %v141_v42, %v141_v42 }
  0x20   :  { %334 = vst [vmem:[%s493_s3 + $0x40] sm:$0xff] %v325_v41  }
  0x21   :  { %237 = vst [vmem:[%s493_s3 + $0x48] sm:$0xf] %v281_v43 }

// kernel: multiscale_forward.27
= control target key start
LH: loop header
LB: loop body
LE: loop exit
PB: predicated region body
PF: predicated region fallthrough
CT: control target
= control target key end

     0   :  { %s1321_s18 = smov 0   ;;  %s1323_s19 = smov 0   ;;  %s1455_s0 = inlined_call_operand.vmem [shape: bf16[40,1024], index: 0, kind: input, shape index: {}]   ;;  %s1456_s1 = inlined_call_operand.vmem [shape: bf16[1024,128], index: 1, kind: input, shape index: {}]   ;;  %s1457_s2 = inlined_call_operand.vmem [shape: f32[1,128], index: 2, kind: input, shape index: {}]   ;;  %s1458_s3 = inlined_call_operand.vmem [shape: f32[40,128], index: 3, kind: output, shape index: {0}]   ;;  %s1459_s4 = inlined_call_operand.vmem [shape: f32[1,128], index: 4, kind: output, shape index: {1}]   ;;  %s1460_s5 = inlined_call_operand.vmem [shape: f32[1,128], index: 5, kind: output, shape index: {2}]  }
   0x1   :  { %s1325_s20 = smov 0   ;;  %s1327_s21 = smov 0  }
   0x2   :  { %s1329_s22 = smov 0  }
   0x3 LB: > { %s28_s2 = sadd.s32 1, %s1284_s21  ;;  %p51_p1 = scmp.ne.s32.totalorder %s1276_s19, %s1272_s18  ;;  %s1288_s22 = sphi %s1329_s22, %s16_s22   ;;  %s1284_s21 = sphi %s1327_s21, %s1464_s21   ;;  %s1280_s20 = sphi %s1325_s20, %s1463_s20   ;;  %s1276_s19 = sphi %s1323_s19, %s1462_s19   ;;  %s1272_s18 = sphi %s1321_s18, %s1461_s18  }
   0x4   : > { %p29_p0 = scmp.ge.s32.totalorder %s28_s2, 2  ;;  %p52_p2 = scmp.eq.s32.totalorder %s1288_s22, 0 }
   0x5   : > { %s44_s24 = sadd.s32 1, %s1276_s19  ;;  %p1032_p5 = scmp.ge.s32.totalorder %s1288_s22, 2 }
   0x6   : > { %s1466_s2 = smov (%p29_p0, %s28_s2), 0  ;;  %p53_p3 = por %p52_p2, %p51_p1 }
   0x7   : > { %s40_s23 = ssub.s32 %s1284_s21, %s1466_s2  ;;  %217 = sbr.rel (%p1032_p5) target bundleno = 23 (0x17), region = 20 }
   0x8   : > { %p42_p4 = scmp.eq.s32.totalorder %s40_s23, 0 }
   0xa   : > { %s1356_s25 = scalar_select %p42_p4, %s1276_s19, %s44_s24  }
   0xe   : > { %220 = sbr.rel (!%p53_p3) target bundleno = 23 (0x17), region = 24  ;;  %s222_s26 = sand.u32 (%p53_p3), 1, %s1276_s19  }
   0xf   : > { %s1090_s27 = sshll.u32 (%p53_p3), %s1284_s21, 4  ;;  %s1159_s28 = smul.u32 (%p53_p3), 80, %s222_s26 }
  0x10   : > { %s230_s6 = scalar_lea.vmem (%p53_p3), %s1455_s0, %s1090_s27 }
  0x11   : > { %v243_v0 = vld [vmem:[%s230_s6] sm:$0xff] (%p53_p3)  ;;  %v245_v1 = vld [vmem:[%s230_s6 + $0x8] sm:$0xff] (%p53_p3)  ;;  %s224_s7 = scalar_lea.vmem (%p53_p3), [#allocation3], %s1159_s28 }
  0x12   : > { %v247_v2 = vld [vmem:[%s230_s6 + $0x20] sm:$0xff] (%p53_p3)  ;;  %v249_v3 = vld [vmem:[%s230_s6 + $0x28] sm:$0xff] (%p53_p3)  ;;  %244 = vst [vmem:[%s224_s7] sm:$0xff] (%p53_p3), %v243_v0  ;;  %246 = vst [vmem:[%s224_s7 + $0x8] sm:$0xff] (%p53_p3), %v245_v1 }
  0x13   : > { %v251_v4 = vld [vmem:[%s230_s6 + $0x40] sm:$0xff] (%p53_p3)  ;;  %v253_v5 = vld [vmem:[%s230_s6 + $0x48] sm:$0xff] (%p53_p3)  ;;  %248 = vst [vmem:[%s224_s7 + $0x10] sm:$0xff] (%p53_p3), %v247_v2  ;;  %250 = vst [vmem:[%s224_s7 + $0x18] sm:$0xff] (%p53_p3), %v249_v3 }
  0x14   : > { %252 = vst [vmem:[%s224_s7 + $0x20] sm:$0xff] (%p53_p3), %v251_v4  ;;  %254 = vst [vmem:[%s224_s7 + $0x28] sm:$0xff] (%p53_p3), %v253_v5  ;;  %v255_v6 = vld [vmem:[%s230_s6 + $0x60] sm:$0xff] (%p53_p3)  ;;  %v257_v7 = vld [vmem:[%s230_s6 + $0x68] sm:$0xff] (%p53_p3) }
  0x15   : > { %v259_v8 = vld [vmem:[%s230_s6 + $0x80] sm:$0xff]  ;;  %256 = vst [vmem:[%s224_s7 + $0x30] sm:$0xff] %v255_v6  ;;  %258 = vst [vmem:[%s224_s7 + $0x38] sm:$0xff] %v257_v7  ;;  %v261_v9 = vld [vmem:[%s230_s6 + $0x88] sm:$0xff] }
  0x16   : > { %260 = vst [vmem:[%s224_s7 + $0x40] sm:$0xff] %v259_v8  ;;  %262 = vst [vmem:[%s224_s7 + $0x48] sm:$0xff] %v261_v9 }
  0x17 PF: > { %p1035_p6 = scmp.ge.s32.totalorder %s1288_s22, 1  ;;  %p279_p7 = scmp.lt.s32.totalorder %s1288_s22, 3 }
  0x19   : > { %p280_p8 = pnand %p1035_p6, %p279_p7 }
  0x1a   : > { %s286_s8 = sand.u32 (!%p280_p8), 1, %s1272_s18   ;;  %s1036_s9 = sshll.u32 (!%p280_p8), %s1280_s20, 6 }
  0x1b   : > { %283 = sbr.rel (%p280_p8) target bundleno = 336 (0x150), region = 51  ;;  %p336_p9 = scmp.lt.s32.totalorder (!%p280_p8), %s1036_s9, 127 }
  0x1c   : > { %s1160_s10 = smul.u32 (!%p280_p8), 80, %s286_s8  ;;  %p1038_p10 = scmp.ne.s32.totalorder (!%p280_p8), %s1280_s20, 0 }
  0x1e   : > { %s1373_s15 = scalar_lea.vmem (!%p280_p8), [#allocation3], %s1160_s10 }
  0x22   : > { %s1468_s9 = smov (!%p336_p9, %s1036_s9), 127  ;;  %366 = sbr.rel (%p1038_p10) target bundleno = 41 (0x29), region = 59 }
  0x23   : > { %s1037_s11 = sshll.u32 %s1468_s9, 2  ;;  %v1290_v10 = vmov (!%p1038_p10), 0.0  }
  0x24   : > { %s1371_s14 = scalar_lea.vmem %s1456_s1, %s1037_s11  ;;  %367 = vst [vmem:[#allocation2] sm:$0xff] (!%p1038_p10), %v1290_v10  ;;  %368 = vst [vmem:[#allocation2 + $0x8] sm:$0xff] (!%p1038_p10), %v1290_v10 }
  0x25   : > { %369 = vst [vmem:[#allocation2 + $0x10] sm:$0xff] (!%p1038_p10), %v1290_v10  ;;  %370 = vst [vmem:[#allocation2 + $0x18] sm:$0xff] (!%p1038_p10), %v1290_v10 }
  0x26   : > { %371 = vst [vmem:[#allocation2 + $0x20] sm:$0xff] (!%p1038_p10), %v1290_v10 }
  0x29 PF: > { %v1202_v11 = vld [vmem:[%s1371_s14 + $0x40] sm:$0xff]   ;;  %v1206_v15 = vld [vmem:[%s1371_s14 + $0x48] sm:$0xff]   ;;  %v1210_v19 = vld [vmem:[%s1371_s14 + $0x50] sm:$0xff]   ;;  %p1083_p11 = scmp.ne.s32.totalorder %s1280_s20, 1 }
  0x2a   : > { %v1203_v12 = vld [vmem:[%s1371_s14 + $0xc0] sm:$0xff]   ;;  %1091 = vmatprep.subr.bf16.mxu0 %v1202_v11  ;;  %v1207_v16 = vld [vmem:[%s1371_s14 + $0xc8] sm:$0xff]   ;;  %v1211_v20 = vld [vmem:[%s1371_s14 + $0xd0] sm:$0xff]  }
  0x2b   : > { %v1204_v13 = vld [vmem:[%s1371_s14] sm:$0xff]   ;;  %1125 = vmatprep.subr.bf16.mxu1 %v1203_v12  ;;  %v1208_v17 = vld [vmem:[%s1371_s14 + $0x8] sm:$0xff]   ;;  %v1212_v21 = vld [vmem:[%s1371_s14 + $0x10] sm:$0xff]  }
  0x2c   : > { %v1205_v14 = vld [vmem:[%s1371_s14 + $0x80] sm:$0xff]   ;;  %1092 = vmatpush3.bf16.msra.mxu0 %v1204_v13  ;;  %v1209_v18 = vld [vmem:[%s1371_s14 + $0x88] sm:$0xff]   ;;  %v1213_v22 = vld [vmem:[%s1371_s14 + $0x90] sm:$0xff]  }
  0x2d   : > { %1126 = vmatpush3.bf16.msra.mxu1 %v1205_v14  ;;  %1093 = vmatprep.subr.bf16.mxu0 %v1206_v15  ;;  %v1214_v23 = vld [vmem:[%s1371_s14 + $0x58] sm:$0xff]   ;;  %v1218_v27 = vld [vmem:[%s1371_s14 + $0x60] sm:$0xff]   ;;  %v1222_v31 = vld [vmem:[%s1371_s14 + $0x68] sm:$0xff]  }
  0x2e   : > { %1127 = vmatprep.subr.bf16.mxu1 %v1207_v16  ;;  %v1215_v24 = vld [vmem:[%s1371_s14 + $0xd8] sm:$0xff]   ;;  %v1219_v28 = vld [vmem:[%s1371_s14 + $0xe0] sm:$0xff]   ;;  %v1223_v32 = vld [vmem:[%s1371_s14 + $0xe8] sm:$0xff]  }
  0x2f   : > { %v1216_v25 = vld [vmem:[%s1371_s14 + $0x18] sm:$0xff]   ;;  %v1220_v29 = vld [vmem:[%s1371_s14 + $0x20] sm:$0xff]   ;;  %v1224_v33 = vld [vmem:[%s1371_s14 + $0x28] sm:$0xff]  }
  0x30   : > { %1094 = vmatpush3.bf16.msra.mxu0 %v1208_v17  ;;  %v1217_v26 = vld [vmem:[%s1371_s14 + $0x98] sm:$0xff]   ;;  %v1221_v30 = vld [vmem:[%s1371_s14 + $0xa0] sm:$0xff]   ;;  %v1225_v34 = vld [vmem:[%s1371_s14 + $0xa8] sm:$0xff]  }
  0x31   : > { %1128 = vmatpush3.bf16.msra.mxu1 %v1209_v18  ;;  %1095 = vmatprep.subr.bf16.mxu0 %v1210_v19  ;;  %v1226_v35 = vld [vmem:[%s1371_s14 + $0x70] sm:$0xff]   ;;  %v1230_v39 = vld [vmem:[%s1371_s14 + $0x78] sm:$0xff]   ;;  %v372_v2 = vld [vmem:[#allocation2] sm:$0xff] }
  0x32   : > { %1129 = vmatprep.subr.bf16.mxu1 %v1211_v20  ;;  %v1227_v36 = vld [vmem:[%s1371_s14 + $0xf0] sm:$0xff]   ;;  %v1231_v40 = vld [vmem:[%s1371_s14 + $0xf8] sm:$0xff]   ;;  %v373_v7 = vld [vmem:[#allocation2 + $0x8] sm:$0xff] }
  0x33   : > { %v1228_v37 = vld [vmem:[%s1371_s14 + $0x30] sm:$0xff]   ;;  %v1232_v41 = vld [vmem:[%s1371_s14 + $0x38] sm:$0xff]  }
  0x34   : > { %1096 = vmatpush3.bf16.msra.mxu0 %v1212_v21  ;;  %v1229_v38 = vld [vmem:[%s1371_s14 + $0xb0] sm:$0xff]   ;;  %v1233_v42 = vld [vmem:[%s1371_s14 + $0xb8] sm:$0xff]  }
  0x35   : > { %1130 = vmatpush3.bf16.msra.mxu1 %v1213_v22  ;;  %1097 = vmatprep.subr.bf16.mxu0 %v1214_v23  ;;  %v1234_v43 = vld [vmem:[%s1373_s15] ss:$16 sps:$4 sm:$0xff]   ;;  %v1236_v44 = vld [vmem:[%s1373_s15 + $0x4] ss:$16 sps:$4 sm:$0xff]   ;;  %v1237_v45 = vld [vmem:[%s1373_s15 + $0x8] ss:$16 sps:$4 sm:$0xff]  }
  0x36   : > { %1131 = vmatprep.subr.bf16.mxu1 %v1215_v24  ;;  %v1239_v46 = vld [vmem:[%s1373_s15 + $0xc] ss:$16 sps:$4 sm:$0xff]   ;;  %729 = vmatprep.mubr.bf16.mxu0 %v1236_v44  ;;  %v1240_v47 = vld [vmem:[%s1373_s15 + $0x24] ss:$16 sps:$4 sm:$0xff]   ;;  %v1244_v51 = vld [vmem:[%s1373_s15 + $0x20] ss:$16 sps:$4 sm:$0xff]  }
  0x37   : > { %785 = vmatprep.mubr.bf16.mxu1 %v1239_v46  ;;  %v1242_v48 = vld [vmem:[%s1373_s15 + $0x2c] ss:$16 sps:$4 sm:$0xff]   ;;  %v385_v49 = vld [vmem:[%s1373_s15 + $0x40] sm:$0xff]  ;;  %v1245_v52 = vld [vmem:[%s1373_s15 + $0x28] ss:$16 sps:$4 sm:$0xff]  }
  0x38   : > { %1098 = vmatpush3.bf16.msra.mxu0 %v1216_v25  ;;  %v386_v50 = vld [vmem:[%s1373_s15 + $0x48] sm:$0xff]  ;;  %v1048_v53 = vcombine.high %v385_v49, %v385_v49  ;;  %v1047_v55 = vcombine.low %v385_v49, %v385_v49  ;;  %v375_v25 = vld [vmem:[#allocation2 + $0x18] sm:$0xff] }
  0x39   : > { %1132 = vmatpush3.bf16.msra.mxu1 %v1217_v26  ;;  %1099 = vmatprep.subr.bf16.mxu0 %v1218_v27  ;;  %v1050_v54 = vcombine.high %v386_v50, %v386_v50  ;;  %v1049_v56 = vcombine.low %v386_v50, %v386_v50  ;;  %v374_v20 = vld [vmem:[#allocation2 + $0x10] sm:$0xff] }
  0x3a   : > { %1133 = vmatprep.subr.bf16.mxu1 %v1219_v28 }
  0x3c   : > { %1100 = vmatpush3.bf16.msra.mxu0 %v1220_v29 }
  0x3d   : > { %1134 = vmatpush3.bf16.msra.mxu1 %v1221_v30  ;;  %1101 = vmatprep.subr.bf16.mxu0 %v1222_v31 }
  0x3e   : > { %1135 = vmatprep.subr.bf16.mxu1 %v1223_v32 }
  0x40   : > { %1102 = vmatpush3.bf16.msra.mxu0 %v1224_v33 }
  0x41   : > { %1136 = vmatpush3.bf16.msra.mxu1 %v1225_v34  ;;  %1103 = vmatprep.subr.bf16.mxu0 %v1226_v35 }
  0x42   : > { %1137 = vmatprep.subr.bf16.mxu1 %v1227_v36 }
  0x44   : > { %1104 = vmatpush3.bf16.msra.mxu0 %v1228_v37 }
  0x45   : > { %1138 = vmatpush3.bf16.msra.mxu1 %v1229_v38  ;;  %1105 = vmatprep.subr.bf16.mxu0 %v1230_v39  ;;  %v376_v38 = vld [vmem:[#allocation2 + $0x20] sm:$0xff] }
  0x46   : > { %1139 = vmatprep.subr.bf16.mxu1 %v1231_v40 }
  0x48   : > { %1106 = vmatpush3.bf16.msra.mxu0 %v1232_v41 }
  0x49   : > { %1140 = vmatpush3.bf16.msra.mxu1 %v1233_v42 }
  0x4b   : > { %730 = vmatmul.mubr.bf16.vlgmr.msra.gmra.mrb[0].mxu0 %v1234_v43 }
  0x4c   : > { %786 = vmatmul.mubr.bf16.vlgmr.msra.gmra.mrb[0].mxu1 %v1237_v45  ;;  %737 = vmatprep.mubr.bf16.mxu0 %v1240_v47 }
  0x4d   : > { %793 = vmatprep.mubr.bf16.mxu1 %v1242_v48 }
  0x53   : > { %738 = vmatmul.mubr.bf16.gmra.mrb[4].mxu0 %v1244_v51 }
  0x54   : > { %794 = vmatmul.mubr.bf16.gmra.mrb[4].mxu1 %v1245_v52  ;;  %745 = vmatprep.mubr.bf16.mxu0 %v1048_v53 }
  0x55   : > { %801 = vmatprep.mubr.bf16.mxu1 %v1050_v54 }
  0x5b   : > { %746 = vmatmul.mubr.bf16.gmra.mrb[8].mxu0 %v1047_v55 }
  0x5c   : > { %802 = vmatmul.mubr.bf16.gmra.mrb[8].mxu1 %v1049_v56 }
 0x11e   : > { %v1107_v57 = vpop.f32.mrb[0].mxu0 }
 0x11f   : > { %v1141_v58 = vpop.f32.mrb[0].mxu1  ;;  %v1108_v59 = vpop.f32.mrb[1].mxu0 }
 0x120   : > { %v1109_v60 = vadd.f32 %v1108_v59, %v1107_v57  ;;  %v1142_v61 = vpop.f32.mrb[1].mxu1  ;;  %v1110_v62 = vpop.f32.mrb[2].mxu0 }
 0x121   : > { %v1143_v63 = vadd.f32 %v1142_v61, %v1141_v58  ;;  %v1144_v0 = vpop.f32.mrb[2].mxu1  ;;  %v1111_v1 = vpop.f32.mrb[3].mxu0 }
 0x122   : > { %v1112_v3 = vadd.f32 %v1111_v1, %v1110_v62  ;;  %v1145_v4 = vpop.f32.mrb[3].mxu1 }
 0x123   : > { %v788_v5 = vadd.f32 %v1143_v63, %v1109_v60  ;;  %v1146_v6 = vadd.f32 %v1145_v4, %v1144_v0 }
 0x125   : > { %v809_v8 = vadd.f32 %v788_v5, %v372_v2  ;;  %v791_v9 = vadd.f32 %v1146_v6, %v1112_v3 }
 0x126   : > { %v1113_v10 = vpop.f32.mrb[4].mxu0 }
 0x127   : > { %814 = vst [vmem:[#allocation2] sm:$0xff] %v809_v8  ;;  %v810_v11 = vadd.f32 %v791_v9, %v373_v7  ;;  %v1147_v12 = vpop.f32.mrb[4].mxu1  ;;  %v1114_v13 = vpop.f32.mrb[5].mxu0 }
 0x128   : > { %v1115_v14 = vadd.f32 %v1114_v13, %v1113_v10  ;;  %v1148_v15 = vpop.f32.mrb[5].mxu1  ;;  %v1116_v16 = vpop.f32.mrb[6].mxu0 }
 0x129   : > { %815 = vst [vmem:[#allocation2 + $0x8] sm:$0xff] %v810_v11  ;;  %v1149_v17 = vadd.f32 %v1148_v15, %v1147_v12  ;;  %v1150_v18 = vpop.f32.mrb[6].mxu1  ;;  %v1117_v19 = vpop.f32.mrb[7].mxu0 }
 0x12a   : > { %v1118_v21 = vadd.f32 %v1117_v19, %v1116_v16  ;;  %v1151_v22 = vpop.f32.mrb[7].mxu1 }
 0x12b   : > { %v796_v23 = vadd.f32 %v1149_v17, %v1115_v14  ;;  %v1152_v24 = vadd.f32 %v1151_v22, %v1150_v18 }
 0x12d   : > { %v811_v26 = vadd.f32 %v796_v23, %v374_v20  ;;  %v799_v27 = vadd.f32 %v1152_v24, %v1118_v21 }
 0x12e   : > { %v1119_v28 = vpop.f32.mrb[8].mxu0  ;;  %v823_v42 = vld [vmem:[#allocation2] sm:$0xff] (!%p1083_p11) }
 0x12f   : > { %816 = vst [vmem:[#allocation2 + $0x10] sm:$0xff] %v811_v26  ;;  %v812_v29 = vadd.f32 %v799_v27, %v375_v25  ;;  %v1153_v30 = vpop.f32.mrb[8].mxu1  ;;  %v1120_v31 = vpop.f32.mrb[9].mxu0  ;;  %869 = vst [vmem:[%s1458_s3] sm:$0xff] (!%p1083_p11), %v823_v42  ;;  %v838_v48 = vmul.f32 (!%p1083_p11), %v823_v42, %v823_v42 }
 0x130   : > { %v1121_v32 = vadd.f32 %v1120_v31, %v1119_v28  ;;  %v1154_v33 = vpop.f32.mrb[9].mxu1  ;;  %v1122_v34 = vpop.f32.mrb[10].mxu0  ;;  %v824_v43 = vld [vmem:[#allocation2 + $0x8] sm:$0xff] (!%p1083_p11) }
 0x131   : > { %817 = vst [vmem:[#allocation2 + $0x18] sm:$0xff] %v812_v29  ;;  %v1155_v35 = vadd.f32 %v1154_v33, %v1153_v30  ;;  %v1156_v36 = vpop.f32.mrb[10].mxu1  ;;  %v1123_v37 = vpop.f32.mrb[11].mxu0  ;;  %822 = sbr.rel (%p1083_p11) target bundleno = 336 (0x150), region = 63  ;;  %v828_v47 = vadd.f32 (!%p1083_p11), %v824_v43, %v823_v42  ;;  %870 = vst [vmem:[%s1458_s3 + $0x8] sm:$0xff] (!%p1083_p11), %v824_v43  ;;  %v839_v49 = vmul.f32 (!%p1083_p11), %v824_v43, %v824_v43 }
 0x132   : > { %v1157_v39 = vpop.f32.mrb[11].mxu1 }
 0x133   : > { %v804_v40 = vadd.f32 %v1155_v35, %v1121_v32  ;;  %v843_v53 = vadd.f32 (!%p1083_p11), %v839_v49, %v838_v48 }
 0x135   : > { %v813_v41 = vadd.f32 %v804_v40, %v376_v38 }
 0x136   : > { %v825_v44 = vld [vmem:[#allocation2 + $0x10] sm:$0xff] (!%p1083_p11) }
 0x137   : > { %818 = vst [vmem:[#allocation2 + $0x20] sm:$0xff] %v813_v41  ;;  %871 = vst [vmem:[%s1458_s3 + $0x10] sm:$0xff] (!%p1083_p11), %v825_v44  ;;  %v840_v50 = vmul.f32 (!%p1083_p11), %v825_v44, %v825_v44  ;;  %v829_v51 = vadd.f32 (!%p1083_p11), %v828_v47, %v825_v44 }
 0x138   : > { %v826_v45 = vld [vmem:[#allocation2 + $0x18] sm:$0xff] }
 0x139   : > { %872 = vst [vmem:[%s1458_s3 + $0x18] sm:$0xff] %v826_v45  ;;  %v841_v52 = vmul.f32 %v826_v45, %v826_v45  ;;  %v830_v54 = vadd.f32 %v829_v51, %v826_v45  ;;  %v844_v56 = vadd.f32 %v843_v53, %v840_v50 }
 0x13b   : > { %v845_v58 = vadd.f32 %v844_v56, %v841_v52 }
 0x13e   : > { %v827_v46 = vld [vmem:[#allocation2 + $0x20] sm:$0xff] }
 0x13f   : > { %873 = vst [vmem:[%s1458_s3 + $0x20] sm:$0xff] %v827_v46  ;;  %v842_v55 = vmul.f32 %v827_v46, %v827_v46  ;;  %v831_v57 = vadd.f32 %v830_v54, %v827_v46 }
 0x141   : > { %v832_v59 = vrot.slane %v831_v57, 4  ;;  %v846_v60 = vadd.f32 %v845_v58, %v842_v55 }
 0x143   : > { %v833_v61 = vadd.f32 %v832_v59, %v831_v57  ;;  %v847_v62 = vrot.slane %v846_v60, 4 }
 0x145   : > { %v834_v63 = vrot.slane %v833_v61, 2  ;;  %v848_v0 = vadd.f32 %v847_v62, %v846_v60 }
 0x147   : > { %v835_v1 = vadd.f32 %v834_v63, %v833_v61  ;;  %v849_v2 = vrot.slane %v848_v0, 2 }
 0x149   : > { %v836_v3 = vrot.slane %v835_v1, 1  ;;  %v850_v4 = vadd.f32 %v849_v2, %v848_v0 }
 0x14b   : > { %v837_v5 = vadd.f32 %v836_v3, %v835_v1  ;;  %v851_v6 = vrot.slane %v850_v4, 1 }
 0x14d   : > { %857 = vst [vmem:[%s1459_s4] sm:$0x1] %v837_v5  ;;  %v852_v7 = vadd.f32 %v851_v6, %v850_v4 }
 0x14f   : > { %858 = vst [vmem:[%s1460_s5] sm:$0x1] %v852_v7 }
 0x150 PF: > { %s16_s22 = sadd.s32 1, %s1288_s22   ;;  %s1461_s18 = smov %s1276_s19 }
 0x151   : > { %p13_p12 = scmp.ge.s32.totalorder %s16_s22, 4   ;;  %s1462_s19 = smov %s1356_s25 }
 0x152   : > { %s1463_s20 = smov %s1284_s21  ;;  %s1464_s21 = smov %s1466_s2 }
 0x153   :  { %15 = sbr.rel (!%p13_p12) target bundleno = 3 (0x3), region = 136 }

// kernel: multiscale_forward.28
= control target key start
LH: loop header
LB: loop body
LE: loop exit
PB: predicated region body
PF: predicated region fallthrough
CT: control target
= control target key end

     0   :  { %s161_s0 = inlined_call_operand.vmem [shape: f32[40,128], index: 0, kind: input, shape index: {}]   ;;  %s162_s1 = inlined_call_operand.vmem [shape: f32[1,128], index: 1, kind: input, shape index: {}]   ;;  %s163_s2 = inlined_call_operand.vmem [shape: f32[1,128], index: 2, kind: input, shape index: {}]   ;;  %s164_s3 = inlined_call_operand.vmem [shape: bf16[40,128], index: 3, kind: output, shape index: {}]  }
   0x1   :  { %v14_v0 = vld [vmem:[%s161_s0] sm:$0xff]  ;;  %v15_v1 = vld [vmem:[%s161_s0 + $0x8] sm:$0xff]  ;;  %v16_v6 = vld [vmem:[%s161_s0 + $0x10] sm:$0xff] }
   0x2   :  { %v88_v2 = vld [vmem:[%s162_s1] ss:$0 sm:$0xff]  ;;  %v17_v7 = vld [vmem:[%s161_s0 + $0x18] sm:$0xff] }
   0x3   :  { %v26_v3 = vmul.f32 %v88_v2, %v14_v0  ;;  %v27_v4 = vmul.f32 %v88_v2, %v15_v1  ;;  %v89_v5 = vld [vmem:[%s163_s2] ss:$0 sm:$0xff]  ;;  %v28_v8 = vmul.f32 %v88_v2, %v16_v6  ;;  %v29_v9 = vmul.f32 %v88_v2, %v17_v7 }
   0x4   :  { %v18_v10 = vld [vmem:[%s161_s0 + $0x20] sm:$0xff] }
   0x5   :  { %v38_v11 = vadd.f32 %v89_v5, %v26_v3  ;;  %v39_v12 = vadd.f32 %v89_v5, %v27_v4  ;;  %v30_v13 = vmul.f32 %v88_v2, %v18_v10  ;;  %v40_v14 = vadd.f32 %v89_v5, %v28_v8 }
   0x6   :  { %v41_v15 = vadd.f32 %v89_v5, %v29_v9 }
   0x7   :  { %vm43_vm0 = vcmp.ge.f32.partialorder %v38_v11, 0.0  ;;  %vm44_vm1 = vcmp.ge.f32.partialorder %v39_v12, 0.0  ;;  %v48_v16 = vmul.f32 0.2, %v38_v11  ;;  %v49_v17 = vmul.f32 0.2, %v39_v12 }
   0x8   :  { %vm45_vm2 = vcmp.ge.f32.partialorder %v40_v14, 0.0  ;;  %vm46_vm3 = vcmp.ge.f32.partialorder %v41_v15, 0.0  ;;  %v50_v18 = vmul.f32 0.2, %v40_v14  ;;  %v51_v19 = vmul.f32 0.2, %v41_v15 }
   0x9   :  { %v53_v20 = vsel %vm43_vm0, %v38_v11, %v48_v16  ;;  %v54_v21 = vsel %vm44_vm1, %v39_v12, %v49_v17  ;;  %v42_v22 = vadd.f32 %v89_v5, %v30_v13 }
   0xa   :  { %v103_v23 = vpack.c.bf16 %v54_v21, %v53_v20  ;;  %v55_v24 = vsel %vm45_vm2, %v40_v14, %v50_v18  ;;  %v56_v25 = vsel %vm46_vm3, %v41_v15, %v51_v19 }
   0xb   :  { %v108_v26 = vpack.c.bf16 %v56_v25, %v55_v24  ;;  %vm47_vm4 = vcmp.ge.f32.partialorder %v42_v22, 0.0  ;;  %v52_v27 = vmul.f32 0.2, %v42_v22 }
   0xc   :  { %104 = vst [vmem:[%s164_s3] sm:$0xff] %v103_v23  }
   0xd   :  { %110 = vst [vmem:[%s164_s3 + $0x8] sm:$0xff] %v108_v26   ;;  %v57_v28 = vsel %vm47_vm4, %v42_v22, %v52_v27 }
   0xe   :  { %v99_v29 = vpack.c.bf16 %v57_v28, %v57_v28 }
  0x10   :  { %83 = vst [vmem:[%s164_s3 + $0x10] sm:$0xf] %v99_v29 }

// kernel: multiscale_forward.29
= control target key start
LH: loop header
LB: loop body
LE: loop exit
PB: predicated region body
PF: predicated region fallthrough
CT: control target
= control target key end

     0   :  { %s1610_s18 = smov 0   ;;  %s1612_s19 = smov 0   ;;  %s1831_s0 = inlined_call_operand.vmem [shape: bf16[96,2048], index: 0, kind: input, shape index: {}]   ;;  %s1832_s1 = inlined_call_operand.vmem [shape: bf16[2048,128], index: 1, kind: input, shape index: {}]   ;;  %s1833_s2 = inlined_call_operand.vmem [shape: f32[1,128], index: 2, kind: input, shape index: {}]   ;;  %s1834_s3 = inlined_call_operand.vmem [shape: f32[96,128], index: 3, kind: output, shape index: {0}]   ;;  %s1835_s4 = inlined_call_operand.vmem [shape: f32[1,128], index: 4, kind: output, shape index: {1}]   ;;  %s1836_s5 = inlined_call_operand.vmem [shape: f32[1,128], index: 5, kind: output, shape index: {2}]  }
   0x1   :  { %s1614_s20 = smov 0   ;;  %s1616_s21 = smov 0  }
   0x2   :  { %s1618_s22 = smov 0  }
   0x3 LB: > { %s28_s2 = sadd.s32 1, %s1573_s21  ;;  %p51_p1 = scmp.ne.s32.totalorder %s1565_s19, %s1561_s18  ;;  %s1577_s22 = sphi %s1618_s22, %s16_s22   ;;  %s1573_s21 = sphi %s1616_s21, %s1840_s21   ;;  %s1569_s20 = sphi %s1614_s20, %s1839_s20   ;;  %s1565_s19 = sphi %s1612_s19, %s1838_s19   ;;  %s1561_s18 = sphi %s1610_s18, %s1837_s18  }
   0x4   : > { %p29_p0 = scmp.ge.s32.totalorder %s28_s2, 4  ;;  %p52_p2 = scmp.eq.s32.totalorder %s1577_s22, 0 }
   0x5   : > { %s44_s24 = sadd.s32 1, %s1565_s19  ;;  %p1253_p5 = scmp.ge.s32.totalorder %s1577_s22, 4 }
   0x6   : > { %s1842_s2 = smov (%p29_p0, %s28_s2), 0  ;;  %p53_p3 = por %p52_p2, %p51_p1 }
   0x7   : > { %s40_s23 = ssub.s32 %s1573_s21, %s1842_s2  ;;  %217 = sbr.rel (%p1253_p5) target bundleno = 30 (0x1e), region = 20 }
   0x8   : > { %p42_p4 = scmp.eq.s32.totalorder %s40_s23, 0 }
   0xa   : > { %s1645_s25 = scalar_select %p42_p4, %s1565_s19, %s44_s24  }
   0xe   : > { %220 = sbr.rel (!%p53_p3) target bundleno = 30 (0x1e), region = 24  ;;  %s222_s26 = sand.u32 (%p53_p3), 1, %s1565_s19  }
   0xf   : > { %s1323_s27 = sshll.u32 (%p53_p3), %s1573_s21, 4  ;;  %s1428_s28 = smul.u32 (%p53_p3), 192, %s222_s26 }
  0x10   : > { %s1653_s6 = scalar_lea.vmem (%p53_p3), %s1831_s0, %s1323_s27 }
  0x11   : > { %v243_v0 = vld [vmem:[%s1653_s6] sm:$0xff] (%p53_p3)  ;;  %v245_v1 = vld [vmem:[%s1653_s6 + $0x8] sm:$0xff] (%p53_p3)  ;;  %s1661_s7 = scalar_lea.vmem (%p53_p3), [#allocation3], %s1428_s28 }
  0x12   : > { %v247_v2 = vld [vmem:[%s1653_s6 + $0x40] sm:$0xff] (%p53_p3)  ;;  %v249_v3 = vld [vmem:[%s1653_s6 + $0x48] sm:$0xff] (%p53_p3)  ;;  %244 = vst [vmem:[%s1661_s7] sm:$0xff] (%p53_p3), %v243_v0  ;;  %246 = vst [vmem:[%s1661_s7 + $0x8] sm:$0xff] (%p53_p3), %v245_v1 }
  0x13   : > { %v251_v4 = vld [vmem:[%s1653_s6 + $0x80] sm:$0xff] (%p53_p3)  ;;  %v253_v5 = vld [vmem:[%s1653_s6 + $0x88] sm:$0xff] (%p53_p3)  ;;  %248 = vst [vmem:[%s1661_s7 + $0x10] sm:$0xff] (%p53_p3), %v247_v2  ;;  %250 = vst [vmem:[%s1661_s7 + $0x18] sm:$0xff] (%p53_p3), %v249_v3 }
  0x14   : > { %252 = vst [vmem:[%s1661_s7 + $0x20] sm:$0xff] (%p53_p3), %v251_v4  ;;  %254 = vst [vmem:[%s1661_s7 + $0x28] sm:$0xff] (%p53_p3), %v253_v5  ;;  %v255_v6 = vld [vmem:[%s1653_s6 + $0xc0] sm:$0xff] (%p53_p3)  ;;  %v257_v7 = vld [vmem:[%s1653_s6 + $0xc8] sm:$0xff] (%p53_p3) }
  0x15   : > { %v259_v8 = vld [vmem:[%s1653_s6 + $0x100] sm:$0xff]  ;;  %256 = vst [vmem:[%s1661_s7 + $0x30] sm:$0xff] %v255_v6  ;;  %258 = vst [vmem:[%s1661_s7 + $0x38] sm:$0xff] %v257_v7  ;;  %v261_v9 = vld [vmem:[%s1653_s6 + $0x108] sm:$0xff] }
  0x16   : > { %260 = vst [vmem:[%s1661_s7 + $0x40] sm:$0xff] %v259_v8  ;;  %v263_v10 = vld [vmem:[%s1653_s6 + $0x140] sm:$0xff]  ;;  %v265_v11 = vld [vmem:[%s1653_s6 + $0x148] sm:$0xff]  ;;  %262 = vst [vmem:[%s1661_s7 + $0x48] sm:$0xff] %v261_v9 }
  0x17   : > { %264 = vst [vmem:[%s1661_s7 + $0x50] sm:$0xff] %v263_v10  ;;  %266 = vst [vmem:[%s1661_s7 + $0x58] sm:$0xff] %v265_v11  ;;  %v267_v12 = vld [vmem:[%s1653_s6 + $0x180] sm:$0xff]  ;;  %v269_v13 = vld [vmem:[%s1653_s6 + $0x188] sm:$0xff] }
  0x18   : > { %v271_v14 = vld [vmem:[%s1653_s6 + $0x1c0] sm:$0xff]  ;;  %268 = vst [vmem:[%s1661_s7 + $0x60] sm:$0xff] %v267_v12  ;;  %270 = vst [vmem:[%s1661_s7 + $0x68] sm:$0xff] %v269_v13  ;;  %v273_v15 = vld [vmem:[%s1653_s6 + $0x1c8] sm:$0xff] }
  0x19   : > { %272 = vst [vmem:[%s1661_s7 + $0x70] sm:$0xff] %v271_v14  ;;  %v275_v16 = vld [vmem:[%s1653_s6 + $0x200] sm:$0xff]  ;;  %v277_v17 = vld [vmem:[%s1653_s6 + $0x208] sm:$0xff]  ;;  %274 = vst [vmem:[%s1661_s7 + $0x78] sm:$0xff] %v273_v15 }
  0x1a   : > { %276 = vst [vmem:[%s1661_s7 + $0x80] sm:$0xff] %v275_v16  ;;  %278 = vst [vmem:[%s1661_s7 + $0x88] sm:$0xff] %v277_v17  ;;  %v279_v18 = vld [vmem:[%s1653_s6 + $0x240] sm:$0xff]  ;;  %v281_v19 = vld [vmem:[%s1653_s6 + $0x248] sm:$0xff] }
  0x1b   : > { %v283_v20 = vld [vmem:[%s1653_s6 + $0x280] sm:$0xff]  ;;  %280 = vst [vmem:[%s1661_s7 + $0x90] sm:$0xff] %v279_v18  ;;  %282 = vst [vmem:[%s1661_s7 + $0x98] sm:$0xff] %v281_v19  ;;  %v285_v21 = vld [vmem:[%s1653_s6 + $0x288] sm:$0xff] }
  0x1c   : > { %284 = vst [vmem:[%s1661_s7 + $0xa0] sm:$0xff] %v283_v20  ;;  %v287_v22 = vld [vmem:[%s1653_s6 + $0x2c0] sm:$0xff]  ;;  %v289_v23 = vld [vmem:[%s1653_s6 + $0x2c8] sm:$0xff]  ;;  %286 = vst [vmem:[%s1661_s7 + $0xa8] sm:$0xff] %v285_v21 }
  0x1d   : > { %288 = vst [vmem:[%s1661_s7 + $0xb0] sm:$0xff] %v287_v22  ;;  %290 = vst [vmem:[%s1661_s7 + $0xb8] sm:$0xff] %v289_v23 }
  0x1e PF: > { %p1256_p6 = scmp.ge.s32.totalorder %s1577_s22, 1  ;;  %p307_p7 = scmp.lt.s32.totalorder %s1577_s22, 5 }
  0x20   : > { %p308_p8 = pnand %p1256_p6, %p307_p7 }
  0x21   : > { %s314_s8 = sand.u32 (!%p308_p8), 1, %s1561_s18   ;;  %s1257_s9 = sshll.u32 (!%p308_p8), %s1569_s20, 6 }
  0x22   : > { %311 = sbr.rel (%p308_p8) target bundleno = 370 (0x172), region = 51  ;;  %p364_p9 = scmp.lt.s32.totalorder (!%p308_p8), %s1257_s9, 255 }
  0x23   : > { %s1429_s10 = smul.u32 (!%p308_p8), 192, %s314_s8  ;;  %p1259_p10 = scmp.ne.s32.totalorder (!%p308_p8), %s1569_s20, 0 }
  0x25   : > { %s1714_s15 = scalar_lea.vmem (!%p308_p8), [#allocation3], %s1429_s10 }
  0x29   : > { %s1844_s9 = smov (!%p364_p9, %s1257_s9), 255  ;;  %394 = sbr.rel (%p1259_p10) target bundleno = 49 (0x31), region = 59 }
  0x2a   : > { %s1258_s11 = sshll.u32 %s1844_s9, 2  ;;  %v1579_v24 = vmov (!%p1259_p10), 0.0  }
  0x2b   : > { %s1712_s14 = scalar_lea.vmem %s1832_s1, %s1258_s11  ;;  %395 = vst [vmem:[#allocation2] sm:$0xff] (!%p1259_p10), %v1579_v24  ;;  %396 = vst [vmem:[#allocation2 + $0x8] sm:$0xff] (!%p1259_p10), %v1579_v24 }
  0x2c   : > { %397 = vst [vmem:[#allocation2 + $0x10] sm:$0xff] (!%p1259_p10), %v1579_v24  ;;  %398 = vst [vmem:[#allocation2 + $0x18] sm:$0xff] (!%p1259_p10), %v1579_v24 }
  0x2d   : > { %399 = vst [vmem:[#allocation2 + $0x20] sm:$0xff] (!%p1259_p10), %v1579_v24  ;;  %400 = vst [vmem:[#allocation2 + $0x28] sm:$0xff] (!%p1259_p10), %v1579_v24 }
  0x2e   : > { %401 = vst [vmem:[#allocation2 + $0x30] sm:$0xff] (!%p1259_p10), %v1579_v24  ;;  %402 = vst [vmem:[#allocation2 + $0x38] sm:$0xff] (!%p1259_p10), %v1579_v24 }
  0x2f   : > { %403 = vst [vmem:[#allocation2 + $0x40] sm:$0xff] (!%p1259_p10), %v1579_v24  ;;  %404 = vst [vmem:[#allocation2 + $0x48] sm:$0xff] (!%p1259_p10), %v1579_v24 }
  0x30   : > { %405 = vst [vmem:[#allocation2 + $0x50] sm:$0xff] %v1579_v24  ;;  %406 = vst [vmem:[#allocation2 + $0x58] sm:$0xff] %v1579_v24 }
  0x31 PF: > { %v1471_v25 = vld [vmem:[%s1712_s14 + $0x40] sm:$0xff]   ;;  %v1475_v29 = vld [vmem:[%s1712_s14 + $0x48] sm:$0xff]   ;;  %v1479_v33 = vld [vmem:[%s1712_s14 + $0x50] sm:$0xff]   ;;  %p1316_p11 = scmp.ne.s32.totalorder %s1569_s20, 3 }
  0x32   : > { %v1472_v26 = vld [vmem:[%s1712_s14 + $0xc0] sm:$0xff]   ;;  %1324 = vmatprep.subr.bf16.mxu0 %v1471_v25  ;;  %v1476_v30 = vld [vmem:[%s1712_s14 + $0xc8] sm:$0xff]   ;;  %v1480_v34 = vld [vmem:[%s1712_s14 + $0xd0] sm:$0xff]  }
  0x33   : > { %v1473_v27 = vld [vmem:[%s1712_s14] sm:$0xff]   ;;  %1376 = vmatprep.subr.bf16.mxu1 %v1472_v26  ;;  %v1477_v31 = vld [vmem:[%s1712_s14 + $0x8] sm:$0xff]   ;;  %v1481_v35 = vld [vmem:[%s1712_s14 + $0x10] sm:$0xff]  }
  0x34   : > { %v1474_v28 = vld [vmem:[%s1712_s14 + $0x80] sm:$0xff]   ;;  %1325 = vmatpush3.bf16.msra.mxu0 %v1473_v27  ;;  %v1478_v32 = vld [vmem:[%s1712_s14 + $0x88] sm:$0xff]   ;;  %v1482_v36 = vld [vmem:[%s1712_s14 + $0x90] sm:$0xff]  }
  0x35   : > { %1377 = vmatpush3.bf16.msra.mxu1 %v1474_v28  ;;  %1326 = vmatprep.subr.bf16.mxu0 %v1475_v29  ;;  %v1483_v37 = vld [vmem:[%s1712_s14 + $0x58] sm:$0xff]   ;;  %v1487_v41 = vld [vmem:[%s1712_s14 + $0x60] sm:$0xff]   ;;  %v1491_v45 = vld [vmem:[%s1712_s14 + $0x68] sm:$0xff]  }
  0x36   : > { %1378 = vmatprep.subr.bf16.mxu1 %v1476_v30  ;;  %v1484_v38 = vld [vmem:[%s1712_s14 + $0xd8] sm:$0xff]   ;;  %v1488_v42 = vld [vmem:[%s1712_s14 + $0xe0] sm:$0xff]   ;;  %v1492_v46 = vld [vmem:[%s1712_s14 + $0xe8] sm:$0xff]  }
  0x37   : > { %v1485_v39 = vld [vmem:[%s1712_s14 + $0x18] sm:$0xff]   ;;  %v1489_v43 = vld [vmem:[%s1712_s14 + $0x20] sm:$0xff]   ;;  %v1493_v47 = vld [vmem:[%s1712_s14 + $0x28] sm:$0xff]  }
  0x38   : > { %1327 = vmatpush3.bf16.msra.mxu0 %v1477_v31  ;;  %v1486_v40 = vld [vmem:[%s1712_s14 + $0x98] sm:$0xff]   ;;  %v1490_v44 = vld [vmem:[%s1712_s14 + $0xa0] sm:$0xff]   ;;  %v1494_v48 = vld [vmem:[%s1712_s14 + $0xa8] sm:$0xff]  }
  0x39   : > { %1379 = vmatpush3.bf16.msra.mxu1 %v1478_v32  ;;  %1328 = vmatprep.subr.bf16.mxu0 %v1479_v33  ;;  %v1495_v49 = vld [vmem:[%s1712_s14 + $0x70] sm:$0xff]   ;;  %v1499_v53 = vld [vmem:[%s1712_s14 + $0x78] sm:$0xff]   ;;  %v407_v26 = vld [vmem:[#allocation2] sm:$0xff] }
  0x3a   : > { %1380 = vmatprep.subr.bf16.mxu1 %v1480_v34  ;;  %v1496_v50 = vld [vmem:[%s1712_s14 + $0xf0] sm:$0xff]   ;;  %v1500_v54 = vld [vmem:[%s1712_s14 + $0xf8] sm:$0xff]   ;;  %v408_v31 = vld [vmem:[#allocation2 + $0x8] sm:$0xff] }
  0x3b   : > { %v1497_v51 = vld [vmem:[%s1712_s14 + $0x30] sm:$0xff]   ;;  %v1501_v55 = vld [vmem:[%s1712_s14 + $0x38] sm:$0xff]  }
  0x3c   : > { %1329 = vmatpush3.bf16.msra.mxu0 %v1481_v35  ;;  %v1498_v52 = vld [vmem:[%s1712_s14 + $0xb0] sm:$0xff]   ;;  %v1502_v56 = vld [vmem:[%s1712_s14 + $0xb8] sm:$0xff]  }
  0x3d   : > { %1381 = vmatpush3.bf16.msra.mxu1 %v1482_v36  ;;  %1330 = vmatprep.subr.bf16.mxu0 %v1483_v37  ;;  %v1503_v57 = vld [vmem:[%s1714_s15] ss:$16 sps:$4 sm:$0xff]   ;;  %v1505_v58 = vld [vmem:[%s1714_s15 + $0x4] ss:$16 sps:$4 sm:$0xff]   ;;  %v1506_v59 = vld [vmem:[%s1714_s15 + $0x8] ss:$16 sps:$4 sm:$0xff]  }
  0x3e   : > { %1382 = vmatprep.subr.bf16.mxu1 %v1484_v38  ;;  %v1508_v60 = vld [vmem:[%s1714_s15 + $0xc] ss:$16 sps:$4 sm:$0xff]   ;;  %851 = vmatprep.mubr.bf16.mxu0 %v1505_v58  ;;  %v1509_v61 = vld [vmem:[%s1714_s15 + $0x24] ss:$16 sps:$4 sm:$0xff]   ;;  %v1513_v63 = vld [vmem:[%s1714_s15 + $0x20] ss:$16 sps:$4 sm:$0xff]  }
  0x3f   : > { %932 = vmatprep.mubr.bf16.mxu1 %v1508_v60  ;;  %v1511_v62 = vld [vmem:[%s1714_s15 + $0x2c] ss:$16 sps:$4 sm:$0xff]   ;;  %v1514_v0 = vld [vmem:[%s1714_s15 + $0x28] ss:$16 sps:$4 sm:$0xff]   ;;  %v1515_v1 = vld [vmem:[%s1714_s15 + $0x44] ss:$16 sps:$4 sm:$0xff]  }
  0x40   : > { %1331 = vmatpush3.bf16.msra.mxu0 %v1485_v39  ;;  %v1517_v2 = vld [vmem:[%s1714_s15 + $0x4c] ss:$16 sps:$4 sm:$0xff]   ;;  %v1519_v3 = vld [vmem:[%s1714_s15 + $0x40] ss:$16 sps:$4 sm:$0xff]   ;;  %v1520_v4 = vld [vmem:[%s1714_s15 + $0x48] ss:$16 sps:$4 sm:$0xff]  }
  0x41   : > { %1383 = vmatpush3.bf16.msra.mxu1 %v1486_v40  ;;  %1332 = vmatprep.subr.bf16.mxu0 %v1487_v41  ;;  %v1521_v5 = vld [vmem:[%s1714_s15 + $0x64] ss:$16 sps:$4 sm:$0xff]   ;;  %v1523_v6 = vld [vmem:[%s1714_s15 + $0x6c] ss:$16 sps:$4 sm:$0xff]   ;;  %v1525_v7 = vld [vmem:[%s1714_s15 + $0x60] ss:$16 sps:$4 sm:$0xff]  }
  0x42   : > { %1384 = vmatprep.subr.bf16.mxu1 %v1488_v42  ;;  %v1526_v8 = vld [vmem:[%s1714_s15 + $0x68] ss:$16 sps:$4 sm:$0xff]   ;;  %v1527_v9 = vld [vmem:[%s1714_s15 + $0x84] ss:$16 sps:$4 sm:$0xff]   ;;  %v1529_v10 = vld [vmem:[%s1714_s15 + $0x8c] ss:$16 sps:$4 sm:$0xff]  }
  0x43   : > { %v1531_v11 = vld [vmem:[%s1714_s15 + $0x80] ss:$16 sps:$4 sm:$0xff]   ;;  %v1532_v12 = vld [vmem:[%s1714_s15 + $0x88] ss:$16 sps:$4 sm:$0xff]   ;;  %v1533_v13 = vld [vmem:[%s1714_s15 + $0xa4] ss:$16 sps:$4 sm:$0xff]  }
  0x44   : > { %1333 = vmatpush3.bf16.msra.mxu0 %v1489_v43  ;;  %v1535_v14 = vld [vmem:[%s1714_s15 + $0xac] ss:$16 sps:$4 sm:$0xff]   ;;  %v1537_v15 = vld [vmem:[%s1714_s15 + $0xa0] ss:$16 sps:$4 sm:$0xff]   ;;  %v1538_v16 = vld [vmem:[%s1714_s15 + $0xa8] ss:$16 sps:$4 sm:$0xff]  }
  0x45   : > { %1385 = vmatpush3.bf16.msra.mxu1 %v1490_v44  ;;  %1334 = vmatprep.subr.bf16.mxu0 %v1491_v45  ;;  %v409_v44 = vld [vmem:[#allocation2 + $0x10] sm:$0xff] }
  0x46   : > { %1386 = vmatprep.subr.bf16.mxu1 %v1492_v46 }
  0x48   : > { %1335 = vmatpush3.bf16.msra.mxu0 %v1493_v47 }
  0x49   : > { %1387 = vmatpush3.bf16.msra.mxu1 %v1494_v48  ;;  %1336 = vmatprep.subr.bf16.mxu0 %v1495_v49  ;;  %v410_v49 = vld [vmem:[#allocation2 + $0x18] sm:$0xff] }
  0x4a   : > { %1388 = vmatprep.subr.bf16.mxu1 %v1496_v50 }
  0x4c   : > { %1337 = vmatpush3.bf16.msra.mxu0 %v1497_v51 }
  0x4d   : > { %1389 = vmatpush3.bf16.msra.mxu1 %v1498_v52  ;;  %1338 = vmatprep.subr.bf16.mxu0 %v1499_v53 }
  0x4e   : > { %1390 = vmatprep.subr.bf16.mxu1 %v1500_v54 }
  0x50   : > { %1339 = vmatpush3.bf16.msra.mxu0 %v1501_v55 }
  0x51   : > { %1391 = vmatpush3.bf16.msra.mxu1 %v1502_v56 }
  0x53   : > { %852 = vmatmul.mubr.bf16.vlgmr.msra.gmra.mrb[0].mxu0 %v1503_v57 }
  0x54   : > { %933 = vmatmul.mubr.bf16.vlgmr.msra.gmra.mrb[0].mxu1 %v1506_v59  ;;  %859 = vmatprep.mubr.bf16.mxu0 %v1509_v61 }
  0x55   : > { %940 = vmatprep.mubr.bf16.mxu1 %v1511_v62  ;;  %v411_v62 = vld [vmem:[#allocation2 + $0x20] sm:$0xff] }
  0x5b   : > { %860 = vmatmul.mubr.bf16.gmra.mrb[4].mxu0 %v1513_v63 }
  0x5c   : > { %941 = vmatmul.mubr.bf16.gmra.mrb[4].mxu1 %v1514_v0  ;;  %867 = vmatprep.mubr.bf16.mxu0 %v1515_v1 }
  0x5d   : > { %948 = vmatprep.mubr.bf16.mxu1 %v1517_v2 }
  0x63   : > { %868 = vmatmul.mubr.bf16.gmra.mrb[8].mxu0 %v1519_v3  ;;  %v412_v3 = vld [vmem:[#allocation2 + $0x28] sm:$0xff] }
  0x64   : > { %949 = vmatmul.mubr.bf16.gmra.mrb[8].mxu1 %v1520_v4  ;;  %875 = vmatprep.mubr.bf16.mxu0 %v1521_v5 }
  0x65   : > { %956 = vmatprep.mubr.bf16.mxu1 %v1523_v6 }
  0x6b   : > { %876 = vmatmul.mubr.bf16.gmra.mrb[12].mxu0 %v1525_v7 }
  0x6c   : > { %957 = vmatmul.mubr.bf16.gmra.mrb[12].mxu1 %v1526_v8  ;;  %883 = vmatprep.mubr.bf16.mxu0 %v1527_v9 }
  0x6d   : > { %964 = vmatprep.mubr.bf16.mxu1 %v1529_v10 }
  0x73   : > { %884 = vmatmul.mubr.bf16.gmra.mrb[16].mxu0 %v1531_v11 }
  0x74   : > { %965 = vmatmul.mubr.bf16.gmra.mrb[16].mxu1 %v1532_v12  ;;  %891 = vmatprep.mubr.bf16.mxu0 %v1533_v13 }
  0x75   : > { %972 = vmatprep.mubr.bf16.mxu1 %v1535_v14 }
  0x7b   : > { %892 = vmatmul.mubr.bf16.gmra.mrb[20].mxu0 %v1537_v15 }
  0x7c   : > { %973 = vmatmul.mubr.bf16.gmra.mrb[20].mxu1 %v1538_v16  ;;  %v413_v16 = vld [vmem:[#allocation2 + $0x30] sm:$0xff] }
 0x126   : > { %v1340_v17 = vpop.f32.mrb[0].mxu0 }
 0x127   : > { %v1392_v18 = vpop.f32.mrb[0].mxu1  ;;  %v1341_v19 = vpop.f32.mrb[1].mxu0 }
 0x128   : > { %v1342_v20 = vadd.f32 %v1341_v19, %v1340_v17  ;;  %v1393_v21 = vpop.f32.mrb[1].mxu1  ;;  %v1343_v22 = vpop.f32.mrb[2].mxu0 }
 0x129   : > { %v1394_v23 = vadd.f32 %v1393_v21, %v1392_v18  ;;  %v1395_v24 = vpop.f32.mrb[2].mxu1  ;;  %v1344_v25 = vpop.f32.mrb[3].mxu0  ;;  %v414_v21 = vld [vmem:[#allocation2 + $0x38] sm:$0xff] }
 0x12a   : > { %v1345_v27 = vadd.f32 %v1344_v25, %v1343_v22  ;;  %v1396_v28 = vpop.f32.mrb[3].mxu1 }
 0x12b   : > { %v935_v29 = vadd.f32 %v1394_v23, %v1342_v20  ;;  %v1397_v30 = vadd.f32 %v1396_v28, %v1395_v24 }
 0x12d   : > { %v981_v32 = vadd.f32 %v935_v29, %v407_v26  ;;  %v938_v33 = vadd.f32 %v1397_v30, %v1345_v27 }
 0x12e   : > { %v1346_v34 = vpop.f32.mrb[4].mxu0 }
 0x12f   : > { %993 = vst [vmem:[#allocation2] sm:$0xff] %v981_v32  ;;  %v982_v35 = vadd.f32 %v938_v33, %v408_v31  ;;  %v1398_v36 = vpop.f32.mrb[4].mxu1  ;;  %v1347_v37 = vpop.f32.mrb[5].mxu0 }
 0x130   : > { %v1348_v38 = vadd.f32 %v1347_v37, %v1346_v34  ;;  %v1399_v39 = vpop.f32.mrb[5].mxu1  ;;  %v1349_v40 = vpop.f32.mrb[6].mxu0  ;;  %v415_v34 = vld [vmem:[#allocation2 + $0x40] sm:$0xff] }
 0x131   : > { %994 = vst [vmem:[#allocation2 + $0x8] sm:$0xff] %v982_v35  ;;  %v1400_v41 = vadd.f32 %v1399_v39, %v1398_v36  ;;  %v1401_v42 = vpop.f32.mrb[6].mxu1  ;;  %v1350_v43 = vpop.f32.mrb[7].mxu0  ;;  %v416_v39 = vld [vmem:[#allocation2 + $0x48] sm:$0xff] }
 0x132   : > { %v1351_v45 = vadd.f32 %v1350_v43, %v1349_v40  ;;  %v1402_v46 = vpop.f32.mrb[7].mxu1 }
 0x133   : > { %v943_v47 = vadd.f32 %v1400_v41, %v1348_v38  ;;  %v1403_v48 = vadd.f32 %v1402_v46, %v1401_v42 }
 0x135   : > { %v983_v50 = vadd.f32 %v943_v47, %v409_v44  ;;  %v946_v51 = vadd.f32 %v1403_v48, %v1351_v45 }
 0x136   : > { %v1352_v52 = vpop.f32.mrb[8].mxu0 }
 0x137   : > { %995 = vst [vmem:[#allocation2 + $0x10] sm:$0xff] %v983_v50  ;;  %v984_v53 = vadd.f32 %v946_v51, %v410_v49  ;;  %v1404_v54 = vpop.f32.mrb[8].mxu1  ;;  %v1353_v55 = vpop.f32.mrb[9].mxu0 }
 0x138   : > { %v1354_v56 = vadd.f32 %v1353_v55, %v1352_v52  ;;  %v1405_v57 = vpop.f32.mrb[9].mxu1  ;;  %v1355_v58 = vpop.f32.mrb[10].mxu0  ;;  %v417_v52 = vld [vmem:[#allocation2 + $0x50] sm:$0xff] }
 0x139   : > { %996 = vst [vmem:[#allocation2 + $0x18] sm:$0xff] %v984_v53  ;;  %v1406_v59 = vadd.f32 %v1405_v57, %v1404_v54  ;;  %v1407_v60 = vpop.f32.mrb[10].mxu1  ;;  %v1356_v61 = vpop.f32.mrb[11].mxu0  ;;  %v418_v57 = vld [vmem:[#allocation2 + $0x58] sm:$0xff] }
 0x13a   : > { %v1357_v63 = vadd.f32 %v1356_v61, %v1355_v58  ;;  %v1408_v0 = vpop.f32.mrb[11].mxu1  ;;  %v1009_v61 = vld [vmem:[#allocation2] sm:$0xff] (!%p1316_p11) }
 0x13b   : > { %v951_v1 = vadd.f32 %v1406_v59, %v1354_v56  ;;  %v1409_v2 = vadd.f32 %v1408_v0, %v1407_v60  ;;  %1083 = vst [vmem:[%s1834_s3] sm:$0xff] (!%p1316_p11), %v1009_v61 }
 0x13d   : > { %v985_v4 = vadd.f32 %v951_v1, %v411_v62  ;;  %v954_v5 = vadd.f32 %v1409_v2, %v1357_v63  ;;  %v1010_v62 = vld [vmem:[#allocation2 + $0x8] sm:$0xff] (!%p1316_p11) }
 0x13e   : > { %v1358_v6 = vpop.f32.mrb[12].mxu0  ;;  %v1011_v63 = vld [vmem:[#allocation2 + $0x10] sm:$0xff] (!%p1316_p11)  ;;  %1084 = vst [vmem:[%s1834_s3 + $0x8] sm:$0xff] (!%p1316_p11), %v1010_v62 }
 0x13f   : > { %997 = vst [vmem:[#allocation2 + $0x20] sm:$0xff] %v985_v4  ;;  %v986_v7 = vadd.f32 %v954_v5, %v412_v3  ;;  %v1410_v8 = vpop.f32.mrb[12].mxu1  ;;  %v1359_v9 = vpop.f32.mrb[13].mxu0  ;;  %v1021_v3 = vadd.f32 (!%p1316_p11), %v1010_v62, %v1009_v61  ;;  %1085 = vst [vmem:[%s1834_s3 + $0x10] sm:$0xff] (!%p1316_p11), %v1011_v63  ;;  %v1038_v4 = vmul.f32 (!%p1316_p11), %v1009_v61, %v1009_v61 }
 0x140   : > { %v1360_v10 = vadd.f32 %v1359_v9, %v1358_v6  ;;  %v1411_v11 = vpop.f32.mrb[13].mxu1  ;;  %v1361_v12 = vpop.f32.mrb[14].mxu0  ;;  %v1012_v0 = vld [vmem:[#allocation2 + $0x18] sm:$0xff] (!%p1316_p11)  ;;  %v1039_v5 = vmul.f32 (!%p1316_p11), %v1010_v62, %v1010_v62  ;;  %v1040_v9 = vmul.f32 (!%p1316_p11), %v1011_v63, %v1011_v63 }
 0x141   : > { %998 = vst [vmem:[#allocation2 + $0x28] sm:$0xff] %v986_v7  ;;  %v1412_v13 = vadd.f32 %v1411_v11, %v1410_v8  ;;  %v1413_v14 = vpop.f32.mrb[14].mxu1  ;;  %v1362_v15 = vpop.f32.mrb[15].mxu0  ;;  %1086 = vst [vmem:[%s1834_s3 + $0x18] sm:$0xff] (!%p1316_p11), %v1012_v0 }
 0x142   : > { %v1363_v17 = vadd.f32 %v1362_v15, %v1361_v12  ;;  %v1414_v18 = vpop.f32.mrb[15].mxu1  ;;  %v1050_v15 = vadd.f32 (!%p1316_p11), %v1039_v5, %v1038_v4 }
 0x143   : > { %v959_v19 = vadd.f32 %v1412_v13, %v1360_v10  ;;  %v1415_v20 = vadd.f32 %v1414_v18, %v1413_v14  ;;  %v1022_v13 = vadd.f32 (!%p1316_p11), %v1021_v3, %v1011_v63  ;;  %v1041_v14 = vmul.f32 (!%p1316_p11), %v1012_v0, %v1012_v0 }
 0x144   : > { %v1051_v18 = vadd.f32 (!%p1316_p11), %v1050_v15, %v1040_v9 }
 0x145   : > { %v987_v22 = vadd.f32 %v959_v19, %v413_v16  ;;  %v962_v23 = vadd.f32 %v1415_v20, %v1363_v17  ;;  %v1023_v16 = vadd.f32 (!%p1316_p11), %v1022_v13, %v1012_v0 }
 0x146   : > { %v1364_v24 = vpop.f32.mrb[16].mxu0  ;;  %v1013_v1 = vld [vmem:[#allocation2 + $0x20] sm:$0xff] (!%p1316_p11) }
 0x147   : > { %999 = vst [vmem:[#allocation2 + $0x30] sm:$0xff] %v987_v22  ;;  %v988_v25 = vadd.f32 %v962_v23, %v414_v21  ;;  %v1416_v26 = vpop.f32.mrb[16].mxu1  ;;  %v1365_v27 = vpop.f32.mrb[17].mxu0  ;;  %1087 = vst [vmem:[%s1834_s3 + $0x20] sm:$0xff] (!%p1316_p11), %v1013_v1  ;;  %v1042_v17 = vmul.f32 (!%p1316_p11), %v1013_v1, %v1013_v1  ;;  %v1024_v19 = vadd.f32 (!%p1316_p11), %v1023_v16, %v1013_v1 }
 0x148   : > { %v1366_v28 = vadd.f32 %v1365_v27, %v1364_v24  ;;  %v1417_v29 = vpop.f32.mrb[17].mxu1  ;;  %v1367_v30 = vpop.f32.mrb[18].mxu0  ;;  %v1014_v2 = vld [vmem:[#allocation2 + $0x28] sm:$0xff] (!%p1316_p11)  ;;  %v1052_v21 = vadd.f32 (!%p1316_p11), %v1051_v18, %v1041_v14 }
 0x149   : > { %1000 = vst [vmem:[#allocation2 + $0x38] sm:$0xff] %v988_v25  ;;  %v1418_v31 = vadd.f32 %v1417_v29, %v1416_v26  ;;  %v1419_v32 = vpop.f32.mrb[18].mxu1  ;;  %v1368_v33 = vpop.f32.mrb[19].mxu0  ;;  %1088 = vst [vmem:[%s1834_s3 + $0x28] sm:$0xff] (!%p1316_p11), %v1014_v2  ;;  %v1043_v20 = vmul.f32 (!%p1316_p11), %v1014_v2, %v1014_v2  ;;  %v1025_v22 = vadd.f32 (!%p1316_p11), %v1024_v19, %v1014_v2 }
 0x14a   : > { %v1369_v35 = vadd.f32 %v1368_v33, %v1367_v30  ;;  %v1420_v36 = vpop.f32.mrb[19].mxu1  ;;  %v1053_v24 = vadd.f32 (!%p1316_p11), %v1052_v21, %v1042_v17 }
 0x14b   : > { %v967_v37 = vadd.f32 %v1418_v31, %v1366_v28  ;;  %v1421_v38 = vadd.f32 %v1420_v36, %v1419_v32 }
 0x14c   : > { %v1054_v27 = vadd.f32 (!%p1316_p11), %v1053_v24, %v1043_v20 }
 0x14d   : > { %v989_v40 = vadd.f32 %v967_v37, %v415_v34  ;;  %v970_v41 = vadd.f32 %v1421_v38, %v1369_v35 }
 0x14e   : > { %v1370_v42 = vpop.f32.mrb[20].mxu0  ;;  %v1015_v6 = vld [vmem:[#allocation2 + $0x30] sm:$0xff] (!%p1316_p11) }
 0x14f   : > { %1001 = vst [vmem:[#allocation2 + $0x40] sm:$0xff] %v989_v40  ;;  %v990_v43 = vadd.f32 %v970_v41, %v416_v39  ;;  %v1422_v44 = vpop.f32.mrb[20].mxu1  ;;  %v1371_v45 = vpop.f32.mrb[21].mxu0  ;;  %1089 = vst [vmem:[%s1834_s3 + $0x30] sm:$0xff] (!%p1316_p11), %v1015_v6  ;;  %v1044_v23 = vmul.f32 (!%p1316_p11), %v1015_v6, %v1015_v6  ;;  %v1026_v25 = vadd.f32 (!%p1316_p11), %v1025_v22, %v1015_v6 }
 0x150   : > { %v1372_v46 = vadd.f32 %v1371_v45, %v1370_v42  ;;  %v1423_v47 = vpop.f32.mrb[21].mxu1  ;;  %v1373_v48 = vpop.f32.mrb[22].mxu0  ;;  %v1016_v7 = vld [vmem:[#allocation2 + $0x38] sm:$0xff] (!%p1316_p11) }
 0x151   : > { %1002 = vst [vmem:[#allocation2 + $0x48] sm:$0xff] %v990_v43  ;;  %v1424_v49 = vadd.f32 %v1423_v47, %v1422_v44  ;;  %v1425_v50 = vpop.f32.mrb[22].mxu1  ;;  %v1374_v51 = vpop.f32.mrb[23].mxu0  ;;  %1090 = vst [vmem:[%s1834_s3 + $0x38] sm:$0xff] (!%p1316_p11), %v1016_v7  ;;  %v1045_v26 = vmul.f32 (!%p1316_p11), %v1016_v7, %v1016_v7  ;;  %v1027_v28 = vadd.f32 (!%p1316_p11), %v1026_v25, %v1016_v7 }
 0x152   : > { %v1375_v53 = vadd.f32 %v1374_v51, %v1373_v48  ;;  %v1426_v54 = vpop.f32.mrb[23].mxu1  ;;  %v1055_v30 = vadd.f32 (!%p1316_p11), %v1054_v27, %v1044_v23 }
 0x153   : > { %v975_v55 = vadd.f32 %v1424_v49, %v1372_v46  ;;  %v1427_v56 = vadd.f32 %v1426_v54, %v1425_v50  ;;  %1008 = sbr.rel (%p1316_p11) target bundleno = 370 (0x172), region = 63 }
 0x154   : > { %v1056_v33 = vadd.f32 (!%p1316_p11), %v1055_v30, %v1045_v26 }
 0x155   : > { %v991_v58 = vadd.f32 %v975_v55, %v417_v52  ;;  %v978_v59 = vadd.f32 %v1427_v56, %v1375_v53 }
 0x156   : > { %v1017_v8 = vld [vmem:[#allocation2 + $0x40] sm:$0xff] (!%p1316_p11) }
 0x157   : > { %1003 = vst [vmem:[#allocation2 + $0x50] sm:$0xff] %v991_v58  ;;  %v992_v60 = vadd.f32 %v978_v59, %v418_v57  ;;  %1091 = vst [vmem:[%s1834_s3 + $0x40] sm:$0xff] (!%p1316_p11), %v1017_v8  ;;  %v1046_v29 = vmul.f32 (!%p1316_p11), %v1017_v8, %v1017_v8  ;;  %v1028_v31 = vadd.f32 (!%p1316_p11), %v1027_v28, %v1017_v8 }
 0x158   : > { %v1018_v10 = vld [vmem:[#allocation2 + $0x48] sm:$0xff] (!%p1316_p11) }
 0x159   : > { %1004 = vst [vmem:[#allocation2 + $0x58] sm:$0xff] %v992_v60  ;;  %1092 = vst [vmem:[%s1834_s3 + $0x48] sm:$0xff] (!%p1316_p11), %v1018_v10  ;;  %v1047_v32 = vmul.f32 (!%p1316_p11), %v1018_v10, %v1018_v10  ;;  %v1029_v34 = vadd.f32 (!%p1316_p11), %v1028_v31, %v1018_v10  ;;  %v1057_v36 = vadd.f32 (!%p1316_p11), %v1056_v33, %v1046_v29 }
 0x15b   : > { %v1058_v39 = vadd.f32 %v1057_v36, %v1047_v32 }
 0x15e   : > { %v1019_v11 = vld [vmem:[#allocation2 + $0x50] sm:$0xff] }
 0x15f   : > { %1093 = vst [vmem:[%s1834_s3 + $0x50] sm:$0xff] %v1019_v11  ;;  %v1048_v35 = vmul.f32 %v1019_v11, %v1019_v11  ;;  %v1030_v37 = vadd.f32 %v1029_v34, %v1019_v11 }
 0x160   : > { %v1020_v12 = vld [vmem:[#allocation2 + $0x58] sm:$0xff] }
 0x161   : > { %1094 = vst [vmem:[%s1834_s3 + $0x58] sm:$0xff] %v1020_v12  ;;  %v1049_v38 = vmul.f32 %v1020_v12, %v1020_v12  ;;  %v1031_v40 = vadd.f32 %v1030_v37, %v1020_v12  ;;  %v1059_v41 = vadd.f32 %v1058_v39, %v1048_v35 }
 0x163   : > { %v1032_v42 = vrot.slane %v1031_v40, 4  ;;  %v1060_v43 = vadd.f32 %v1059_v41, %v1049_v38 }
 0x165   : > { %v1033_v44 = vadd.f32 %v1032_v42, %v1031_v40  ;;  %v1061_v45 = vrot.slane %v1060_v43, 4 }
 0x167   : > { %v1034_v46 = vrot.slane %v1033_v44, 2  ;;  %v1062_v47 = vadd.f32 %v1061_v45, %v1060_v43 }
 0x169   : > { %v1035_v48 = vadd.f32 %v1034_v46, %v1033_v44  ;;  %v1063_v49 = vrot.slane %v1062_v47, 2 }
 0x16b   : > { %v1036_v50 = vrot.slane %v1035_v48, 1  ;;  %v1064_v51 = vadd.f32 %v1063_v49, %v1062_v47 }
 0x16d   : > { %v1037_v52 = vadd.f32 %v1036_v50, %v1035_v48  ;;  %v1065_v53 = vrot.slane %v1064_v51, 1 }
 0x16f   : > { %1071 = vst [vmem:[%s1835_s4] sm:$0x1] %v1037_v52  ;;  %v1066_v54 = vadd.f32 %v1065_v53, %v1064_v51 }
 0x171   : > { %1072 = vst [vmem:[%s1836_s5] sm:$0x1] %v1066_v54 }
 0x172 PF: > { %s16_s22 = sadd.s32 1, %s1577_s22   ;;  %s1837_s18 = smov %s1565_s19 }
 0x173   : > { %p13_p12 = scmp.ge.s32.totalorder %s16_s22, 6   ;;  %s1838_s19 = smov %s1645_s25 }
 0x174   : > { %s1839_s20 = smov %s1573_s21  ;;  %s1840_s21 = smov %s1842_s2 }
 0x175   :  { %15 = sbr.rel (!%p13_p12) target bundleno = 3 (0x3), region = 136 }

// kernel: multiscale_forward.30
= control target key start
LH: loop header
LB: loop body
LE: loop exit
PB: predicated region body
PF: predicated region fallthrough
CT: control target
= control target key end

     0   :  { %s319_s0 = inlined_call_operand.vmem [shape: f32[96,128], index: 0, kind: input, shape index: {}]   ;;  %s320_s1 = inlined_call_operand.vmem [shape: f32[1,128], index: 1, kind: input, shape index: {}]   ;;  %s321_s2 = inlined_call_operand.vmem [shape: f32[1,128], index: 2, kind: input, shape index: {}]   ;;  %s322_s3 = inlined_call_operand.vmem [shape: bf16[96,128], index: 3, kind: output, shape index: {}]  }
   0x1   :  { %v14_v0 = vld [vmem:[%s319_s0] sm:$0xff]  ;;  %v15_v1 = vld [vmem:[%s319_s0 + $0x8] sm:$0xff]  ;;  %v16_v6 = vld [vmem:[%s319_s0 + $0x10] sm:$0xff] }
   0x2   :  { %v164_v2 = vld [vmem:[%s320_s1] ss:$0 sm:$0xff]  ;;  %v17_v7 = vld [vmem:[%s319_s0 + $0x18] sm:$0xff]  ;;  %v19_v11 = vld [vmem:[%s319_s0 + $0x28] sm:$0xff] }
   0x3   :  { %v33_v3 = vmul.f32 %v164_v2, %v14_v0  ;;  %v34_v4 = vmul.f32 %v164_v2, %v15_v1  ;;  %v257_v5 = vld [vmem:[%s321_s2] ss:$0 sm:$0xff]  ;;  %v35_v8 = vmul.f32 %v164_v2, %v16_v6  ;;  %v36_v9 = vmul.f32 %v164_v2, %v17_v7  ;;  %v20_v12 = vld [vmem:[%s319_s0 + $0x30] sm:$0xff]  ;;  %v21_v17 = vld [vmem:[%s319_s0 + $0x38] sm:$0xff] }
   0x4   :  { %v18_v10 = vld [vmem:[%s319_s0 + $0x20] sm:$0xff]  ;;  %v38_v16 = vmul.f32 %v164_v2, %v19_v11  ;;  %v39_v20 = vmul.f32 %v164_v2, %v20_v12  ;;  %v40_v21 = vmul.f32 %v164_v2, %v21_v17  ;;  %v23_v35 = vld [vmem:[%s319_s0 + $0x48] sm:$0xff]  ;;  %v24_v36 = vld [vmem:[%s319_s0 + $0x50] sm:$0xff] }
   0x5   :  { %v52_v13 = vadd.f32 %v257_v5, %v33_v3  ;;  %v53_v14 = vadd.f32 %v257_v5, %v34_v4  ;;  %v37_v15 = vmul.f32 %v164_v2, %v18_v10  ;;  %v54_v18 = vadd.f32 %v257_v5, %v35_v8  ;;  %v22_v34 = vld [vmem:[%s319_s0 + $0x40] sm:$0xff]  ;;  %v25_v42 = vld [vmem:[%s319_s0 + $0x58] sm:$0xff] }
   0x6   :  { %v55_v19 = vadd.f32 %v257_v5, %v36_v9  ;;  %v57_v29 = vadd.f32 %v257_v5, %v38_v16  ;;  %v58_v33 = vadd.f32 %v257_v5, %v39_v20  ;;  %v59_v40 = vadd.f32 %v257_v5, %v40_v21 }
   0x7   :  { %vm64_vm0 = vcmp.ge.f32.partialorder %v52_v13, 0.0  ;;  %vm65_vm1 = vcmp.ge.f32.partialorder %v53_v14, 0.0  ;;  %v76_v22 = vmul.f32 0.2, %v52_v13  ;;  %v77_v23 = vmul.f32 0.2, %v53_v14 }
   0x8   :  { %vm66_vm2 = vcmp.ge.f32.partialorder %v54_v18, 0.0  ;;  %vm67_vm3 = vcmp.ge.f32.partialorder %v55_v19, 0.0  ;;  %v78_v24 = vmul.f32 0.2, %v54_v18  ;;  %v79_v25 = vmul.f32 0.2, %v55_v19 }
   0x9   :  { %v88_v26 = vsel %vm64_vm0, %v52_v13, %v76_v22  ;;  %v89_v27 = vsel %vm65_vm1, %v53_v14, %v77_v23  ;;  %v56_v28 = vadd.f32 %v257_v5, %v37_v15  ;;  %vm69_vm5 = vcmp.ge.f32.partialorder %v57_v29, 0.0 }
   0xa   :  { %v193_v30 = vpack.c.bf16 %v89_v27, %v88_v26  ;;  %v90_v31 = vsel %vm66_vm2, %v54_v18, %v78_v24  ;;  %v91_v32 = vsel %vm67_vm3, %v55_v19, %v79_v25  ;;  %v81_v39 = vmul.f32 0.2, %v57_v29 }
   0xb   :  { %v198_v37 = vpack.c.bf16 %v91_v32, %v90_v31  ;;  %vm68_vm4 = vcmp.ge.f32.partialorder %v56_v28, 0.0  ;;  %v80_v38 = vmul.f32 0.2, %v56_v28  ;;  %vm70_vm6 = vcmp.ge.f32.partialorder %v58_v33, 0.0 }
   0xc   :  { %194 = vst [vmem:[%s322_s3] sm:$0xff] %v193_v30   ;;  %v82_v41 = vmul.f32 0.2, %v58_v33  ;;  %v41_v44 = vmul.f32 %v164_v2, %v22_v34  ;;  %v42_v45 = vmul.f32 %v164_v2, %v23_v35  ;;  %v43_v46 = vmul.f32 %v164_v2, %v24_v36 }
   0xd   :  { %220 = vst [vmem:[%s322_s3 + $0x8] sm:$0xff] %v198_v37   ;;  %v92_v43 = vsel %vm68_vm4, %v56_v28, %v80_v38  ;;  %v93_v47 = vsel %vm69_vm5, %v57_v29, %v81_v39  ;;  %vm71_vm7 = vcmp.ge.f32.partialorder %v59_v40, 0.0  ;;  %v83_v48 = vmul.f32 0.2, %v59_v40 }
   0xe   :  { %v94_v49 = vsel %vm70_vm6, %v58_v33, %v82_v41  ;;  %v203_v50 = vpack.c.bf16 %v93_v47, %v92_v43  ;;  %v60_v51 = vadd.f32 %v257_v5, %v41_v44  ;;  %v61_v52 = vadd.f32 %v257_v5, %v42_v45 }
   0xf   :  { %v44_v53 = vmul.f32 %v164_v2, %v25_v42  ;;  %v95_v54 = vsel %vm71_vm7, %v59_v40, %v83_v48  ;;  %v62_v55 = vadd.f32 %v257_v5, %v43_v46 }
  0x10   :  { %221 = vst [vmem:[%s322_s3 + $0x10] sm:$0xff] %v203_v50   ;;  %v208_v56 = vpack.c.bf16 %v95_v54, %v94_v49  ;;  %vm72_vm8 = vcmp.ge.f32.partialorder %v60_v51, 0.0  ;;  %vm73_vm9 = vcmp.ge.f32.partialorder %v61_v52, 0.0  ;;  %v84_v57 = vmul.f32 0.2, %v60_v51 }
  0x11   :  { %v85_v58 = vmul.f32 0.2, %v61_v52  ;;  %v63_v59 = vadd.f32 %v257_v5, %v44_v53  ;;  %vm74_vm10 = vcmp.ge.f32.partialorder %v62_v55, 0.0  ;;  %v86_v60 = vmul.f32 0.2, %v62_v55 }
  0x12   :  { %222 = vst [vmem:[%s322_s3 + $0x18] sm:$0xff] %v208_v56   ;;  %v96_v61 = vsel %vm72_vm8, %v60_v51, %v84_v57 }
  0x13   :  { %v97_v62 = vsel %vm73_vm9, %v61_v52, %v85_v58  ;;  %vm75_vm11 = vcmp.ge.f32.partialorder %v63_v59, 0.0  ;;  %v87_v63 = vmul.f32 0.2, %v63_v59  ;;  %v98_v0 = vsel %vm74_vm10, %v62_v55, %v86_v60 }
  0x14   :  { %v213_v1 = vpack.c.bf16 %v97_v62, %v96_v61 }
  0x15   :  { %v99_v2 = vsel %vm75_vm11, %v63_v59, %v87_v63 }
  0x16   :  { %223 = vst [vmem:[%s322_s3 + $0x20] sm:$0xff] %v213_v1   ;;  %v218_v3 = vpack.c.bf16 %v99_v2, %v98_v0 }
  0x18   :  { %224 = vst [vmem:[%s322_s3 + $0x28] sm:$0xff] %v218_v3  }

// kernel: multiscale_forward.31
= control target key start
LH: loop header
LB: loop body
LE: loop exit
PB: predicated region body
PF: predicated region fallthrough
CT: control target
= control target key end

     0   :  { %s2006_s12 = smov 0   ;;  %s2008_s13 = smov 0   ;;  %s2368_s0 = inlined_call_operand.vmem [shape: bf16[200,4096], index: 0, kind: input, shape index: {}]   ;;  %s2369_s1 = inlined_call_operand.vmem [shape: bf16[4096,128], index: 1, kind: input, shape index: {}]   ;;  %s2370_s2 = inlined_call_operand.vmem [shape: f32[1,128], index: 2, kind: input, shape index: {}]   ;;  %s2371_s3 = inlined_call_operand.vmem [shape: f32[200,128], index: 3, kind: output, shape index: {}]  }
   0x1   :  { %s2010_s14 = smov 0   ;;  %s2012_s15 = smov 0  }
   0x2   :  { %s2014_s16 = smov 0  }
   0x3 LB: > { %s25_s17 = sadd.s32 1, %s1979_s15  ;;  %p48_p1 = scmp.ne.s32.totalorder %s1971_s13, %s1967_s12  ;;  %s1983_s16 = sphi %s2014_s16, %s13_s16   ;;  %s1979_s15 = sphi %s2012_s15, %s2375_s15   ;;  %s1975_s14 = sphi %s2010_s14, %s2374_s14   ;;  %s1971_s13 = sphi %s2008_s13, %s2373_s13   ;;  %s1967_s12 = sphi %s2006_s12, %s2372_s12  }
   0x4   : > { %p26_p0 = scmp.ge.s32.totalorder %s25_s17, 8  ;;  %p49_p2 = scmp.eq.s32.totalorder %s1983_s16, 0 }
   0x5   : > { %s41_s19 = sadd.s32 1, %s1971_s13  ;;  %p1508_p5 = scmp.ge.s32.totalorder %s1983_s16, 8 }
   0x6   : > { %s2377_s17 = smov (%p26_p0, %s25_s17), 0  ;;  %p50_p3 = por %p49_p2, %p48_p1 }
   0x7   : > { %s37_s18 = ssub.s32 %s1979_s15, %s2377_s17  ;;  %162 = sbr.rel (%p1508_p5) target bundleno = 43 (0x2b), region = 20 }
   0x8   : > { %p39_p4 = scmp.eq.s32.totalorder %s37_s18, 0 }
   0xa   : > { %s2041_s20 = scalar_select %p39_p4, %s1971_s13, %s41_s19  }
   0xe   : > { %165 = sbr.rel (!%p50_p3) target bundleno = 43 (0x2b), region = 24  ;;  %s167_s21 = sand.u32 (%p50_p3), 1, %s1971_s13  }
   0xf   : > { %s1605_s22 = sshll.u32 (%p50_p3), %s1979_s15, 4  ;;  %s1794_s23 = smul.u32 (%p50_p3), 400, %s167_s21 }
  0x10   : > { %s2049_s26 = scalar_lea.vmem (%p50_p3), %s2368_s0, %s1605_s22 }
  0x11   : > { %v188_v0 = vld [vmem:[%s2049_s26] sm:$0xff] (%p50_p3)  ;;  %v190_v1 = vld [vmem:[%s2049_s26 + $0x8] sm:$0xff] (%p50_p3)  ;;  %s2057_s27 = scalar_lea.vmem (%p50_p3), [#allocation3], %s1794_s23 }
  0x12   : > { %v192_v2 = vld [vmem:[%s2049_s26 + $0x80] sm:$0xff] (%p50_p3)  ;;  %v194_v3 = vld [vmem:[%s2049_s26 + $0x88] sm:$0xff] (%p50_p3)  ;;  %189 = vst [vmem:[%s2057_s27] sm:$0xff] (%p50_p3), %v188_v0  ;;  %191 = vst [vmem:[%s2057_s27 + $0x8] sm:$0xff] (%p50_p3), %v190_v1 }
  0x13   : > { %v196_v4 = vld [vmem:[%s2049_s26 + $0x100] sm:$0xff] (%p50_p3)  ;;  %v198_v5 = vld [vmem:[%s2049_s26 + $0x108] sm:$0xff] (%p50_p3)  ;;  %193 = vst [vmem:[%s2057_s27 + $0x10] sm:$0xff] (%p50_p3), %v192_v2  ;;  %195 = vst [vmem:[%s2057_s27 + $0x18] sm:$0xff] (%p50_p3), %v194_v3 }
  0x14   : > { %197 = vst [vmem:[%s2057_s27 + $0x20] sm:$0xff] (%p50_p3), %v196_v4  ;;  %199 = vst [vmem:[%s2057_s27 + $0x28] sm:$0xff] (%p50_p3), %v198_v5  ;;  %v200_v6 = vld [vmem:[%s2049_s26 + $0x180] sm:$0xff] (%p50_p3)  ;;  %v202_v7 = vld [vmem:[%s2049_s26 + $0x188] sm:$0xff] (%p50_p3) }
  0x15   : > { %v204_v8 = vld [vmem:[%s2049_s26 + $0x200] sm:$0xff]  ;;  %201 = vst [vmem:[%s2057_s27 + $0x30] sm:$0xff] %v200_v6  ;;  %203 = vst [vmem:[%s2057_s27 + $0x38] sm:$0xff] %v202_v7  ;;  %v206_v9 = vld [vmem:[%s2049_s26 + $0x208] sm:$0xff] }
  0x16   : > { %205 = vst [vmem:[%s2057_s27 + $0x40] sm:$0xff] %v204_v8  ;;  %v208_v10 = vld [vmem:[%s2049_s26 + $0x280] sm:$0xff]  ;;  %v210_v11 = vld [vmem:[%s2049_s26 + $0x288] sm:$0xff]  ;;  %207 = vst [vmem:[%s2057_s27 + $0x48] sm:$0xff] %v206_v9 }
  0x17   : > { %209 = vst [vmem:[%s2057_s27 + $0x50] sm:$0xff] %v208_v10  ;;  %211 = vst [vmem:[%s2057_s27 + $0x58] sm:$0xff] %v210_v11  ;;  %v212_v12 = vld [vmem:[%s2049_s26 + $0x300] sm:$0xff]  ;;  %v214_v13 = vld [vmem:[%s2049_s26 + $0x308] sm:$0xff] }
  0x18   : > { %v216_v14 = vld [vmem:[%s2049_s26 + $0x380] sm:$0xff]  ;;  %213 = vst [vmem:[%s2057_s27 + $0x60] sm:$0xff] %v212_v12  ;;  %215 = vst [vmem:[%s2057_s27 + $0x68] sm:$0xff] %v214_v13  ;;  %v218_v15 = vld [vmem:[%s2049_s26 + $0x388] sm:$0xff] }
  0x19   : > { %217 = vst [vmem:[%s2057_s27 + $0x70] sm:$0xff] %v216_v14  ;;  %v220_v16 = vld [vmem:[%s2049_s26 + $0x400] sm:$0xff]  ;;  %v222_v17 = vld [vmem:[%s2049_s26 + $0x408] sm:$0xff]  ;;  %219 = vst [vmem:[%s2057_s27 + $0x78] sm:$0xff] %v218_v15 }
  0x1a   : > { %221 = vst [vmem:[%s2057_s27 + $0x80] sm:$0xff] %v220_v16  ;;  %223 = vst [vmem:[%s2057_s27 + $0x88] sm:$0xff] %v222_v17  ;;  %v224_v18 = vld [vmem:[%s2049_s26 + $0x480] sm:$0xff]  ;;  %v226_v19 = vld [vmem:[%s2049_s26 + $0x488] sm:$0xff] }
  0x1b   : > { %v228_v20 = vld [vmem:[%s2049_s26 + $0x500] sm:$0xff]  ;;  %225 = vst [vmem:[%s2057_s27 + $0x90] sm:$0xff] %v224_v18  ;;  %227 = vst [vmem:[%s2057_s27 + $0x98] sm:$0xff] %v226_v19  ;;  %v230_v21 = vld [vmem:[%s2049_s26 + $0x508] sm:$0xff] }
  0x1c   : > { %229 = vst [vmem:[%s2057_s27 + $0xa0] sm:$0xff] %v228_v20  ;;  %v232_v22 = vld [vmem:[%s2049_s26 + $0x580] sm:$0xff]  ;;  %v234_v23 = vld [vmem:[%s2049_s26 + $0x588] sm:$0xff]  ;;  %231 = vst [vmem:[%s2057_s27 + $0xa8] sm:$0xff] %v230_v21 }
  0x1d   : > { %233 = vst [vmem:[%s2057_s27 + $0xb0] sm:$0xff] %v232_v22  ;;  %235 = vst [vmem:[%s2057_s27 + $0xb8] sm:$0xff] %v234_v23  ;;  %v236_v24 = vld [vmem:[%s2049_s26 + $0x600] sm:$0xff]  ;;  %v238_v25 = vld [vmem:[%s2049_s26 + $0x608] sm:$0xff] }
  0x1e   : > { %v240_v26 = vld [vmem:[%s2049_s26 + $0x680] sm:$0xff]  ;;  %237 = vst [vmem:[%s2057_s27 + $0xc0] sm:$0xff] %v236_v24  ;;  %239 = vst [vmem:[%s2057_s27 + $0xc8] sm:$0xff] %v238_v25  ;;  %v242_v27 = vld [vmem:[%s2049_s26 + $0x688] sm:$0xff] }
  0x1f   : > { %241 = vst [vmem:[%s2057_s27 + $0xd0] sm:$0xff] %v240_v26  ;;  %v244_v28 = vld [vmem:[%s2049_s26 + $0x700] sm:$0xff]  ;;  %v246_v29 = vld [vmem:[%s2049_s26 + $0x708] sm:$0xff]  ;;  %243 = vst [vmem:[%s2057_s27 + $0xd8] sm:$0xff] %v242_v27 }
  0x20   : > { %245 = vst [vmem:[%s2057_s27 + $0xe0] sm:$0xff] %v244_v28  ;;  %247 = vst [vmem:[%s2057_s27 + $0xe8] sm:$0xff] %v246_v29  ;;  %v248_v30 = vld [vmem:[%s2049_s26 + $0x780] sm:$0xff]  ;;  %v250_v31 = vld [vmem:[%s2049_s26 + $0x788] sm:$0xff] }
  0x21   : > { %v252_v32 = vld [vmem:[%s2049_s26 + $0x800] sm:$0xff]  ;;  %249 = vst [vmem:[%s2057_s27 + $0xf0] sm:$0xff] %v248_v30  ;;  %251 = vst [vmem:[%s2057_s27 + $0xf8] sm:$0xff] %v250_v31  ;;  %v254_v33 = vld [vmem:[%s2049_s26 + $0x808] sm:$0xff] }
  0x22   : > { %253 = vst [vmem:[%s2057_s27 + $0x100] sm:$0xff] %v252_v32  ;;  %v256_v34 = vld [vmem:[%s2049_s26 + $0x880] sm:$0xff]  ;;  %v258_v35 = vld [vmem:[%s2049_s26 + $0x888] sm:$0xff]  ;;  %255 = vst [vmem:[%s2057_s27 + $0x108] sm:$0xff] %v254_v33 }
  0x23   : > { %257 = vst [vmem:[%s2057_s27 + $0x110] sm:$0xff] %v256_v34  ;;  %259 = vst [vmem:[%s2057_s27 + $0x118] sm:$0xff] %v258_v35  ;;  %v260_v36 = vld [vmem:[%s2049_s26 + $0x900] sm:$0xff]  ;;  %v262_v37 = vld [vmem:[%s2049_s26 + $0x908] sm:$0xff] }
  0x24   : > { %v264_v38 = vld [vmem:[%s2049_s26 + $0x980] sm:$0xff]  ;;  %261 = vst [vmem:[%s2057_s27 + $0x120] sm:$0xff] %v260_v36  ;;  %263 = vst [vmem:[%s2057_s27 + $0x128] sm:$0xff] %v262_v37  ;;  %v266_v39 = vld [vmem:[%s2049_s26 + $0x988] sm:$0xff] }
  0x25   : > { %265 = vst [vmem:[%s2057_s27 + $0x130] sm:$0xff] %v264_v38  ;;  %v268_v40 = vld [vmem:[%s2049_s26 + $0xa00] sm:$0xff]  ;;  %v270_v41 = vld [vmem:[%s2049_s26 + $0xa08] sm:$0xff]  ;;  %267 = vst [vmem:[%s2057_s27 + $0x138] sm:$0xff] %v266_v39 }
  0x26   : > { %269 = vst [vmem:[%s2057_s27 + $0x140] sm:$0xff] %v268_v40  ;;  %271 = vst [vmem:[%s2057_s27 + $0x148] sm:$0xff] %v270_v41  ;;  %v272_v42 = vld [vmem:[%s2049_s26 + $0xa80] sm:$0xff]  ;;  %v274_v43 = vld [vmem:[%s2049_s26 + $0xa88] sm:$0xff] }
  0x27   : > { %v276_v44 = vld [vmem:[%s2049_s26 + $0xb00] sm:$0xff]  ;;  %273 = vst [vmem:[%s2057_s27 + $0x150] sm:$0xff] %v272_v42  ;;  %275 = vst [vmem:[%s2057_s27 + $0x158] sm:$0xff] %v274_v43  ;;  %v278_v45 = vld [vmem:[%s2049_s26 + $0xb08] sm:$0xff] }
  0x28   : > { %277 = vst [vmem:[%s2057_s27 + $0x160] sm:$0xff] %v276_v44  ;;  %v280_v46 = vld [vmem:[%s2049_s26 + $0xb80] sm:$0xff]  ;;  %v282_v47 = vld [vmem:[%s2049_s26 + $0xb88] sm:$0xff]  ;;  %279 = vst [vmem:[%s2057_s27 + $0x168] sm:$0xff] %v278_v45 }
  0x29   : > { %281 = vst [vmem:[%s2057_s27 + $0x170] sm:$0xff] %v280_v46  ;;  %283 = vst [vmem:[%s2057_s27 + $0x178] sm:$0xff] %v282_v47  ;;  %v284_v48 = vld [vmem:[%s2049_s26 + $0xc00] sm:$0xff]  ;;  %v286_v49 = vld [vmem:[%s2049_s26 + $0xc08] sm:$0xff] }
  0x2a   : > { %285 = vst [vmem:[%s2057_s27 + $0x180] sm:$0xff] %v284_v48  ;;  %287 = vst [vmem:[%s2057_s27 + $0x188] sm:$0xff] %v286_v49 }
  0x2b PF: > { %p1511_p6 = scmp.ge.s32.totalorder %s1983_s16, 1  ;;  %p304_p7 = scmp.lt.s32.totalorder %s1983_s16, 9 }
  0x2d   : > { %p305_p8 = pnand %p1511_p6, %p304_p7 }
  0x2e   : > { %s311_s28 = sand.u32 (!%p305_p8), 1, %s1967_s12   ;;  %s1512_s29 = sshll.u32 (!%p305_p8), %s1975_s14, 6 }
  0x2f   : > { %308 = sbr.rel (%p305_p8) target bundleno = 430 (0x1ae), region = 51  ;;  %p351_p9 = scmp.lt.s32.totalorder (!%p305_p8), %s1512_s29, 511 }
  0x30   : > { %s1795_s30 = smul.u32 (!%p305_p8), 400, %s311_s28  ;;  %p1514_p10 = scmp.ne.s32.totalorder (!%p305_p8), %s1975_s14, 0 }
  0x32   : > { %s2162_s8 = scalar_lea.vmem (!%p305_p8), [#allocation3], %s1795_s30 }
  0x36   : > { %s2379_s29 = smov (!%p351_p9, %s1512_s29), 511  ;;  %375 = sbr.rel (%p1514_p10) target bundleno = 69 (0x45), region = 59 }
  0x37   : > { %s1513_s4 = sshll.u32 %s2379_s29, 2  ;;  %v1985_v50 = vmov (!%p1514_p10), 0.0  }
  0x38   : > { %s2160_s7 = scalar_lea.vmem %s2369_s1, %s1513_s4  ;;  %376 = vst [vmem:[#allocation2] sm:$0xff] (!%p1514_p10), %v1985_v50  ;;  %377 = vst [vmem:[#allocation2 + $0x8] sm:$0xff] (!%p1514_p10), %v1985_v50 }
  0x39   : > { %378 = vst [vmem:[#allocation2 + $0x10] sm:$0xff] (!%p1514_p10), %v1985_v50  ;;  %379 = vst [vmem:[#allocation2 + $0x18] sm:$0xff] (!%p1514_p10), %v1985_v50 }
  0x3a   : > { %380 = vst [vmem:[#allocation2 + $0x20] sm:$0xff] (!%p1514_p10), %v1985_v50  ;;  %381 = vst [vmem:[#allocation2 + $0x28] sm:$0xff] (!%p1514_p10), %v1985_v50 }
  0x3b   : > { %382 = vst [vmem:[#allocation2 + $0x30] sm:$0xff] (!%p1514_p10), %v1985_v50  ;;  %383 = vst [vmem:[#allocation2 + $0x38] sm:$0xff] (!%p1514_p10), %v1985_v50 }
  0x3c   : > { %384 = vst [vmem:[#allocation2 + $0x40] sm:$0xff] (!%p1514_p10), %v1985_v50  ;;  %385 = vst [vmem:[#allocation2 + $0x48] sm:$0xff] (!%p1514_p10), %v1985_v50 }
  0x3d   : > { %386 = vst [vmem:[#allocation2 + $0x50] sm:$0xff] %v1985_v50  ;;  %387 = vst [vmem:[#allocation2 + $0x58] sm:$0xff] %v1985_v50 }
  0x3e   : > { %388 = vst [vmem:[#allocation2 + $0x60] sm:$0xff] %v1985_v50  ;;  %389 = vst [vmem:[#allocation2 + $0x68] sm:$0xff] %v1985_v50 }
  0x3f   : > { %390 = vst [vmem:[#allocation2 + $0x70] sm:$0xff] %v1985_v50  ;;  %391 = vst [vmem:[#allocation2 + $0x78] sm:$0xff] %v1985_v50 }
  0x40   : > { %392 = vst [vmem:[#allocation2 + $0x80] sm:$0xff] %v1985_v50  ;;  %393 = vst [vmem:[#allocation2 + $0x88] sm:$0xff] %v1985_v50 }
  0x41   : > { %394 = vst [vmem:[#allocation2 + $0x90] sm:$0xff] %v1985_v50  ;;  %395 = vst [vmem:[#allocation2 + $0x98] sm:$0xff] %v1985_v50 }
  0x42   : > { %396 = vst [vmem:[#allocation2 + $0xa0] sm:$0xff] %v1985_v50  ;;  %397 = vst [vmem:[#allocation2 + $0xa8] sm:$0xff] %v1985_v50 }
  0x43   : > { %398 = vst [vmem:[#allocation2 + $0xb0] sm:$0xff] %v1985_v50  ;;  %399 = vst [vmem:[#allocation2 + $0xb8] sm:$0xff] %v1985_v50 }
  0x44   : > { %400 = vst [vmem:[#allocation2 + $0xc0] sm:$0xff] %v1985_v50 }
  0x45 PF: > { %v1837_v51 = vld [vmem:[%s2160_s7 + $0x40] sm:$0xff]   ;;  %v1841_v55 = vld [vmem:[%s2160_s7 + $0x48] sm:$0xff]   ;;  %v1845_v59 = vld [vmem:[%s2160_s7 + $0x50] sm:$0xff]   ;;  %p1599_p11 = scmp.ne.s32.totalorder %s1975_s14, 7 }
  0x46   : > { %v1838_v52 = vld [vmem:[%s2160_s7 + $0xc0] sm:$0xff]   ;;  %1606 = vmatprep.subr.bf16.mxu0 %v1837_v51  ;;  %v1842_v56 = vld [vmem:[%s2160_s7 + $0xc8] sm:$0xff]   ;;  %v1846_v60 = vld [vmem:[%s2160_s7 + $0xd0] sm:$0xff]  }
  0x47   : > { %v1839_v53 = vld [vmem:[%s2160_s7] sm:$0xff]   ;;  %1700 = vmatprep.subr.bf16.mxu1 %v1838_v52  ;;  %v1843_v57 = vld [vmem:[%s2160_s7 + $0x8] sm:$0xff]   ;;  %v1847_v61 = vld [vmem:[%s2160_s7 + $0x10] sm:$0xff]  }
  0x48   : > { %v1840_v54 = vld [vmem:[%s2160_s7 + $0x80] sm:$0xff]   ;;  %1607 = vmatpush3.bf16.msra.mxu0 %v1839_v53  ;;  %v1844_v58 = vld [vmem:[%s2160_s7 + $0x88] sm:$0xff]   ;;  %v1848_v62 = vld [vmem:[%s2160_s7 + $0x90] sm:$0xff]  }
  0x49   : > { %1701 = vmatpush3.bf16.msra.mxu1 %v1840_v54  ;;  %1608 = vmatprep.subr.bf16.mxu0 %v1841_v55  ;;  %v1849_v63 = vld [vmem:[%s2160_s7 + $0x58] sm:$0xff]   ;;  %v1853_v3 = vld [vmem:[%s2160_s7 + $0x60] sm:$0xff]   ;;  %v1857_v7 = vld [vmem:[%s2160_s7 + $0x68] sm:$0xff]  }
  0x4a   : > { %1702 = vmatprep.subr.bf16.mxu1 %v1842_v56  ;;  %v1850_v0 = vld [vmem:[%s2160_s7 + $0xd8] sm:$0xff]   ;;  %v1854_v4 = vld [vmem:[%s2160_s7 + $0xe0] sm:$0xff]   ;;  %v1858_v8 = vld [vmem:[%s2160_s7 + $0xe8] sm:$0xff]  }
  0x4b   : > { %v1851_v1 = vld [vmem:[%s2160_s7 + $0x18] sm:$0xff]   ;;  %v1855_v5 = vld [vmem:[%s2160_s7 + $0x20] sm:$0xff]   ;;  %v1859_v9 = vld [vmem:[%s2160_s7 + $0x28] sm:$0xff]  }
  0x4c   : > { %1609 = vmatpush3.bf16.msra.mxu0 %v1843_v57  ;;  %v1852_v2 = vld [vmem:[%s2160_s7 + $0x98] sm:$0xff]   ;;  %v1856_v6 = vld [vmem:[%s2160_s7 + $0xa0] sm:$0xff]   ;;  %v1860_v10 = vld [vmem:[%s2160_s7 + $0xa8] sm:$0xff]  }
  0x4d   : > { %1703 = vmatpush3.bf16.msra.mxu1 %v1844_v58  ;;  %1610 = vmatprep.subr.bf16.mxu0 %v1845_v59  ;;  %v1861_v11 = vld [vmem:[%s2160_s7 + $0x70] sm:$0xff]   ;;  %v1865_v15 = vld [vmem:[%s2160_s7 + $0x78] sm:$0xff]  }
  0x4e   : > { %1704 = vmatprep.subr.bf16.mxu1 %v1846_v60  ;;  %v1862_v12 = vld [vmem:[%s2160_s7 + $0xf0] sm:$0xff]   ;;  %v1866_v16 = vld [vmem:[%s2160_s7 + $0xf8] sm:$0xff]  }
  0x4f   : > { %v1863_v13 = vld [vmem:[%s2160_s7 + $0x30] sm:$0xff]   ;;  %v1867_v17 = vld [vmem:[%s2160_s7 + $0x38] sm:$0xff]  }
  0x50   : > { %1611 = vmatpush3.bf16.msra.mxu0 %v1847_v61  ;;  %v1864_v14 = vld [vmem:[%s2160_s7 + $0xb0] sm:$0xff]   ;;  %v1868_v18 = vld [vmem:[%s2160_s7 + $0xb8] sm:$0xff]  }
  0x51   : > { %1705 = vmatpush3.bf16.msra.mxu1 %v1848_v62  ;;  %1612 = vmatprep.subr.bf16.mxu0 %v1849_v63  ;;  %v1869_v19 = vld [vmem:[%s2162_s8] ss:$16 sps:$4 sm:$0xff]   ;;  %v1871_v20 = vld [vmem:[%s2162_s8 + $0x4] ss:$16 sps:$4 sm:$0xff]   ;;  %v1872_v21 = vld [vmem:[%s2162_s8 + $0x8] ss:$16 sps:$4 sm:$0xff]  }
  0x52   : > { %1706 = vmatprep.subr.bf16.mxu1 %v1850_v0  ;;  %v1874_v22 = vld [vmem:[%s2162_s8 + $0xc] ss:$16 sps:$4 sm:$0xff]   ;;  %1018 = vmatprep.mubr.bf16.mxu0 %v1871_v20  ;;  %v1875_v23 = vld [vmem:[%s2162_s8 + $0x24] ss:$16 sps:$4 sm:$0xff]   ;;  %v1879_v25 = vld [vmem:[%s2162_s8 + $0x20] ss:$16 sps:$4 sm:$0xff]  }
  0x53   : > { %1154 = vmatprep.mubr.bf16.mxu1 %v1874_v22  ;;  %v1877_v24 = vld [vmem:[%s2162_s8 + $0x2c] ss:$16 sps:$4 sm:$0xff]   ;;  %v1880_v26 = vld [vmem:[%s2162_s8 + $0x28] ss:$16 sps:$4 sm:$0xff]   ;;  %v1881_v27 = vld [vmem:[%s2162_s8 + $0x44] ss:$16 sps:$4 sm:$0xff]  }
  0x54   : > { %1613 = vmatpush3.bf16.msra.mxu0 %v1851_v1  ;;  %v1883_v28 = vld [vmem:[%s2162_s8 + $0x4c] ss:$16 sps:$4 sm:$0xff]   ;;  %v1885_v29 = vld [vmem:[%s2162_s8 + $0x40] ss:$16 sps:$4 sm:$0xff]   ;;  %v1886_v30 = vld [vmem:[%s2162_s8 + $0x48] ss:$16 sps:$4 sm:$0xff]  }
  0x55   : > { %1707 = vmatpush3.bf16.msra.mxu1 %v1852_v2  ;;  %1614 = vmatprep.subr.bf16.mxu0 %v1853_v3  ;;  %v1887_v31 = vld [vmem:[%s2162_s8 + $0x64] ss:$16 sps:$4 sm:$0xff]   ;;  %v1889_v32 = vld [vmem:[%s2162_s8 + $0x6c] ss:$16 sps:$4 sm:$0xff]   ;;  %v1891_v33 = vld [vmem:[%s2162_s8 + $0x60] ss:$16 sps:$4 sm:$0xff]  }
  0x56   : > { %1708 = vmatprep.subr.bf16.mxu1 %v1854_v4  ;;  %v1892_v34 = vld [vmem:[%s2162_s8 + $0x68] ss:$16 sps:$4 sm:$0xff]   ;;  %v1893_v35 = vld [vmem:[%s2162_s8 + $0x84] ss:$16 sps:$4 sm:$0xff]   ;;  %v1895_v36 = vld [vmem:[%s2162_s8 + $0x8c] ss:$16 sps:$4 sm:$0xff]  }
  0x57   : > { %v1897_v37 = vld [vmem:[%s2162_s8 + $0x80] ss:$16 sps:$4 sm:$0xff]   ;;  %v1898_v38 = vld [vmem:[%s2162_s8 + $0x88] ss:$16 sps:$4 sm:$0xff]   ;;  %v1899_v39 = vld [vmem:[%s2162_s8 + $0xa4] ss:$16 sps:$4 sm:$0xff]  }
  0x58   : > { %1615 = vmatpush3.bf16.msra.mxu0 %v1855_v5  ;;  %v1901_v40 = vld [vmem:[%s2162_s8 + $0xac] ss:$16 sps:$4 sm:$0xff]   ;;  %v1903_v41 = vld [vmem:[%s2162_s8 + $0xa0] ss:$16 sps:$4 sm:$0xff]   ;;  %v1904_v42 = vld [vmem:[%s2162_s8 + $0xa8] ss:$16 sps:$4 sm:$0xff]  }
  0x59   : > { %1709 = vmatpush3.bf16.msra.mxu1 %v1856_v6  ;;  %1616 = vmatprep.subr.bf16.mxu0 %v1857_v7  ;;  %v1905_v43 = vld [vmem:[%s2162_s8 + $0xc4] ss:$16 sps:$4 sm:$0xff]   ;;  %v1907_v44 = vld [vmem:[%s2162_s8 + $0xcc] ss:$16 sps:$4 sm:$0xff]   ;;  %v1909_v45 = vld [vmem:[%s2162_s8 + $0xc0] ss:$16 sps:$4 sm:$0xff]  }
  0x5a   : > { %1710 = vmatprep.subr.bf16.mxu1 %v1858_v8  ;;  %v1910_v46 = vld [vmem:[%s2162_s8 + $0xc8] ss:$16 sps:$4 sm:$0xff]   ;;  %v1911_v47 = vld [vmem:[%s2162_s8 + $0xe4] ss:$16 sps:$4 sm:$0xff]   ;;  %v1913_v48 = vld [vmem:[%s2162_s8 + $0xec] ss:$16 sps:$4 sm:$0xff]  }
  0x5b   : > { %v1915_v49 = vld [vmem:[%s2162_s8 + $0xe0] ss:$16 sps:$4 sm:$0xff]   ;;  %v1916_v50 = vld [vmem:[%s2162_s8 + $0xe8] ss:$16 sps:$4 sm:$0xff]   ;;  %v1917_v51 = vld [vmem:[%s2162_s8 + $0x104] ss:$16 sps:$4 sm:$0xff]  }
  0x5c   : > { %1617 = vmatpush3.bf16.msra.mxu0 %v1859_v9  ;;  %v1919_v52 = vld [vmem:[%s2162_s8 + $0x10c] ss:$16 sps:$4 sm:$0xff]   ;;  %v1921_v53 = vld [vmem:[%s2162_s8 + $0x100] ss:$16 sps:$4 sm:$0xff]   ;;  %v1922_v54 = vld [vmem:[%s2162_s8 + $0x108] ss:$16 sps:$4 sm:$0xff]  }
  0x5d   : > { %1711 = vmatpush3.bf16.msra.mxu1 %v1860_v10  ;;  %1618 = vmatprep.subr.bf16.mxu0 %v1861_v11  ;;  %v1923_v55 = vld [vmem:[%s2162_s8 + $0x124] ss:$16 sps:$4 sm:$0xff]   ;;  %v1925_v56 = vld [vmem:[%s2162_s8 + $0x12c] ss:$16 sps:$4 sm:$0xff]   ;;  %v1927_v57 = vld [vmem:[%s2162_s8 + $0x120] ss:$16 sps:$4 sm:$0xff]  }
  0x5e   : > { %1712 = vmatprep.subr.bf16.mxu1 %v1862_v12  ;;  %v1928_v58 = vld [vmem:[%s2162_s8 + $0x128] ss:$16 sps:$4 sm:$0xff]   ;;  %v1929_v59 = vld [vmem:[%s2162_s8 + $0x144] ss:$16 sps:$4 sm:$0xff]   ;;  %v1931_v60 = vld [vmem:[%s2162_s8 + $0x14c] ss:$16 sps:$4 sm:$0xff]  }
  0x5f   : > { %v1933_v61 = vld [vmem:[%s2162_s8 + $0x140] ss:$16 sps:$4 sm:$0xff]   ;;  %v1934_v62 = vld [vmem:[%s2162_s8 + $0x148] ss:$16 sps:$4 sm:$0xff]   ;;  %v1935_v63 = vld [vmem:[%s2162_s8 + $0x164] ss:$16 sps:$4 sm:$0xff]  }
  0x60   : > { %1619 = vmatpush3.bf16.msra.mxu0 %v1863_v13  ;;  %v1937_v0 = vld [vmem:[%s2162_s8 + $0x16c] ss:$16 sps:$4 sm:$0xff]   ;;  %v474_v1 = vld [vmem:[%s2162_s8 + $0x180] sm:$0xff]  ;;  %v1940_v4 = vld [vmem:[%s2162_s8 + $0x168] ss:$16 sps:$4 sm:$0xff]  }
  0x61   : > { %1713 = vmatpush3.bf16.msra.mxu1 %v1864_v14  ;;  %1620 = vmatprep.subr.bf16.mxu0 %v1865_v15  ;;  %v475_v2 = vld [vmem:[%s2162_s8 + $0x188] sm:$0xff]  ;;  %v1939_v3 = vld [vmem:[%s2162_s8 + $0x160] ss:$16 sps:$4 sm:$0xff]   ;;  %v1564_v5 = vcombine.high %v474_v1, %v474_v1  ;;  %v1563_v7 = vcombine.low %v474_v1, %v474_v1 }
  0x62   : > { %1714 = vmatprep.subr.bf16.mxu1 %v1866_v16  ;;  %v1566_v6 = vcombine.high %v475_v2, %v475_v2  ;;  %v1565_v8 = vcombine.low %v475_v2, %v475_v2 }
  0x64   : > { %1621 = vmatpush3.bf16.msra.mxu0 %v1867_v17 }
  0x65   : > { %1715 = vmatpush3.bf16.msra.mxu1 %v1868_v18  ;;  %v401_v18 = vld [vmem:[#allocation2] sm:$0xff] }
  0x67   : > { %1019 = vmatmul.mubr.bf16.vlgmr.msra.gmra.mrb[0].mxu0 %v1869_v19 }
  0x68   : > { %1155 = vmatmul.mubr.bf16.vlgmr.msra.gmra.mrb[0].mxu1 %v1872_v21  ;;  %1026 = vmatprep.mubr.bf16.mxu0 %v1875_v23  ;;  %v402_v23 = vld [vmem:[#allocation2 + $0x8] sm:$0xff] }
  0x69   : > { %1162 = vmatprep.mubr.bf16.mxu1 %v1877_v24 }
  0x6f   : > { %1027 = vmatmul.mubr.bf16.gmra.mrb[4].mxu0 %v1879_v25 }
  0x70   : > { %1163 = vmatmul.mubr.bf16.gmra.mrb[4].mxu1 %v1880_v26  ;;  %1034 = vmatprep.mubr.bf16.mxu0 %v1881_v27 }
  0x71   : > { %1170 = vmatprep.mubr.bf16.mxu1 %v1883_v28 }
  0x77   : > { %1035 = vmatmul.mubr.bf16.gmra.mrb[8].mxu0 %v1885_v29 }
  0x78   : > { %1171 = vmatmul.mubr.bf16.gmra.mrb[8].mxu1 %v1886_v30  ;;  %1042 = vmatprep.mubr.bf16.mxu0 %v1887_v31 }
  0x79   : > { %1178 = vmatprep.mubr.bf16.mxu1 %v1889_v32 }
  0x7f   : > { %1043 = vmatmul.mubr.bf16.gmra.mrb[12].mxu0 %v1891_v33 }
  0x80   : > { %1179 = vmatmul.mubr.bf16.gmra.mrb[12].mxu1 %v1892_v34  ;;  %1050 = vmatprep.mubr.bf16.mxu0 %v1893_v35 }
  0x81   : > { %1186 = vmatprep.mubr.bf16.mxu1 %v1895_v36  ;;  %v403_v36 = vld [vmem:[#allocation2 + $0x10] sm:$0xff] }
  0x87   : > { %1051 = vmatmul.mubr.bf16.gmra.mrb[16].mxu0 %v1897_v37 }
  0x88   : > { %1187 = vmatmul.mubr.bf16.gmra.mrb[16].mxu1 %v1898_v38  ;;  %1058 = vmatprep.mubr.bf16.mxu0 %v1899_v39 }
  0x89   : > { %1194 = vmatprep.mubr.bf16.mxu1 %v1901_v40 }
  0x8f   : > { %1059 = vmatmul.mubr.bf16.gmra.mrb[20].mxu0 %v1903_v41  ;;  %v404_v41 = vld [vmem:[#allocation2 + $0x18] sm:$0xff] }
  0x90   : > { %1195 = vmatmul.mubr.bf16.gmra.mrb[20].mxu1 %v1904_v42  ;;  %1066 = vmatprep.mubr.bf16.mxu0 %v1905_v43 }
  0x91   : > { %1202 = vmatprep.mubr.bf16.mxu1 %v1907_v44 }
  0x97   : > { %1067 = vmatmul.mubr.bf16.gmra.mrb[24].mxu0 %v1909_v45 }
  0x98   : > { %1203 = vmatmul.mubr.bf16.gmra.mrb[24].mxu1 %v1910_v46  ;;  %1074 = vmatprep.mubr.bf16.mxu0 %v1911_v47 }
  0x99   : > { %1210 = vmatprep.mubr.bf16.mxu1 %v1913_v48 }
  0x9f   : > { %1075 = vmatmul.mubr.bf16.gmra.mrb[28].mxu0 %v1915_v49 }
  0xa0   : > { %1211 = vmatmul.mubr.bf16.gmra.mrb[28].mxu1 %v1916_v50  ;;  %1082 = vmatprep.mubr.bf16.mxu0 %v1917_v51 }
  0xa1   : > { %1218 = vmatprep.mubr.bf16.mxu1 %v1919_v52 }
  0xa7   : > { %1083 = vmatmul.mubr.bf16.gmra.mrb[32].mxu0 %v1921_v53 }
  0xa8   : > { %1219 = vmatmul.mubr.bf16.gmra.mrb[32].mxu1 %v1922_v54  ;;  %1090 = vmatprep.mubr.bf16.mxu0 %v1923_v55  ;;  %v405_v54 = vld [vmem:[#allocation2 + $0x20] sm:$0xff] }
  0xa9   : > { %1226 = vmatprep.mubr.bf16.mxu1 %v1925_v56 }
  0xaf   : > { %1091 = vmatmul.mubr.bf16.gmra.mrb[36].mxu0 %v1927_v57 }
  0xb0   : > { %1227 = vmatmul.mubr.bf16.gmra.mrb[36].mxu1 %v1928_v58  ;;  %1098 = vmatprep.mubr.bf16.mxu0 %v1929_v59  ;;  %v406_v59 = vld [vmem:[#allocation2 + $0x28] sm:$0xff] }
  0xb1   : > { %1234 = vmatprep.mubr.bf16.mxu1 %v1931_v60 }
  0xb7   : > { %1099 = vmatmul.mubr.bf16.gmra.mrb[40].mxu0 %v1933_v61 }
  0xb8   : > { %1235 = vmatmul.mubr.bf16.gmra.mrb[40].mxu1 %v1934_v62  ;;  %1106 = vmatprep.mubr.bf16.mxu0 %v1935_v63 }
  0xb9   : > { %1242 = vmatprep.mubr.bf16.mxu1 %v1937_v0 }
  0xbf   : > { %1107 = vmatmul.mubr.bf16.gmra.mrb[44].mxu0 %v1939_v3 }
  0xc0   : > { %1243 = vmatmul.mubr.bf16.gmra.mrb[44].mxu1 %v1940_v4  ;;  %1114 = vmatprep.mubr.bf16.mxu0 %v1564_v5 }
  0xc1   : > { %1250 = vmatprep.mubr.bf16.mxu1 %v1566_v6 }
  0xc7   : > { %1115 = vmatmul.mubr.bf16.gmra.mrb[48].mxu0 %v1563_v7 }
  0xc8   : > { %1251 = vmatmul.mubr.bf16.gmra.mrb[48].mxu1 %v1565_v8  ;;  %v407_v8 = vld [vmem:[#allocation2 + $0x30] sm:$0xff] }
 0x13a   : > { %v1622_v9 = vpop.f32.mrb[0].mxu0 }
 0x13b   : > { %v1716_v10 = vpop.f32.mrb[0].mxu1  ;;  %v1623_v11 = vpop.f32.mrb[1].mxu0 }
 0x13c   : > { %v1624_v12 = vadd.f32 %v1623_v11, %v1622_v9  ;;  %v1717_v13 = vpop.f32.mrb[1].mxu1  ;;  %v1625_v14 = vpop.f32.mrb[2].mxu0 }
 0x13d   : > { %v1718_v15 = vadd.f32 %v1717_v13, %v1716_v10  ;;  %v1719_v16 = vpop.f32.mrb[2].mxu1  ;;  %v1626_v17 = vpop.f32.mrb[3].mxu0  ;;  %v408_v13 = vld [vmem:[#allocation2 + $0x38] sm:$0xff] }
 0x13e   : > { %v1627_v19 = vadd.f32 %v1626_v17, %v1625_v14  ;;  %v1720_v20 = vpop.f32.mrb[3].mxu1 }
 0x13f   : > { %v1157_v21 = vadd.f32 %v1718_v15, %v1624_v12  ;;  %v1721_v22 = vadd.f32 %v1720_v20, %v1719_v16 }
 0x141   : > { %v1258_v24 = vadd.f32 %v1157_v21, %v401_v18  ;;  %v1160_v25 = vadd.f32 %v1721_v22, %v1627_v19 }
 0x142   : > { %v1628_v26 = vpop.f32.mrb[4].mxu0 }
 0x143   : > { %1283 = vst [vmem:[#allocation2] sm:$0xff] %v1258_v24  ;;  %v1259_v27 = vadd.f32 %v1160_v25, %v402_v23  ;;  %v1722_v28 = vpop.f32.mrb[4].mxu1  ;;  %v1629_v29 = vpop.f32.mrb[5].mxu0 }
 0x144   : > { %v1630_v30 = vadd.f32 %v1629_v29, %v1628_v26  ;;  %v1723_v31 = vpop.f32.mrb[5].mxu1  ;;  %v1631_v32 = vpop.f32.mrb[6].mxu0  ;;  %v409_v26 = vld [vmem:[#allocation2 + $0x40] sm:$0xff] }
 0x145   : > { %1284 = vst [vmem:[#allocation2 + $0x8] sm:$0xff] %v1259_v27  ;;  %v1724_v33 = vadd.f32 %v1723_v31, %v1722_v28  ;;  %v1725_v34 = vpop.f32.mrb[6].mxu1  ;;  %v1632_v35 = vpop.f32.mrb[7].mxu0  ;;  %v410_v31 = vld [vmem:[#allocation2 + $0x48] sm:$0xff] }
 0x146   : > { %v1633_v37 = vadd.f32 %v1632_v35, %v1631_v32  ;;  %v1726_v38 = vpop.f32.mrb[7].mxu1 }
 0x147   : > { %v1165_v39 = vadd.f32 %v1724_v33, %v1630_v30  ;;  %v1727_v40 = vadd.f32 %v1726_v38, %v1725_v34 }
 0x149   : > { %v1260_v42 = vadd.f32 %v1165_v39, %v403_v36  ;;  %v1168_v43 = vadd.f32 %v1727_v40, %v1633_v37 }
 0x14a   : > { %v1634_v44 = vpop.f32.mrb[8].mxu0 }
 0x14b   : > { %1285 = vst [vmem:[#allocation2 + $0x10] sm:$0xff] %v1260_v42  ;;  %v1261_v45 = vadd.f32 %v1168_v43, %v404_v41  ;;  %v1728_v46 = vpop.f32.mrb[8].mxu1  ;;  %v1635_v47 = vpop.f32.mrb[9].mxu0 }
 0x14c   : > { %v1636_v48 = vadd.f32 %v1635_v47, %v1634_v44  ;;  %v1729_v49 = vpop.f32.mrb[9].mxu1  ;;  %v1637_v50 = vpop.f32.mrb[10].mxu0  ;;  %v411_v44 = vld [vmem:[#allocation2 + $0x50] sm:$0xff] }
 0x14d   : > { %1286 = vst [vmem:[#allocation2 + $0x18] sm:$0xff] %v1261_v45  ;;  %v1730_v51 = vadd.f32 %v1729_v49, %v1728_v46  ;;  %v1731_v52 = vpop.f32.mrb[10].mxu1  ;;  %v1638_v53 = vpop.f32.mrb[11].mxu0  ;;  %v412_v49 = vld [vmem:[#allocation2 + $0x58] sm:$0xff] }
 0x14e   : > { %v1639_v55 = vadd.f32 %v1638_v53, %v1637_v50  ;;  %v1732_v56 = vpop.f32.mrb[11].mxu1 }
 0x14f   : > { %v1173_v57 = vadd.f32 %v1730_v51, %v1636_v48  ;;  %v1733_v58 = vadd.f32 %v1732_v56, %v1731_v52 }
 0x151   : > { %v1262_v60 = vadd.f32 %v1173_v57, %v405_v54  ;;  %v1176_v61 = vadd.f32 %v1733_v58, %v1639_v55 }
 0x152   : > { %v1640_v62 = vpop.f32.mrb[12].mxu0 }
 0x153   : > { %1287 = vst [vmem:[#allocation2 + $0x20] sm:$0xff] %v1262_v60  ;;  %v1263_v63 = vadd.f32 %v1176_v61, %v406_v59  ;;  %v1734_v0 = vpop.f32.mrb[12].mxu1  ;;  %v1641_v1 = vpop.f32.mrb[13].mxu0 }
 0x154   : > { %v1642_v2 = vadd.f32 %v1641_v1, %v1640_v62  ;;  %v1735_v3 = vpop.f32.mrb[13].mxu1  ;;  %v1643_v4 = vpop.f32.mrb[14].mxu0  ;;  %v413_v62 = vld [vmem:[#allocation2 + $0x60] sm:$0xff] }
 0x155   : > { %1288 = vst [vmem:[#allocation2 + $0x28] sm:$0xff] %v1263_v63  ;;  %v1736_v5 = vadd.f32 %v1735_v3, %v1734_v0  ;;  %v1737_v6 = vpop.f32.mrb[14].mxu1  ;;  %v1644_v7 = vpop.f32.mrb[15].mxu0  ;;  %v414_v3 = vld [vmem:[#allocation2 + $0x68] sm:$0xff] }
 0x156   : > { %v1645_v9 = vadd.f32 %v1644_v7, %v1643_v4  ;;  %v1738_v10 = vpop.f32.mrb[15].mxu1 }
 0x157   : > { %v1181_v11 = vadd.f32 %v1736_v5, %v1642_v2  ;;  %v1739_v12 = vadd.f32 %v1738_v10, %v1737_v6 }
 0x159   : > { %v1264_v14 = vadd.f32 %v1181_v11, %v407_v8  ;;  %v1184_v15 = vadd.f32 %v1739_v12, %v1645_v9 }
 0x15a   : > { %v1646_v16 = vpop.f32.mrb[16].mxu0 }
 0x15b   : > { %1289 = vst [vmem:[#allocation2 + $0x30] sm:$0xff] %v1264_v14  ;;  %v1265_v17 = vadd.f32 %v1184_v15, %v408_v13  ;;  %v1740_v18 = vpop.f32.mrb[16].mxu1  ;;  %v1647_v19 = vpop.f32.mrb[17].mxu0 }
 0x15c   : > { %v1648_v20 = vadd.f32 %v1647_v19, %v1646_v16  ;;  %v1741_v21 = vpop.f32.mrb[17].mxu1  ;;  %v1649_v22 = vpop.f32.mrb[18].mxu0  ;;  %v415_v16 = vld [vmem:[#allocation2 + $0x70] sm:$0xff] }
 0x15d   : > { %1290 = vst [vmem:[#allocation2 + $0x38] sm:$0xff] %v1265_v17  ;;  %v1742_v23 = vadd.f32 %v1741_v21, %v1740_v18  ;;  %v1743_v24 = vpop.f32.mrb[18].mxu1  ;;  %v1650_v25 = vpop.f32.mrb[19].mxu0  ;;  %v416_v21 = vld [vmem:[#allocation2 + $0x78] sm:$0xff] }
 0x15e   : > { %v1651_v27 = vadd.f32 %v1650_v25, %v1649_v22  ;;  %v1744_v28 = vpop.f32.mrb[19].mxu1 }
 0x15f   : > { %v1189_v29 = vadd.f32 %v1742_v23, %v1648_v20  ;;  %v1745_v30 = vadd.f32 %v1744_v28, %v1743_v24 }
 0x161   : > { %v1266_v32 = vadd.f32 %v1189_v29, %v409_v26  ;;  %v1192_v33 = vadd.f32 %v1745_v30, %v1651_v27 }
 0x162   : > { %v1652_v34 = vpop.f32.mrb[20].mxu0 }
 0x163   : > { %1291 = vst [vmem:[#allocation2 + $0x40] sm:$0xff] %v1266_v32  ;;  %v1267_v35 = vadd.f32 %v1192_v33, %v410_v31  ;;  %v1746_v36 = vpop.f32.mrb[20].mxu1  ;;  %v1653_v37 = vpop.f32.mrb[21].mxu0 }
 0x164   : > { %v1654_v38 = vadd.f32 %v1653_v37, %v1652_v34  ;;  %v1747_v39 = vpop.f32.mrb[21].mxu1  ;;  %v1655_v40 = vpop.f32.mrb[22].mxu0  ;;  %v417_v34 = vld [vmem:[#allocation2 + $0x80] sm:$0xff] }
 0x165   : > { %1292 = vst [vmem:[#allocation2 + $0x48] sm:$0xff] %v1267_v35  ;;  %v1748_v41 = vadd.f32 %v1747_v39, %v1746_v36  ;;  %v1749_v42 = vpop.f32.mrb[22].mxu1  ;;  %v1656_v43 = vpop.f32.mrb[23].mxu0  ;;  %v418_v39 = vld [vmem:[#allocation2 + $0x88] sm:$0xff] }
 0x166   : > { %v1657_v45 = vadd.f32 %v1656_v43, %v1655_v40  ;;  %v1750_v46 = vpop.f32.mrb[23].mxu1 }
 0x167   : > { %v1197_v47 = vadd.f32 %v1748_v41, %v1654_v38  ;;  %v1751_v48 = vadd.f32 %v1750_v46, %v1749_v42 }
 0x169   : > { %v1268_v50 = vadd.f32 %v1197_v47, %v411_v44  ;;  %v1200_v51 = vadd.f32 %v1751_v48, %v1657_v45 }
 0x16a   : > { %v1658_v52 = vpop.f32.mrb[24].mxu0 }
 0x16b   : > { %1293 = vst [vmem:[#allocation2 + $0x50] sm:$0xff] %v1268_v50  ;;  %v1269_v53 = vadd.f32 %v1200_v51, %v412_v49  ;;  %v1752_v54 = vpop.f32.mrb[24].mxu1  ;;  %v1659_v55 = vpop.f32.mrb[25].mxu0 }
 0x16c   : > { %v1660_v56 = vadd.f32 %v1659_v55, %v1658_v52  ;;  %v1753_v57 = vpop.f32.mrb[25].mxu1  ;;  %v1661_v58 = vpop.f32.mrb[26].mxu0  ;;  %v419_v52 = vld [vmem:[#allocation2 + $0x90] sm:$0xff] }
 0x16d   : > { %1294 = vst [vmem:[#allocation2 + $0x58] sm:$0xff] %v1269_v53  ;;  %v1754_v59 = vadd.f32 %v1753_v57, %v1752_v54  ;;  %v1755_v60 = vpop.f32.mrb[26].mxu1  ;;  %v1662_v61 = vpop.f32.mrb[27].mxu0  ;;  %v420_v57 = vld [vmem:[#allocation2 + $0x98] sm:$0xff] }
 0x16e   : > { %v1663_v63 = vadd.f32 %v1662_v61, %v1661_v58  ;;  %v1756_v0 = vpop.f32.mrb[27].mxu1 }
 0x16f   : > { %v1205_v1 = vadd.f32 %v1754_v59, %v1660_v56  ;;  %v1757_v2 = vadd.f32 %v1756_v0, %v1755_v60 }
 0x171   : > { %v1270_v4 = vadd.f32 %v1205_v1, %v413_v62  ;;  %v1208_v5 = vadd.f32 %v1757_v2, %v1663_v63 }
 0x172   : > { %v1664_v6 = vpop.f32.mrb[28].mxu0 }
 0x173   : > { %1295 = vst [vmem:[#allocation2 + $0x60] sm:$0xff] %v1270_v4  ;;  %v1271_v7 = vadd.f32 %v1208_v5, %v414_v3  ;;  %v1758_v8 = vpop.f32.mrb[28].mxu1  ;;  %v1665_v9 = vpop.f32.mrb[29].mxu0 }
 0x174   : > { %v1666_v10 = vadd.f32 %v1665_v9, %v1664_v6  ;;  %v1759_v11 = vpop.f32.mrb[29].mxu1  ;;  %v1667_v12 = vpop.f32.mrb[30].mxu0  ;;  %v421_v6 = vld [vmem:[#allocation2 + $0xa0] sm:$0xff] }
 0x175   : > { %1296 = vst [vmem:[#allocation2 + $0x68] sm:$0xff] %v1271_v7  ;;  %v1760_v13 = vadd.f32 %v1759_v11, %v1758_v8  ;;  %v1761_v14 = vpop.f32.mrb[30].mxu1  ;;  %v1668_v15 = vpop.f32.mrb[31].mxu0  ;;  %v422_v11 = vld [vmem:[#allocation2 + $0xa8] sm:$0xff] }
 0x176   : > { %v1669_v17 = vadd.f32 %v1668_v15, %v1667_v12  ;;  %v1762_v18 = vpop.f32.mrb[31].mxu1 }
 0x177   : > { %v1213_v19 = vadd.f32 %v1760_v13, %v1666_v10  ;;  %v1763_v20 = vadd.f32 %v1762_v18, %v1761_v14 }
 0x179   : > { %v1272_v22 = vadd.f32 %v1213_v19, %v415_v16  ;;  %v1216_v23 = vadd.f32 %v1763_v20, %v1669_v17 }
 0x17a   : > { %v1670_v24 = vpop.f32.mrb[32].mxu0 }
 0x17b   : > { %1297 = vst [vmem:[#allocation2 + $0x70] sm:$0xff] %v1272_v22  ;;  %v1273_v25 = vadd.f32 %v1216_v23, %v416_v21  ;;  %v1764_v26 = vpop.f32.mrb[32].mxu1  ;;  %v1671_v27 = vpop.f32.mrb[33].mxu0 }
 0x17c   : > { %v1672_v28 = vadd.f32 %v1671_v27, %v1670_v24  ;;  %v1765_v29 = vpop.f32.mrb[33].mxu1  ;;  %v1673_v30 = vpop.f32.mrb[34].mxu0  ;;  %v423_v24 = vld [vmem:[#allocation2 + $0xb0] sm:$0xff] }
 0x17d   : > { %1298 = vst [vmem:[#allocation2 + $0x78] sm:$0xff] %v1273_v25  ;;  %v1766_v31 = vadd.f32 %v1765_v29, %v1764_v26  ;;  %v1767_v32 = vpop.f32.mrb[34].mxu1  ;;  %v1674_v33 = vpop.f32.mrb[35].mxu0  ;;  %v424_v29 = vld [vmem:[#allocation2 + $0xb8] sm:$0xff] }
 0x17e   : > { %v1675_v35 = vadd.f32 %v1674_v33, %v1673_v30  ;;  %v1768_v36 = vpop.f32.mrb[35].mxu1 }
 0x17f   : > { %v1221_v37 = vadd.f32 %v1766_v31, %v1672_v28  ;;  %v1769_v38 = vadd.f32 %v1768_v36, %v1767_v32 }
 0x181   : > { %v1274_v40 = vadd.f32 %v1221_v37, %v417_v34  ;;  %v1224_v41 = vadd.f32 %v1769_v38, %v1675_v35 }
 0x182   : > { %v1676_v42 = vpop.f32.mrb[36].mxu0 }
 0x183   : > { %1299 = vst [vmem:[#allocation2 + $0x80] sm:$0xff] %v1274_v40  ;;  %v1275_v43 = vadd.f32 %v1224_v41, %v418_v39  ;;  %v1770_v44 = vpop.f32.mrb[36].mxu1  ;;  %v1677_v45 = vpop.f32.mrb[37].mxu0 }
 0x184   : > { %v1678_v46 = vadd.f32 %v1677_v45, %v1676_v42  ;;  %v1771_v47 = vpop.f32.mrb[37].mxu1  ;;  %v1679_v48 = vpop.f32.mrb[38].mxu0  ;;  %v425_v42 = vld [vmem:[#allocation2 + $0xc0] sm:$0xff] }
 0x185   : > { %1300 = vst [vmem:[#allocation2 + $0x88] sm:$0xff] %v1275_v43  ;;  %v1772_v49 = vadd.f32 %v1771_v47, %v1770_v44  ;;  %v1773_v50 = vpop.f32.mrb[38].mxu1  ;;  %v1680_v51 = vpop.f32.mrb[39].mxu0  ;;  %v2251_v47 = vld [vmem:[%s2370_s2] ss:$0 sm:$0xff] (!%p1599_p11) }
 0x186   : > { %v1681_v53 = vadd.f32 %v1680_v51, %v1679_v48  ;;  %v1774_v54 = vpop.f32.mrb[39].mxu1  ;;  %v1313_v48 = vld [vmem:[#allocation2 + $0x8] sm:$0xff] (!%p1599_p11)  ;;  %v1314_v51 = vld [vmem:[#allocation2 + $0x10] sm:$0xff] (!%p1599_p11) }
 0x187   : > { %v1229_v55 = vadd.f32 %v1772_v49, %v1678_v46  ;;  %v1775_v56 = vadd.f32 %v1774_v54, %v1773_v50  ;;  %v1312_v46 = vld [vmem:[#allocation2] sm:$0xff] (!%p1599_p11)  ;;  %v1345_v50 = vadd.f32 (!%p1599_p11), %v2251_v47, %v1313_v48  ;;  %v1346_v54 = vadd.f32 (!%p1599_p11), %v2251_v47, %v1314_v51 }
 0x188   : > { %v1344_v49 = vadd.f32 (!%p1599_p11), %v2251_v47, %v1312_v46 }
 0x189   : > { %v1276_v58 = vadd.f32 %v1229_v55, %v419_v52  ;;  %v1232_v59 = vadd.f32 %v1775_v56, %v1681_v53  ;;  %v1315_v52 = vld [vmem:[#allocation2 + $0x18] sm:$0xff] (!%p1599_p11)  ;;  %v1316_v53 = vld [vmem:[#allocation2 + $0x20] sm:$0xff] (!%p1599_p11)  ;;  %1370 = vst [vmem:[%s2371_s3 + $0x8] sm:$0xff] (!%p1599_p11), %v1345_v50  ;;  %1371 = vst [vmem:[%s2371_s3 + $0x10] sm:$0xff] (!%p1599_p11), %v1346_v54 }
 0x18a   : > { %v1682_v60 = vpop.f32.mrb[40].mxu0  ;;  %v1347_v55 = vadd.f32 (!%p1599_p11), %v2251_v47, %v1315_v52  ;;  %v1348_v56 = vadd.f32 (!%p1599_p11), %v2251_v47, %v1316_v53  ;;  %1369 = vst [vmem:[%s2371_s3] sm:$0xff] (!%p1599_p11), %v1344_v49 }
 0x18b   : > { %1301 = vst [vmem:[#allocation2 + $0x90] sm:$0xff] %v1276_v58  ;;  %v1277_v61 = vadd.f32 %v1232_v59, %v420_v57  ;;  %v1776_v62 = vpop.f32.mrb[40].mxu1  ;;  %v1683_v63 = vpop.f32.mrb[41].mxu0  ;;  %v1317_v57 = vld [vmem:[#allocation2 + $0x28] sm:$0xff] (!%p1599_p11)  ;;  %v1318_v58 = vld [vmem:[#allocation2 + $0x30] sm:$0xff] (!%p1599_p11)  ;;  %v1319_v59 = vld [vmem:[#allocation2 + $0x38] sm:$0xff] (!%p1599_p11) }
 0x18c   : > { %v1684_v0 = vadd.f32 %v1683_v63, %v1682_v60  ;;  %v1777_v1 = vpop.f32.mrb[41].mxu1  ;;  %v1685_v2 = vpop.f32.mrb[42].mxu0  ;;  %v1349_v60 = vadd.f32 (!%p1599_p11), %v2251_v47, %v1317_v57  ;;  %v1320_v63 = vld [vmem:[#allocation2 + $0x40] sm:$0xff] (!%p1599_p11)  ;;  %1372 = vst [vmem:[%s2371_s3 + $0x18] sm:$0xff] (!%p1599_p11), %v1347_v55  ;;  %1373 = vst [vmem:[%s2371_s3 + $0x20] sm:$0xff] (!%p1599_p11), %v1348_v56 }
 0x18d   : > { %1302 = vst [vmem:[#allocation2 + $0x98] sm:$0xff] %v1277_v61  ;;  %v1778_v3 = vadd.f32 %v1777_v1, %v1776_v62  ;;  %v1779_v4 = vpop.f32.mrb[42].mxu1  ;;  %v1686_v5 = vpop.f32.mrb[43].mxu0  ;;  %v1350_v61 = vadd.f32 (!%p1599_p11), %v2251_v47, %v1318_v58  ;;  %v1351_v62 = vadd.f32 (!%p1599_p11), %v2251_v47, %v1319_v59  ;;  %v1322_v1 = vld [vmem:[#allocation2 + $0x50] sm:$0xff] (!%p1599_p11) }
 0x18e   : > { %v1687_v7 = vadd.f32 %v1686_v5, %v1685_v2  ;;  %v1780_v8 = vpop.f32.mrb[43].mxu1  ;;  %v1352_v2 = vadd.f32 (!%p1599_p11), %v2251_v47, %v1320_v63  ;;  %v1323_v5 = vld [vmem:[#allocation2 + $0x58] sm:$0xff] (!%p1599_p11)  ;;  %1374 = vst [vmem:[%s2371_s3 + $0x28] sm:$0xff] (!%p1599_p11), %v1349_v60 }
 0x18f   : > { %v1237_v9 = vadd.f32 %v1778_v3, %v1684_v0  ;;  %v1781_v10 = vadd.f32 %v1780_v8, %v1779_v4  ;;  %v1321_v0 = vld [vmem:[#allocation2 + $0x48] sm:$0xff] (!%p1599_p11)  ;;  %v1354_v4 = vadd.f32 (!%p1599_p11), %v2251_v47, %v1322_v1  ;;  %1375 = vst [vmem:[%s2371_s3 + $0x30] sm:$0xff] (!%p1599_p11), %v1350_v61  ;;  %1376 = vst [vmem:[%s2371_s3 + $0x38] sm:$0xff] (!%p1599_p11), %v1351_v62 }
 0x190   : > { %v1353_v3 = vadd.f32 (!%p1599_p11), %v2251_v47, %v1321_v0  ;;  %v1355_v8 = vadd.f32 (!%p1599_p11), %v2251_v47, %v1323_v5  ;;  %1377 = vst [vmem:[%s2371_s3 + $0x40] sm:$0xff] (!%p1599_p11), %v1352_v2 }
 0x191   : > { %v1278_v12 = vadd.f32 %v1237_v9, %v421_v6  ;;  %v1240_v13 = vadd.f32 %v1781_v10, %v1687_v7  ;;  %v1324_v6 = vld [vmem:[#allocation2 + $0x60] sm:$0xff] (!%p1599_p11)  ;;  %v1325_v7 = vld [vmem:[#allocation2 + $0x68] sm:$0xff] (!%p1599_p11)  ;;  %1379 = vst [vmem:[%s2371_s3 + $0x50] sm:$0xff] (!%p1599_p11), %v1354_v4 }
 0x192   : > { %v1688_v14 = vpop.f32.mrb[44].mxu0  ;;  %v1356_v9 = vadd.f32 (!%p1599_p11), %v2251_v47, %v1324_v6  ;;  %v1357_v10 = vadd.f32 (!%p1599_p11), %v2251_v47, %v1325_v7  ;;  %1378 = vst [vmem:[%s2371_s3 + $0x48] sm:$0xff] (!%p1599_p11), %v1353_v3  ;;  %1380 = vst [vmem:[%s2371_s3 + $0x58] sm:$0xff] (!%p1599_p11), %v1355_v8 }
 0x193   : > { %1303 = vst [vmem:[#allocation2 + $0xa0] sm:$0xff] %v1278_v12  ;;  %v1279_v15 = vadd.f32 %v1240_v13, %v422_v11  ;;  %v1782_v16 = vpop.f32.mrb[44].mxu1  ;;  %v1689_v17 = vpop.f32.mrb[45].mxu0  ;;  %v1326_v11 = vld [vmem:[#allocation2 + $0x70] sm:$0xff] (!%p1599_p11)  ;;  %v1327_v12 = vld [vmem:[#allocation2 + $0x78] sm:$0xff] (!%p1599_p11)  ;;  %v1328_v13 = vld [vmem:[#allocation2 + $0x80] sm:$0xff] (!%p1599_p11) }
 0x194   : > { %v1690_v18 = vadd.f32 %v1689_v17, %v1688_v14  ;;  %v1783_v19 = vpop.f32.mrb[45].mxu1  ;;  %v1691_v20 = vpop.f32.mrb[46].mxu0  ;;  %v1358_v14 = vadd.f32 (!%p1599_p11), %v2251_v47, %v1326_v11  ;;  %v1329_v17 = vld [vmem:[#allocation2 + $0x88] sm:$0xff] (!%p1599_p11)  ;;  %1381 = vst [vmem:[%s2371_s3 + $0x60] sm:$0xff] (!%p1599_p11), %v1356_v9  ;;  %1382 = vst [vmem:[%s2371_s3 + $0x68] sm:$0xff] (!%p1599_p11), %v1357_v10 }
 0x195   : > { %1304 = vst [vmem:[#allocation2 + $0xa8] sm:$0xff] %v1279_v15  ;;  %v1784_v21 = vadd.f32 %v1783_v19, %v1782_v16  ;;  %v1785_v22 = vpop.f32.mrb[46].mxu1  ;;  %v1692_v23 = vpop.f32.mrb[47].mxu0  ;;  %v1359_v15 = vadd.f32 (!%p1599_p11), %v2251_v47, %v1327_v12  ;;  %v1360_v16 = vadd.f32 (!%p1599_p11), %v2251_v47, %v1328_v13  ;;  %v1331_v19 = vld [vmem:[#allocation2 + $0x98] sm:$0xff] (!%p1599_p11) }
 0x196   : > { %v1693_v25 = vadd.f32 %v1692_v23, %v1691_v20  ;;  %v1786_v26 = vpop.f32.mrb[47].mxu1  ;;  %v1361_v20 = vadd.f32 (!%p1599_p11), %v2251_v47, %v1329_v17  ;;  %1383 = vst [vmem:[%s2371_s3 + $0x70] sm:$0xff] (!%p1599_p11), %v1358_v14 }
 0x197   : > { %v1245_v27 = vadd.f32 %v1784_v21, %v1690_v18  ;;  %v1787_v28 = vadd.f32 %v1786_v26, %v1785_v22  ;;  %v1330_v18 = vld [vmem:[#allocation2 + $0x90] sm:$0xff] (!%p1599_p11)  ;;  %v1363_v22 = vadd.f32 (!%p1599_p11), %v2251_v47, %v1331_v19  ;;  %1384 = vst [vmem:[%s2371_s3 + $0x78] sm:$0xff] (!%p1599_p11), %v1359_v15  ;;  %1385 = vst [vmem:[%s2371_s3 + $0x80] sm:$0xff] (!%p1599_p11), %v1360_v16 }
 0x198   : > { %v1362_v21 = vadd.f32 (!%p1599_p11), %v2251_v47, %v1330_v18  ;;  %1386 = vst [vmem:[%s2371_s3 + $0x88] sm:$0xff] (!%p1599_p11), %v1361_v20 }
 0x199   : > { %v1280_v30 = vadd.f32 %v1245_v27, %v423_v24  ;;  %v1248_v31 = vadd.f32 %v1787_v28, %v1693_v25  ;;  %1388 = vst [vmem:[%s2371_s3 + $0x98] sm:$0xff] (!%p1599_p11), %v1363_v22 }
 0x19a   : > { %v1694_v32 = vpop.f32.mrb[48].mxu0  ;;  %v1332_v23 = vld [vmem:[#allocation2 + $0xa0] sm:$0xff] (!%p1599_p11)  ;;  %1387 = vst [vmem:[%s2371_s3 + $0x90] sm:$0xff] (!%p1599_p11), %v1362_v21 }
 0x19b   : > { %1305 = vst [vmem:[#allocation2 + $0xb0] sm:$0xff] %v1280_v30  ;;  %v1281_v33 = vadd.f32 %v1248_v31, %v424_v29  ;;  %v1788_v34 = vpop.f32.mrb[48].mxu1  ;;  %v1695_v35 = vpop.f32.mrb[49].mxu0  ;;  %v1364_v26 = vadd.f32 (!%p1599_p11), %v2251_v47, %v1332_v23 }
 0x19c   : > { %v1696_v36 = vadd.f32 %v1695_v35, %v1694_v32  ;;  %v1789_v37 = vpop.f32.mrb[49].mxu1  ;;  %v1697_v38 = vpop.f32.mrb[50].mxu0  ;;  %v1333_v24 = vld [vmem:[#allocation2 + $0xa8] sm:$0xff] (!%p1599_p11) }
 0x19d   : > { %1306 = vst [vmem:[#allocation2 + $0xb8] sm:$0xff] %v1281_v33  ;;  %v1790_v39 = vadd.f32 %v1789_v37, %v1788_v34  ;;  %v1791_v40 = vpop.f32.mrb[50].mxu1  ;;  %v1698_v41 = vpop.f32.mrb[51].mxu0  ;;  %1311 = sbr.rel (%p1599_p11) target bundleno = 430 (0x1ae), region = 63  ;;  %v1365_v27 = vadd.f32 (!%p1599_p11), %v2251_v47, %v1333_v24  ;;  %1389 = vst [vmem:[%s2371_s3 + $0xa0] sm:$0xff] (!%p1599_p11), %v1364_v26 }
 0x19e   : > { %v1792_v43 = vpop.f32.mrb[51].mxu1 }
 0x19f   : > { %v1253_v44 = vadd.f32 %v1790_v39, %v1696_v36  ;;  %1390 = vst [vmem:[%s2371_s3 + $0xa8] sm:$0xff] (!%p1599_p11), %v1365_v27 }
 0x1a1   : > { %v1282_v45 = vadd.f32 %v1253_v44, %v425_v42 }
 0x1a2   : > { %v1334_v25 = vld [vmem:[#allocation2 + $0xb0] sm:$0xff] (!%p1599_p11) }
 0x1a3   : > { %1307 = vst [vmem:[#allocation2 + $0xc0] sm:$0xff] %v1282_v45  ;;  %v1366_v28 = vadd.f32 (!%p1599_p11), %v2251_v47, %v1334_v25 }
 0x1a4   : > { %v1335_v29 = vld [vmem:[#allocation2 + $0xb8] sm:$0xff] }
 0x1a5   : > { %v1367_v31 = vadd.f32 %v2251_v47, %v1335_v29  ;;  %1391 = vst [vmem:[%s2371_s3 + $0xb0] sm:$0xff] %v1366_v28 }
 0x1a7   : > { %1392 = vst [vmem:[%s2371_s3 + $0xb8] sm:$0xff] %v1367_v31 }
 0x1aa   : > { %v1336_v30 = vld [vmem:[#allocation2 + $0xc0] sm:$0xff] }
 0x1ab   : > { %v1368_v32 = vadd.f32 %v2251_v47, %v1336_v30 }
 0x1ad   : > { %1393 = vst [vmem:[%s2371_s3 + $0xc0] sm:$0xff] %v1368_v32 }
 0x1ae PF: > { %s13_s16 = sadd.s32 1, %s1983_s16   ;;  %s2372_s12 = smov %s1971_s13 }
 0x1af   : > { %p10_p12 = scmp.ge.s32.totalorder %s13_s16, 10   ;;  %s2373_s13 = smov %s2041_s20 }
 0x1b0   : > { %s2374_s14 = smov %s1979_s15  ;;  %s2375_s15 = smov %s2377_s17 }
 0x1b1   :  { %12 = sbr.rel (!%p10_p12) target bundleno = 3 (0x3), region = 104 }

// kernel: multiscale_forward.40
= control target key start
LH: loop header
LB: loop body
LE: loop exit
PB: predicated region body
PF: predicated region fallthrough
CT: control target
= control target key end

     0   :  { %s533_s1 = inlined_call_operand.vmem [shape: bf16[256,128], index: 1, kind: input, shape index: {}]   ;;  %s534_s0 = inlined_call_operand.vmem [shape: bf16[40,256], index: 0, kind: input, shape index: {}]   ;;  %s535_s2 = inlined_call_operand.vmem [shape: f32[1,128], index: 2, kind: input, shape index: {}]   ;;  %s536_s3 = inlined_call_operand.vmem [shape: bf16[40,128], index: 3, kind: output, shape index: {}]  }
   0x1   :  { %v414_v0 = vld [vmem:[%s533_s1 + $0x40] sm:$0xff]   ;;  %v416_v2 = vld [vmem:[%s533_s1 + $0x48] sm:$0xff]   ;;  %v418_v4 = vld [vmem:[%s533_s1 + $0x50] sm:$0xff]  }
   0x2   :  { %v415_v1 = vld [vmem:[%s533_s1] sm:$0xff]   ;;  %398 = vmatprep.subr.bf16.mxu1 %v414_v0  ;;  %364 = vmatprep.subr.bf16.mxu0 %v414_v0  ;;  %v417_v3 = vld [vmem:[%s533_s1 + $0x8] sm:$0xff]   ;;  %v419_v5 = vld [vmem:[%s533_s1 + $0x10] sm:$0xff]  }
   0x3   :  { %406 = vmatpush3.bf16.msra.mxu1 %v415_v1  ;;  %365 = vmatpush3.bf16.msra.mxu0 %v415_v1  ;;  %v420_v6 = vld [vmem:[%s533_s1 + $0x58] sm:$0xff]   ;;  %v422_v8 = vld [vmem:[%s533_s1 + $0x60] sm:$0xff]   ;;  %v424_v10 = vld [vmem:[%s533_s1 + $0x68] sm:$0xff]  }
   0x4   :  { %399 = vmatprep.subr.bf16.mxu1 %v416_v2  ;;  %366 = vmatprep.subr.bf16.mxu0 %v416_v2  ;;  %v421_v7 = vld [vmem:[%s533_s1 + $0x18] sm:$0xff]   ;;  %v423_v9 = vld [vmem:[%s533_s1 + $0x20] sm:$0xff]   ;;  %v425_v13 = vld [vmem:[%s533_s1 + $0x28] sm:$0xff]  }
   0x5   :  { %v432_v11 = vld [vmem:[%s534_s0 + $0x14] ss:$8 sps:$4 sm:$0xff]   ;;  %v435_v12 = vld [vmem:[%s534_s0 + $0x4] ss:$8 sps:$4 sm:$0xff]   ;;  %v430_v19 = vld [vmem:[%s534_s0 + $0x10] ss:$8 sps:$4 sm:$0xff]  }
   0x6   :  { %v426_v14 = vld [vmem:[%s533_s1 + $0x70] sm:$0xff]   ;;  %229 = vmatprep.mubr.bf16.mxu1 %v432_v11  ;;  %221 = vmatprep.mubr.bf16.mxu0 %v435_v12  ;;  %v428_v16 = vld [vmem:[%s533_s1 + $0x78] sm:$0xff]   ;;  %v33_v18 = vld [vmem:[%s534_s0 + $0x20] sm:$0xff] }
   0x7   :  { %407 = vmatpush3.bf16.msra.mxu1 %v417_v3  ;;  %367 = vmatpush3.bf16.msra.mxu0 %v417_v3  ;;  %v427_v15 = vld [vmem:[%s533_s1 + $0x30] sm:$0xff]   ;;  %v429_v17 = vld [vmem:[%s533_s1 + $0x38] sm:$0xff]   ;;  %v433_v20 = vld [vmem:[%s534_s0] ss:$8 sps:$4 sm:$0xff]   ;;  %v325_v21 = vcombine.high %v33_v18, %v33_v18  ;;  %v324_v22 = vcombine.low %v33_v18, %v33_v18 }
   0x8   :  { %400 = vmatprep.subr.bf16.mxu1 %v418_v4  ;;  %368 = vmatprep.subr.bf16.mxu0 %v418_v4  ;;  %v342_v26 = vld [vmem:[%s535_s2] ss:$0 sm:$0xff] }
   0xb   :  { %408 = vmatpush3.bf16.msra.mxu1 %v419_v5  ;;  %369 = vmatpush3.bf16.msra.mxu0 %v419_v5 }
   0xc   :  { %401 = vmatprep.subr.bf16.mxu1 %v420_v6  ;;  %370 = vmatprep.subr.bf16.mxu0 %v420_v6 }
   0xf   :  { %409 = vmatpush3.bf16.msra.mxu1 %v421_v7  ;;  %371 = vmatpush3.bf16.msra.mxu0 %v421_v7 }
  0x10   :  { %402 = vmatprep.subr.bf16.mxu1 %v422_v8  ;;  %372 = vmatprep.subr.bf16.mxu0 %v422_v8 }
  0x13   :  { %410 = vmatpush3.bf16.msra.mxu1 %v423_v9  ;;  %373 = vmatpush3.bf16.msra.mxu0 %v423_v9 }
  0x14   :  { %403 = vmatprep.subr.bf16.mxu1 %v424_v10  ;;  %374 = vmatprep.subr.bf16.mxu0 %v424_v10 }
  0x17   :  { %411 = vmatpush3.bf16.msra.mxu1 %v425_v13  ;;  %375 = vmatpush3.bf16.msra.mxu0 %v425_v13 }
  0x18   :  { %404 = vmatprep.subr.bf16.mxu1 %v426_v14  ;;  %376 = vmatprep.subr.bf16.mxu0 %v426_v14 }
  0x1b   :  { %412 = vmatpush3.bf16.msra.mxu1 %v427_v15  ;;  %377 = vmatpush3.bf16.msra.mxu0 %v427_v15 }
  0x1c   :  { %405 = vmatprep.subr.bf16.mxu1 %v428_v16  ;;  %378 = vmatprep.subr.bf16.mxu0 %v428_v16 }
  0x1f   :  { %413 = vmatpush3.bf16.msra.mxu1 %v429_v17  ;;  %379 = vmatpush3.bf16.msra.mxu0 %v429_v17 }
  0x22   :  { %230 = vmatmul.mubr.bf16.vlgmr.msra.gmra.mrb[0].mxu1 %v430_v19  ;;  %222 = vmatmul.mubr.bf16.vlgmr.msra.gmra.mrb[0].mxu0 %v433_v20 }
  0x23   :  { %237 = vmatprep.mubr.bf16.mxu1 %v325_v21 }
  0x2a   :  { %238 = vmatmul.mubr.bf16.gmra.mrb[4].mxu1 %v324_v22 }
  0xf5   :  { %v386_v23 = vpop.f32.mrb[0].mxu1  ;;  %v380_v24 = vpop.f32.mrb[0].mxu0 }
  0xf6   :  { %v387_v25 = vpop.f32.mrb[1].mxu1  ;;  %v381_v27 = vpop.f32.mrb[1].mxu0 }
  0xf7   :  { %v388_v28 = vadd.f32 %v387_v25, %v386_v23  ;;  %v382_v29 = vadd.f32 %v381_v27, %v380_v24  ;;  %v389_v30 = vpop.f32.mrb[2].mxu1  ;;  %v383_v31 = vpop.f32.mrb[2].mxu0 }
  0xf8   :  { %v390_v32 = vpop.f32.mrb[3].mxu1  ;;  %v384_v33 = vpop.f32.mrb[3].mxu0 }
  0xf9   :  { %v272_v34 = vadd.f32 %v388_v28, %v342_v26  ;;  %v270_v35 = vadd.f32 %v382_v29, %v342_v26  ;;  %v391_v36 = vadd.f32 %v390_v32, %v389_v30  ;;  %v385_v37 = vadd.f32 %v384_v33, %v383_v31 }
  0xfb   :  { %vm275_vm0 = vcmp.ge.f32.partialorder %v270_v35, 0.0  ;;  %v280_v38 = vmul.f32 0.2, %v270_v35  ;;  %v282_v39 = vmul.f32 0.2, %v272_v34  ;;  %v273_v40 = vadd.f32 %v391_v36, %v342_v26 }
  0xfc   :  { %v271_v41 = vadd.f32 %v385_v37, %v342_v26  ;;  %vm277_vm1 = vcmp.ge.f32.partialorder %v272_v34, 0.0 }
  0xfd   :  { %v285_v42 = vsel %vm275_vm0, %v270_v35, %v280_v38  ;;  %v392_v43 = vpop.f32.mrb[4].mxu1  ;;  %vm278_vm2 = vcmp.ge.f32.partialorder %v273_v40, 0.0  ;;  %v283_v44 = vmul.f32 0.2, %v273_v40  ;;  %v287_v47 = vsel %vm277_vm1, %v272_v34, %v282_v39 }
  0xfe   :  { %vm276_vm3 = vcmp.ge.f32.partialorder %v271_v41, 0.0  ;;  %v281_v45 = vmul.f32 0.2, %v271_v41  ;;  %v393_v46 = vpop.f32.mrb[5].mxu1 }
  0xff   :  { %v288_v48 = vsel %vm278_vm2, %v273_v40, %v283_v44  ;;  %v394_v50 = vadd.f32 %v393_v46, %v392_v43  ;;  %v395_v51 = vpop.f32.mrb[6].mxu1 }
 0x100   :  { %v286_v49 = vsel %vm276_vm3, %v271_v41, %v281_v45  ;;  %v361_v52 = vpack.c.bf16 %v288_v48, %v287_v47  ;;  %v396_v54 = vpop.f32.mrb[7].mxu1 }
 0x101   :  { %v356_v53 = vpack.c.bf16 %v286_v49, %v285_v42  ;;  %v274_v55 = vadd.f32 %v394_v50, %v342_v26 }
 0x102   :  { %363 = vst [vmem:[%s536_s3 + $0x8] sm:$0xff] %v361_v52  }
 0x103   :  { %357 = vst [vmem:[%s536_s3] sm:$0xff] %v356_v53   ;;  %vm279_vm4 = vcmp.ge.f32.partialorder %v274_v55, 0.0  ;;  %v284_v56 = vmul.f32 0.2, %v274_v55 }
 0x105   :  { %v289_v57 = vsel %vm279_vm4, %v274_v55, %v284_v56 }
 0x106   :  { %v352_v58 = vpack.c.bf16 %v289_v57, %v289_v57 }
 0x108   :  { %315 = vst [vmem:[%s536_s3 + $0x10] sm:$0xf] %v352_v58 }

// kernel: multiscale_forward.41
= control target key start
LH: loop header
LB: loop body
LE: loop exit
PB: predicated region body
PF: predicated region fallthrough
CT: control target
= control target key end

     0   :  { %s711_s1 = inlined_call_operand.vmem [shape: bf16[512,128], index: 1, kind: input, shape index: {}]   ;;  %s712_s2 = inlined_call_operand.vmem [shape: f32[1,128], index: 2, kind: input, shape index: {}]   ;;  %s713_s0 = inlined_call_operand.vmem [shape: bf16[16,512], index: 0, kind: input, shape index: {}]   ;;  %s714_s3 = inlined_call_operand.vmem [shape: f32[16,128], index: 3, kind: output, shape index: {0}]   ;;  %s715_s4 = inlined_call_operand.vmem [shape: f32[1,128], index: 4, kind: output, shape index: {1}]   ;;  %s716_s5 = inlined_call_operand.vmem [shape: f32[1,128], index: 5, kind: output, shape index: {2}]  }
   0x1   :  { %v523_v0 = vld [vmem:[%s711_s1 + $0x40] sm:$0xff]   ;;  %v527_v4 = vld [vmem:[%s711_s1 + $0x48] sm:$0xff]   ;;  %v531_v8 = vld [vmem:[%s711_s1 + $0x50] sm:$0xff]  }
   0x2   :  { %v524_v1 = vld [vmem:[%s711_s1 + $0xc0] sm:$0xff]   ;;  %479 = vmatprep.subr.bf16.mxu0 %v523_v0  ;;  %v528_v5 = vld [vmem:[%s711_s1 + $0xc8] sm:$0xff]   ;;  %v532_v9 = vld [vmem:[%s711_s1 + $0xd0] sm:$0xff]  }
   0x3   :  { %v525_v2 = vld [vmem:[%s711_s1] sm:$0xff]   ;;  %501 = vmatprep.subr.bf16.mxu1 %v524_v1  ;;  %v529_v6 = vld [vmem:[%s711_s1 + $0x8] sm:$0xff]   ;;  %v533_v10 = vld [vmem:[%s711_s1 + $0x10] sm:$0xff]  }
   0x4   :  { %v526_v3 = vld [vmem:[%s711_s1 + $0x80] sm:$0xff]   ;;  %480 = vmatpush3.bf16.msra.mxu0 %v525_v2  ;;  %v530_v7 = vld [vmem:[%s711_s1 + $0x88] sm:$0xff]   ;;  %v534_v11 = vld [vmem:[%s711_s1 + $0x90] sm:$0xff]  }
   0x5   :  { %502 = vmatpush3.bf16.msra.mxu1 %v526_v3  ;;  %481 = vmatprep.subr.bf16.mxu0 %v527_v4  ;;  %v535_v12 = vld [vmem:[%s711_s1 + $0x58] sm:$0xff]   ;;  %v539_v16 = vld [vmem:[%s711_s1 + $0x60] sm:$0xff]   ;;  %v543_v20 = vld [vmem:[%s711_s1 + $0x68] sm:$0xff]  }
   0x6   :  { %503 = vmatprep.subr.bf16.mxu1 %v528_v5  ;;  %v536_v13 = vld [vmem:[%s711_s1 + $0xd8] sm:$0xff]   ;;  %v540_v17 = vld [vmem:[%s711_s1 + $0xe0] sm:$0xff]   ;;  %v544_v21 = vld [vmem:[%s711_s1 + $0xe8] sm:$0xff]  }
   0x7   :  { %v537_v14 = vld [vmem:[%s711_s1 + $0x18] sm:$0xff]   ;;  %v541_v18 = vld [vmem:[%s711_s1 + $0x20] sm:$0xff]   ;;  %v545_v22 = vld [vmem:[%s711_s1 + $0x28] sm:$0xff]  }
   0x8   :  { %482 = vmatpush3.bf16.msra.mxu0 %v529_v6  ;;  %v538_v15 = vld [vmem:[%s711_s1 + $0x98] sm:$0xff]   ;;  %v542_v19 = vld [vmem:[%s711_s1 + $0xa0] sm:$0xff]   ;;  %v546_v23 = vld [vmem:[%s711_s1 + $0xa8] sm:$0xff]  }
   0x9   :  { %504 = vmatpush3.bf16.msra.mxu1 %v530_v7  ;;  %483 = vmatprep.subr.bf16.mxu0 %v531_v8  ;;  %v547_v24 = vld [vmem:[%s711_s1 + $0x70] sm:$0xff]   ;;  %v551_v28 = vld [vmem:[%s711_s1 + $0x78] sm:$0xff]  }
   0xa   :  { %505 = vmatprep.subr.bf16.mxu1 %v532_v9  ;;  %v548_v25 = vld [vmem:[%s711_s1 + $0xf0] sm:$0xff]   ;;  %v552_v29 = vld [vmem:[%s711_s1 + $0xf8] sm:$0xff]  }
   0xb   :  { %v549_v26 = vld [vmem:[%s711_s1 + $0x30] sm:$0xff]   ;;  %v553_v30 = vld [vmem:[%s711_s1 + $0x38] sm:$0xff]  }
   0xc   :  { %484 = vmatpush3.bf16.msra.mxu0 %v533_v10  ;;  %v550_v27 = vld [vmem:[%s711_s1 + $0xb0] sm:$0xff]   ;;  %v554_v31 = vld [vmem:[%s711_s1 + $0xb8] sm:$0xff]  }
   0xd   :  { %506 = vmatpush3.bf16.msra.mxu1 %v534_v11  ;;  %485 = vmatprep.subr.bf16.mxu0 %v535_v12  ;;  %v555_v32 = vld [vmem:[%s713_s0] ss:$16 sps:$4 sm:$0xff]   ;;  %v557_v33 = vld [vmem:[%s713_s0 + $0x4] ss:$16 sps:$4 sm:$0xff]   ;;  %v558_v34 = vld [vmem:[%s713_s0 + $0x8] ss:$16 sps:$4 sm:$0xff]  }
   0xe   :  { %507 = vmatprep.subr.bf16.mxu1 %v536_v13  ;;  %v560_v35 = vld [vmem:[%s713_s0 + $0xc] ss:$16 sps:$4 sm:$0xff]   ;;  %338 = vmatprep.mubr.bf16.mxu0 %v557_v33 }
   0xf   :  { %379 = vmatprep.mubr.bf16.mxu1 %v560_v35 }
  0x10   :  { %486 = vmatpush3.bf16.msra.mxu0 %v537_v14 }
  0x11   :  { %508 = vmatpush3.bf16.msra.mxu1 %v538_v15  ;;  %487 = vmatprep.subr.bf16.mxu0 %v539_v16 }
  0x12   :  { %509 = vmatprep.subr.bf16.mxu1 %v540_v17 }
  0x14   :  { %488 = vmatpush3.bf16.msra.mxu0 %v541_v18 }
  0x15   :  { %510 = vmatpush3.bf16.msra.mxu1 %v542_v19  ;;  %489 = vmatprep.subr.bf16.mxu0 %v543_v20 }
  0x16   :  { %511 = vmatprep.subr.bf16.mxu1 %v544_v21 }
  0x18   :  { %490 = vmatpush3.bf16.msra.mxu0 %v545_v22 }
  0x19   :  { %512 = vmatpush3.bf16.msra.mxu1 %v546_v23  ;;  %491 = vmatprep.subr.bf16.mxu0 %v547_v24 }
  0x1a   :  { %513 = vmatprep.subr.bf16.mxu1 %v548_v25 }
  0x1c   :  { %492 = vmatpush3.bf16.msra.mxu0 %v549_v26 }
  0x1d   :  { %514 = vmatpush3.bf16.msra.mxu1 %v550_v27  ;;  %493 = vmatprep.subr.bf16.mxu0 %v551_v28 }
  0x1e   :  { %515 = vmatprep.subr.bf16.mxu1 %v552_v29 }
  0x20   :  { %494 = vmatpush3.bf16.msra.mxu0 %v553_v30 }
  0x21   :  { %516 = vmatpush3.bf16.msra.mxu1 %v554_v31 }
  0x23   :  { %339 = vmatmul.mubr.bf16.vlgmr.msra.gmra.mrb[0].mxu0 %v555_v32 }
  0x24   :  { %380 = vmatmul.mubr.bf16.vlgmr.msra.gmra.mrb[0].mxu1 %v558_v34 }
  0xf6   :  { %v495_v36 = vpop.f32.mrb[0].mxu0 }
  0xf7   :  { %v517_v37 = vpop.f32.mrb[0].mxu1  ;;  %v496_v38 = vpop.f32.mrb[1].mxu0 }
  0xf8   :  { %v497_v39 = vadd.f32 %v496_v38, %v495_v36  ;;  %v518_v40 = vpop.f32.mrb[1].mxu1  ;;  %v498_v41 = vpop.f32.mrb[2].mxu0 }
  0xf9   :  { %v519_v42 = vadd.f32 %v518_v40, %v517_v37  ;;  %v520_v43 = vpop.f32.mrb[2].mxu1  ;;  %v499_v44 = vpop.f32.mrb[3].mxu0 }
  0xfa   :  { %v500_v45 = vadd.f32 %v499_v44, %v498_v41  ;;  %v521_v46 = vpop.f32.mrb[3].mxu1 }
  0xfb   :  { %v382_v47 = vadd.f32 %v519_v42, %v497_v39  ;;  %v522_v48 = vadd.f32 %v521_v46, %v520_v43 }
  0xfd   :  { %429 = vst [vmem:[%s714_s3] sm:$0xff] %v382_v47  ;;  %v385_v49 = vadd.f32 %v522_v48, %v500_v45  ;;  %v404_v50 = vmul.f32 %v382_v47, %v382_v47 }
  0xff   :  { %v397_v51 = vadd.f32 %v385_v49, %v382_v47  ;;  %v405_v52 = vmul.f32 %v385_v49, %v385_v49  ;;  %430 = vst [vmem:[%s714_s3 + $0x8] sm:$0xff] %v385_v49 }
 0x101   :  { %v398_v53 = vrot.slane %v397_v51, 4  ;;  %v406_v54 = vadd.f32 %v405_v52, %v404_v50 }
 0x103   :  { %v399_v55 = vadd.f32 %v398_v53, %v397_v51  ;;  %v407_v56 = vrot.slane %v406_v54, 4 }
 0x105   :  { %v400_v57 = vrot.slane %v399_v55, 2  ;;  %v408_v58 = vadd.f32 %v407_v56, %v406_v54 }
 0x107   :  { %v401_v59 = vadd.f32 %v400_v57, %v399_v55  ;;  %v409_v60 = vrot.slane %v408_v58, 2 }
 0x109   :  { %v402_v61 = vrot.slane %v401_v59, 1  ;;  %v410_v62 = vadd.f32 %v409_v60, %v408_v58 }
 0x10b   :  { %v403_v63 = vadd.f32 %v402_v61, %v401_v59  ;;  %v411_v0 = vrot.slane %v410_v62, 1 }
 0x10d   :  { %v412_v1 = vadd.f32 %v411_v0, %v410_v62  ;;  %417 = vst [vmem:[%s715_s4] sm:$0x1] %v403_v63 }
 0x10f   :  { %418 = vst [vmem:[%s716_s5] sm:$0x1] %v412_v1 }

// kernel: multiscale_forward.42
= control target key start
LH: loop header
LB: loop body
LE: loop exit
PB: predicated region body
PF: predicated region fallthrough
CT: control target
= control target key end

     0   :  { %s100_s0 = inlined_call_operand.vmem [shape: f32[16,128], index: 0, kind: input, shape index: {}]   ;;  %s101_s1 = inlined_call_operand.vmem [shape: f32[1,128], index: 1, kind: input, shape index: {}]   ;;  %s102_s2 = inlined_call_operand.vmem [shape: f32[1,128], index: 2, kind: input, shape index: {}]   ;;  %s103_s3 = inlined_call_operand.vmem [shape: bf16[16,128], index: 3, kind: output, shape index: {}]  }
   0x1   :  { %v14_v0 = vld [vmem:[%s100_s0] sm:$0xff]  ;;  %v15_v1 = vld [vmem:[%s100_s0 + $0x8] sm:$0xff] }
   0x2   :  { %v54_v2 = vld [vmem:[%s101_s1] ss:$0 sm:$0xff] }
   0x3   :  { %v23_v3 = vmul.f32 %v54_v2, %v14_v0  ;;  %v24_v4 = vmul.f32 %v54_v2, %v15_v1  ;;  %v55_v5 = vld [vmem:[%s102_s2] ss:$0 sm:$0xff] }
   0x5   :  { %v32_v6 = vadd.f32 %v55_v5, %v23_v3  ;;  %v33_v7 = vadd.f32 %v55_v5, %v24_v4 }
   0x7   :  { %vm34_vm0 = vcmp.ge.f32.partialorder %v32_v6, 0.0  ;;  %vm35_vm1 = vcmp.ge.f32.partialorder %v33_v7, 0.0  ;;  %v36_v8 = vmul.f32 0.2, %v32_v6  ;;  %v37_v9 = vmul.f32 0.2, %v33_v7 }
   0x9   :  { %v38_v10 = vsel %vm34_vm0, %v32_v6, %v36_v8  ;;  %v39_v11 = vsel %vm35_vm1, %v33_v7, %v37_v9 }
   0xa   :  { %v63_v12 = vpack.c.bf16 %v39_v11, %v38_v10 }
   0xc   :  { %64 = vst [vmem:[%s103_s3] sm:$0xff] %v63_v12  }

// kernel: multiscale_forward.43
= control target key start
LH: loop header
LB: loop body
LE: loop exit
PB: predicated region body
PF: predicated region fallthrough
CT: control target
= control target key end

     0   :  { %s1170_s18 = smov 0   ;;  %s1172_s19 = smov 0   ;;  %s1289_s0 = inlined_call_operand.vmem [shape: bf16[16,1024], index: 0, kind: input, shape index: {}]   ;;  %s1290_s1 = inlined_call_operand.vmem [shape: bf16[1024,128], index: 1, kind: input, shape index: {}]   ;;  %s1291_s2 = inlined_call_operand.vmem [shape: f32[1,128], index: 2, kind: input, shape index: {}]   ;;  %s1292_s3 = inlined_call_operand.vmem [shape: f32[16,128], index: 3, kind: output, shape index: {0}]   ;;  %s1293_s4 = inlined_call_operand.vmem [shape: f32[1,128], index: 4, kind: output, shape index: {1}]   ;;  %s1294_s5 = inlined_call_operand.vmem [shape: f32[1,128], index: 5, kind: output, shape index: {2}]  }
   0x1   :  { %s1174_s20 = smov 0   ;;  %s1176_s21 = smov 0  }
   0x2   :  { %s1178_s22 = smov 0  }
   0x3 LB: > { %s28_s2 = sadd.s32 1, %s1133_s21  ;;  %p51_p1 = scmp.ne.s32.totalorder %s1125_s19, %s1121_s18  ;;  %s1137_s22 = sphi %s1178_s22, %s16_s22   ;;  %s1133_s21 = sphi %s1176_s21, %s1298_s21   ;;  %s1129_s20 = sphi %s1174_s20, %s1297_s20   ;;  %s1125_s19 = sphi %s1172_s19, %s1296_s19   ;;  %s1121_s18 = sphi %s1170_s18, %s1295_s18  }
   0x4   : > { %p29_p0 = scmp.ge.s32.totalorder %s28_s2, 2  ;;  %p52_p2 = scmp.eq.s32.totalorder %s1137_s22, 0 }
   0x5   : > { %s44_s24 = sadd.s32 1, %s1125_s19  ;;  %p923_p5 = scmp.ge.s32.totalorder %s1137_s22, 2 }
   0x6   : > { %s1300_s2 = smov (%p29_p0, %s28_s2), 0  ;;  %p53_p3 = por %p52_p2, %p51_p1 }
   0x7   : > { %s40_s23 = ssub.s32 %s1133_s21, %s1300_s2  ;;  %217 = sbr.rel (%p923_p5) target bundleno = 21 (0x15), region = 20 }
   0x8   : > { %p42_p4 = scmp.eq.s32.totalorder %s40_s23, 0 }
   0xa   : > { %s1205_s25 = scalar_select %p42_p4, %s1125_s19, %s44_s24  }
   0xe   : > { %220 = sbr.rel (!%p53_p3) target bundleno = 21 (0x15), region = 24  ;;  %s222_s26 = sand.u32 (%p53_p3), 1, %s1125_s19  }
   0xf   : > { %s975_s27 = sshll.u32 (%p53_p3), %s1133_s21, 4  ;;  %s924_s28 = sshll.u32 (%p53_p3), %s222_s26, 5 }
  0x10   : > { %s230_s6 = scalar_lea.vmem (%p53_p3), %s1289_s0, %s975_s27  ;;  %s224_s7 = scalar_lea.vmem (%p53_p3), [#allocation3], %s924_s28 }
  0x11   : > { %v243_v0 = vld [vmem:[%s230_s6] sm:$0xff] (%p53_p3)  ;;  %v245_v1 = vld [vmem:[%s230_s6 + $0x8] sm:$0xff] (%p53_p3) }
  0x12   : > { %v247_v2 = vld [vmem:[%s230_s6 + $0x20] sm:$0xff] (%p53_p3)  ;;  %244 = vst [vmem:[%s224_s7] sm:$0xff] (%p53_p3), %v243_v0  ;;  %246 = vst [vmem:[%s224_s7 + $0x8] sm:$0xff] (%p53_p3), %v245_v1  ;;  %v249_v3 = vld [vmem:[%s230_s6 + $0x28] sm:$0xff] (%p53_p3) }
  0x13   : > { %248 = vst [vmem:[%s224_s7 + $0x10] sm:$0xff] (%p53_p3), %v247_v2  ;;  %250 = vst [vmem:[%s224_s7 + $0x18] sm:$0xff] (%p53_p3), %v249_v3 }
  0x15 PF: > { %p927_p6 = scmp.ge.s32.totalorder %s1137_s22, 1  ;;  %p267_p7 = scmp.lt.s32.totalorder %s1137_s22, 3 }
  0x17   : > { %p268_p8 = pnand %p927_p6, %p267_p7 }
  0x18   : > { %s274_s8 = sand.u32 (!%p268_p8), 1, %s1121_s18   ;;  %s929_s9 = sshll.u32 (!%p268_p8), %s1129_s20, 6 }
  0x19   : > { %271 = sbr.rel (%p268_p8) target bundleno = 320 (0x140), region = 51  ;;  %s928_s10 = sshll.u32 (!%p268_p8), %s274_s8, 5 }
  0x1a   : > { %p324_p9 = scmp.lt.s32.totalorder (!%p268_p8), %s929_s9, 127  ;;  %s1222_s15 = scalar_lea.vmem (!%p268_p8), [#allocation3], %s928_s10 }
  0x1b   : > { %p931_p10 = scmp.ne.s32.totalorder (!%p268_p8), %s1129_s20, 0 }
  0x20   : > { %s1302_s9 = smov (!%p324_p9, %s929_s9), 127  ;;  %354 = sbr.rel (%p931_p10) target bundleno = 39 (0x27), region = 59 }
  0x21   : > { %s930_s11 = sshll.u32 %s1302_s9, 2  ;;  %v1139_v4 = vmov (!%p931_p10), 0.0  }
  0x22   : > { %s1220_s14 = scalar_lea.vmem %s1290_s1, %s930_s11  ;;  %355 = vst [vmem:[#allocation2] sm:$0xff] (!%p931_p10), %v1139_v4  ;;  %356 = vst [vmem:[#allocation2 + $0x8] sm:$0xff] (!%p931_p10), %v1139_v4 }
  0x27 PF: > { %v1061_v5 = vld [vmem:[%s1220_s14 + $0x40] sm:$0xff]   ;;  %v1065_v9 = vld [vmem:[%s1220_s14 + $0x48] sm:$0xff]   ;;  %v1069_v13 = vld [vmem:[%s1220_s14 + $0x50] sm:$0xff]   ;;  %p968_p11 = scmp.ne.s32.totalorder %s1129_s20, 1 }
  0x28   : > { %v1062_v6 = vld [vmem:[%s1220_s14 + $0xc0] sm:$0xff]   ;;  %976 = vmatprep.subr.bf16.mxu0 %v1061_v5  ;;  %v1066_v10 = vld [vmem:[%s1220_s14 + $0xc8] sm:$0xff]   ;;  %v1070_v14 = vld [vmem:[%s1220_s14 + $0xd0] sm:$0xff]  }
  0x29   : > { %v1063_v7 = vld [vmem:[%s1220_s14] sm:$0xff]   ;;  %998 = vmatprep.subr.bf16.mxu1 %v1062_v6  ;;  %v1067_v11 = vld [vmem:[%s1220_s14 + $0x8] sm:$0xff]   ;;  %v1071_v15 = vld [vmem:[%s1220_s14 + $0x10] sm:$0xff]  }
  0x2a   : > { %v1064_v8 = vld [vmem:[%s1220_s14 + $0x80] sm:$0xff]   ;;  %977 = vmatpush3.bf16.msra.mxu0 %v1063_v7  ;;  %v1068_v12 = vld [vmem:[%s1220_s14 + $0x88] sm:$0xff]   ;;  %v1072_v16 = vld [vmem:[%s1220_s14 + $0x90] sm:$0xff]  }
  0x2b   : > { %999 = vmatpush3.bf16.msra.mxu1 %v1064_v8  ;;  %978 = vmatprep.subr.bf16.mxu0 %v1065_v9  ;;  %v1073_v17 = vld [vmem:[%s1220_s14 + $0x58] sm:$0xff]   ;;  %v1077_v21 = vld [vmem:[%s1220_s14 + $0x60] sm:$0xff]   ;;  %v1081_v25 = vld [vmem:[%s1220_s14 + $0x68] sm:$0xff]  }
  0x2c   : > { %1000 = vmatprep.subr.bf16.mxu1 %v1066_v10  ;;  %v1074_v18 = vld [vmem:[%s1220_s14 + $0xd8] sm:$0xff]   ;;  %v1078_v22 = vld [vmem:[%s1220_s14 + $0xe0] sm:$0xff]   ;;  %v1082_v26 = vld [vmem:[%s1220_s14 + $0xe8] sm:$0xff]  }
  0x2d   : > { %v1075_v19 = vld [vmem:[%s1220_s14 + $0x18] sm:$0xff]   ;;  %v1079_v23 = vld [vmem:[%s1220_s14 + $0x20] sm:$0xff]   ;;  %v1083_v27 = vld [vmem:[%s1220_s14 + $0x28] sm:$0xff]  }
  0x2e   : > { %979 = vmatpush3.bf16.msra.mxu0 %v1067_v11  ;;  %v1076_v20 = vld [vmem:[%s1220_s14 + $0x98] sm:$0xff]   ;;  %v1080_v24 = vld [vmem:[%s1220_s14 + $0xa0] sm:$0xff]   ;;  %v1084_v28 = vld [vmem:[%s1220_s14 + $0xa8] sm:$0xff]  }
  0x2f   : > { %1001 = vmatpush3.bf16.msra.mxu1 %v1068_v12  ;;  %980 = vmatprep.subr.bf16.mxu0 %v1069_v13  ;;  %v1085_v29 = vld [vmem:[%s1220_s14 + $0x70] sm:$0xff]   ;;  %v1089_v33 = vld [vmem:[%s1220_s14 + $0x78] sm:$0xff]   ;;  %v357_v50 = vld [vmem:[#allocation2] sm:$0xff] }
  0x30   : > { %1002 = vmatprep.subr.bf16.mxu1 %v1070_v14  ;;  %v1086_v30 = vld [vmem:[%s1220_s14 + $0xf0] sm:$0xff]   ;;  %v1090_v34 = vld [vmem:[%s1220_s14 + $0xf8] sm:$0xff]   ;;  %v358_v55 = vld [vmem:[#allocation2 + $0x8] sm:$0xff] }
  0x31   : > { %v1087_v31 = vld [vmem:[%s1220_s14 + $0x30] sm:$0xff]   ;;  %v1091_v35 = vld [vmem:[%s1220_s14 + $0x38] sm:$0xff]  }
  0x32   : > { %981 = vmatpush3.bf16.msra.mxu0 %v1071_v15  ;;  %v1088_v32 = vld [vmem:[%s1220_s14 + $0xb0] sm:$0xff]   ;;  %v1092_v36 = vld [vmem:[%s1220_s14 + $0xb8] sm:$0xff]  }
  0x33   : > { %1003 = vmatpush3.bf16.msra.mxu1 %v1072_v16  ;;  %982 = vmatprep.subr.bf16.mxu0 %v1073_v17  ;;  %v1093_v37 = vld [vmem:[%s1222_s15] ss:$16 sps:$4 sm:$0xff]   ;;  %v1095_v38 = vld [vmem:[%s1222_s15 + $0x4] ss:$16 sps:$4 sm:$0xff]   ;;  %v1096_v39 = vld [vmem:[%s1222_s15 + $0x8] ss:$16 sps:$4 sm:$0xff]  }
  0x34   : > { %1004 = vmatprep.subr.bf16.mxu1 %v1074_v18  ;;  %v1098_v40 = vld [vmem:[%s1222_s15 + $0xc] ss:$16 sps:$4 sm:$0xff]   ;;  %671 = vmatprep.mubr.bf16.mxu0 %v1095_v38 }
  0x35   : > { %712 = vmatprep.mubr.bf16.mxu1 %v1098_v40 }
  0x36   : > { %983 = vmatpush3.bf16.msra.mxu0 %v1075_v19 }
  0x37   : > { %1005 = vmatpush3.bf16.msra.mxu1 %v1076_v20  ;;  %984 = vmatprep.subr.bf16.mxu0 %v1077_v21 }
  0x38   : > { %1006 = vmatprep.subr.bf16.mxu1 %v1078_v22 }
  0x3a   : > { %985 = vmatpush3.bf16.msra.mxu0 %v1079_v23 }
  0x3b   : > { %1007 = vmatpush3.bf16.msra.mxu1 %v1080_v24  ;;  %986 = vmatprep.subr.bf16.mxu0 %v1081_v25 }
  0x3c   : > { %1008 = vmatprep.subr.bf16.mxu1 %v1082_v26 }
  0x3e   : > { %987 = vmatpush3.bf16.msra.mxu0 %v1083_v27 }
  0x3f   : > { %1009 = vmatpush3.bf16.msra.mxu1 %v1084_v28  ;;  %988 = vmatprep.subr.bf16.mxu0 %v1085_v29 }
  0x40   : > { %1010 = vmatprep.subr.bf16.mxu1 %v1086_v30 }
  0x42   : > { %989 = vmatpush3.bf16.msra.mxu0 %v1087_v31 }
  0x43   : > { %1011 = vmatpush3.bf16.msra.mxu1 %v1088_v32  ;;  %990 = vmatprep.subr.bf16.mxu0 %v1089_v33 }
  0x44   : > { %1012 = vmatprep.subr.bf16.mxu1 %v1090_v34 }
  0x46   : > { %991 = vmatpush3.bf16.msra.mxu0 %v1091_v35 }
  0x47   : > { %1013 = vmatpush3.bf16.msra.mxu1 %v1092_v36 }
  0x49   : > { %672 = vmatmul.mubr.bf16.vlgmr.msra.gmra.mrb[0].mxu0 %v1093_v37 }
  0x4a   : > { %713 = vmatmul.mubr.bf16.vlgmr.msra.gmra.mrb[0].mxu1 %v1096_v39 }
 0x11c   : > { %v992_v41 = vpop.f32.mrb[0].mxu0 }
 0x11d   : > { %v1014_v42 = vpop.f32.mrb[0].mxu1  ;;  %v993_v43 = vpop.f32.mrb[1].mxu0 }
 0x11e   : > { %v994_v44 = vadd.f32 %v993_v43, %v992_v41  ;;  %v1015_v45 = vpop.f32.mrb[1].mxu1  ;;  %v995_v46 = vpop.f32.mrb[2].mxu0 }
 0x11f   : > { %v1016_v47 = vadd.f32 %v1015_v45, %v1014_v42  ;;  %v1017_v48 = vpop.f32.mrb[2].mxu1  ;;  %v996_v49 = vpop.f32.mrb[3].mxu0 }
 0x120   : > { %v997_v51 = vadd.f32 %v996_v49, %v995_v46  ;;  %v1018_v52 = vpop.f32.mrb[3].mxu1 }
 0x121   : > { %v715_v53 = vadd.f32 %v1016_v47, %v994_v44  ;;  %v1019_v54 = vadd.f32 %v1018_v52, %v1017_v48  ;;  %728 = sbr.rel (%p968_p11) target bundleno = 320 (0x140), region = 63 }
 0x123   : > { %v721_v56 = vadd.f32 %v715_v53, %v357_v50  ;;  %v718_v57 = vadd.f32 %v1019_v54, %v997_v51 }
 0x125   : > { %723 = vst [vmem:[#allocation2] sm:$0xff] %v721_v56  ;;  %v722_v58 = vadd.f32 %v718_v57, %v358_v55 }
 0x127   : > { %724 = vst [vmem:[#allocation2 + $0x8] sm:$0xff] %v722_v58 }
 0x12c   : > { %v729_v59 = vld [vmem:[#allocation2] sm:$0xff] }
 0x12d   : > { %763 = vst [vmem:[%s1292_s3] sm:$0xff] %v729_v59  ;;  %v738_v62 = vmul.f32 %v729_v59, %v729_v59 }
 0x12e   : > { %v730_v60 = vld [vmem:[#allocation2 + $0x8] sm:$0xff] }
 0x12f   : > { %v731_v61 = vadd.f32 %v730_v60, %v729_v59  ;;  %764 = vst [vmem:[%s1292_s3 + $0x8] sm:$0xff] %v730_v60  ;;  %v739_v63 = vmul.f32 %v730_v60, %v730_v60 }
 0x131   : > { %v732_v0 = vrot.slane %v731_v61, 4  ;;  %v740_v1 = vadd.f32 %v739_v63, %v738_v62 }
 0x133   : > { %v733_v2 = vadd.f32 %v732_v0, %v731_v61  ;;  %v741_v3 = vrot.slane %v740_v1, 4 }
 0x135   : > { %v734_v4 = vrot.slane %v733_v2, 2  ;;  %v742_v5 = vadd.f32 %v741_v3, %v740_v1 }
 0x137   : > { %v735_v6 = vadd.f32 %v734_v4, %v733_v2  ;;  %v743_v7 = vrot.slane %v742_v5, 2 }
 0x139   : > { %v736_v8 = vrot.slane %v735_v6, 1  ;;  %v744_v9 = vadd.f32 %v743_v7, %v742_v5 }
 0x13b   : > { %v737_v10 = vadd.f32 %v736_v8, %v735_v6  ;;  %v745_v11 = vrot.slane %v744_v9, 1 }
 0x13d   : > { %751 = vst [vmem:[%s1293_s4] sm:$0x1] %v737_v10  ;;  %v746_v12 = vadd.f32 %v745_v11, %v744_v9 }
 0x13f   : > { %752 = vst [vmem:[%s1294_s5] sm:$0x1] %v746_v12 }
 0x140 PF: > { %s16_s22 = sadd.s32 1, %s1137_s22   ;;  %s1295_s18 = smov %s1125_s19 }
 0x141   : > { %p13_p12 = scmp.ge.s32.totalorder %s16_s22, 4   ;;  %s1296_s19 = smov %s1205_s25 }
 0x142   : > { %s1297_s20 = smov %s1133_s21  ;;  %s1298_s21 = smov %s1300_s2 }
 0x143   :  { %15 = sbr.rel (!%p13_p12) target bundleno = 3 (0x3), region = 136 }

// kernel: multiscale_forward.32
= control target key start
LH: loop header
LB: loop body
LE: loop exit
PB: predicated region body
PF: predicated region fallthrough
CT: control target
= control target key end

     0   :  { %s1100_s1 = inlined_call_operand.vmem [shape: bf16[256,128], index: 1, kind: input, shape index: {}]   ;;  %s1101_s0 = inlined_call_operand.vmem [shape: bf16[152,256], index: 0, kind: input, shape index: {}]   ;;  %s1102_s2 = inlined_call_operand.vmem [shape: f32[1,128], index: 2, kind: input, shape index: {}]   ;;  %s1103_s3 = inlined_call_operand.vmem [shape: bf16[152,128], index: 3, kind: output, shape index: {}]  }
   0x1   :  { %v876_v0 = vld [vmem:[%s1100_s1 + $0x40] sm:$0xff]   ;;  %v878_v2 = vld [vmem:[%s1100_s1 + $0x48] sm:$0xff]   ;;  %v880_v4 = vld [vmem:[%s1100_s1 + $0x50] sm:$0xff]  }
   0x2   :  { %v877_v1 = vld [vmem:[%s1100_s1] sm:$0xff]   ;;  %784 = vmatprep.subr.bf16.mxu0 %v876_v0  ;;  %860 = vmatprep.subr.bf16.mxu1 %v876_v0  ;;  %v879_v3 = vld [vmem:[%s1100_s1 + $0x8] sm:$0xff]   ;;  %v881_v5 = vld [vmem:[%s1100_s1 + $0x10] sm:$0xff]  }
   0x3   :  { %785 = vmatpush3.bf16.msra.mxu0 %v877_v1  ;;  %868 = vmatpush3.bf16.msra.mxu1 %v877_v1  ;;  %v882_v6 = vld [vmem:[%s1100_s1 + $0x58] sm:$0xff]   ;;  %v884_v8 = vld [vmem:[%s1100_s1 + $0x60] sm:$0xff]   ;;  %v886_v10 = vld [vmem:[%s1100_s1 + $0x68] sm:$0xff]  }
   0x4   :  { %786 = vmatprep.subr.bf16.mxu0 %v878_v2  ;;  %861 = vmatprep.subr.bf16.mxu1 %v878_v2  ;;  %v883_v7 = vld [vmem:[%s1100_s1 + $0x18] sm:$0xff]   ;;  %v885_v9 = vld [vmem:[%s1100_s1 + $0x20] sm:$0xff]   ;;  %v887_v13 = vld [vmem:[%s1100_s1 + $0x28] sm:$0xff]  }
   0x5   :  { %v894_v11 = vld [vmem:[%s1101_s0 + $0x4] ss:$8 sps:$4 sm:$0xff]   ;;  %v897_v12 = vld [vmem:[%s1101_s0 + $0x54] ss:$8 sps:$4 sm:$0xff]   ;;  %v892_v18 = vld [vmem:[%s1101_s0] ss:$8 sps:$4 sm:$0xff]  }
   0x6   :  { %v888_v14 = vld [vmem:[%s1100_s1 + $0x70] sm:$0xff]   ;;  %333 = vmatprep.mubr.bf16.mxu0 %v894_v11  ;;  %373 = vmatprep.mubr.bf16.mxu1 %v897_v12  ;;  %v890_v16 = vld [vmem:[%s1100_s1 + $0x78] sm:$0xff]   ;;  %v900_v21 = vld [vmem:[%s1101_s0 + $0x64] ss:$8 sps:$4 sm:$0xff]  }
   0x7   :  { %787 = vmatpush3.bf16.msra.mxu0 %v879_v3  ;;  %869 = vmatpush3.bf16.msra.mxu1 %v879_v3  ;;  %v889_v15 = vld [vmem:[%s1100_s1 + $0x30] sm:$0xff]   ;;  %v891_v17 = vld [vmem:[%s1100_s1 + $0x38] sm:$0xff]   ;;  %v903_v23 = vld [vmem:[%s1101_s0 + $0x60] ss:$8 sps:$4 sm:$0xff]  }
   0x8   :  { %788 = vmatprep.subr.bf16.mxu0 %v880_v4  ;;  %862 = vmatprep.subr.bf16.mxu1 %v880_v4  ;;  %v895_v19 = vld [vmem:[%s1101_s0 + $0x50] ss:$8 sps:$4 sm:$0xff]   ;;  %v898_v20 = vld [vmem:[%s1101_s0 + $0x14] ss:$8 sps:$4 sm:$0xff]   ;;  %v904_v24 = vld [vmem:[%s1101_s0 + $0x24] ss:$8 sps:$4 sm:$0xff]  }
   0x9   :  { %v902_v22 = vld [vmem:[%s1101_s0 + $0x10] ss:$8 sps:$4 sm:$0xff]   ;;  %v906_v25 = vld [vmem:[%s1101_s0 + $0x74] ss:$8 sps:$4 sm:$0xff]   ;;  %v908_v26 = vld [vmem:[%s1101_s0 + $0x20] ss:$8 sps:$4 sm:$0xff]  }
   0xa   :  { %v909_v27 = vld [vmem:[%s1101_s0 + $0x70] ss:$8 sps:$4 sm:$0xff]   ;;  %v910_v28 = vld [vmem:[%s1101_s0 + $0x34] ss:$8 sps:$4 sm:$0xff]   ;;  %v912_v29 = vld [vmem:[%s1101_s0 + $0x84] ss:$8 sps:$4 sm:$0xff]  }
   0xb   :  { %789 = vmatpush3.bf16.msra.mxu0 %v881_v5  ;;  %870 = vmatpush3.bf16.msra.mxu1 %v881_v5  ;;  %v75_v30 = vld [vmem:[%s1101_s0 + $0x90] sm:$0xff]  ;;  %v915_v32 = vld [vmem:[%s1101_s0 + $0x80] ss:$8 sps:$4 sm:$0xff]   ;;  %v916_v33 = vld [vmem:[%s1101_s0 + $0x44] ss:$8 sps:$4 sm:$0xff]  }
   0xc   :  { %790 = vmatprep.subr.bf16.mxu0 %v882_v6  ;;  %863 = vmatprep.subr.bf16.mxu1 %v882_v6  ;;  %v914_v31 = vld [vmem:[%s1101_s0 + $0x30] ss:$8 sps:$4 sm:$0xff]   ;;  %v675_v34 = vcombine.high %v75_v30, %v75_v30  ;;  %v919_v35 = vld [vmem:[%s1101_s0 + $0x40] ss:$8 sps:$4 sm:$0xff]   ;;  %v674_v36 = vcombine.low %v75_v30, %v75_v30 }
   0xd   :  { %v1049_v40 = vld [vmem:[%s1102_s2] ss:$0 sm:$0xff] }
   0xf   :  { %791 = vmatpush3.bf16.msra.mxu0 %v883_v7  ;;  %871 = vmatpush3.bf16.msra.mxu1 %v883_v7 }
  0x10   :  { %792 = vmatprep.subr.bf16.mxu0 %v884_v8  ;;  %864 = vmatprep.subr.bf16.mxu1 %v884_v8 }
  0x13   :  { %793 = vmatpush3.bf16.msra.mxu0 %v885_v9  ;;  %872 = vmatpush3.bf16.msra.mxu1 %v885_v9 }
  0x14   :  { %794 = vmatprep.subr.bf16.mxu0 %v886_v10  ;;  %865 = vmatprep.subr.bf16.mxu1 %v886_v10 }
  0x17   :  { %795 = vmatpush3.bf16.msra.mxu0 %v887_v13  ;;  %873 = vmatpush3.bf16.msra.mxu1 %v887_v13 }
  0x18   :  { %796 = vmatprep.subr.bf16.mxu0 %v888_v14  ;;  %866 = vmatprep.subr.bf16.mxu1 %v888_v14 }
  0x1b   :  { %797 = vmatpush3.bf16.msra.mxu0 %v889_v15  ;;  %874 = vmatpush3.bf16.msra.mxu1 %v889_v15 }
  0x1c   :  { %798 = vmatprep.subr.bf16.mxu0 %v890_v16  ;;  %867 = vmatprep.subr.bf16.mxu1 %v890_v16 }
  0x1f   :  { %799 = vmatpush3.bf16.msra.mxu0 %v891_v17  ;;  %875 = vmatpush3.bf16.msra.mxu1 %v891_v17 }
  0x22   :  { %334 = vmatmul.mubr.bf16.vlgmr.msra.gmra.mrb[0].mxu0 %v892_v18  ;;  %374 = vmatmul.mubr.bf16.vlgmr.msra.gmra.mrb[0].mxu1 %v895_v19 }
  0x23   :  { %341 = vmatprep.mubr.bf16.mxu0 %v898_v20  ;;  %381 = vmatprep.mubr.bf16.mxu1 %v900_v21 }
  0x2a   :  { %342 = vmatmul.mubr.bf16.gmra.mrb[4].mxu0 %v902_v22  ;;  %382 = vmatmul.mubr.bf16.gmra.mrb[4].mxu1 %v903_v23 }
  0x2b   :  { %349 = vmatprep.mubr.bf16.mxu0 %v904_v24  ;;  %389 = vmatprep.mubr.bf16.mxu1 %v906_v25 }
  0x32   :  { %350 = vmatmul.mubr.bf16.gmra.mrb[8].mxu0 %v908_v26  ;;  %390 = vmatmul.mubr.bf16.gmra.mrb[8].mxu1 %v909_v27 }
  0x33   :  { %357 = vmatprep.mubr.bf16.mxu0 %v910_v28  ;;  %397 = vmatprep.mubr.bf16.mxu1 %v912_v29 }
  0x3a   :  { %358 = vmatmul.mubr.bf16.gmra.mrb[12].mxu0 %v914_v31  ;;  %398 = vmatmul.mubr.bf16.gmra.mrb[12].mxu1 %v915_v32 }
  0x3b   :  { %365 = vmatprep.mubr.bf16.mxu0 %v916_v33  ;;  %405 = vmatprep.mubr.bf16.mxu1 %v675_v34 }
  0x42   :  { %366 = vmatmul.mubr.bf16.gmra.mrb[16].mxu0 %v919_v35  ;;  %406 = vmatmul.mubr.bf16.gmra.mrb[16].mxu1 %v674_v36 }
  0xf5   :  { %v800_v37 = vpop.f32.mrb[0].mxu0  ;;  %v830_v38 = vpop.f32.mrb[0].mxu1 }
  0xf6   :  { %v801_v39 = vpop.f32.mrb[1].mxu0  ;;  %v831_v41 = vpop.f32.mrb[1].mxu1 }
  0xf7   :  { %v802_v42 = vadd.f32 %v801_v39, %v800_v37  ;;  %v832_v43 = vadd.f32 %v831_v41, %v830_v38  ;;  %v803_v44 = vpop.f32.mrb[2].mxu0  ;;  %v833_v45 = vpop.f32.mrb[2].mxu1 }
  0xf8   :  { %v804_v46 = vpop.f32.mrb[3].mxu0  ;;  %v834_v47 = vpop.f32.mrb[3].mxu1 }
  0xf9   :  { %v480_v48 = vadd.f32 %v802_v42, %v1049_v40  ;;  %v490_v49 = vadd.f32 %v832_v43, %v1049_v40  ;;  %v805_v50 = vadd.f32 %v804_v46, %v803_v44  ;;  %v835_v51 = vadd.f32 %v834_v47, %v833_v45 }
  0xfb   :  { %v518_v52 = vmul.f32 0.2, %v480_v48  ;;  %v528_v53 = vmul.f32 0.2, %v490_v49  ;;  %vm499_vm0 = vcmp.ge.f32.partialorder %v480_v48, 0.0  ;;  %vm509_vm1 = vcmp.ge.f32.partialorder %v490_v49, 0.0 }
  0xfc   :  { %v481_v54 = vadd.f32 %v805_v50, %v1049_v40  ;;  %v491_v55 = vadd.f32 %v835_v51, %v1049_v40 }
  0xfd   :  { %v806_v56 = vpop.f32.mrb[4].mxu0  ;;  %v836_v57 = vpop.f32.mrb[4].mxu1  ;;  %v537_v60 = vsel %vm499_vm0, %v480_v48, %v518_v52  ;;  %v547_v61 = vsel %vm509_vm1, %v490_v49, %v528_v53 }
  0xfe   :  { %vm500_vm2 = vcmp.ge.f32.partialorder %v481_v54, 0.0  ;;  %v519_v58 = vmul.f32 0.2, %v481_v54  ;;  %vm510_vm3 = vcmp.ge.f32.partialorder %v491_v55, 0.0  ;;  %v529_v59 = vmul.f32 0.2, %v491_v55 }
  0xff   :  { %v807_v62 = vpop.f32.mrb[5].mxu0  ;;  %v837_v63 = vpop.f32.mrb[5].mxu1 }
 0x100   :  { %v538_v0 = vsel %vm500_vm2, %v481_v54, %v519_v58  ;;  %v548_v1 = vsel %vm510_vm3, %v491_v55, %v529_v59  ;;  %v808_v2 = vadd.f32 %v807_v62, %v806_v56  ;;  %v838_v3 = vadd.f32 %v837_v63, %v836_v57  ;;  %v809_v4 = vpop.f32.mrb[6].mxu0  ;;  %v839_v5 = vpop.f32.mrb[6].mxu1 }
 0x101   :  { %v734_v6 = vpack.c.bf16 %v538_v0, %v537_v60  ;;  %v759_v7 = vpack.c.bf16 %v548_v1, %v547_v61  ;;  %v810_v8 = vpop.f32.mrb[7].mxu0  ;;  %v840_v9 = vpop.f32.mrb[7].mxu1 }
 0x102   :  { %v482_v10 = vadd.f32 %v808_v2, %v1049_v40  ;;  %v492_v11 = vadd.f32 %v838_v3, %v1049_v40  ;;  %v811_v12 = vadd.f32 %v810_v8, %v809_v4  ;;  %v841_v13 = vadd.f32 %v840_v9, %v839_v5 }
 0x103   :  { %735 = vst [vmem:[%s1103_s3] sm:$0xff] %v734_v6   ;;  %780 = vst [vmem:[%s1103_s3 + $0x28] sm:$0xff] %v759_v7  }
 0x104   :  { %v520_v14 = vmul.f32 0.2, %v482_v10  ;;  %v530_v15 = vmul.f32 0.2, %v492_v11  ;;  %v483_v16 = vadd.f32 %v811_v12, %v1049_v40  ;;  %v493_v17 = vadd.f32 %v841_v13, %v1049_v40 }
 0x105   :  { %v812_v18 = vpop.f32.mrb[8].mxu0  ;;  %v842_v19 = vpop.f32.mrb[8].mxu1  ;;  %vm501_vm4 = vcmp.ge.f32.partialorder %v482_v10, 0.0  ;;  %vm511_vm5 = vcmp.ge.f32.partialorder %v492_v11, 0.0 }
 0x106   :  { %v813_v20 = vpop.f32.mrb[9].mxu0  ;;  %v843_v21 = vpop.f32.mrb[9].mxu1  ;;  %vm502_vm6 = vcmp.ge.f32.partialorder %v483_v16, 0.0  ;;  %v521_v22 = vmul.f32 0.2, %v483_v16  ;;  %vm512_vm7 = vcmp.ge.f32.partialorder %v493_v17, 0.0  ;;  %v539_v28 = vsel %vm501_vm4, %v482_v10, %v520_v14 }
 0x107   :  { %v531_v23 = vmul.f32 0.2, %v493_v17  ;;  %v814_v24 = vadd.f32 %v813_v20, %v812_v18  ;;  %v844_v25 = vadd.f32 %v843_v21, %v842_v19  ;;  %v815_v26 = vpop.f32.mrb[10].mxu0  ;;  %v845_v27 = vpop.f32.mrb[10].mxu1  ;;  %v549_v29 = vsel %vm511_vm5, %v492_v11, %v530_v15 }
 0x108   :  { %v540_v30 = vsel %vm502_vm6, %v483_v16, %v521_v22  ;;  %v816_v32 = vpop.f32.mrb[11].mxu0  ;;  %v846_v33 = vpop.f32.mrb[11].mxu1 }
 0x109   :  { %v550_v31 = vsel %vm512_vm7, %v493_v17, %v531_v23  ;;  %v739_v34 = vpack.c.bf16 %v540_v30, %v539_v28  ;;  %v484_v36 = vadd.f32 %v814_v24, %v1049_v40  ;;  %v494_v37 = vadd.f32 %v844_v25, %v1049_v40 }
 0x10a   :  { %v764_v35 = vpack.c.bf16 %v550_v31, %v549_v29  ;;  %v817_v38 = vadd.f32 %v816_v32, %v815_v26  ;;  %v847_v39 = vadd.f32 %v846_v33, %v845_v27 }
 0x10b   :  { %776 = vst [vmem:[%s1103_s3 + $0x8] sm:$0xff] %v739_v34   ;;  %v522_v41 = vmul.f32 0.2, %v484_v36  ;;  %v532_v42 = vmul.f32 0.2, %v494_v37  ;;  %vm503_vm8 = vcmp.ge.f32.partialorder %v484_v36, 0.0 }
 0x10c   :  { %781 = vst [vmem:[%s1103_s3 + $0x30] sm:$0xff] %v764_v35   ;;  %v485_v43 = vadd.f32 %v817_v38, %v1049_v40  ;;  %v495_v44 = vadd.f32 %v847_v39, %v1049_v40  ;;  %vm513_vm9 = vcmp.ge.f32.partialorder %v494_v37, 0.0 }
 0x10d   :  { %v818_v45 = vpop.f32.mrb[12].mxu0  ;;  %v848_v46 = vpop.f32.mrb[12].mxu1  ;;  %v541_v55 = vsel %vm503_vm8, %v484_v36, %v522_v41  ;;  %v551_v56 = vsel %vm513_vm9, %v494_v37, %v532_v42 }
 0x10e   :  { %v819_v47 = vpop.f32.mrb[13].mxu0  ;;  %v849_v48 = vpop.f32.mrb[13].mxu1  ;;  %vm504_vm10 = vcmp.ge.f32.partialorder %v485_v43, 0.0  ;;  %v523_v49 = vmul.f32 0.2, %v485_v43  ;;  %vm514_vm11 = vcmp.ge.f32.partialorder %v495_v44, 0.0 }
 0x10f   :  { %v533_v50 = vmul.f32 0.2, %v495_v44  ;;  %v820_v51 = vadd.f32 %v819_v47, %v818_v45  ;;  %v850_v52 = vadd.f32 %v849_v48, %v848_v46  ;;  %v821_v53 = vpop.f32.mrb[14].mxu0  ;;  %v851_v54 = vpop.f32.mrb[14].mxu1 }
 0x110   :  { %v542_v57 = vsel %vm504_vm10, %v485_v43, %v523_v49  ;;  %v822_v59 = vpop.f32.mrb[15].mxu0  ;;  %v852_v60 = vpop.f32.mrb[15].mxu1 }
 0x111   :  { %v552_v58 = vsel %vm514_vm11, %v495_v44, %v533_v50  ;;  %v744_v61 = vpack.c.bf16 %v542_v57, %v541_v55  ;;  %v486_v63 = vadd.f32 %v820_v51, %v1049_v40  ;;  %v496_v0 = vadd.f32 %v850_v52, %v1049_v40 }
 0x112   :  { %v769_v62 = vpack.c.bf16 %v552_v58, %v551_v56  ;;  %v823_v1 = vadd.f32 %v822_v59, %v821_v53  ;;  %v853_v2 = vadd.f32 %v852_v60, %v851_v54 }
 0x113   :  { %777 = vst [vmem:[%s1103_s3 + $0x10] sm:$0xff] %v744_v61   ;;  %v524_v3 = vmul.f32 0.2, %v486_v63  ;;  %v534_v4 = vmul.f32 0.2, %v496_v0  ;;  %vm505_vm12 = vcmp.ge.f32.partialorder %v486_v63, 0.0 }
 0x114   :  { %782 = vst [vmem:[%s1103_s3 + $0x38] sm:$0xff] %v769_v62   ;;  %v487_v5 = vadd.f32 %v823_v1, %v1049_v40  ;;  %v497_v6 = vadd.f32 %v853_v2, %v1049_v40  ;;  %vm515_vm13 = vcmp.ge.f32.partialorder %v496_v0, 0.0 }
 0x115   :  { %v824_v7 = vpop.f32.mrb[16].mxu0  ;;  %v854_v8 = vpop.f32.mrb[16].mxu1  ;;  %v543_v17 = vsel %vm505_vm12, %v486_v63, %v524_v3  ;;  %v553_v18 = vsel %vm515_vm13, %v496_v0, %v534_v4 }
 0x116   :  { %v825_v9 = vpop.f32.mrb[17].mxu0  ;;  %v855_v10 = vpop.f32.mrb[17].mxu1  ;;  %vm506_vm14 = vcmp.ge.f32.partialorder %v487_v5, 0.0  ;;  %v525_v11 = vmul.f32 0.2, %v487_v5  ;;  %vm516_vm15 = vcmp.ge.f32.partialorder %v497_v6, 0.0 }
 0x117   :  { %v535_v12 = vmul.f32 0.2, %v497_v6  ;;  %v826_v13 = vadd.f32 %v825_v9, %v824_v7  ;;  %v856_v14 = vadd.f32 %v855_v10, %v854_v8  ;;  %v827_v15 = vpop.f32.mrb[18].mxu0  ;;  %v857_v16 = vpop.f32.mrb[18].mxu1 }
 0x118   :  { %v544_v19 = vsel %vm506_vm14, %v487_v5, %v525_v11  ;;  %v828_v21 = vpop.f32.mrb[19].mxu0  ;;  %v858_v22 = vpop.f32.mrb[19].mxu1 }
 0x119   :  { %v554_v20 = vsel %vm516_vm15, %v497_v6, %v535_v12  ;;  %v749_v23 = vpack.c.bf16 %v544_v19, %v543_v17  ;;  %v488_v25 = vadd.f32 %v826_v13, %v1049_v40  ;;  %v498_v26 = vadd.f32 %v856_v14, %v1049_v40 }
 0x11a   :  { %v774_v24 = vpack.c.bf16 %v554_v20, %v553_v18  ;;  %v829_v27 = vadd.f32 %v828_v21, %v827_v15 }
 0x11b   :  { %778 = vst [vmem:[%s1103_s3 + $0x18] sm:$0xff] %v749_v23   ;;  %vm517_vm0 = vcmp.ge.f32.partialorder %v498_v26, 0.0  ;;  %v536_v28 = vmul.f32 0.2, %v498_v26  ;;  %v526_v29 = vmul.f32 0.2, %v488_v25 }
 0x11c   :  { %783 = vst [vmem:[%s1103_s3 + $0x40] sm:$0xff] %v774_v24   ;;  %v489_v30 = vadd.f32 %v829_v27, %v1049_v40  ;;  %vm507_vm1 = vcmp.ge.f32.partialorder %v488_v25, 0.0 }
 0x11d   :  { %v555_v31 = vsel %vm517_vm0, %v498_v26, %v536_v28  ;;  %v545_v34 = vsel %vm507_vm1, %v488_v25, %v526_v29 }
 0x11e   :  { %v730_v32 = vpack.c.bf16 %v555_v31, %v555_v31  ;;  %vm508_vm2 = vcmp.ge.f32.partialorder %v489_v30, 0.0  ;;  %v527_v33 = vmul.f32 0.2, %v489_v30 }
 0x120   :  { %651 = vst [vmem:[%s1103_s3 + $0x48] sm:$0xf] %v730_v32  ;;  %v546_v35 = vsel %vm508_vm2, %v489_v30, %v527_v33 }
 0x121   :  { %v754_v36 = vpack.c.bf16 %v546_v35, %v545_v34 }
 0x123   :  { %779 = vst [vmem:[%s1103_s3 + $0x20] sm:$0xff] %v754_v36  }

// kernel: multiscale_forward.33
= control target key start
LH: loop header
LB: loop body
LE: loop exit
PB: predicated region body
PF: predicated region fallthrough
CT: control target
= control target key end

     0   :  { %s877_s1 = inlined_call_operand.vmem [shape: bf16[512,128], index: 1, kind: input, shape index: {}]   ;;  %s878_s2 = inlined_call_operand.vmem [shape: f32[1,128], index: 2, kind: input, shape index: {}]   ;;  %s879_s0 = inlined_call_operand.vmem [shape: bf16[40,512], index: 0, kind: input, shape index: {}]   ;;  %s880_s3 = inlined_call_operand.vmem [shape: f32[40,128], index: 3, kind: output, shape index: {0}]   ;;  %s881_s4 = inlined_call_operand.vmem [shape: f32[1,128], index: 4, kind: output, shape index: {1}]   ;;  %s882_s5 = inlined_call_operand.vmem [shape: f32[1,128], index: 5, kind: output, shape index: {2}]  }
   0x1   :  { %v652_v0 = vld [vmem:[%s877_s1 + $0x40] sm:$0xff]   ;;  %v656_v4 = vld [vmem:[%s877_s1 + $0x48] sm:$0xff]   ;;  %v660_v8 = vld [vmem:[%s877_s1 + $0x50] sm:$0xff]  }
   0x2   :  { %v653_v1 = vld [vmem:[%s877_s1 + $0xc0] sm:$0xff]   ;;  %584 = vmatprep.subr.bf16.mxu0 %v652_v0  ;;  %v657_v5 = vld [vmem:[%s877_s1 + $0xc8] sm:$0xff]   ;;  %v661_v9 = vld [vmem:[%s877_s1 + $0xd0] sm:$0xff]  }
   0x3   :  { %v654_v2 = vld [vmem:[%s877_s1] sm:$0xff]   ;;  %618 = vmatprep.subr.bf16.mxu1 %v653_v1  ;;  %v658_v6 = vld [vmem:[%s877_s1 + $0x8] sm:$0xff]   ;;  %v662_v10 = vld [vmem:[%s877_s1 + $0x10] sm:$0xff]  }
   0x4   :  { %v655_v3 = vld [vmem:[%s877_s1 + $0x80] sm:$0xff]   ;;  %585 = vmatpush3.bf16.msra.mxu0 %v654_v2  ;;  %v659_v7 = vld [vmem:[%s877_s1 + $0x88] sm:$0xff]   ;;  %v663_v11 = vld [vmem:[%s877_s1 + $0x90] sm:$0xff]  }
   0x5   :  { %619 = vmatpush3.bf16.msra.mxu1 %v655_v3  ;;  %586 = vmatprep.subr.bf16.mxu0 %v656_v4  ;;  %v664_v12 = vld [vmem:[%s877_s1 + $0x58] sm:$0xff]   ;;  %v668_v16 = vld [vmem:[%s877_s1 + $0x60] sm:$0xff]   ;;  %v672_v20 = vld [vmem:[%s877_s1 + $0x68] sm:$0xff]  }
   0x6   :  { %620 = vmatprep.subr.bf16.mxu1 %v657_v5  ;;  %v665_v13 = vld [vmem:[%s877_s1 + $0xd8] sm:$0xff]   ;;  %v669_v17 = vld [vmem:[%s877_s1 + $0xe0] sm:$0xff]   ;;  %v673_v21 = vld [vmem:[%s877_s1 + $0xe8] sm:$0xff]  }
   0x7   :  { %v666_v14 = vld [vmem:[%s877_s1 + $0x18] sm:$0xff]   ;;  %v670_v18 = vld [vmem:[%s877_s1 + $0x20] sm:$0xff]   ;;  %v674_v22 = vld [vmem:[%s877_s1 + $0x28] sm:$0xff]  }
   0x8   :  { %587 = vmatpush3.bf16.msra.mxu0 %v658_v6  ;;  %v667_v15 = vld [vmem:[%s877_s1 + $0x98] sm:$0xff]   ;;  %v671_v19 = vld [vmem:[%s877_s1 + $0xa0] sm:$0xff]   ;;  %v675_v23 = vld [vmem:[%s877_s1 + $0xa8] sm:$0xff]  }
   0x9   :  { %621 = vmatpush3.bf16.msra.mxu1 %v659_v7  ;;  %588 = vmatprep.subr.bf16.mxu0 %v660_v8  ;;  %v676_v24 = vld [vmem:[%s877_s1 + $0x70] sm:$0xff]   ;;  %v680_v28 = vld [vmem:[%s877_s1 + $0x78] sm:$0xff]   ;;  %v40_v38 = vld [vmem:[%s879_s0 + $0x40] sm:$0xff] }
   0xa   :  { %622 = vmatprep.subr.bf16.mxu1 %v661_v9  ;;  %v677_v25 = vld [vmem:[%s877_s1 + $0xf0] sm:$0xff]   ;;  %v681_v29 = vld [vmem:[%s877_s1 + $0xf8] sm:$0xff]   ;;  %v41_v39 = vld [vmem:[%s879_s0 + $0x48] sm:$0xff]  ;;  %v549_v42 = vcombine.high %v40_v38, %v40_v38  ;;  %v548_v44 = vcombine.low %v40_v38, %v40_v38 }
   0xb   :  { %v678_v26 = vld [vmem:[%s877_s1 + $0x30] sm:$0xff]   ;;  %v682_v30 = vld [vmem:[%s877_s1 + $0x38] sm:$0xff]   ;;  %v551_v43 = vcombine.high %v41_v39, %v41_v39  ;;  %v550_v45 = vcombine.low %v41_v39, %v41_v39 }
   0xc   :  { %589 = vmatpush3.bf16.msra.mxu0 %v662_v10  ;;  %v679_v27 = vld [vmem:[%s877_s1 + $0xb0] sm:$0xff]   ;;  %v683_v31 = vld [vmem:[%s877_s1 + $0xb8] sm:$0xff]  }
   0xd   :  { %623 = vmatpush3.bf16.msra.mxu1 %v663_v11  ;;  %590 = vmatprep.subr.bf16.mxu0 %v664_v12  ;;  %v684_v32 = vld [vmem:[%s879_s0] ss:$16 sps:$4 sm:$0xff]   ;;  %v686_v33 = vld [vmem:[%s879_s0 + $0x4] ss:$16 sps:$4 sm:$0xff]   ;;  %v687_v34 = vld [vmem:[%s879_s0 + $0x8] ss:$16 sps:$4 sm:$0xff]  }
   0xe   :  { %624 = vmatprep.subr.bf16.mxu1 %v665_v13  ;;  %v689_v35 = vld [vmem:[%s879_s0 + $0xc] ss:$16 sps:$4 sm:$0xff]   ;;  %384 = vmatprep.mubr.bf16.mxu0 %v686_v33  ;;  %v690_v36 = vld [vmem:[%s879_s0 + $0x24] ss:$16 sps:$4 sm:$0xff]   ;;  %v694_v40 = vld [vmem:[%s879_s0 + $0x20] ss:$16 sps:$4 sm:$0xff]  }
   0xf   :  { %440 = vmatprep.mubr.bf16.mxu1 %v689_v35  ;;  %v692_v37 = vld [vmem:[%s879_s0 + $0x2c] ss:$16 sps:$4 sm:$0xff]   ;;  %v695_v41 = vld [vmem:[%s879_s0 + $0x28] ss:$16 sps:$4 sm:$0xff]  }
  0x10   :  { %591 = vmatpush3.bf16.msra.mxu0 %v666_v14 }
  0x11   :  { %625 = vmatpush3.bf16.msra.mxu1 %v667_v15  ;;  %592 = vmatprep.subr.bf16.mxu0 %v668_v16 }
  0x12   :  { %626 = vmatprep.subr.bf16.mxu1 %v669_v17 }
  0x14   :  { %593 = vmatpush3.bf16.msra.mxu0 %v670_v18 }
  0x15   :  { %627 = vmatpush3.bf16.msra.mxu1 %v671_v19  ;;  %594 = vmatprep.subr.bf16.mxu0 %v672_v20 }
  0x16   :  { %628 = vmatprep.subr.bf16.mxu1 %v673_v21 }
  0x18   :  { %595 = vmatpush3.bf16.msra.mxu0 %v674_v22 }
  0x19   :  { %629 = vmatpush3.bf16.msra.mxu1 %v675_v23  ;;  %596 = vmatprep.subr.bf16.mxu0 %v676_v24 }
  0x1a   :  { %630 = vmatprep.subr.bf16.mxu1 %v677_v25 }
  0x1c   :  { %597 = vmatpush3.bf16.msra.mxu0 %v678_v26 }
  0x1d   :  { %631 = vmatpush3.bf16.msra.mxu1 %v679_v27  ;;  %598 = vmatprep.subr.bf16.mxu0 %v680_v28 }
  0x1e   :  { %632 = vmatprep.subr.bf16.mxu1 %v681_v29 }
  0x20   :  { %599 = vmatpush3.bf16.msra.mxu0 %v682_v30 }
  0x21   :  { %633 = vmatpush3.bf16.msra.mxu1 %v683_v31 }
  0x23   :  { %385 = vmatmul.mubr.bf16.vlgmr.msra.gmra.mrb[0].mxu0 %v684_v32 }
  0x24   :  { %441 = vmatmul.mubr.bf16.vlgmr.msra.gmra.mrb[0].mxu1 %v687_v34  ;;  %392 = vmatprep.mubr.bf16.mxu0 %v690_v36 }
  0x25   :  { %448 = vmatprep.mubr.bf16.mxu1 %v692_v37 }
  0x2b   :  { %393 = vmatmul.mubr.bf16.gmra.mrb[4].mxu0 %v694_v40 }
  0x2c   :  { %449 = vmatmul.mubr.bf16.gmra.mrb[4].mxu1 %v695_v41  ;;  %400 = vmatprep.mubr.bf16.mxu0 %v549_v42 }
  0x2d   :  { %456 = vmatprep.mubr.bf16.mxu1 %v551_v43 }
  0x33   :  { %401 = vmatmul.mubr.bf16.gmra.mrb[8].mxu0 %v548_v44 }
  0x34   :  { %457 = vmatmul.mubr.bf16.gmra.mrb[8].mxu1 %v550_v45 }
  0xf6   :  { %v600_v46 = vpop.f32.mrb[0].mxu0 }
  0xf7   :  { %v634_v47 = vpop.f32.mrb[0].mxu1  ;;  %v601_v48 = vpop.f32.mrb[1].mxu0 }
  0xf8   :  { %v602_v49 = vadd.f32 %v601_v48, %v600_v46  ;;  %v635_v50 = vpop.f32.mrb[1].mxu1  ;;  %v603_v51 = vpop.f32.mrb[2].mxu0 }
  0xf9   :  { %v636_v52 = vadd.f32 %v635_v50, %v634_v47  ;;  %v637_v53 = vpop.f32.mrb[2].mxu1  ;;  %v604_v54 = vpop.f32.mrb[3].mxu0 }
  0xfa   :  { %v605_v55 = vadd.f32 %v604_v54, %v603_v51  ;;  %v638_v56 = vpop.f32.mrb[3].mxu1 }
  0xfb   :  { %v443_v57 = vadd.f32 %v636_v52, %v602_v49  ;;  %v639_v58 = vadd.f32 %v638_v56, %v637_v53 }
  0xfd   :  { %523 = vst [vmem:[%s880_s3] sm:$0xff] %v443_v57  ;;  %v446_v59 = vadd.f32 %v639_v58, %v605_v55  ;;  %v492_v61 = vmul.f32 %v443_v57, %v443_v57 }
  0xfe   :  { %v606_v60 = vpop.f32.mrb[4].mxu0 }
  0xff   :  { %v482_v62 = vadd.f32 %v446_v59, %v443_v57  ;;  %v493_v63 = vmul.f32 %v446_v59, %v446_v59  ;;  %524 = vst [vmem:[%s880_s3 + $0x8] sm:$0xff] %v446_v59  ;;  %v640_v0 = vpop.f32.mrb[4].mxu1  ;;  %v607_v1 = vpop.f32.mrb[5].mxu0 }
 0x100   :  { %v608_v2 = vadd.f32 %v607_v1, %v606_v60  ;;  %v641_v3 = vpop.f32.mrb[5].mxu1  ;;  %v609_v4 = vpop.f32.mrb[6].mxu0 }
 0x101   :  { %v497_v5 = vadd.f32 %v493_v63, %v492_v61  ;;  %v642_v6 = vadd.f32 %v641_v3, %v640_v0  ;;  %v643_v7 = vpop.f32.mrb[6].mxu1  ;;  %v610_v8 = vpop.f32.mrb[7].mxu0 }
 0x102   :  { %v611_v9 = vadd.f32 %v610_v8, %v609_v4  ;;  %v644_v10 = vpop.f32.mrb[7].mxu1 }
 0x103   :  { %v451_v11 = vadd.f32 %v642_v6, %v608_v2  ;;  %v645_v12 = vadd.f32 %v644_v10, %v643_v7 }
 0x105   :  { %v483_v13 = vadd.f32 %v482_v62, %v451_v11  ;;  %v494_v14 = vmul.f32 %v451_v11, %v451_v11  ;;  %525 = vst [vmem:[%s880_s3 + $0x10] sm:$0xff] %v451_v11  ;;  %v454_v15 = vadd.f32 %v645_v12, %v611_v9 }
 0x106   :  { %v612_v16 = vpop.f32.mrb[8].mxu0 }
 0x107   :  { %v498_v17 = vadd.f32 %v497_v5, %v494_v14  ;;  %v484_v18 = vadd.f32 %v483_v13, %v454_v15  ;;  %v495_v19 = vmul.f32 %v454_v15, %v454_v15  ;;  %526 = vst [vmem:[%s880_s3 + $0x18] sm:$0xff] %v454_v15  ;;  %v646_v20 = vpop.f32.mrb[8].mxu1  ;;  %v613_v21 = vpop.f32.mrb[9].mxu0 }
 0x108   :  { %v614_v22 = vadd.f32 %v613_v21, %v612_v16  ;;  %v647_v23 = vpop.f32.mrb[9].mxu1  ;;  %v615_v24 = vpop.f32.mrb[10].mxu0 }
 0x109   :  { %v499_v25 = vadd.f32 %v498_v17, %v495_v19  ;;  %v648_v26 = vadd.f32 %v647_v23, %v646_v20  ;;  %v649_v27 = vpop.f32.mrb[10].mxu1  ;;  %v616_v28 = vpop.f32.mrb[11].mxu0 }
 0x10a   :  { %v650_v29 = vpop.f32.mrb[11].mxu1 }
 0x10b   :  { %v459_v30 = vadd.f32 %v648_v26, %v614_v22 }
 0x10d   :  { %v485_v31 = vadd.f32 %v484_v18, %v459_v30  ;;  %v496_v32 = vmul.f32 %v459_v30, %v459_v30  ;;  %527 = vst [vmem:[%s880_s3 + $0x20] sm:$0xff] %v459_v30 }
 0x10f   :  { %v486_v33 = vrot.slane %v485_v31, 4  ;;  %v500_v34 = vadd.f32 %v499_v25, %v496_v32 }
 0x111   :  { %v487_v35 = vadd.f32 %v486_v33, %v485_v31  ;;  %v501_v36 = vrot.slane %v500_v34, 4 }
 0x113   :  { %v488_v37 = vrot.slane %v487_v35, 2  ;;  %v502_v38 = vadd.f32 %v501_v36, %v500_v34 }
 0x115   :  { %v489_v39 = vadd.f32 %v488_v37, %v487_v35  ;;  %v503_v40 = vrot.slane %v502_v38, 2 }
 0x117   :  { %v490_v41 = vrot.slane %v489_v39, 1  ;;  %v504_v42 = vadd.f32 %v503_v40, %v502_v38 }
 0x119   :  { %v491_v43 = vadd.f32 %v490_v41, %v489_v39  ;;  %v505_v44 = vrot.slane %v504_v42, 1 }
 0x11b   :  { %v506_v45 = vadd.f32 %v505_v44, %v504_v42  ;;  %511 = vst [vmem:[%s881_s4] sm:$0x1] %v491_v43 }
 0x11d   :  { %512 = vst [vmem:[%s882_s5] sm:$0x1] %v506_v45 }

// kernel: multiscale_forward.37
= control target key start
LH: loop header
LB: loop body
LE: loop exit
PB: predicated region body
PF: predicated region fallthrough
CT: control target
= control target key end

     0   :  { %s1409_s18 = smov 0   ;;  %s1411_s19 = smov 0   ;;  %s1553_s0 = inlined_call_operand.vmem [shape: bf16[56,2048], index: 0, kind: input, shape index: {}]   ;;  %s1554_s1 = inlined_call_operand.vmem [shape: bf16[2048,128], index: 1, kind: input, shape index: {}]   ;;  %s1555_s2 = inlined_call_operand.vmem [shape: f32[1,128], index: 2, kind: input, shape index: {}]   ;;  %s1556_s3 = inlined_call_operand.vmem [shape: f32[56,128], index: 3, kind: output, shape index: {0}]   ;;  %s1557_s4 = inlined_call_operand.vmem [shape: f32[1,128], index: 4, kind: output, shape index: {1}]   ;;  %s1558_s5 = inlined_call_operand.vmem [shape: f32[1,128], index: 5, kind: output, shape index: {2}]  }
   0x1   :  { %s1413_s20 = smov 0   ;;  %s1415_s21 = smov 0  }
   0x2   :  { %s1417_s22 = smov 0  }
   0x3 LB: > { %s28_s2 = sadd.s32 1, %s1372_s21  ;;  %p51_p1 = scmp.ne.s32.totalorder %s1364_s19, %s1360_s18  ;;  %s1376_s22 = sphi %s1417_s22, %s16_s22   ;;  %s1372_s21 = sphi %s1415_s21, %s1562_s21   ;;  %s1368_s20 = sphi %s1413_s20, %s1561_s20   ;;  %s1364_s19 = sphi %s1411_s19, %s1560_s19   ;;  %s1360_s18 = sphi %s1409_s18, %s1559_s18  }
   0x4   : > { %p29_p0 = scmp.ge.s32.totalorder %s28_s2, 4  ;;  %p52_p2 = scmp.eq.s32.totalorder %s1376_s22, 0 }
   0x5   : > { %s44_s24 = sadd.s32 1, %s1364_s19  ;;  %p1098_p5 = scmp.ge.s32.totalorder %s1376_s22, 4 }
   0x6   : > { %s1564_s2 = smov (%p29_p0, %s28_s2), 0  ;;  %p53_p3 = por %p52_p2, %p51_p1 }
   0x7   : > { %s40_s23 = ssub.s32 %s1372_s21, %s1564_s2  ;;  %217 = sbr.rel (%p1098_p5) target bundleno = 25 (0x19), region = 20 }
   0x8   : > { %p42_p4 = scmp.eq.s32.totalorder %s40_s23, 0 }
   0xa   : > { %s1444_s25 = scalar_select %p42_p4, %s1364_s19, %s44_s24  }
   0xe   : > { %220 = sbr.rel (!%p53_p3) target bundleno = 25 (0x19), region = 24  ;;  %s222_s26 = sand.u32 (%p53_p3), 1, %s1364_s19  }
   0xf   : > { %s1160_s27 = sshll.u32 (%p53_p3), %s1372_s21, 4  ;;  %s1241_s28 = smul.u32 (%p53_p3), 112, %s222_s26 }
  0x10   : > { %s230_s6 = scalar_lea.vmem (%p53_p3), %s1553_s0, %s1160_s27 }
  0x11   : > { %v243_v0 = vld [vmem:[%s230_s6] sm:$0xff] (%p53_p3)  ;;  %v245_v1 = vld [vmem:[%s230_s6 + $0x8] sm:$0xff] (%p53_p3)  ;;  %s224_s7 = scalar_lea.vmem (%p53_p3), [#allocation3], %s1241_s28 }
  0x12   : > { %v247_v2 = vld [vmem:[%s230_s6 + $0x40] sm:$0xff] (%p53_p3)  ;;  %v249_v3 = vld [vmem:[%s230_s6 + $0x48] sm:$0xff] (%p53_p3)  ;;  %244 = vst [vmem:[%s224_s7] sm:$0xff] (%p53_p3), %v243_v0  ;;  %246 = vst [vmem:[%s224_s7 + $0x8] sm:$0xff] (%p53_p3), %v245_v1 }
  0x13   : > { %v251_v4 = vld [vmem:[%s230_s6 + $0x80] sm:$0xff] (%p53_p3)  ;;  %v253_v5 = vld [vmem:[%s230_s6 + $0x88] sm:$0xff] (%p53_p3)  ;;  %248 = vst [vmem:[%s224_s7 + $0x10] sm:$0xff] (%p53_p3), %v247_v2  ;;  %250 = vst [vmem:[%s224_s7 + $0x18] sm:$0xff] (%p53_p3), %v249_v3 }
  0x14   : > { %252 = vst [vmem:[%s224_s7 + $0x20] sm:$0xff] (%p53_p3), %v251_v4  ;;  %254 = vst [vmem:[%s224_s7 + $0x28] sm:$0xff] (%p53_p3), %v253_v5  ;;  %v255_v6 = vld [vmem:[%s230_s6 + $0xc0] sm:$0xff] (%p53_p3)  ;;  %v257_v7 = vld [vmem:[%s230_s6 + $0xc8] sm:$0xff] (%p53_p3) }
  0x15   : > { %v259_v8 = vld [vmem:[%s230_s6 + $0x100] sm:$0xff]  ;;  %256 = vst [vmem:[%s224_s7 + $0x30] sm:$0xff] %v255_v6  ;;  %258 = vst [vmem:[%s224_s7 + $0x38] sm:$0xff] %v257_v7  ;;  %v261_v9 = vld [vmem:[%s230_s6 + $0x108] sm:$0xff] }
  0x16   : > { %260 = vst [vmem:[%s224_s7 + $0x40] sm:$0xff] %v259_v8  ;;  %v263_v10 = vld [vmem:[%s230_s6 + $0x140] sm:$0xff]  ;;  %v265_v11 = vld [vmem:[%s230_s6 + $0x148] sm:$0xff]  ;;  %262 = vst [vmem:[%s224_s7 + $0x48] sm:$0xff] %v261_v9 }
  0x17   : > { %264 = vst [vmem:[%s224_s7 + $0x50] sm:$0xff] %v263_v10  ;;  %266 = vst [vmem:[%s224_s7 + $0x58] sm:$0xff] %v265_v11  ;;  %v267_v12 = vld [vmem:[%s230_s6 + $0x180] sm:$0xff]  ;;  %v269_v13 = vld [vmem:[%s230_s6 + $0x188] sm:$0xff] }
  0x18   : > { %268 = vst [vmem:[%s224_s7 + $0x60] sm:$0xff] %v267_v12  ;;  %270 = vst [vmem:[%s224_s7 + $0x68] sm:$0xff] %v269_v13 }
  0x19 PF: > { %p1101_p6 = scmp.ge.s32.totalorder %s1376_s22, 1  ;;  %p287_p7 = scmp.lt.s32.totalorder %s1376_s22, 5 }
  0x1b   : > { %p288_p8 = pnand %p1101_p6, %p287_p7 }
  0x1c   : > { %s294_s8 = sand.u32 (!%p288_p8), 1, %s1360_s18   ;;  %s1102_s9 = sshll.u32 (!%p288_p8), %s1368_s20, 6 }
  0x1d   : > { %291 = sbr.rel (%p288_p8) target bundleno = 346 (0x15a), region = 51  ;;  %p344_p9 = scmp.lt.s32.totalorder (!%p288_p8), %s1102_s9, 255 }
  0x1e   : > { %s1242_s10 = smul.u32 (!%p288_p8), 112, %s294_s8  ;;  %p1104_p10 = scmp.ne.s32.totalorder (!%p288_p8), %s1368_s20, 0 }
  0x20   : > { %s1461_s15 = scalar_lea.vmem (!%p288_p8), [#allocation3], %s1242_s10 }
  0x24   : > { %s1566_s9 = smov (!%p344_p9, %s1102_s9), 255  ;;  %374 = sbr.rel (%p1104_p10) target bundleno = 43 (0x2b), region = 59 }
  0x25   : > { %s1103_s11 = sshll.u32 %s1566_s9, 2  ;;  %v1378_v14 = vmov (!%p1104_p10), 0.0  }
  0x26   : > { %s1459_s14 = scalar_lea.vmem %s1554_s1, %s1103_s11  ;;  %375 = vst [vmem:[#allocation2] sm:$0xff] (!%p1104_p10), %v1378_v14  ;;  %376 = vst [vmem:[#allocation2 + $0x8] sm:$0xff] (!%p1104_p10), %v1378_v14 }
  0x27   : > { %377 = vst [vmem:[#allocation2 + $0x10] sm:$0xff] (!%p1104_p10), %v1378_v14  ;;  %378 = vst [vmem:[#allocation2 + $0x18] sm:$0xff] (!%p1104_p10), %v1378_v14 }
  0x28   : > { %379 = vst [vmem:[#allocation2 + $0x20] sm:$0xff] (!%p1104_p10), %v1378_v14  ;;  %380 = vst [vmem:[#allocation2 + $0x28] sm:$0xff] (!%p1104_p10), %v1378_v14 }
  0x29   : > { %381 = vst [vmem:[#allocation2 + $0x30] sm:$0xff] (!%p1104_p10), %v1378_v14 }
  0x2b PF: > { %v1284_v15 = vld [vmem:[%s1459_s14 + $0x40] sm:$0xff]   ;;  %v1288_v19 = vld [vmem:[%s1459_s14 + $0x48] sm:$0xff]   ;;  %v1292_v23 = vld [vmem:[%s1459_s14 + $0x50] sm:$0xff]   ;;  %p1153_p11 = scmp.ne.s32.totalorder %s1368_s20, 3 }
  0x2c   : > { %v1285_v16 = vld [vmem:[%s1459_s14 + $0xc0] sm:$0xff]   ;;  %1161 = vmatprep.subr.bf16.mxu0 %v1284_v15  ;;  %v1289_v20 = vld [vmem:[%s1459_s14 + $0xc8] sm:$0xff]   ;;  %v1293_v24 = vld [vmem:[%s1459_s14 + $0xd0] sm:$0xff]  }
  0x2d   : > { %v1286_v17 = vld [vmem:[%s1459_s14] sm:$0xff]   ;;  %1201 = vmatprep.subr.bf16.mxu1 %v1285_v16  ;;  %v1290_v21 = vld [vmem:[%s1459_s14 + $0x8] sm:$0xff]   ;;  %v1294_v25 = vld [vmem:[%s1459_s14 + $0x10] sm:$0xff]  }
  0x2e   : > { %v1287_v18 = vld [vmem:[%s1459_s14 + $0x80] sm:$0xff]   ;;  %1162 = vmatpush3.bf16.msra.mxu0 %v1286_v17  ;;  %v1291_v22 = vld [vmem:[%s1459_s14 + $0x88] sm:$0xff]   ;;  %v1295_v26 = vld [vmem:[%s1459_s14 + $0x90] sm:$0xff]  }
  0x2f   : > { %1202 = vmatpush3.bf16.msra.mxu1 %v1287_v18  ;;  %1163 = vmatprep.subr.bf16.mxu0 %v1288_v19  ;;  %v1296_v27 = vld [vmem:[%s1459_s14 + $0x58] sm:$0xff]   ;;  %v1300_v31 = vld [vmem:[%s1459_s14 + $0x60] sm:$0xff]   ;;  %v1304_v35 = vld [vmem:[%s1459_s14 + $0x68] sm:$0xff]  }
  0x30   : > { %1203 = vmatprep.subr.bf16.mxu1 %v1289_v20  ;;  %v1297_v28 = vld [vmem:[%s1459_s14 + $0xd8] sm:$0xff]   ;;  %v1301_v32 = vld [vmem:[%s1459_s14 + $0xe0] sm:$0xff]   ;;  %v1305_v36 = vld [vmem:[%s1459_s14 + $0xe8] sm:$0xff]  }
  0x31   : > { %v1298_v29 = vld [vmem:[%s1459_s14 + $0x18] sm:$0xff]   ;;  %v1302_v33 = vld [vmem:[%s1459_s14 + $0x20] sm:$0xff]   ;;  %v1306_v37 = vld [vmem:[%s1459_s14 + $0x28] sm:$0xff]  }
  0x32   : > { %1164 = vmatpush3.bf16.msra.mxu0 %v1290_v21  ;;  %v1299_v30 = vld [vmem:[%s1459_s14 + $0x98] sm:$0xff]   ;;  %v1303_v34 = vld [vmem:[%s1459_s14 + $0xa0] sm:$0xff]   ;;  %v1307_v38 = vld [vmem:[%s1459_s14 + $0xa8] sm:$0xff]  }
  0x33   : > { %1204 = vmatpush3.bf16.msra.mxu1 %v1291_v22  ;;  %1165 = vmatprep.subr.bf16.mxu0 %v1292_v23  ;;  %v1308_v39 = vld [vmem:[%s1459_s14 + $0x70] sm:$0xff]   ;;  %v1312_v43 = vld [vmem:[%s1459_s14 + $0x78] sm:$0xff]   ;;  %v382_v10 = vld [vmem:[#allocation2] sm:$0xff] }
  0x34   : > { %1205 = vmatprep.subr.bf16.mxu1 %v1293_v24  ;;  %v1309_v40 = vld [vmem:[%s1459_s14 + $0xf0] sm:$0xff]   ;;  %v1313_v44 = vld [vmem:[%s1459_s14 + $0xf8] sm:$0xff]   ;;  %v383_v15 = vld [vmem:[#allocation2 + $0x8] sm:$0xff] }
  0x35   : > { %v1310_v41 = vld [vmem:[%s1459_s14 + $0x30] sm:$0xff]   ;;  %v1314_v45 = vld [vmem:[%s1459_s14 + $0x38] sm:$0xff]  }
  0x36   : > { %1166 = vmatpush3.bf16.msra.mxu0 %v1294_v25  ;;  %v1311_v42 = vld [vmem:[%s1459_s14 + $0xb0] sm:$0xff]   ;;  %v1315_v46 = vld [vmem:[%s1459_s14 + $0xb8] sm:$0xff]  }
  0x37   : > { %1206 = vmatpush3.bf16.msra.mxu1 %v1295_v26  ;;  %1167 = vmatprep.subr.bf16.mxu0 %v1296_v27  ;;  %v1316_v47 = vld [vmem:[%s1461_s15] ss:$16 sps:$4 sm:$0xff]   ;;  %v1318_v48 = vld [vmem:[%s1461_s15 + $0x4] ss:$16 sps:$4 sm:$0xff]   ;;  %v1319_v49 = vld [vmem:[%s1461_s15 + $0x8] ss:$16 sps:$4 sm:$0xff]  }
  0x38   : > { %1207 = vmatprep.subr.bf16.mxu1 %v1297_v28  ;;  %v1321_v50 = vld [vmem:[%s1461_s15 + $0xc] ss:$16 sps:$4 sm:$0xff]   ;;  %765 = vmatprep.mubr.bf16.mxu0 %v1318_v48  ;;  %v1322_v51 = vld [vmem:[%s1461_s15 + $0x24] ss:$16 sps:$4 sm:$0xff]   ;;  %v1326_v53 = vld [vmem:[%s1461_s15 + $0x20] ss:$16 sps:$4 sm:$0xff]  }
  0x39   : > { %829 = vmatprep.mubr.bf16.mxu1 %v1321_v50  ;;  %v1324_v52 = vld [vmem:[%s1461_s15 + $0x2c] ss:$16 sps:$4 sm:$0xff]   ;;  %v1327_v54 = vld [vmem:[%s1461_s15 + $0x28] ss:$16 sps:$4 sm:$0xff]   ;;  %v1328_v55 = vld [vmem:[%s1461_s15 + $0x44] ss:$16 sps:$4 sm:$0xff]  }
  0x3a   : > { %1168 = vmatpush3.bf16.msra.mxu0 %v1298_v29  ;;  %v1330_v56 = vld [vmem:[%s1461_s15 + $0x4c] ss:$16 sps:$4 sm:$0xff]   ;;  %v401_v57 = vld [vmem:[%s1461_s15 + $0x60] sm:$0xff]  ;;  %v1333_v60 = vld [vmem:[%s1461_s15 + $0x48] ss:$16 sps:$4 sm:$0xff]  }
  0x3b   : > { %1208 = vmatpush3.bf16.msra.mxu1 %v1299_v30  ;;  %1169 = vmatprep.subr.bf16.mxu0 %v1300_v31  ;;  %v402_v58 = vld [vmem:[%s1461_s15 + $0x68] sm:$0xff]  ;;  %v1332_v59 = vld [vmem:[%s1461_s15 + $0x40] ss:$16 sps:$4 sm:$0xff]   ;;  %v1118_v61 = vcombine.high %v401_v57, %v401_v57  ;;  %v1117_v63 = vcombine.low %v401_v57, %v401_v57 }
  0x3c   : > { %1209 = vmatprep.subr.bf16.mxu1 %v1301_v32  ;;  %v1120_v62 = vcombine.high %v402_v58, %v402_v58  ;;  %v1119_v0 = vcombine.low %v402_v58, %v402_v58  ;;  %v384_v28 = vld [vmem:[#allocation2 + $0x10] sm:$0xff] }
  0x3e   : > { %1170 = vmatpush3.bf16.msra.mxu0 %v1302_v33  ;;  %v385_v33 = vld [vmem:[#allocation2 + $0x18] sm:$0xff] }
  0x3f   : > { %1210 = vmatpush3.bf16.msra.mxu1 %v1303_v34  ;;  %1171 = vmatprep.subr.bf16.mxu0 %v1304_v35 }
  0x40   : > { %1211 = vmatprep.subr.bf16.mxu1 %v1305_v36 }
  0x42   : > { %1172 = vmatpush3.bf16.msra.mxu0 %v1306_v37 }
  0x43   : > { %1212 = vmatpush3.bf16.msra.mxu1 %v1307_v38  ;;  %1173 = vmatprep.subr.bf16.mxu0 %v1308_v39 }
  0x44   : > { %1213 = vmatprep.subr.bf16.mxu1 %v1309_v40 }
  0x46   : > { %1174 = vmatpush3.bf16.msra.mxu0 %v1310_v41 }
  0x47   : > { %1214 = vmatpush3.bf16.msra.mxu1 %v1311_v42  ;;  %1175 = vmatprep.subr.bf16.mxu0 %v1312_v43 }
  0x48   : > { %1215 = vmatprep.subr.bf16.mxu1 %v1313_v44 }
  0x4a   : > { %1176 = vmatpush3.bf16.msra.mxu0 %v1314_v45 }
  0x4b   : > { %1216 = vmatpush3.bf16.msra.mxu1 %v1315_v46  ;;  %v386_v46 = vld [vmem:[#allocation2 + $0x20] sm:$0xff] }
  0x4d   : > { %766 = vmatmul.mubr.bf16.vlgmr.msra.gmra.mrb[0].mxu0 %v1316_v47 }
  0x4e   : > { %830 = vmatmul.mubr.bf16.vlgmr.msra.gmra.mrb[0].mxu1 %v1319_v49  ;;  %773 = vmatprep.mubr.bf16.mxu0 %v1322_v51  ;;  %v387_v51 = vld [vmem:[#allocation2 + $0x28] sm:$0xff] }
  0x4f   : > { %837 = vmatprep.mubr.bf16.mxu1 %v1324_v52 }
  0x55   : > { %774 = vmatmul.mubr.bf16.gmra.mrb[4].mxu0 %v1326_v53 }
  0x56   : > { %838 = vmatmul.mubr.bf16.gmra.mrb[4].mxu1 %v1327_v54  ;;  %781 = vmatprep.mubr.bf16.mxu0 %v1328_v55 }
  0x57   : > { %845 = vmatprep.mubr.bf16.mxu1 %v1330_v56 }
  0x5d   : > { %782 = vmatmul.mubr.bf16.gmra.mrb[8].mxu0 %v1332_v59 }
  0x5e   : > { %846 = vmatmul.mubr.bf16.gmra.mrb[8].mxu1 %v1333_v60  ;;  %789 = vmatprep.mubr.bf16.mxu0 %v1118_v61 }
  0x5f   : > { %853 = vmatprep.mubr.bf16.mxu1 %v1120_v62 }
  0x65   : > { %790 = vmatmul.mubr.bf16.gmra.mrb[12].mxu0 %v1117_v63 }
  0x66   : > { %854 = vmatmul.mubr.bf16.gmra.mrb[12].mxu1 %v1119_v0  ;;  %v388_v0 = vld [vmem:[#allocation2 + $0x30] sm:$0xff] }
 0x120   : > { %v1177_v1 = vpop.f32.mrb[0].mxu0 }
 0x121   : > { %v1217_v2 = vpop.f32.mrb[0].mxu1  ;;  %v1178_v3 = vpop.f32.mrb[1].mxu0 }
 0x122   : > { %v1179_v4 = vadd.f32 %v1178_v3, %v1177_v1  ;;  %v1218_v5 = vpop.f32.mrb[1].mxu1  ;;  %v1180_v6 = vpop.f32.mrb[2].mxu0 }
 0x123   : > { %v1219_v7 = vadd.f32 %v1218_v5, %v1217_v2  ;;  %v1220_v8 = vpop.f32.mrb[2].mxu1  ;;  %v1181_v9 = vpop.f32.mrb[3].mxu0 }
 0x124   : > { %v1182_v11 = vadd.f32 %v1181_v9, %v1180_v6  ;;  %v1221_v12 = vpop.f32.mrb[3].mxu1 }
 0x125   : > { %v832_v13 = vadd.f32 %v1219_v7, %v1179_v4  ;;  %v1222_v14 = vadd.f32 %v1221_v12, %v1220_v8 }
 0x127   : > { %v861_v16 = vadd.f32 %v832_v13, %v382_v10  ;;  %v835_v17 = vadd.f32 %v1222_v14, %v1182_v11 }
 0x128   : > { %v1183_v18 = vpop.f32.mrb[4].mxu0 }
 0x129   : > { %868 = vst [vmem:[#allocation2] sm:$0xff] %v861_v16  ;;  %v862_v19 = vadd.f32 %v835_v17, %v383_v15  ;;  %v1223_v20 = vpop.f32.mrb[4].mxu1  ;;  %v1184_v21 = vpop.f32.mrb[5].mxu0 }
 0x12a   : > { %v1185_v22 = vadd.f32 %v1184_v21, %v1183_v18  ;;  %v1224_v23 = vpop.f32.mrb[5].mxu1  ;;  %v1186_v24 = vpop.f32.mrb[6].mxu0 }
 0x12b   : > { %869 = vst [vmem:[#allocation2 + $0x8] sm:$0xff] %v862_v19  ;;  %v1225_v25 = vadd.f32 %v1224_v23, %v1223_v20  ;;  %v1226_v26 = vpop.f32.mrb[6].mxu1  ;;  %v1187_v27 = vpop.f32.mrb[7].mxu0 }
 0x12c   : > { %v1188_v29 = vadd.f32 %v1187_v27, %v1186_v24  ;;  %v1227_v30 = vpop.f32.mrb[7].mxu1 }
 0x12d   : > { %v840_v31 = vadd.f32 %v1225_v25, %v1185_v22  ;;  %v1228_v32 = vadd.f32 %v1227_v30, %v1226_v26 }
 0x12f   : > { %v863_v34 = vadd.f32 %v840_v31, %v384_v28  ;;  %v843_v35 = vadd.f32 %v1228_v32, %v1188_v29 }
 0x130   : > { %v1189_v36 = vpop.f32.mrb[8].mxu0  ;;  %v879_v4 = vld [vmem:[#allocation2] sm:$0xff] (!%p1153_p11) }
 0x131   : > { %870 = vst [vmem:[#allocation2 + $0x10] sm:$0xff] %v863_v34  ;;  %v864_v37 = vadd.f32 %v843_v35, %v385_v33  ;;  %v1229_v38 = vpop.f32.mrb[8].mxu1  ;;  %v1190_v39 = vpop.f32.mrb[9].mxu0  ;;  %933 = vst [vmem:[%s1556_s3] sm:$0xff] (!%p1153_p11), %v879_v4  ;;  %v898_v11 = vmul.f32 (!%p1153_p11), %v879_v4, %v879_v4 }
 0x132   : > { %v1191_v40 = vadd.f32 %v1190_v39, %v1189_v36  ;;  %v1230_v41 = vpop.f32.mrb[9].mxu1  ;;  %v1192_v42 = vpop.f32.mrb[10].mxu0  ;;  %v880_v5 = vld [vmem:[#allocation2 + $0x8] sm:$0xff] (!%p1153_p11) }
 0x133   : > { %871 = vst [vmem:[#allocation2 + $0x18] sm:$0xff] %v864_v37  ;;  %v1231_v43 = vadd.f32 %v1230_v41, %v1229_v38  ;;  %v1232_v44 = vpop.f32.mrb[10].mxu1  ;;  %v1193_v45 = vpop.f32.mrb[11].mxu0  ;;  %v886_v10 = vadd.f32 (!%p1153_p11), %v880_v5, %v879_v4  ;;  %934 = vst [vmem:[%s1556_s3 + $0x8] sm:$0xff] (!%p1153_p11), %v880_v5  ;;  %v899_v12 = vmul.f32 (!%p1153_p11), %v880_v5, %v880_v5 }
 0x134   : > { %v1194_v47 = vadd.f32 %v1193_v45, %v1192_v42  ;;  %v1233_v48 = vpop.f32.mrb[11].mxu1 }
 0x135   : > { %v848_v49 = vadd.f32 %v1231_v43, %v1191_v40  ;;  %v1234_v50 = vadd.f32 %v1233_v48, %v1232_v44  ;;  %v905_v17 = vadd.f32 (!%p1153_p11), %v899_v12, %v898_v11 }
 0x137   : > { %v865_v52 = vadd.f32 %v848_v49, %v386_v46  ;;  %v851_v53 = vadd.f32 %v1234_v50, %v1194_v47 }
 0x138   : > { %v1195_v54 = vpop.f32.mrb[12].mxu0  ;;  %v881_v6 = vld [vmem:[#allocation2 + $0x10] sm:$0xff] (!%p1153_p11) }
 0x139   : > { %872 = vst [vmem:[#allocation2 + $0x20] sm:$0xff] %v865_v52  ;;  %v866_v55 = vadd.f32 %v851_v53, %v387_v51  ;;  %v1235_v56 = vpop.f32.mrb[12].mxu1  ;;  %v1196_v57 = vpop.f32.mrb[13].mxu0  ;;  %935 = vst [vmem:[%s1556_s3 + $0x10] sm:$0xff] (!%p1153_p11), %v881_v6  ;;  %v900_v13 = vmul.f32 (!%p1153_p11), %v881_v6, %v881_v6  ;;  %v887_v15 = vadd.f32 (!%p1153_p11), %v886_v10, %v881_v6 }
 0x13a   : > { %v1197_v58 = vadd.f32 %v1196_v57, %v1195_v54  ;;  %v1236_v59 = vpop.f32.mrb[13].mxu1  ;;  %v1198_v60 = vpop.f32.mrb[14].mxu0  ;;  %v882_v7 = vld [vmem:[#allocation2 + $0x18] sm:$0xff] (!%p1153_p11) }
 0x13b   : > { %873 = vst [vmem:[#allocation2 + $0x28] sm:$0xff] %v866_v55  ;;  %v1237_v61 = vadd.f32 %v1236_v59, %v1235_v56  ;;  %v1238_v62 = vpop.f32.mrb[14].mxu1  ;;  %v1199_v63 = vpop.f32.mrb[15].mxu0  ;;  %878 = sbr.rel (%p1153_p11) target bundleno = 346 (0x15a), region = 63  ;;  %936 = vst [vmem:[%s1556_s3 + $0x18] sm:$0xff] (!%p1153_p11), %v882_v7  ;;  %v901_v16 = vmul.f32 (!%p1153_p11), %v882_v7, %v882_v7  ;;  %v888_v18 = vadd.f32 (!%p1153_p11), %v887_v15, %v882_v7 }
 0x13c   : > { %v1239_v1 = vpop.f32.mrb[15].mxu1  ;;  %v906_v20 = vadd.f32 (!%p1153_p11), %v905_v17, %v900_v13 }
 0x13d   : > { %v856_v2 = vadd.f32 %v1237_v61, %v1197_v58 }
 0x13e   : > { %v907_v23 = vadd.f32 (!%p1153_p11), %v906_v20, %v901_v16 }
 0x13f   : > { %v867_v3 = vadd.f32 %v856_v2, %v388_v0 }
 0x140   : > { %v883_v8 = vld [vmem:[#allocation2 + $0x20] sm:$0xff] (!%p1153_p11) }
 0x141   : > { %874 = vst [vmem:[#allocation2 + $0x30] sm:$0xff] %v867_v3  ;;  %937 = vst [vmem:[%s1556_s3 + $0x20] sm:$0xff] (!%p1153_p11), %v883_v8  ;;  %v902_v19 = vmul.f32 (!%p1153_p11), %v883_v8, %v883_v8  ;;  %v889_v21 = vadd.f32 (!%p1153_p11), %v888_v18, %v883_v8 }
 0x142   : > { %v884_v9 = vld [vmem:[#allocation2 + $0x28] sm:$0xff] }
 0x143   : > { %938 = vst [vmem:[%s1556_s3 + $0x28] sm:$0xff] %v884_v9  ;;  %v903_v22 = vmul.f32 %v884_v9, %v884_v9  ;;  %v890_v24 = vadd.f32 %v889_v21, %v884_v9  ;;  %v908_v26 = vadd.f32 %v907_v23, %v902_v19 }
 0x145   : > { %v909_v28 = vadd.f32 %v908_v26, %v903_v22 }
 0x148   : > { %v885_v14 = vld [vmem:[#allocation2 + $0x30] sm:$0xff] }
 0x149   : > { %939 = vst [vmem:[%s1556_s3 + $0x30] sm:$0xff] %v885_v14  ;;  %v904_v25 = vmul.f32 %v885_v14, %v885_v14  ;;  %v891_v27 = vadd.f32 %v890_v24, %v885_v14 }
 0x14b   : > { %v892_v29 = vrot.slane %v891_v27, 4  ;;  %v910_v30 = vadd.f32 %v909_v28, %v904_v25 }
 0x14d   : > { %v893_v31 = vadd.f32 %v892_v29, %v891_v27  ;;  %v911_v32 = vrot.slane %v910_v30, 4 }
 0x14f   : > { %v894_v33 = vrot.slane %v893_v31, 2  ;;  %v912_v34 = vadd.f32 %v911_v32, %v910_v30 }
 0x151   : > { %v895_v35 = vadd.f32 %v894_v33, %v893_v31  ;;  %v913_v36 = vrot.slane %v912_v34, 2 }
 0x153   : > { %v896_v37 = vrot.slane %v895_v35, 1  ;;  %v914_v38 = vadd.f32 %v913_v36, %v912_v34 }
 0x155   : > { %v897_v39 = vadd.f32 %v896_v37, %v895_v35  ;;  %v915_v40 = vrot.slane %v914_v38, 1 }
 0x157   : > { %921 = vst [vmem:[%s1557_s4] sm:$0x1] %v897_v39  ;;  %v916_v41 = vadd.f32 %v915_v40, %v914_v38 }
 0x159   : > { %922 = vst [vmem:[%s1558_s5] sm:$0x1] %v916_v41 }
 0x15a PF: > { %s16_s22 = sadd.s32 1, %s1376_s22   ;;  %s1559_s18 = smov %s1364_s19 }
 0x15b   : > { %p13_p12 = scmp.ge.s32.totalorder %s16_s22, 6   ;;  %s1560_s19 = smov %s1444_s25 }
 0x15c   : > { %s1561_s20 = smov %s1372_s21  ;;  %s1562_s21 = smov %s1564_s2 }
 0x15d   :  { %15 = sbr.rel (!%p13_p12) target bundleno = 3 (0x3), region = 136 }

// kernel: multiscale_forward.38
= control target key start
LH: loop header
LB: loop body
LE: loop exit
PB: predicated region body
PF: predicated region fallthrough
CT: control target
= control target key end

     0   :  { %s202_s0 = inlined_call_operand.vmem [shape: f32[56,128], index: 0, kind: input, shape index: {}]   ;;  %s203_s1 = inlined_call_operand.vmem [shape: f32[1,128], index: 1, kind: input, shape index: {}]   ;;  %s204_s2 = inlined_call_operand.vmem [shape: f32[1,128], index: 2, kind: input, shape index: {}]   ;;  %s205_s3 = inlined_call_operand.vmem [shape: bf16[56,128], index: 3, kind: output, shape index: {}]  }
   0x1   :  { %v14_v0 = vld [vmem:[%s202_s0] sm:$0xff]  ;;  %v15_v1 = vld [vmem:[%s202_s0 + $0x8] sm:$0xff]  ;;  %v16_v6 = vld [vmem:[%s202_s0 + $0x10] sm:$0xff] }
   0x2   :  { %v110_v2 = vld [vmem:[%s203_s1] ss:$0 sm:$0xff]  ;;  %v17_v7 = vld [vmem:[%s202_s0 + $0x18] sm:$0xff]  ;;  %v19_v11 = vld [vmem:[%s202_s0 + $0x28] sm:$0xff] }
   0x3   :  { %v28_v3 = vmul.f32 %v110_v2, %v14_v0  ;;  %v29_v4 = vmul.f32 %v110_v2, %v15_v1  ;;  %v111_v5 = vld [vmem:[%s204_s2] ss:$0 sm:$0xff]  ;;  %v30_v8 = vmul.f32 %v110_v2, %v16_v6  ;;  %v31_v9 = vmul.f32 %v110_v2, %v17_v7  ;;  %v20_v12 = vld [vmem:[%s202_s0 + $0x30] sm:$0xff] }
   0x4   :  { %v18_v10 = vld [vmem:[%s202_s0 + $0x20] sm:$0xff]  ;;  %v33_v16 = vmul.f32 %v110_v2, %v19_v11  ;;  %v34_v19 = vmul.f32 %v110_v2, %v20_v12 }
   0x5   :  { %v42_v13 = vadd.f32 %v111_v5, %v28_v3  ;;  %v43_v14 = vadd.f32 %v111_v5, %v29_v4  ;;  %v32_v15 = vmul.f32 %v110_v2, %v18_v10  ;;  %v44_v17 = vadd.f32 %v111_v5, %v30_v8 }
   0x6   :  { %v45_v18 = vadd.f32 %v111_v5, %v31_v9  ;;  %v47_v27 = vadd.f32 %v111_v5, %v33_v16  ;;  %v48_v31 = vadd.f32 %v111_v5, %v34_v19 }
   0x7   :  { %vm49_vm0 = vcmp.ge.f32.partialorder %v42_v13, 0.0  ;;  %vm50_vm1 = vcmp.ge.f32.partialorder %v43_v14, 0.0  ;;  %v56_v20 = vmul.f32 0.2, %v42_v13  ;;  %v57_v21 = vmul.f32 0.2, %v43_v14 }
   0x8   :  { %vm51_vm2 = vcmp.ge.f32.partialorder %v44_v17, 0.0  ;;  %vm52_vm3 = vcmp.ge.f32.partialorder %v45_v18, 0.0  ;;  %v58_v22 = vmul.f32 0.2, %v44_v17  ;;  %v59_v23 = vmul.f32 0.2, %v45_v18 }
   0x9   :  { %v63_v24 = vsel %vm49_vm0, %v42_v13, %v56_v20  ;;  %v64_v25 = vsel %vm50_vm1, %v43_v14, %v57_v21  ;;  %v46_v26 = vadd.f32 %v111_v5, %v32_v15  ;;  %vm54_vm5 = vcmp.ge.f32.partialorder %v47_v27, 0.0 }
   0xa   :  { %v129_v28 = vpack.c.bf16 %v64_v25, %v63_v24  ;;  %v65_v29 = vsel %vm51_vm2, %v44_v17, %v58_v22  ;;  %v66_v30 = vsel %vm52_vm3, %v45_v18, %v59_v23  ;;  %v61_v34 = vmul.f32 0.2, %v47_v27 }
   0xb   :  { %v134_v32 = vpack.c.bf16 %v66_v30, %v65_v29  ;;  %vm53_vm4 = vcmp.ge.f32.partialorder %v46_v26, 0.0  ;;  %v60_v33 = vmul.f32 0.2, %v46_v26  ;;  %vm55_vm6 = vcmp.ge.f32.partialorder %v48_v31, 0.0 }
   0xc   :  { %130 = vst [vmem:[%s205_s3] sm:$0xff] %v129_v28   ;;  %v62_v35 = vmul.f32 0.2, %v48_v31  ;;  %v68_v37 = vsel %vm54_vm5, %v47_v27, %v61_v34 }
   0xd   :  { %141 = vst [vmem:[%s205_s3 + $0x8] sm:$0xff] %v134_v32   ;;  %v67_v36 = vsel %vm53_vm4, %v46_v26, %v60_v33 }
   0xe   :  { %v69_v38 = vsel %vm55_vm6, %v48_v31, %v62_v35  ;;  %v139_v39 = vpack.c.bf16 %v68_v37, %v67_v36 }
   0xf   :  { %v125_v40 = vpack.c.bf16 %v69_v38, %v69_v38 }
  0x10   :  { %142 = vst [vmem:[%s205_s3 + $0x10] sm:$0xff] %v139_v39  }
  0x11   :  { %105 = vst [vmem:[%s205_s3 + $0x18] sm:$0xf] %v125_v40 }

// kernel: multiscale_forward.39
= control target key start
LH: loop header
LB: loop body
LE: loop exit
PB: predicated region body
PF: predicated region fallthrough
CT: control target
= control target key end

     0   :  { %s1609_s12 = smov 0   ;;  %s1611_s13 = smov 0   ;;  %s1863_s0 = inlined_call_operand.vmem [shape: bf16[128,4096], index: 0, kind: input, shape index: {}]   ;;  %s1864_s1 = inlined_call_operand.vmem [shape: bf16[4096,128], index: 1, kind: input, shape index: {}]   ;;  %s1865_s2 = inlined_call_operand.vmem [shape: f32[1,128], index: 2, kind: input, shape index: {}]   ;;  %s1866_s3 = inlined_call_operand.vmem [shape: f32[128,128], index: 3, kind: output, shape index: {}]  }
   0x1   :  { %s1613_s14 = smov 0   ;;  %s1615_s15 = smov 0  }
   0x2   :  { %s1617_s16 = smov 0  }
   0x3 LB: > { %s25_s17 = sadd.s32 1, %s1582_s15  ;;  %p48_p1 = scmp.ne.s32.totalorder %s1574_s13, %s1570_s12  ;;  %s1586_s16 = sphi %s1617_s16, %s13_s16   ;;  %s1582_s15 = sphi %s1615_s15, %s1870_s15   ;;  %s1578_s14 = sphi %s1613_s14, %s1869_s14   ;;  %s1574_s13 = sphi %s1611_s13, %s1868_s13   ;;  %s1570_s12 = sphi %s1609_s12, %s1867_s12  }
   0x4   : > { %p26_p0 = scmp.ge.s32.totalorder %s25_s17, 8  ;;  %p49_p2 = scmp.eq.s32.totalorder %s1586_s16, 0 }
   0x5   : > { %s41_s19 = sadd.s32 1, %s1574_s13  ;;  %p1219_p5 = scmp.ge.s32.totalorder %s1586_s16, 8 }
   0x6   : > { %s1872_s17 = smov (%p26_p0, %s25_s17), 0  ;;  %p50_p3 = por %p49_p2, %p48_p1 }
   0x7   : > { %s37_s18 = ssub.s32 %s1582_s15, %s1872_s17  ;;  %162 = sbr.rel (%p1219_p5) target bundleno = 34 (0x22), region = 20 }
   0x8   : > { %p39_p4 = scmp.eq.s32.totalorder %s37_s18, 0 }
   0xa   : > { %s1644_s20 = scalar_select %p39_p4, %s1574_s13, %s41_s19  }
   0xe   : > { %165 = sbr.rel (!%p50_p3) target bundleno = 34 (0x22), region = 24  ;;  %s167_s21 = sand.u32 (%p50_p3), 1, %s1574_s13  }
   0xf   : > { %s1298_s22 = sshll.u32 (%p50_p3), %s1582_s15, 4  ;;  %s1220_s23 = sshll.u32 (%p50_p3), %s167_s21, 8 }
  0x10   : > { %s1652_s26 = scalar_lea.vmem (%p50_p3), %s1863_s0, %s1298_s22  ;;  %s1657_s27 = scalar_lea.vmem (%p50_p3), [#allocation3], %s1220_s23 }
  0x11   : > { %v188_v0 = vld [vmem:[%s1652_s26] sm:$0xff] (%p50_p3)  ;;  %v190_v1 = vld [vmem:[%s1652_s26 + $0x8] sm:$0xff] (%p50_p3) }
  0x12   : > { %v192_v2 = vld [vmem:[%s1652_s26 + $0x80] sm:$0xff] (%p50_p3)  ;;  %189 = vst [vmem:[%s1657_s27] sm:$0xff] (%p50_p3), %v188_v0  ;;  %191 = vst [vmem:[%s1657_s27 + $0x8] sm:$0xff] (%p50_p3), %v190_v1  ;;  %v194_v3 = vld [vmem:[%s1652_s26 + $0x88] sm:$0xff] (%p50_p3) }
  0x13   : > { %193 = vst [vmem:[%s1657_s27 + $0x10] sm:$0xff] (%p50_p3), %v192_v2  ;;  %v196_v4 = vld [vmem:[%s1652_s26 + $0x100] sm:$0xff] (%p50_p3)  ;;  %v198_v5 = vld [vmem:[%s1652_s26 + $0x108] sm:$0xff] (%p50_p3)  ;;  %195 = vst [vmem:[%s1657_s27 + $0x18] sm:$0xff] (%p50_p3), %v194_v3 }
  0x14   : > { %197 = vst [vmem:[%s1657_s27 + $0x20] sm:$0xff] (%p50_p3), %v196_v4  ;;  %199 = vst [vmem:[%s1657_s27 + $0x28] sm:$0xff] (%p50_p3), %v198_v5  ;;  %v200_v6 = vld [vmem:[%s1652_s26 + $0x180] sm:$0xff] (%p50_p3)  ;;  %v202_v7 = vld [vmem:[%s1652_s26 + $0x188] sm:$0xff] (%p50_p3) }
  0x15   : > { %v204_v8 = vld [vmem:[%s1652_s26 + $0x200] sm:$0xff]  ;;  %201 = vst [vmem:[%s1657_s27 + $0x30] sm:$0xff] %v200_v6  ;;  %203 = vst [vmem:[%s1657_s27 + $0x38] sm:$0xff] %v202_v7  ;;  %v206_v9 = vld [vmem:[%s1652_s26 + $0x208] sm:$0xff] }
  0x16   : > { %205 = vst [vmem:[%s1657_s27 + $0x40] sm:$0xff] %v204_v8  ;;  %v208_v10 = vld [vmem:[%s1652_s26 + $0x280] sm:$0xff]  ;;  %v210_v11 = vld [vmem:[%s1652_s26 + $0x288] sm:$0xff]  ;;  %207 = vst [vmem:[%s1657_s27 + $0x48] sm:$0xff] %v206_v9 }
  0x17   : > { %209 = vst [vmem:[%s1657_s27 + $0x50] sm:$0xff] %v208_v10  ;;  %211 = vst [vmem:[%s1657_s27 + $0x58] sm:$0xff] %v210_v11  ;;  %v212_v12 = vld [vmem:[%s1652_s26 + $0x300] sm:$0xff]  ;;  %v214_v13 = vld [vmem:[%s1652_s26 + $0x308] sm:$0xff] }
  0x18   : > { %v216_v14 = vld [vmem:[%s1652_s26 + $0x380] sm:$0xff]  ;;  %213 = vst [vmem:[%s1657_s27 + $0x60] sm:$0xff] %v212_v12  ;;  %215 = vst [vmem:[%s1657_s27 + $0x68] sm:$0xff] %v214_v13  ;;  %v218_v15 = vld [vmem:[%s1652_s26 + $0x388] sm:$0xff] }
  0x19   : > { %217 = vst [vmem:[%s1657_s27 + $0x70] sm:$0xff] %v216_v14  ;;  %v220_v16 = vld [vmem:[%s1652_s26 + $0x400] sm:$0xff]  ;;  %v222_v17 = vld [vmem:[%s1652_s26 + $0x408] sm:$0xff]  ;;  %219 = vst [vmem:[%s1657_s27 + $0x78] sm:$0xff] %v218_v15 }
  0x1a   : > { %221 = vst [vmem:[%s1657_s27 + $0x80] sm:$0xff] %v220_v16  ;;  %223 = vst [vmem:[%s1657_s27 + $0x88] sm:$0xff] %v222_v17  ;;  %v224_v18 = vld [vmem:[%s1652_s26 + $0x480] sm:$0xff]  ;;  %v226_v19 = vld [vmem:[%s1652_s26 + $0x488] sm:$0xff] }
  0x1b   : > { %v228_v20 = vld [vmem:[%s1652_s26 + $0x500] sm:$0xff]  ;;  %225 = vst [vmem:[%s1657_s27 + $0x90] sm:$0xff] %v224_v18  ;;  %227 = vst [vmem:[%s1657_s27 + $0x98] sm:$0xff] %v226_v19  ;;  %v230_v21 = vld [vmem:[%s1652_s26 + $0x508] sm:$0xff] }
  0x1c   : > { %229 = vst [vmem:[%s1657_s27 + $0xa0] sm:$0xff] %v228_v20  ;;  %v232_v22 = vld [vmem:[%s1652_s26 + $0x580] sm:$0xff]  ;;  %v234_v23 = vld [vmem:[%s1652_s26 + $0x588] sm:$0xff]  ;;  %231 = vst [vmem:[%s1657_s27 + $0xa8] sm:$0xff] %v230_v21 }
  0x1d   : > { %233 = vst [vmem:[%s1657_s27 + $0xb0] sm:$0xff] %v232_v22  ;;  %235 = vst [vmem:[%s1657_s27 + $0xb8] sm:$0xff] %v234_v23  ;;  %v236_v24 = vld [vmem:[%s1652_s26 + $0x600] sm:$0xff]  ;;  %v238_v25 = vld [vmem:[%s1652_s26 + $0x608] sm:$0xff] }
  0x1e   : > { %v240_v26 = vld [vmem:[%s1652_s26 + $0x680] sm:$0xff]  ;;  %237 = vst [vmem:[%s1657_s27 + $0xc0] sm:$0xff] %v236_v24  ;;  %239 = vst [vmem:[%s1657_s27 + $0xc8] sm:$0xff] %v238_v25  ;;  %v242_v27 = vld [vmem:[%s1652_s26 + $0x688] sm:$0xff] }
  0x1f   : > { %241 = vst [vmem:[%s1657_s27 + $0xd0] sm:$0xff] %v240_v26  ;;  %v244_v28 = vld [vmem:[%s1652_s26 + $0x700] sm:$0xff]  ;;  %v246_v29 = vld [vmem:[%s1652_s26 + $0x708] sm:$0xff]  ;;  %243 = vst [vmem:[%s1657_s27 + $0xd8] sm:$0xff] %v242_v27 }
  0x20   : > { %245 = vst [vmem:[%s1657_s27 + $0xe0] sm:$0xff] %v244_v28  ;;  %247 = vst [vmem:[%s1657_s27 + $0xe8] sm:$0xff] %v246_v29  ;;  %v248_v30 = vld [vmem:[%s1652_s26 + $0x780] sm:$0xff]  ;;  %v250_v31 = vld [vmem:[%s1652_s26 + $0x788] sm:$0xff] }
  0x21   : > { %249 = vst [vmem:[%s1657_s27 + $0xf0] sm:$0xff] %v248_v30  ;;  %251 = vst [vmem:[%s1657_s27 + $0xf8] sm:$0xff] %v250_v31 }
  0x22 PF: > { %p1223_p6 = scmp.ge.s32.totalorder %s1586_s16, 1  ;;  %p268_p7 = scmp.lt.s32.totalorder %s1586_s16, 9 }
  0x24   : > { %p269_p8 = pnand %p1223_p6, %p268_p7 }
  0x25   : > { %s275_s28 = sand.u32 (!%p269_p8), 1, %s1570_s12   ;;  %s1225_s29 = sshll.u32 (!%p269_p8), %s1578_s14, 6 }
  0x26   : > { %272 = sbr.rel (%p269_p8) target bundleno = 378 (0x17a), region = 51  ;;  %s1224_s30 = sshll.u32 (!%p269_p8), %s275_s28, 8 }
  0x27   : > { %p315_p9 = scmp.lt.s32.totalorder (!%p269_p8), %s1225_s29, 511  ;;  %s1729_s8 = scalar_lea.vmem (!%p269_p8), [#allocation3], %s1224_s30 }
  0x28   : > { %p1227_p10 = scmp.ne.s32.totalorder (!%p269_p8), %s1578_s14, 0 }
  0x2d   : > { %s1874_s29 = smov (!%p315_p9, %s1225_s29), 511  ;;  %339 = sbr.rel (%p1227_p10) target bundleno = 55 (0x37), region = 59 }
  0x2e   : > { %s1226_s4 = sshll.u32 %s1874_s29, 2  ;;  %v1588_v32 = vmov (!%p1227_p10), 0.0  }
  0x2f   : > { %s1727_s7 = scalar_lea.vmem %s1864_s1, %s1226_s4  ;;  %340 = vst [vmem:[#allocation2] sm:$0xff] (!%p1227_p10), %v1588_v32  ;;  %341 = vst [vmem:[#allocation2 + $0x8] sm:$0xff] (!%p1227_p10), %v1588_v32 }
  0x30   : > { %342 = vst [vmem:[#allocation2 + $0x10] sm:$0xff] (!%p1227_p10), %v1588_v32  ;;  %343 = vst [vmem:[#allocation2 + $0x18] sm:$0xff] (!%p1227_p10), %v1588_v32 }
  0x31   : > { %344 = vst [vmem:[#allocation2 + $0x20] sm:$0xff] (!%p1227_p10), %v1588_v32  ;;  %345 = vst [vmem:[#allocation2 + $0x28] sm:$0xff] (!%p1227_p10), %v1588_v32 }
  0x32   : > { %346 = vst [vmem:[#allocation2 + $0x30] sm:$0xff] (!%p1227_p10), %v1588_v32  ;;  %347 = vst [vmem:[#allocation2 + $0x38] sm:$0xff] (!%p1227_p10), %v1588_v32 }
  0x33   : > { %348 = vst [vmem:[#allocation2 + $0x40] sm:$0xff] (!%p1227_p10), %v1588_v32  ;;  %349 = vst [vmem:[#allocation2 + $0x48] sm:$0xff] (!%p1227_p10), %v1588_v32 }
  0x34   : > { %350 = vst [vmem:[#allocation2 + $0x50] sm:$0xff] %v1588_v32  ;;  %351 = vst [vmem:[#allocation2 + $0x58] sm:$0xff] %v1588_v32 }
  0x35   : > { %352 = vst [vmem:[#allocation2 + $0x60] sm:$0xff] %v1588_v32  ;;  %353 = vst [vmem:[#allocation2 + $0x68] sm:$0xff] %v1588_v32 }
  0x36   : > { %354 = vst [vmem:[#allocation2 + $0x70] sm:$0xff] %v1588_v32  ;;  %355 = vst [vmem:[#allocation2 + $0x78] sm:$0xff] %v1588_v32 }
  0x37 PF: > { %v1468_v33 = vld [vmem:[%s1727_s7 + $0x40] sm:$0xff]   ;;  %v1472_v37 = vld [vmem:[%s1727_s7 + $0x48] sm:$0xff]   ;;  %v1476_v41 = vld [vmem:[%s1727_s7 + $0x50] sm:$0xff]   ;;  %p1292_p11 = scmp.ne.s32.totalorder %s1578_s14, 7 }
  0x38   : > { %v1469_v34 = vld [vmem:[%s1727_s7 + $0xc0] sm:$0xff]   ;;  %1299 = vmatprep.subr.bf16.mxu0 %v1468_v33  ;;  %v1473_v38 = vld [vmem:[%s1727_s7 + $0xc8] sm:$0xff]   ;;  %v1477_v42 = vld [vmem:[%s1727_s7 + $0xd0] sm:$0xff]  }
  0x39   : > { %v1470_v35 = vld [vmem:[%s1727_s7] sm:$0xff]   ;;  %1363 = vmatprep.subr.bf16.mxu1 %v1469_v34  ;;  %v1474_v39 = vld [vmem:[%s1727_s7 + $0x8] sm:$0xff]   ;;  %v1478_v43 = vld [vmem:[%s1727_s7 + $0x10] sm:$0xff]  }
  0x3a   : > { %v1471_v36 = vld [vmem:[%s1727_s7 + $0x80] sm:$0xff]   ;;  %1300 = vmatpush3.bf16.msra.mxu0 %v1470_v35  ;;  %v1475_v40 = vld [vmem:[%s1727_s7 + $0x88] sm:$0xff]   ;;  %v1479_v44 = vld [vmem:[%s1727_s7 + $0x90] sm:$0xff]  }
  0x3b   : > { %1364 = vmatpush3.bf16.msra.mxu1 %v1471_v36  ;;  %1301 = vmatprep.subr.bf16.mxu0 %v1472_v37  ;;  %v1480_v45 = vld [vmem:[%s1727_s7 + $0x58] sm:$0xff]   ;;  %v1484_v49 = vld [vmem:[%s1727_s7 + $0x60] sm:$0xff]   ;;  %v1488_v53 = vld [vmem:[%s1727_s7 + $0x68] sm:$0xff]  }
  0x3c   : > { %1365 = vmatprep.subr.bf16.mxu1 %v1473_v38  ;;  %v1481_v46 = vld [vmem:[%s1727_s7 + $0xd8] sm:$0xff]   ;;  %v1485_v50 = vld [vmem:[%s1727_s7 + $0xe0] sm:$0xff]   ;;  %v1489_v54 = vld [vmem:[%s1727_s7 + $0xe8] sm:$0xff]  }
  0x3d   : > { %v1482_v47 = vld [vmem:[%s1727_s7 + $0x18] sm:$0xff]   ;;  %v1486_v51 = vld [vmem:[%s1727_s7 + $0x20] sm:$0xff]   ;;  %v1490_v55 = vld [vmem:[%s1727_s7 + $0x28] sm:$0xff]  }
  0x3e   : > { %1302 = vmatpush3.bf16.msra.mxu0 %v1474_v39  ;;  %v1483_v48 = vld [vmem:[%s1727_s7 + $0x98] sm:$0xff]   ;;  %v1487_v52 = vld [vmem:[%s1727_s7 + $0xa0] sm:$0xff]   ;;  %v1491_v56 = vld [vmem:[%s1727_s7 + $0xa8] sm:$0xff]  }
  0x3f   : > { %1366 = vmatpush3.bf16.msra.mxu1 %v1475_v40  ;;  %1303 = vmatprep.subr.bf16.mxu0 %v1476_v41  ;;  %v1492_v57 = vld [vmem:[%s1727_s7 + $0x70] sm:$0xff]   ;;  %v1496_v61 = vld [vmem:[%s1727_s7 + $0x78] sm:$0xff]  }
  0x40   : > { %1367 = vmatprep.subr.bf16.mxu1 %v1477_v42  ;;  %v1493_v58 = vld [vmem:[%s1727_s7 + $0xf0] sm:$0xff]   ;;  %v1497_v62 = vld [vmem:[%s1727_s7 + $0xf8] sm:$0xff]   ;;  %v356_v42 = vld [vmem:[#allocation2] sm:$0xff] }
  0x41   : > { %v1494_v59 = vld [vmem:[%s1727_s7 + $0x30] sm:$0xff]   ;;  %v1498_v63 = vld [vmem:[%s1727_s7 + $0x38] sm:$0xff]  }
  0x42   : > { %1304 = vmatpush3.bf16.msra.mxu0 %v1478_v43  ;;  %v1495_v60 = vld [vmem:[%s1727_s7 + $0xb0] sm:$0xff]   ;;  %v1499_v0 = vld [vmem:[%s1727_s7 + $0xb8] sm:$0xff]  }
  0x43   : > { %1368 = vmatpush3.bf16.msra.mxu1 %v1479_v44  ;;  %1305 = vmatprep.subr.bf16.mxu0 %v1480_v45  ;;  %v1500_v1 = vld [vmem:[%s1729_s8] ss:$16 sps:$4 sm:$0xff]   ;;  %v1502_v2 = vld [vmem:[%s1729_s8 + $0x4] ss:$16 sps:$4 sm:$0xff]   ;;  %v1503_v3 = vld [vmem:[%s1729_s8 + $0x8] ss:$16 sps:$4 sm:$0xff]  }
  0x44   : > { %1369 = vmatprep.subr.bf16.mxu1 %v1481_v46  ;;  %v1505_v4 = vld [vmem:[%s1729_s8 + $0xc] ss:$16 sps:$4 sm:$0xff]   ;;  %852 = vmatprep.mubr.bf16.mxu0 %v1502_v2  ;;  %v1506_v5 = vld [vmem:[%s1729_s8 + $0x24] ss:$16 sps:$4 sm:$0xff]   ;;  %v1510_v7 = vld [vmem:[%s1729_s8 + $0x20] ss:$16 sps:$4 sm:$0xff]  }
  0x45   : > { %949 = vmatprep.mubr.bf16.mxu1 %v1505_v4  ;;  %v1508_v6 = vld [vmem:[%s1729_s8 + $0x2c] ss:$16 sps:$4 sm:$0xff]   ;;  %v1511_v8 = vld [vmem:[%s1729_s8 + $0x28] ss:$16 sps:$4 sm:$0xff]   ;;  %v1512_v9 = vld [vmem:[%s1729_s8 + $0x44] ss:$16 sps:$4 sm:$0xff]  }
  0x46   : > { %1306 = vmatpush3.bf16.msra.mxu0 %v1482_v47  ;;  %v1514_v10 = vld [vmem:[%s1729_s8 + $0x4c] ss:$16 sps:$4 sm:$0xff]   ;;  %v1516_v11 = vld [vmem:[%s1729_s8 + $0x40] ss:$16 sps:$4 sm:$0xff]   ;;  %v1517_v12 = vld [vmem:[%s1729_s8 + $0x48] ss:$16 sps:$4 sm:$0xff]  }
  0x47   : > { %1370 = vmatpush3.bf16.msra.mxu1 %v1483_v48  ;;  %1307 = vmatprep.subr.bf16.mxu0 %v1484_v49  ;;  %v1518_v13 = vld [vmem:[%s1729_s8 + $0x64] ss:$16 sps:$4 sm:$0xff]   ;;  %v1520_v14 = vld [vmem:[%s1729_s8 + $0x6c] ss:$16 sps:$4 sm:$0xff]   ;;  %v1522_v15 = vld [vmem:[%s1729_s8 + $0x60] ss:$16 sps:$4 sm:$0xff]  }
  0x48   : > { %1371 = vmatprep.subr.bf16.mxu1 %v1485_v50  ;;  %v1523_v16 = vld [vmem:[%s1729_s8 + $0x68] ss:$16 sps:$4 sm:$0xff]   ;;  %v1524_v17 = vld [vmem:[%s1729_s8 + $0x84] ss:$16 sps:$4 sm:$0xff]   ;;  %v1526_v18 = vld [vmem:[%s1729_s8 + $0x8c] ss:$16 sps:$4 sm:$0xff]  }
  0x49   : > { %v1528_v19 = vld [vmem:[%s1729_s8 + $0x80] ss:$16 sps:$4 sm:$0xff]   ;;  %v1529_v20 = vld [vmem:[%s1729_s8 + $0x88] ss:$16 sps:$4 sm:$0xff]   ;;  %v1530_v21 = vld [vmem:[%s1729_s8 + $0xa4] ss:$16 sps:$4 sm:$0xff]  }
  0x4a   : > { %1308 = vmatpush3.bf16.msra.mxu0 %v1486_v51  ;;  %v1532_v22 = vld [vmem:[%s1729_s8 + $0xac] ss:$16 sps:$4 sm:$0xff]   ;;  %v1534_v23 = vld [vmem:[%s1729_s8 + $0xa0] ss:$16 sps:$4 sm:$0xff]   ;;  %v1535_v24 = vld [vmem:[%s1729_s8 + $0xa8] ss:$16 sps:$4 sm:$0xff]  }
  0x4b   : > { %1372 = vmatpush3.bf16.msra.mxu1 %v1487_v52  ;;  %1309 = vmatprep.subr.bf16.mxu0 %v1488_v53  ;;  %v1536_v25 = vld [vmem:[%s1729_s8 + $0xc4] ss:$16 sps:$4 sm:$0xff]   ;;  %v1538_v26 = vld [vmem:[%s1729_s8 + $0xcc] ss:$16 sps:$4 sm:$0xff]   ;;  %v1540_v27 = vld [vmem:[%s1729_s8 + $0xc0] ss:$16 sps:$4 sm:$0xff]  }
  0x4c   : > { %1373 = vmatprep.subr.bf16.mxu1 %v1489_v54  ;;  %v1541_v28 = vld [vmem:[%s1729_s8 + $0xc8] ss:$16 sps:$4 sm:$0xff]   ;;  %v1542_v29 = vld [vmem:[%s1729_s8 + $0xe4] ss:$16 sps:$4 sm:$0xff]   ;;  %v1544_v30 = vld [vmem:[%s1729_s8 + $0xec] ss:$16 sps:$4 sm:$0xff]  }
  0x4d   : > { %v1546_v31 = vld [vmem:[%s1729_s8 + $0xe0] ss:$16 sps:$4 sm:$0xff]   ;;  %v1547_v32 = vld [vmem:[%s1729_s8 + $0xe8] ss:$16 sps:$4 sm:$0xff]  }
  0x4e   : > { %1310 = vmatpush3.bf16.msra.mxu0 %v1490_v55  ;;  %v357_v47 = vld [vmem:[#allocation2 + $0x8] sm:$0xff] }
  0x4f   : > { %1374 = vmatpush3.bf16.msra.mxu1 %v1491_v56  ;;  %1311 = vmatprep.subr.bf16.mxu0 %v1492_v57 }
  0x50   : > { %1375 = vmatprep.subr.bf16.mxu1 %v1493_v58 }
  0x52   : > { %1312 = vmatpush3.bf16.msra.mxu0 %v1494_v59 }
  0x53   : > { %1376 = vmatpush3.bf16.msra.mxu1 %v1495_v60  ;;  %1313 = vmatprep.subr.bf16.mxu0 %v1496_v61  ;;  %v358_v60 = vld [vmem:[#allocation2 + $0x10] sm:$0xff] }
  0x54   : > { %1377 = vmatprep.subr.bf16.mxu1 %v1497_v62 }
  0x56   : > { %1314 = vmatpush3.bf16.msra.mxu0 %v1498_v63 }
  0x57   : > { %1378 = vmatpush3.bf16.msra.mxu1 %v1499_v0 }
  0x59   : > { %853 = vmatmul.mubr.bf16.vlgmr.msra.gmra.mrb[0].mxu0 %v1500_v1  ;;  %v359_v1 = vld [vmem:[#allocation2 + $0x18] sm:$0xff] }
  0x5a   : > { %950 = vmatmul.mubr.bf16.vlgmr.msra.gmra.mrb[0].mxu1 %v1503_v3  ;;  %860 = vmatprep.mubr.bf16.mxu0 %v1506_v5 }
  0x5b   : > { %957 = vmatprep.mubr.bf16.mxu1 %v1508_v6 }
  0x61   : > { %861 = vmatmul.mubr.bf16.gmra.mrb[4].mxu0 %v1510_v7 }
  0x62   : > { %958 = vmatmul.mubr.bf16.gmra.mrb[4].mxu1 %v1511_v8  ;;  %868 = vmatprep.mubr.bf16.mxu0 %v1512_v9 }
  0x63   : > { %965 = vmatprep.mubr.bf16.mxu1 %v1514_v10 }
  0x69   : > { %869 = vmatmul.mubr.bf16.gmra.mrb[8].mxu0 %v1516_v11 }
  0x6a   : > { %966 = vmatmul.mubr.bf16.gmra.mrb[8].mxu1 %v1517_v12  ;;  %876 = vmatprep.mubr.bf16.mxu0 %v1518_v13 }
  0x6b   : > { %973 = vmatprep.mubr.bf16.mxu1 %v1520_v14  ;;  %v360_v14 = vld [vmem:[#allocation2 + $0x20] sm:$0xff] }
  0x71   : > { %877 = vmatmul.mubr.bf16.gmra.mrb[12].mxu0 %v1522_v15 }
  0x72   : > { %974 = vmatmul.mubr.bf16.gmra.mrb[12].mxu1 %v1523_v16  ;;  %884 = vmatprep.mubr.bf16.mxu0 %v1524_v17 }
  0x73   : > { %981 = vmatprep.mubr.bf16.mxu1 %v1526_v18 }
  0x79   : > { %885 = vmatmul.mubr.bf16.gmra.mrb[16].mxu0 %v1528_v19  ;;  %v361_v19 = vld [vmem:[#allocation2 + $0x28] sm:$0xff] }
  0x7a   : > { %982 = vmatmul.mubr.bf16.gmra.mrb[16].mxu1 %v1529_v20  ;;  %892 = vmatprep.mubr.bf16.mxu0 %v1530_v21 }
  0x7b   : > { %989 = vmatprep.mubr.bf16.mxu1 %v1532_v22 }
  0x81   : > { %893 = vmatmul.mubr.bf16.gmra.mrb[20].mxu0 %v1534_v23 }
  0x82   : > { %990 = vmatmul.mubr.bf16.gmra.mrb[20].mxu1 %v1535_v24  ;;  %900 = vmatprep.mubr.bf16.mxu0 %v1536_v25 }
  0x83   : > { %997 = vmatprep.mubr.bf16.mxu1 %v1538_v26 }
  0x89   : > { %901 = vmatmul.mubr.bf16.gmra.mrb[24].mxu0 %v1540_v27 }
  0x8a   : > { %998 = vmatmul.mubr.bf16.gmra.mrb[24].mxu1 %v1541_v28  ;;  %908 = vmatprep.mubr.bf16.mxu0 %v1542_v29 }
  0x8b   : > { %1005 = vmatprep.mubr.bf16.mxu1 %v1544_v30 }
  0x91   : > { %909 = vmatmul.mubr.bf16.gmra.mrb[28].mxu0 %v1546_v31 }
  0x92   : > { %1006 = vmatmul.mubr.bf16.gmra.mrb[28].mxu1 %v1547_v32  ;;  %v362_v32 = vld [vmem:[#allocation2 + $0x30] sm:$0xff] }
 0x12c   : > { %v1315_v33 = vpop.f32.mrb[0].mxu0 }
 0x12d   : > { %v1379_v34 = vpop.f32.mrb[0].mxu1  ;;  %v1316_v35 = vpop.f32.mrb[1].mxu0 }
 0x12e   : > { %v1317_v36 = vadd.f32 %v1316_v35, %v1315_v33  ;;  %v1380_v37 = vpop.f32.mrb[1].mxu1  ;;  %v1318_v38 = vpop.f32.mrb[2].mxu0 }
 0x12f   : > { %v1381_v39 = vadd.f32 %v1380_v37, %v1379_v34  ;;  %v1382_v40 = vpop.f32.mrb[2].mxu1  ;;  %v1319_v41 = vpop.f32.mrb[3].mxu0  ;;  %v363_v37 = vld [vmem:[#allocation2 + $0x38] sm:$0xff] }
 0x130   : > { %v1320_v43 = vadd.f32 %v1319_v41, %v1318_v38  ;;  %v1383_v44 = vpop.f32.mrb[3].mxu1 }
 0x131   : > { %v952_v45 = vadd.f32 %v1381_v39, %v1317_v36  ;;  %v1384_v46 = vadd.f32 %v1383_v44, %v1382_v40 }
 0x133   : > { %v1014_v48 = vadd.f32 %v952_v45, %v356_v42  ;;  %v955_v49 = vadd.f32 %v1384_v46, %v1320_v43 }
 0x134   : > { %v1321_v50 = vpop.f32.mrb[4].mxu0 }
 0x135   : > { %1030 = vst [vmem:[#allocation2] sm:$0xff] %v1014_v48  ;;  %v1015_v51 = vadd.f32 %v955_v49, %v357_v47  ;;  %v1385_v52 = vpop.f32.mrb[4].mxu1  ;;  %v1322_v53 = vpop.f32.mrb[5].mxu0 }
 0x136   : > { %v1323_v54 = vadd.f32 %v1322_v53, %v1321_v50  ;;  %v1386_v55 = vpop.f32.mrb[5].mxu1  ;;  %v1324_v56 = vpop.f32.mrb[6].mxu0  ;;  %v364_v50 = vld [vmem:[#allocation2 + $0x40] sm:$0xff] }
 0x137   : > { %1031 = vst [vmem:[#allocation2 + $0x8] sm:$0xff] %v1015_v51  ;;  %v1387_v57 = vadd.f32 %v1386_v55, %v1385_v52  ;;  %v1388_v58 = vpop.f32.mrb[6].mxu1  ;;  %v1325_v59 = vpop.f32.mrb[7].mxu0  ;;  %v365_v55 = vld [vmem:[#allocation2 + $0x48] sm:$0xff] }
 0x138   : > { %v1326_v61 = vadd.f32 %v1325_v59, %v1324_v56  ;;  %v1389_v62 = vpop.f32.mrb[7].mxu1 }
 0x139   : > { %v960_v63 = vadd.f32 %v1387_v57, %v1323_v54  ;;  %v1390_v0 = vadd.f32 %v1389_v62, %v1388_v58 }
 0x13b   : > { %v1016_v2 = vadd.f32 %v960_v63, %v358_v60  ;;  %v963_v3 = vadd.f32 %v1390_v0, %v1326_v61 }
 0x13c   : > { %v1327_v4 = vpop.f32.mrb[8].mxu0 }
 0x13d   : > { %1032 = vst [vmem:[#allocation2 + $0x10] sm:$0xff] %v1016_v2  ;;  %v1017_v5 = vadd.f32 %v963_v3, %v359_v1  ;;  %v1391_v6 = vpop.f32.mrb[8].mxu1  ;;  %v1328_v7 = vpop.f32.mrb[9].mxu0 }
 0x13e   : > { %v1329_v8 = vadd.f32 %v1328_v7, %v1327_v4  ;;  %v1392_v9 = vpop.f32.mrb[9].mxu1  ;;  %v1330_v10 = vpop.f32.mrb[10].mxu0  ;;  %v366_v4 = vld [vmem:[#allocation2 + $0x50] sm:$0xff] }
 0x13f   : > { %1033 = vst [vmem:[#allocation2 + $0x18] sm:$0xff] %v1017_v5  ;;  %v1393_v11 = vadd.f32 %v1392_v9, %v1391_v6  ;;  %v1394_v12 = vpop.f32.mrb[10].mxu1  ;;  %v1331_v13 = vpop.f32.mrb[11].mxu0  ;;  %v367_v9 = vld [vmem:[#allocation2 + $0x58] sm:$0xff] }
 0x140   : > { %v1332_v15 = vadd.f32 %v1331_v13, %v1330_v10  ;;  %v1395_v16 = vpop.f32.mrb[11].mxu1 }
 0x141   : > { %v968_v17 = vadd.f32 %v1393_v11, %v1329_v8  ;;  %v1396_v18 = vadd.f32 %v1395_v16, %v1394_v12 }
 0x143   : > { %v1018_v20 = vadd.f32 %v968_v17, %v360_v14  ;;  %v971_v21 = vadd.f32 %v1396_v18, %v1332_v15 }
 0x144   : > { %v1333_v22 = vpop.f32.mrb[12].mxu0 }
 0x145   : > { %1034 = vst [vmem:[#allocation2 + $0x20] sm:$0xff] %v1018_v20  ;;  %v1019_v23 = vadd.f32 %v971_v21, %v361_v19  ;;  %v1397_v24 = vpop.f32.mrb[12].mxu1  ;;  %v1334_v25 = vpop.f32.mrb[13].mxu0 }
 0x146   : > { %v1335_v26 = vadd.f32 %v1334_v25, %v1333_v22  ;;  %v1398_v27 = vpop.f32.mrb[13].mxu1  ;;  %v1336_v28 = vpop.f32.mrb[14].mxu0  ;;  %v368_v22 = vld [vmem:[#allocation2 + $0x60] sm:$0xff] }
 0x147   : > { %1035 = vst [vmem:[#allocation2 + $0x28] sm:$0xff] %v1019_v23  ;;  %v1399_v29 = vadd.f32 %v1398_v27, %v1397_v24  ;;  %v1400_v30 = vpop.f32.mrb[14].mxu1  ;;  %v1337_v31 = vpop.f32.mrb[15].mxu0  ;;  %v369_v27 = vld [vmem:[#allocation2 + $0x68] sm:$0xff] }
 0x148   : > { %v1338_v33 = vadd.f32 %v1337_v31, %v1336_v28  ;;  %v1401_v34 = vpop.f32.mrb[15].mxu1 }
 0x149   : > { %v976_v35 = vadd.f32 %v1399_v29, %v1335_v26  ;;  %v1402_v36 = vadd.f32 %v1401_v34, %v1400_v30 }
 0x14b   : > { %v1020_v38 = vadd.f32 %v976_v35, %v362_v32  ;;  %v979_v39 = vadd.f32 %v1402_v36, %v1338_v33 }
 0x14c   : > { %v1339_v40 = vpop.f32.mrb[16].mxu0 }
 0x14d   : > { %1036 = vst [vmem:[#allocation2 + $0x30] sm:$0xff] %v1020_v38  ;;  %v1021_v41 = vadd.f32 %v979_v39, %v363_v37  ;;  %v1403_v42 = vpop.f32.mrb[16].mxu1  ;;  %v1340_v43 = vpop.f32.mrb[17].mxu0 }
 0x14e   : > { %v1341_v44 = vadd.f32 %v1340_v43, %v1339_v40  ;;  %v1404_v45 = vpop.f32.mrb[17].mxu1  ;;  %v1342_v46 = vpop.f32.mrb[18].mxu0  ;;  %v370_v40 = vld [vmem:[#allocation2 + $0x70] sm:$0xff] }
 0x14f   : > { %1037 = vst [vmem:[#allocation2 + $0x38] sm:$0xff] %v1021_v41  ;;  %v1405_v47 = vadd.f32 %v1404_v45, %v1403_v42  ;;  %v1406_v48 = vpop.f32.mrb[18].mxu1  ;;  %v1343_v49 = vpop.f32.mrb[19].mxu0  ;;  %v371_v45 = vld [vmem:[#allocation2 + $0x78] sm:$0xff] }
 0x150   : > { %v1344_v51 = vadd.f32 %v1343_v49, %v1342_v46  ;;  %v1407_v52 = vpop.f32.mrb[19].mxu1  ;;  %v1050_v49 = vld [vmem:[#allocation2] sm:$0xff] (!%p1292_p11) }
 0x151   : > { %v984_v53 = vadd.f32 %v1405_v47, %v1341_v44  ;;  %v1408_v54 = vadd.f32 %v1407_v52, %v1406_v48 }
 0x153   : > { %v1022_v56 = vadd.f32 %v984_v53, %v364_v50  ;;  %v987_v57 = vadd.f32 %v1408_v54, %v1344_v51  ;;  %v1293_v50 = vld [vmem:[%s1865_s2] ss:$0 sm:$0xff] (!%p1292_p11)  ;;  %v1051_v51 = vld [vmem:[#allocation2 + $0x8] sm:$0xff] (!%p1292_p11)  ;;  %v1052_v54 = vld [vmem:[#allocation2 + $0x10] sm:$0xff] (!%p1292_p11) }
 0x154   : > { %v1345_v58 = vpop.f32.mrb[20].mxu0  ;;  %v1073_v52 = vadd.f32 (!%p1292_p11), %v1293_v50, %v1050_v49  ;;  %v1074_v53 = vadd.f32 (!%p1292_p11), %v1293_v50, %v1051_v51 }
 0x155   : > { %1038 = vst [vmem:[#allocation2 + $0x40] sm:$0xff] %v1022_v56  ;;  %v1023_v59 = vadd.f32 %v987_v57, %v365_v55  ;;  %v1409_v60 = vpop.f32.mrb[20].mxu1  ;;  %v1346_v61 = vpop.f32.mrb[21].mxu0  ;;  %v1053_v55 = vld [vmem:[#allocation2 + $0x18] sm:$0xff] (!%p1292_p11)  ;;  %v1054_v56 = vld [vmem:[#allocation2 + $0x20] sm:$0xff] (!%p1292_p11)  ;;  %v1075_v57 = vadd.f32 (!%p1292_p11), %v1293_v50, %v1052_v54 }
 0x156   : > { %v1347_v62 = vadd.f32 %v1346_v61, %v1345_v58  ;;  %v1410_v63 = vpop.f32.mrb[21].mxu1  ;;  %v1348_v0 = vpop.f32.mrb[22].mxu0  ;;  %v1076_v58 = vadd.f32 (!%p1292_p11), %v1293_v50, %v1053_v55  ;;  %v1056_v61 = vld [vmem:[#allocation2 + $0x30] sm:$0xff] (!%p1292_p11)  ;;  %1089 = vst [vmem:[%s1866_s3] sm:$0xff] (!%p1292_p11), %v1073_v52  ;;  %1090 = vst [vmem:[%s1866_s3 + $0x8] sm:$0xff] (!%p1292_p11), %v1074_v53 }
 0x157   : > { %1039 = vst [vmem:[#allocation2 + $0x48] sm:$0xff] %v1023_v59  ;;  %v1411_v1 = vadd.f32 %v1410_v63, %v1409_v60  ;;  %v1412_v2 = vpop.f32.mrb[22].mxu1  ;;  %v1349_v3 = vpop.f32.mrb[23].mxu0  ;;  %v1077_v59 = vadd.f32 (!%p1292_p11), %v1293_v50, %v1054_v56  ;;  %v1055_v60 = vld [vmem:[#allocation2 + $0x28] sm:$0xff] (!%p1292_p11)  ;;  %1091 = vst [vmem:[%s1866_s3 + $0x10] sm:$0xff] (!%p1292_p11), %v1075_v57 }
 0x158   : > { %v1350_v5 = vadd.f32 %v1349_v3, %v1348_v0  ;;  %v1413_v6 = vpop.f32.mrb[23].mxu1  ;;  %v1078_v63 = vadd.f32 (!%p1292_p11), %v1293_v50, %v1055_v60  ;;  %v1079_v0 = vadd.f32 (!%p1292_p11), %v1293_v50, %v1056_v61  ;;  %1092 = vst [vmem:[%s1866_s3 + $0x18] sm:$0xff] (!%p1292_p11), %v1076_v58 }
 0x159   : > { %v992_v7 = vadd.f32 %v1411_v1, %v1347_v62  ;;  %v1414_v8 = vadd.f32 %v1413_v6, %v1412_v2  ;;  %v1057_v62 = vld [vmem:[#allocation2 + $0x38] sm:$0xff] (!%p1292_p11)  ;;  %1093 = vst [vmem:[%s1866_s3 + $0x20] sm:$0xff] (!%p1292_p11), %v1077_v59 }
 0x15a   : > { %v1080_v1 = vadd.f32 (!%p1292_p11), %v1293_v50, %v1057_v62  ;;  %1094 = vst [vmem:[%s1866_s3 + $0x28] sm:$0xff] (!%p1292_p11), %v1078_v63  ;;  %1095 = vst [vmem:[%s1866_s3 + $0x30] sm:$0xff] (!%p1292_p11), %v1079_v0 }
 0x15b   : > { %v1024_v10 = vadd.f32 %v992_v7, %v366_v4  ;;  %v995_v11 = vadd.f32 %v1414_v8, %v1350_v5 }
 0x15c   : > { %v1351_v12 = vpop.f32.mrb[24].mxu0  ;;  %v1058_v2 = vld [vmem:[#allocation2 + $0x40] sm:$0xff] (!%p1292_p11)  ;;  %1096 = vst [vmem:[%s1866_s3 + $0x38] sm:$0xff] (!%p1292_p11), %v1080_v1 }
 0x15d   : > { %1040 = vst [vmem:[#allocation2 + $0x50] sm:$0xff] %v1024_v10  ;;  %v1025_v13 = vadd.f32 %v995_v11, %v367_v9  ;;  %v1415_v14 = vpop.f32.mrb[24].mxu1  ;;  %v1352_v15 = vpop.f32.mrb[25].mxu0  ;;  %v1081_v5 = vadd.f32 (!%p1292_p11), %v1293_v50, %v1058_v2 }
 0x15e   : > { %v1353_v16 = vadd.f32 %v1352_v15, %v1351_v12  ;;  %v1416_v17 = vpop.f32.mrb[25].mxu1  ;;  %v1354_v18 = vpop.f32.mrb[26].mxu0  ;;  %v1059_v3 = vld [vmem:[#allocation2 + $0x48] sm:$0xff] (!%p1292_p11) }
 0x15f   : > { %1041 = vst [vmem:[#allocation2 + $0x58] sm:$0xff] %v1025_v13  ;;  %v1417_v19 = vadd.f32 %v1416_v17, %v1415_v14  ;;  %v1418_v20 = vpop.f32.mrb[26].mxu1  ;;  %v1355_v21 = vpop.f32.mrb[27].mxu0  ;;  %v1082_v6 = vadd.f32 (!%p1292_p11), %v1293_v50, %v1059_v3  ;;  %1097 = vst [vmem:[%s1866_s3 + $0x40] sm:$0xff] (!%p1292_p11), %v1081_v5 }
 0x160   : > { %v1356_v23 = vadd.f32 %v1355_v21, %v1354_v18  ;;  %v1419_v24 = vpop.f32.mrb[27].mxu1 }
 0x161   : > { %v1000_v25 = vadd.f32 %v1417_v19, %v1353_v16  ;;  %v1420_v26 = vadd.f32 %v1419_v24, %v1418_v20  ;;  %1098 = vst [vmem:[%s1866_s3 + $0x48] sm:$0xff] (!%p1292_p11), %v1082_v6 }
 0x163   : > { %v1026_v28 = vadd.f32 %v1000_v25, %v368_v22  ;;  %v1003_v29 = vadd.f32 %v1420_v26, %v1356_v23 }
 0x164   : > { %v1357_v30 = vpop.f32.mrb[28].mxu0  ;;  %v1060_v4 = vld [vmem:[#allocation2 + $0x50] sm:$0xff] (!%p1292_p11) }
 0x165   : > { %1042 = vst [vmem:[#allocation2 + $0x60] sm:$0xff] %v1026_v28  ;;  %v1027_v31 = vadd.f32 %v1003_v29, %v369_v27  ;;  %v1421_v32 = vpop.f32.mrb[28].mxu1  ;;  %v1358_v33 = vpop.f32.mrb[29].mxu0  ;;  %v1083_v7 = vadd.f32 (!%p1292_p11), %v1293_v50, %v1060_v4 }
 0x166   : > { %v1359_v34 = vadd.f32 %v1358_v33, %v1357_v30  ;;  %v1422_v35 = vpop.f32.mrb[29].mxu1  ;;  %v1360_v36 = vpop.f32.mrb[30].mxu0  ;;  %v1061_v8 = vld [vmem:[#allocation2 + $0x58] sm:$0xff] (!%p1292_p11) }
 0x167   : > { %1043 = vst [vmem:[#allocation2 + $0x68] sm:$0xff] %v1027_v31  ;;  %v1423_v37 = vadd.f32 %v1422_v35, %v1421_v32  ;;  %v1424_v38 = vpop.f32.mrb[30].mxu1  ;;  %v1361_v39 = vpop.f32.mrb[31].mxu0  ;;  %v1084_v11 = vadd.f32 (!%p1292_p11), %v1293_v50, %v1061_v8  ;;  %1099 = vst [vmem:[%s1866_s3 + $0x50] sm:$0xff] (!%p1292_p11), %v1083_v7 }
 0x168   : > { %v1362_v41 = vadd.f32 %v1361_v39, %v1360_v36  ;;  %v1425_v42 = vpop.f32.mrb[31].mxu1 }
 0x169   : > { %v1008_v43 = vadd.f32 %v1423_v37, %v1359_v34  ;;  %v1426_v44 = vadd.f32 %v1425_v42, %v1424_v38  ;;  %1049 = sbr.rel (%p1292_p11) target bundleno = 378 (0x17a), region = 63  ;;  %1100 = vst [vmem:[%s1866_s3 + $0x58] sm:$0xff] (!%p1292_p11), %v1084_v11 }
 0x16b   : > { %v1028_v46 = vadd.f32 %v1008_v43, %v370_v40  ;;  %v1011_v47 = vadd.f32 %v1426_v44, %v1362_v41 }
 0x16c   : > { %v1062_v9 = vld [vmem:[#allocation2 + $0x60] sm:$0xff] (!%p1292_p11) }
 0x16d   : > { %1044 = vst [vmem:[#allocation2 + $0x70] sm:$0xff] %v1028_v46  ;;  %v1029_v48 = vadd.f32 %v1011_v47, %v371_v45  ;;  %v1085_v12 = vadd.f32 (!%p1292_p11), %v1293_v50, %v1062_v9 }
 0x16e   : > { %v1063_v10 = vld [vmem:[#allocation2 + $0x68] sm:$0xff] (!%p1292_p11) }
 0x16f   : > { %1045 = vst [vmem:[#allocation2 + $0x78] sm:$0xff] %v1029_v48  ;;  %v1086_v13 = vadd.f32 (!%p1292_p11), %v1293_v50, %v1063_v10  ;;  %1101 = vst [vmem:[%s1866_s3 + $0x60] sm:$0xff] (!%p1292_p11), %v1085_v12 }
 0x171   : > { %1102 = vst [vmem:[%s1866_s3 + $0x68] sm:$0xff] %v1086_v13 }
 0x174   : > { %v1064_v14 = vld [vmem:[#allocation2 + $0x70] sm:$0xff] }
 0x175   : > { %v1087_v16 = vadd.f32 %v1293_v50, %v1064_v14 }
 0x176   : > { %v1065_v15 = vld [vmem:[#allocation2 + $0x78] sm:$0xff] }
 0x177   : > { %v1088_v17 = vadd.f32 %v1293_v50, %v1065_v15  ;;  %1103 = vst [vmem:[%s1866_s3 + $0x70] sm:$0xff] %v1087_v16 }
 0x179   : > { %1104 = vst [vmem:[%s1866_s3 + $0x78] sm:$0xff] %v1088_v17 }
 0x17a PF: > { %s13_s16 = sadd.s32 1, %s1586_s16   ;;  %s1867_s12 = smov %s1574_s13 }
 0x17b   : > { %p10_p12 = scmp.ge.s32.totalorder %s13_s16, 10   ;;  %s1868_s13 = smov %s1644_s20 }
 0x17c   : > { %s1869_s14 = smov %s1582_s15  ;;  %s1870_s15 = smov %s1872_s17 }
 0x17d   :  { %12 = sbr.rel (!%p10_p12) target bundleno = 3 (0x3), region = 104 }

</bundles_post_ra>
